<compile_context>
chip_gen: v6e
topology: v6e:2x2x1
jax: 0.10.0
libtpu: 0.0.40
codegen_flags: <defaults>
</compile_context>

<pallas_src>
import numpy as np
import jax
import jax.numpy as jnp
from jax import lax
from jax.experimental import pallas as pl
from jax.experimental.pallas import tpu as pltpu

BN_EPS = 1e-3


# ----------------------------- Pallas kernel --------------------------------

def inception_kernel(x_ref,
                     wf_ref, sf_ref, bf_ref,
                     w2_ref, s2_ref, b2_ref,
                     w3_ref, s3_ref, b3_ref,
                     w4_ref, s4_ref, b4_ref,
                     o_ref,
                     xp_pad, r2_pad, r3_pad):
    """One grid step = one batch block (NHWC, channels on the 128-lane axis).

    x_ref   : (B, H, W, Cin)      bf16  unpadded input block
    wf_ref  : (Cin, C1+C2r+C3r)   bf16  fused 1x1 weights (b1 | b2red | b3red)
    w2_ref  : (9*C2r, C2)         bf16  3x3 weights, branch 2 (tap-major rows)
    w3_ref  : (9*C3r, C3)         bf16  3x3 weights, branch 3
    w4_ref  : (Cin, C4)           bf16  1x1 after max-pool
    s*/b*   : (1, C*)             f32   folded BN scale / bias
    o_ref   : (B, H, W, Ctot)     f32   output (direct per-branch stores)
    xp_pad  : (B, H+2, W+2, Cin)  bf16  scratch, -inf halo (max-pool)
    r2_pad  : (B, H+2, W+2, C2r)  bf16  scratch, zero halo  (branch-2 3x3)
    r3_pad  : (B, H+2, W+2, C3r)  bf16  scratch, zero halo  (branch-3 3x3)
    """
    B, H, W = o_ref.shape[0], o_ref.shape[1], o_ref.shape[2]
    cin = x_ref.shape[-1]
    c2r = w2_ref.shape[0] // 9
    c3r = w3_ref.shape[0] // 9
    c2 = w2_ref.shape[1]
    c3 = w3_ref.shape[1]
    c4 = w4_ref.shape[1]
    c1 = wf_ref.shape[1] - c2r - c3r
    M = B * H * W

    def write_halo(pad_ref, value, channels):
        # (Re)write only the four 1-wide halo strips; the interior is fully
        # overwritten below.  Doing this every step (not only at step 0) keeps
        # the kernel correct under v7x megacore sharding of the batch axis.
        row = jnp.full((B, 1, W + 2, channels), value, jnp.bfloat16)
        col = jnp.full((B, H + 2, 1, channels), value, jnp.bfloat16)
        pad_ref[:, pl.ds(0, 1), :, :] = row
        pad_ref[:, pl.ds(H + 1, 1), :, :] = row
        pad_ref[:, :, pl.ds(0, 1), :] = col
        pad_ref[:, :, pl.ds(W + 1, 1), :] = col

    x = x_ref[...]                                    # (B, H, W, Cin) bf16

    # ---- fused 1x1 convs (branch1 + branch2-reduce + branch3-reduce) ------
    y = jnp.dot(x.reshape(M, cin), wf_ref[...],
                preferred_element_type=jnp.float32)
    y = jnp.maximum(y * sf_ref[...] + bf_ref[...], 0.0)

    # branch 1 is ready: store it now to release its registers / VMEM early.
    o_ref[:, :, :, pl.ds(0, c1)] = (
        y[:, :c1].reshape(B, H, W, c1).astype(o_ref.dtype))

    r2 = y[:, c1:c1 + c2r].astype(jnp.bfloat16)
    r3 = y[:, c1 + c2r:].astype(jnp.bfloat16)

    # ---- 3x3 convs: zero-halo reduced activations, one deep-K matmul each --
    write_halo(r2_pad, 0.0, c2r)
    write_halo(r3_pad, 0.0, c3r)
    r2_pad[:, pl.ds(1, H), pl.ds(1, W), :] = r2.reshape(B, H, W, c2r)
    r3_pad[:, pl.ds(1, H), pl.ds(1, W), :] = r3.reshape(B, H, W, c3r)

    def conv3x3(pad_ref, w_ref, s_ref, bias_ref, cred, cout, ch_off):
        # im2col of the already-padded reduced activations -> (M, 9*cred);
        # a single K = 9*cred matmul keeps accumulation inside the MXU.
        taps = [pad_ref[:, pl.ds(kh, H), pl.ds(kw, W), :].reshape(M, cred)
                for kh in range(3) for kw in range(3)]
        col = jnp.concatenate(taps, axis=-1)
        out = jnp.dot(col, w_ref[...], preferred_element_type=jnp.float32)
        out = jnp.maximum(out * s_ref[...] + bias_ref[...], 0.0)
        o_ref[:, :, :, pl.ds(ch_off, cout)] = (
            out.reshape(B, H, W, cout).astype(o_ref.dtype))

    conv3x3(r2_pad, w2_ref, s2_ref, b2_ref, c2r, c2, c1)
    conv3x3(r3_pad, w3_ref, s3_ref, b3_ref, c3r, c3, c1 + c2)

    # ---- branch 4: separable 3x3 max-pool (stride 1, pad 1) + 1x1 ----------
    write_halo(xp_pad, -jnp.inf, cin)
    xp_pad[:, pl.ds(1, H), pl.ds(1, W), :] = x
    # Horizontal pass first (sublane-offset slices come straight from the
    # ref), then vertical pass over the value (major-axis slices, no relayout).
    hm = jnp.maximum(
        jnp.maximum(xp_pad[:, :, pl.ds(0, W), :], xp_pad[:, :, pl.ds(1, W), :]),
        xp_pad[:, :, pl.ds(2, W), :])                 # (B, H+2, W, Cin)
    pooled = jnp.maximum(jnp.maximum(hm[:, 0:H], hm[:, 1:H + 1]),
                         hm[:, 2:H + 2])              # (B, H, W, Cin), finite
    y4 = jnp.dot(pooled.reshape(M, cin), w4_ref[...],
                 preferred_element_type=jnp.float32)
    y4 = jnp.maximum(y4 * s4_ref[...] + b4_ref[...], 0.0)
    o_ref[:, :, :, pl.ds(c1 + c2 + c3, c4)] = (
        y4.reshape(B, H, W, c4).astype(o_ref.dtype))


# ------------------------------ parameters ----------------------------------

def init_basic_conv(key, cin, cout, ksize):
    kw_, kg, kb, km, kv = jax.random.split(key, 5)
    w = 0.1 * jax.random.normal(kw_, (cout, cin, ksize, ksize), jnp.float32)
    gamma = jax.random.uniform(kg, (cout,), jnp.float32, 0.5, 1.5)
    beta = 0.1 * jax.random.normal(kb, (cout,), jnp.float32)
    mean = 0.1 * jax.random.normal(km, (cout,), jnp.float32)
    var = jax.random.uniform(kv, (cout,), jnp.float32, 0.5, 1.5)
    scale = gamma / jnp.sqrt(var + BN_EPS)
    bias = beta - mean * scale
    p = {"w": w, "gamma": gamma, "beta": beta, "mean": mean, "var": var,
         "scale": scale.reshape(1, cout), "bias": bias.reshape(1, cout)}
    if ksize == 1:
        p["w2d"] = w.reshape(cout, cin).T.astype(jnp.bfloat16)       # (Cin, Cout)
    else:
        # (kh, kw, cin, cout) -> tap-major (9*cin, cout); row order matches
        # the in-kernel im2col concatenation (k = kh*3 + kw, then cin).
        p["w9"] = jnp.transpose(w, (2, 3, 1, 0)).reshape(
            9 * cin, cout).astype(jnp.bfloat16)
    return p


def init_inception(key, in_channels, ch1x1, ch3x3red, ch3x3,
                   ch5x5red, ch5x5, pool_proj):
    ks = jax.random.split(key, 6)
    p = {
        "b1": init_basic_conv(ks[0], in_channels, ch1x1, 1),
        "b2a": init_basic_conv(ks[1], in_channels, ch3x3red, 1),
        "b2b": init_basic_conv(ks[2], ch3x3red, ch3x3, 3),
        "b3a": init_basic_conv(ks[3], in_channels, ch5x5red, 1),
        "b3b": init_basic_conv(ks[4], ch5x5red, ch5x5, 3),
        "b4": init_basic_conv(ks[5], in_channels, pool_proj, 1),
    }
    # fuse the three 1x1 convs that share the same input (b1 | b2a | b3a)
    p["wf"] = jnp.concatenate(
        [p["b1"]["w2d"], p["b2a"]["w2d"], p["b3a"]["w2d"]], axis=1)
    p["sf"] = jnp.concatenate(
        [p["b1"]["scale"], p["b2a"]["scale"], p["b3a"]["scale"]], axis=1)
    p["bf"] = jnp.concatenate(
        [p["b1"]["bias"], p["b2a"]["bias"], p["b3a"]["bias"]], axis=1)
    return p


# ------------------------------- forward ------------------------------------

def inception_forward(x_nchw, params, *, batch_block=1):
    """Pallas implementation.  Input/output: NCHW (matches the PyTorch module)."""
    N, Cin, H, W = x_nchw.shape
    assert N % batch_block == 0
    B = batch_block

    # bf16 activations: at real GoogLeNet shapes the kernel is HBM-bound;
    # halving input bytes ~halves the input DMA time and VMEM block size.
    # TODO(synk): keep activations NHWC (and bf16) end-to-end across the net
    # so the entry/exit transposes disappear; the output could also be bf16.
    x_nhwc = jnp.transpose(x_nchw, (0, 2, 3, 1)).astype(jnp.bfloat16)

    wf, sf, bf = params["wf"], params["sf"], params["bf"]
    w2, s2, b2 = params["b2b"]["w9"], params["b2b"]["scale"], params["b2b"]["bias"]
    w3, s3, b3 = params["b3b"]["w9"], params["b3b"]["scale"], params["b3b"]["bias"]
    w4, s4, b4 = params["b4"]["w2d"], params["b4"]["scale"], params["b4"]["bias"]

    c1 = params["b1"]["w"].shape[0]
    c2, c3, c4 = w2.shape[1], w3.shape[1], w4.shape[1]
    c2r, c3r = w2.shape[0] // 9, w3.shape[0] // 9
    ctot = c1 + c2 + c3 + c4

    def resident(a):
        zeros = (0,) * a.ndim
        # Weights / BN params stay VMEM-resident across the grid loop
        # (constant index_map).  If the pipeliner still double-buffers them,
        # pipeline_mode=pl.Buffered(1) on these specs would reclaim that VMEM.
        return pl.BlockSpec(a.shape, lambda n: zeros)

    grid_spec = pltpu.PrefetchScalarGridSpec(
        num_scalar_prefetch=0,
        grid=(N // B,),
        in_specs=[
            pl.BlockSpec((B, H, W, Cin), lambda n: (n, 0, 0, 0)),
            resident(wf), resident(sf), resident(bf),
            resident(w2), resident(s2), resident(b2),
            resident(w3), resident(s3), resident(b3),
            resident(w4), resident(s4), resident(b4),
        ],
        out_specs=pl.BlockSpec((B, H, W, ctot), lambda n: (n, 0, 0, 0)),
        scratch_shapes=[
            pltpu.VMEM((B, H + 2, W + 2, Cin), jnp.bfloat16),
            pltpu.VMEM((B, H + 2, W + 2, c2r), jnp.bfloat16),
            pltpu.VMEM((B, H + 2, W + 2, c3r), jnp.bfloat16),
        ],
    )

    out = pl.pallas_call(
        inception_kernel,
        out_shape=jax.ShapeDtypeStruct((N, H, W, ctot), jnp.float32),
        grid_spec=grid_spec,
        compiler_params=pltpu.CompilerParams(
            dimension_semantics=("parallel",),
            # Above v5e's 16 MiB default scoped limit, with headroom against
            # v7x's 64 MiB physical VMEM.
            vmem_limit_bytes=48 * 1024 * 1024),
    )(x_nhwc, wf, sf, bf, w2, s2, b2, w3, s3, b3, w4, s4, b4)

    return jnp.transpose(out, (0, 3, 1, 2))                 # NCHW


# -------------------------- pure-JAX reference ------------------------------

def _ref_basic_conv(x_nchw, p, padding):
    y = lax.conv_general_dilated(
        x_nchw, p["w"], window_strides=(1, 1), padding=padding,
        dimension_numbers=("NCHW", "OIHW", "NCHW"))
    scale = (p["gamma"] / jnp.sqrt(p["var"] + BN_EPS))[None, :, None, None]
    bias = (p["beta"] - p["mean"] * p["gamma"] /
            jnp.sqrt(p["var"] + BN_EPS))[None, :, None, None]
    return jnp.maximum(y * scale + bias, 0.0)


def inception_reference(x_nchw, params):
    b1 = _ref_basic_conv(x_nchw, params["b1"], "VALID")
    b2 = _ref_basic_conv(_ref_basic_conv(x_nchw, params["b2a"], "VALID"),
                         params["b2b"], [(1, 1), (1, 1)])
    b3 = _ref_basic_conv(_ref_basic_conv(x_nchw, params["b3a"], "VALID"),
                         params["b3b"], [(1, 1), (1, 1)])
    pooled = lax.reduce_window(x_nchw, -jnp.inf, lax.max,
                               (1, 1, 3, 3), (1, 1, 1, 1),
                               ((0, 0), (0, 0), (1, 1), (1, 1)))
    b4 = _ref_basic_conv(pooled, params["b4"], "VALID")
    return jnp.concatenate([b1, b2, b3, b4], axis=1)


# --------------------------------- main -------------------------------------

if __name__ == "__main__":
    key = jax.random.PRNGKey(0)
    kx, kp = jax.random.split(key)

    # small shapes: batch=2, in_channels=4, spatial=16x16
    N, Cin, H, W = 2, 4, 16, 16
    x = jax.random.normal(kx, (N, Cin, H, W), jnp.float32)

    params = init_inception(kp, in_channels=Cin, ch1x1=8, ch3x3red=4,
                            ch3x3=8, ch5x5red=4, ch5x5=4, pool_proj=4)

    out = jax.jit(inception_forward)(x, params)
    out = jax.block_until_ready(out)

    ref = jax.block_until_ready(inception_reference(x, params))
    assert out.shape == (N, 8 + 8 + 4 + 4, H, W), out.shape
    # bf16 matmul operands (inference-style) vs f32 reference -> loose tol.
    np.testing.assert_allclose(np.asarray(out), np.asarray(ref),
                               rtol=2e-2, atol=2e-2)

    print("KERNEL_OK")
</pallas_src>

<mosaic_0001>
module attributes {stable_mosaic.version = 11 : i64} {
  func.func @inception_kernel(%arg0: i32, %arg1: memref<1x16x16x4xbf16, #tpu.memory_space<vmem>>, %arg2: memref<4x16xbf16, #tpu.memory_space<vmem>>, %arg3: memref<1x16xf32, #tpu.memory_space<vmem>>, %arg4: memref<1x16xf32, #tpu.memory_space<vmem>>, %arg5: memref<36x8xbf16, #tpu.memory_space<vmem>>, %arg6: memref<1x8xf32, #tpu.memory_space<vmem>>, %arg7: memref<1x8xf32, #tpu.memory_space<vmem>>, %arg8: memref<36x4xbf16, #tpu.memory_space<vmem>>, %arg9: memref<1x4xf32, #tpu.memory_space<vmem>>, %arg10: memref<1x4xf32, #tpu.memory_space<vmem>>, %arg11: memref<4x4xbf16, #tpu.memory_space<vmem>>, %arg12: memref<1x4xf32, #tpu.memory_space<vmem>>, %arg13: memref<1x4xf32, #tpu.memory_space<vmem>>, %arg14: memref<1x16x16x24xf32, #tpu.memory_space<vmem>>, %arg15: memref<1x18x18x4xbf16, #tpu.memory_space<vmem>>, %arg16: memref<1x18x18x4xbf16, #tpu.memory_space<vmem>>, %arg17: memref<1x18x18x4xbf16, #tpu.memory_space<vmem>>) attributes {dimension_semantics = [#tpu.dimension_semantics<parallel>], iteration_bounds = array<i64: 2>, scalar_prefetch = 0 : i64, scratch_operands = 3 : i64, tpu.core_type = #tpu.core_type<tc>, window_params = [{transform_indices = @transform_0, window_bounds = array<i64: 1, 16, 16, 4>}, {pipeline_mode = #tpu.pipeline_mode<synchronous>, transform_indices = @transform_1, window_bounds = array<i64: 4, 16>}, {pipeline_mode = #tpu.pipeline_mode<synchronous>, transform_indices = @transform_2, window_bounds = array<i64: 1, 16>}, {pipeline_mode = #tpu.pipeline_mode<synchronous>, transform_indices = @transform_3, window_bounds = array<i64: 1, 16>}, {pipeline_mode = #tpu.pipeline_mode<synchronous>, transform_indices = @transform_4, window_bounds = array<i64: 36, 8>}, {pipeline_mode = #tpu.pipeline_mode<synchronous>, transform_indices = @transform_5, window_bounds = array<i64: 1, 8>}, {pipeline_mode = #tpu.pipeline_mode<synchronous>, transform_indices = @transform_6, window_bounds = array<i64: 1, 8>}, {pipeline_mode = #tpu.pipeline_mode<synchronous>, transform_indices = @transform_7, window_bounds = array<i64: 36, 4>}, {pipeline_mode = #tpu.pipeline_mode<synchronous>, transform_indices = @transform_8, window_bounds = array<i64: 1, 4>}, {pipeline_mode = #tpu.pipeline_mode<synchronous>, transform_indices = @transform_9, window_bounds = array<i64: 1, 4>}, {pipeline_mode = #tpu.pipeline_mode<synchronous>, transform_indices = @transform_10, window_bounds = array<i64: 4, 4>}, {pipeline_mode = #tpu.pipeline_mode<synchronous>, transform_indices = @transform_11, window_bounds = array<i64: 1, 4>}, {pipeline_mode = #tpu.pipeline_mode<synchronous>, transform_indices = @transform_12, window_bounds = array<i64: 1, 4>}, {transform_indices = @transform_13, window_bounds = array<i64: 1, 16, 16, 24>}]} {
    %c0 = arith.constant 0 : index
    %c0_0 = arith.constant 0 : index
    %c0_1 = arith.constant 0 : index
    %c0_2 = arith.constant 0 : index
    %0 = vector.load %arg1[%c0, %c0_0, %c0_1, %c0_2] : memref<1x16x16x4xbf16, #tpu.memory_space<vmem>>, vector<1x16x16x4xbf16>
    %1 = vector.shape_cast %0 : vector<1x16x16x4xbf16> to vector<256x4xbf16>
    %c0_3 = arith.constant 0 : index
    %c0_4 = arith.constant 0 : index
    %2 = vector.load %arg2[%c0_3, %c0_4] : memref<4x16xbf16, #tpu.memory_space<vmem>>, vector<4x16xbf16>
    %cst = arith.constant dense<0.000000e+00> : vector<256x16xf32>
    %3 = tpu.matmul %1, %2, %cst {dimension_numbers = #tpu.dot_dimension_numbers<[1], [0], [0], [1], [0, 0, 1, 1], [], []>} : vector<256x4xbf16>, vector<4x16xbf16>, vector<256x16xf32> -> vector<256x16xf32>
    %c0_5 = arith.constant 0 : index
    %c0_6 = arith.constant 0 : index
    %4 = vector.load %arg3[%c0_5, %c0_6] : memref<1x16xf32, #tpu.memory_space<vmem>>, vector<1x16xf32>
    %5 = vector.broadcast %4 : vector<1x16xf32> to vector<256x16xf32>
    %6 = arith.mulf %3, %5 : vector<256x16xf32>
    %c0_7 = arith.constant 0 : index
    %c0_8 = arith.constant 0 : index
    %7 = vector.load %arg4[%c0_7, %c0_8] : memref<1x16xf32, #tpu.memory_space<vmem>>, vector<1x16xf32>
    %8 = vector.broadcast %7 : vector<1x16xf32> to vector<256x16xf32>
    %9 = arith.addf %6, %8 : vector<256x16xf32>
    %cst_9 = arith.constant 0.000000e+00 : f32
    %10 = vector.broadcast %cst_9 : f32 to vector<256x16xf32>
    %11 = arith.maximumf %9, %10 : vector<256x16xf32>
    %12 = vector.extract_strided_slice %11 {offsets = [0, 0], sizes = [256, 8], strides = [1, 1]} : vector<256x16xf32> to vector<256x8xf32>
    %13 = vector.shape_cast %12 : vector<256x8xf32> to vector<1x16x16x8xf32>
    %c0_10 = arith.constant 0 : index
    %c0_11 = arith.constant 0 : index
    %c0_12 = arith.constant 0 : index
    %c0_13 = arith.constant 0 : index
    %14 = vector.load %arg14[%c0_10, %c0_11, %c0_12, %c0_13] : memref<1x16x16x24xf32, #tpu.memory_space<vmem>>, vector<1x16x16x8xf32>
    tpu.vector_store %arg14[%c0_10, %c0_11, %c0_12, %c0_13], %13 {strides = array<i32>} : memref<1x16x16x24xf32, #tpu.memory_space<vmem>>, vector<1x16x16x8xf32>,
    %15 = vector.extract_strided_slice %11 {offsets = [0, 8], sizes = [256, 4], strides = [1, 1]} : vector<256x16xf32> to vector<256x4xf32>
    %16 = arith.truncf %15 : vector<256x4xf32> to vector<256x4xbf16>
    %17 = vector.extract_strided_slice %11 {offsets = [0, 12], sizes = [256, 4], strides = [1, 1]} : vector<256x16xf32> to vector<256x4xf32>
    %18 = arith.truncf %17 : vector<256x4xf32> to vector<256x4xbf16>
    %cst_14 = arith.constant 0.000000e+00 : bf16
    %19 = vector.broadcast %cst_14 : bf16 to vector<1x1x18x4xbf16>
    %cst_15 = arith.constant 0.000000e+00 : bf16
    %20 = vector.broadcast %cst_15 : bf16 to vector<1x18x1x4xbf16>
    %c0_16 = arith.constant 0 : index
    %c0_17 = arith.constant 0 : index
    %c0_18 = arith.constant 0 : index
    %c0_19 = arith.constant 0 : index
    %21 = vector.load %arg16[%c0_16, %c0_17, %c0_18, %c0_19] : memref<1x18x18x4xbf16, #tpu.memory_space<vmem>>, vector<1x1x18x4xbf16>
    tpu.vector_store %arg16[%c0_16, %c0_17, %c0_18, %c0_19], %19 {strides = array<i32>} : memref<1x18x18x4xbf16, #tpu.memory_space<vmem>>, vector<1x1x18x4xbf16>,
    %c0_20 = arith.constant 0 : index
    %c17 = arith.constant 17 : index
    %c0_21 = arith.constant 0 : index
    %c0_22 = arith.constant 0 : index
    %22 = vector.load %arg16[%c0_20, %c17, %c0_21, %c0_22] : memref<1x18x18x4xbf16, #tpu.memory_space<vmem>>, vector<1x1x18x4xbf16>
    tpu.vector_store %arg16[%c0_20, %c17, %c0_21, %c0_22], %19 {strides = array<i32>} : memref<1x18x18x4xbf16, #tpu.memory_space<vmem>>, vector<1x1x18x4xbf16>,
    %c0_23 = arith.constant 0 : index
    %c0_24 = arith.constant 0 : index
    %c0_25 = arith.constant 0 : index
    %c0_26 = arith.constant 0 : index
    %23 = vector.load %arg16[%c0_23, %c0_24, %c0_25, %c0_26] : memref<1x18x18x4xbf16, #tpu.memory_space<vmem>>, vector<1x18x1x4xbf16>
    tpu.vector_store %arg16[%c0_23, %c0_24, %c0_25, %c0_26], %20 {strides = array<i32>} : memref<1x18x18x4xbf16, #tpu.memory_space<vmem>>, vector<1x18x1x4xbf16>,
    %c0_27 = arith.constant 0 : index
    %c0_28 = arith.constant 0 : index
    %c17_29 = arith.constant 17 : index
    %c0_30 = arith.constant 0 : index
    %24 = vector.load %arg16[%c0_27, %c0_28, %c17_29, %c0_30] : memref<1x18x18x4xbf16, #tpu.memory_space<vmem>>, vector<1x18x1x4xbf16>
    tpu.vector_store %arg16[%c0_27, %c0_28, %c17_29, %c0_30], %20 {strides = array<i32>} : memref<1x18x18x4xbf16, #tpu.memory_space<vmem>>, vector<1x18x1x4xbf16>,
    %cst_31 = arith.constant 0.000000e+00 : bf16
    %25 = vector.broadcast %cst_31 : bf16 to vector<1x1x18x4xbf16>
    %cst_32 = arith.constant 0.000000e+00 : bf16
    %26 = vector.broadcast %cst_32 : bf16 to vector<1x18x1x4xbf16>
    %c0_33 = arith.constant 0 : index
    %c0_34 = arith.constant 0 : index
    %c0_35 = arith.constant 0 : index
    %c0_36 = arith.constant 0 : index
    %27 = vector.load %arg17[%c0_33, %c0_34, %c0_35, %c0_36] : memref<1x18x18x4xbf16, #tpu.memory_space<vmem>>, vector<1x1x18x4xbf16>
    tpu.vector_store %arg17[%c0_33, %c0_34, %c0_35, %c0_36], %25 {strides = array<i32>} : memref<1x18x18x4xbf16, #tpu.memory_space<vmem>>, vector<1x1x18x4xbf16>,
    %c0_37 = arith.constant 0 : index
    %c17_38 = arith.constant 17 : index
    %c0_39 = arith.constant 0 : index
    %c0_40 = arith.constant 0 : index
    %28 = vector.load %arg17[%c0_37, %c17_38, %c0_39, %c0_40] : memref<1x18x18x4xbf16, #tpu.memory_space<vmem>>, vector<1x1x18x4xbf16>
    tpu.vector_store %arg17[%c0_37, %c17_38, %c0_39, %c0_40], %25 {strides = array<i32>} : memref<1x18x18x4xbf16, #tpu.memory_space<vmem>>, vector<1x1x18x4xbf16>,
    %c0_41 = arith.constant 0 : index
    %c0_42 = arith.constant 0 : index
    %c0_43 = arith.constant 0 : index
    %c0_44 = arith.constant 0 : index
    %29 = vector.load %arg17[%c0_41, %c0_42, %c0_43, %c0_44] : memref<1x18x18x4xbf16, #tpu.memory_space<vmem>>, vector<1x18x1x4xbf16>
    tpu.vector_store %arg17[%c0_41, %c0_42, %c0_43, %c0_44], %26 {strides = array<i32>} : memref<1x18x18x4xbf16, #tpu.memory_space<vmem>>, vector<1x18x1x4xbf16>,
    %c0_45 = arith.constant 0 : index
    %c0_46 = arith.constant 0 : index
    %c17_47 = arith.constant 17 : index
    %c0_48 = arith.constant 0 : index
    %30 = vector.load %arg17[%c0_45, %c0_46, %c17_47, %c0_48] : memref<1x18x18x4xbf16, #tpu.memory_space<vmem>>, vector<1x18x1x4xbf16>
    tpu.vector_store %arg17[%c0_45, %c0_46, %c17_47, %c0_48], %26 {strides = array<i32>} : memref<1x18x18x4xbf16, #tpu.memory_space<vmem>>, vector<1x18x1x4xbf16>,
    %31 = vector.shape_cast %16 : vector<256x4xbf16> to vector<1x16x16x4xbf16>
    %c0_49 = arith.constant 0 : index
    %c1 = arith.constant 1 : index
    %c1_50 = arith.constant 1 : index
    %c0_51 = arith.constant 0 : index
    %32 = vector.load %arg16[%c0_49, %c1, %c1_50, %c0_51] : memref<1x18x18x4xbf16, #tpu.memory_space<vmem>>, vector<1x16x16x4xbf16>
    tpu.vector_store %arg16[%c0_49, %c1, %c1_50, %c0_51], %31 {strides = array<i32>} : memref<1x18x18x4xbf16, #tpu.memory_space<vmem>>, vector<1x16x16x4xbf16>,
    %33 = vector.shape_cast %18 : vector<256x4xbf16> to vector<1x16x16x4xbf16>
    %c0_52 = arith.constant 0 : index
    %c1_53 = arith.constant 1 : index
    %c1_54 = arith.constant 1 : index
    %c0_55 = arith.constant 0 : index
    %34 = vector.load %arg17[%c0_52, %c1_53, %c1_54, %c0_55] : memref<1x18x18x4xbf16, #tpu.memory_space<vmem>>, vector<1x16x16x4xbf16>
    tpu.vector_store %arg17[%c0_52, %c1_53, %c1_54, %c0_55], %33 {strides = array<i32>} : memref<1x18x18x4xbf16, #tpu.memory_space<vmem>>, vector<1x16x16x4xbf16>,
    %c0_56 = arith.constant 0 : index
    %c0_57 = arith.constant 0 : index
    %c0_58 = arith.constant 0 : index
    %c0_59 = arith.constant 0 : index
    %35 = vector.load %arg16[%c0_56, %c0_57, %c0_58, %c0_59] : memref<1x18x18x4xbf16, #tpu.memory_space<vmem>>, vector<1x16x16x4xbf16>
    %36 = vector.shape_cast %35 : vector<1x16x16x4xbf16> to vector<256x4xbf16>
    %c0_60 = arith.constant 0 : index
    %c0_61 = arith.constant 0 : index
    %c1_62 = arith.constant 1 : index
    %c0_63 = arith.constant 0 : index
    %37 = vector.load %arg16[%c0_60, %c0_61, %c1_62, %c0_63] : memref<1x18x18x4xbf16, #tpu.memory_space<vmem>>, vector<1x16x16x4xbf16>
    %38 = vector.shape_cast %37 : vector<1x16x16x4xbf16> to vector<256x4xbf16>
    %c0_64 = arith.constant 0 : index
    %c0_65 = arith.constant 0 : index
    %c2 = arith.constant 2 : index
    %c0_66 = arith.constant 0 : index
    %39 = vector.load %arg16[%c0_64, %c0_65, %c2, %c0_66] : memref<1x18x18x4xbf16, #tpu.memory_space<vmem>>, vector<1x16x16x4xbf16>
    %40 = vector.shape_cast %39 : vector<1x16x16x4xbf16> to vector<256x4xbf16>
    %c0_67 = arith.constant 0 : index
    %c1_68 = arith.constant 1 : index
    %c0_69 = arith.constant 0 : index
    %c0_70 = arith.constant 0 : index
    %41 = vector.load %arg16[%c0_67, %c1_68, %c0_69, %c0_70] : memref<1x18x18x4xbf16, #tpu.memory_space<vmem>>, vector<1x16x16x4xbf16>
    %42 = vector.shape_cast %41 : vector<1x16x16x4xbf16> to vector<256x4xbf16>
    %c0_71 = arith.constant 0 : index
    %c1_72 = arith.constant 1 : index
    %c1_73 = arith.constant 1 : index
    %c0_74 = arith.constant 0 : index
    %43 = vector.load %arg16[%c0_71, %c1_72, %c1_73, %c0_74] : memref<1x18x18x4xbf16, #tpu.memory_space<vmem>>, vector<1x16x16x4xbf16>
    %44 = vector.shape_cast %43 : vector<1x16x16x4xbf16> to vector<256x4xbf16>
    %c0_75 = arith.constant 0 : index
    %c1_76 = arith.constant 1 : index
    %c2_77 = arith.constant 2 : index
    %c0_78 = arith.constant 0 : index
    %45 = vector.load %arg16[%c0_75, %c1_76, %c2_77, %c0_78] : memref<1x18x18x4xbf16, #tpu.memory_space<vmem>>, vector<1x16x16x4xbf16>
    %46 = vector.shape_cast %45 : vector<1x16x16x4xbf16> to vector<256x4xbf16>
    %c0_79 = arith.constant 0 : index
    %c2_80 = arith.constant 2 : index
    %c0_81 = arith.constant 0 : index
    %c0_82 = arith.constant 0 : index
    %47 = vector.load %arg16[%c0_79, %c2_80, %c0_81, %c0_82] : memref<1x18x18x4xbf16, #tpu.memory_space<vmem>>, vector<1x16x16x4xbf16>
    %48 = vector.shape_cast %47 : vector<1x16x16x4xbf16> to vector<256x4xbf16>
    %c0_83 = arith.constant 0 : index
    %c2_84 = arith.constant 2 : index
    %c1_85 = arith.constant 1 : index
    %c0_86 = arith.constant 0 : index
    %49 = vector.load %arg16[%c0_83, %c2_84, %c1_85, %c0_86] : memref<1x18x18x4xbf16, #tpu.memory_space<vmem>>, vector<1x16x16x4xbf16>
    %50 = vector.shape_cast %49 : vector<1x16x16x4xbf16> to vector<256x4xbf16>
    %c0_87 = arith.constant 0 : index
    %c2_88 = arith.constant 2 : index
    %c2_89 = arith.constant 2 : index
    %c0_90 = arith.constant 0 : index
    %51 = vector.load %arg16[%c0_87, %c2_88, %c2_89, %c0_90] : memref<1x18x18x4xbf16, #tpu.memory_space<vmem>>, vector<1x16x16x4xbf16>
    %52 = vector.shape_cast %51 : vector<1x16x16x4xbf16> to vector<256x4xbf16>
    %53 = tpu.concatenate %36, %38, %40, %42, %44, %46, %48, %50, %52 in 1 : vector<256x4xbf16>, vector<256x4xbf16>, vector<256x4xbf16>, vector<256x4xbf16>, vector<256x4xbf16>, vector<256x4xbf16>, vector<256x4xbf16>, vector<256x4xbf16>, vector<256x4xbf16> -> vector<256x36xbf16>
    %c0_91 = arith.constant 0 : index
    %c0_92 = arith.constant 0 : index
    %54 = vector.load %arg5[%c0_91, %c0_92] : memref<36x8xbf16, #tpu.memory_space<vmem>>, vector<36x8xbf16>
    %cst_93 = arith.constant dense<0.000000e+00> : vector<256x8xf32>
    %55 = tpu.matmul %53, %54, %cst_93 {dimension_numbers = #tpu.dot_dimension_numbers<[1], [0], [0], [1], [0, 0, 1, 1], [], []>} : vector<256x36xbf16>, vector<36x8xbf16>, vector<256x8xf32> -> vector<256x8xf32>
    %c0_94 = arith.constant 0 : index
    %c0_95 = arith.constant 0 : index
    %56 = vector.load %arg6[%c0_94, %c0_95] : memref<1x8xf32, #tpu.memory_space<vmem>>, vector<1x8xf32>
    %57 = vector.broadcast %56 : vector<1x8xf32> to vector<256x8xf32>
    %58 = arith.mulf %55, %57 : vector<256x8xf32>
    %c0_96 = arith.constant 0 : index
    %c0_97 = arith.constant 0 : index
    %59 = vector.load %arg7[%c0_96, %c0_97] : memref<1x8xf32, #tpu.memory_space<vmem>>, vector<1x8xf32>
    %60 = vector.broadcast %59 : vector<1x8xf32> to vector<256x8xf32>
    %61 = arith.addf %58, %60 : vector<256x8xf32>
    %cst_98 = arith.constant 0.000000e+00 : f32
    %62 = vector.broadcast %cst_98 : f32 to vector<256x8xf32>
    %63 = arith.maximumf %61, %62 : vector<256x8xf32>
    %64 = vector.shape_cast %63 : vector<256x8xf32> to vector<1x16x16x8xf32>
    %c0_99 = arith.constant 0 : index
    %c0_100 = arith.constant 0 : index
    %c0_101 = arith.constant 0 : index
    %c8 = arith.constant 8 : index
    %65 = vector.load %arg14[%c0_99, %c0_100, %c0_101, %c8] : memref<1x16x16x24xf32, #tpu.memory_space<vmem>>, vector<1x16x16x8xf32>
    tpu.vector_store %arg14[%c0_99, %c0_100, %c0_101, %c8], %64 {strides = array<i32>} : memref<1x16x16x24xf32, #tpu.memory_space<vmem>>, vector<1x16x16x8xf32>,
    %c0_102 = arith.constant 0 : index
    %c0_103 = arith.constant 0 : index
    %c0_104 = arith.constant 0 : index
    %c0_105 = arith.constant 0 : index
    %66 = vector.load %arg17[%c0_102, %c0_103, %c0_104, %c0_105] : memref<1x18x18x4xbf16, #tpu.memory_space<vmem>>, vector<1x16x16x4xbf16>
    %67 = vector.shape_cast %66 : vector<1x16x16x4xbf16> to vector<256x4xbf16>
    %c0_106 = arith.constant 0 : index
    %c0_107 = arith.constant 0 : index
    %c1_108 = arith.constant 1 : index
    %c0_109 = arith.constant 0 : index
    %68 = vector.load %arg17[%c0_106, %c0_107, %c1_108, %c0_109] : memref<1x18x18x4xbf16, #tpu.memory_space<vmem>>, vector<1x16x16x4xbf16>
    %69 = vector.shape_cast %68 : vector<1x16x16x4xbf16> to vector<256x4xbf16>
    %c0_110 = arith.constant 0 : index
    %c0_111 = arith.constant 0 : index
    %c2_112 = arith.constant 2 : index
    %c0_113 = arith.constant 0 : index
    %70 = vector.load %arg17[%c0_110, %c0_111, %c2_112, %c0_113] : memref<1x18x18x4xbf16, #tpu.memory_space<vmem>>, vector<1x16x16x4xbf16>
    %71 = vector.shape_cast %70 : vector<1x16x16x4xbf16> to vector<256x4xbf16>
    %c0_114 = arith.constant 0 : index
    %c1_115 = arith.constant 1 : index
    %c0_116 = arith.constant 0 : index
    %c0_117 = arith.constant 0 : index
    %72 = vector.load %arg17[%c0_114, %c1_115, %c0_116, %c0_117] : memref<1x18x18x4xbf16, #tpu.memory_space<vmem>>, vector<1x16x16x4xbf16>
    %73 = vector.shape_cast %72 : vector<1x16x16x4xbf16> to vector<256x4xbf16>
    %c0_118 = arith.constant 0 : index
    %c1_119 = arith.constant 1 : index
    %c1_120 = arith.constant 1 : index
    %c0_121 = arith.constant 0 : index
    %74 = vector.load %arg17[%c0_118, %c1_119, %c1_120, %c0_121] : memref<1x18x18x4xbf16, #tpu.memory_space<vmem>>, vector<1x16x16x4xbf16>
    %75 = vector.shape_cast %74 : vector<1x16x16x4xbf16> to vector<256x4xbf16>
    %c0_122 = arith.constant 0 : index
    %c1_123 = arith.constant 1 : index
    %c2_124 = arith.constant 2 : index
    %c0_125 = arith.constant 0 : index
    %76 = vector.load %arg17[%c0_122, %c1_123, %c2_124, %c0_125] : memref<1x18x18x4xbf16, #tpu.memory_space<vmem>>, vector<1x16x16x4xbf16>
    %77 = vector.shape_cast %76 : vector<1x16x16x4xbf16> to vector<256x4xbf16>
    %c0_126 = arith.constant 0 : index
    %c2_127 = arith.constant 2 : index
    %c0_128 = arith.constant 0 : index
    %c0_129 = arith.constant 0 : index
    %78 = vector.load %arg17[%c0_126, %c2_127, %c0_128, %c0_129] : memref<1x18x18x4xbf16, #tpu.memory_space<vmem>>, vector<1x16x16x4xbf16>
    %79 = vector.shape_cast %78 : vector<1x16x16x4xbf16> to vector<256x4xbf16>
    %c0_130 = arith.constant 0 : index
    %c2_131 = arith.constant 2 : index
    %c1_132 = arith.constant 1 : index
    %c0_133 = arith.constant 0 : index
    %80 = vector.load %arg17[%c0_130, %c2_131, %c1_132, %c0_133] : memref<1x18x18x4xbf16, #tpu.memory_space<vmem>>, vector<1x16x16x4xbf16>
    %81 = vector.shape_cast %80 : vector<1x16x16x4xbf16> to vector<256x4xbf16>
    %c0_134 = arith.constant 0 : index
    %c2_135 = arith.constant 2 : index
    %c2_136 = arith.constant 2 : index
    %c0_137 = arith.constant 0 : index
    %82 = vector.load %arg17[%c0_134, %c2_135, %c2_136, %c0_137] : memref<1x18x18x4xbf16, #tpu.memory_space<vmem>>, vector<1x16x16x4xbf16>
    %83 = vector.shape_cast %82 : vector<1x16x16x4xbf16> to vector<256x4xbf16>
    %84 = tpu.concatenate %67, %69, %71, %73, %75, %77, %79, %81, %83 in 1 : vector<256x4xbf16>, vector<256x4xbf16>, vector<256x4xbf16>, vector<256x4xbf16>, vector<256x4xbf16>, vector<256x4xbf16>, vector<256x4xbf16>, vector<256x4xbf16>, vector<256x4xbf16> -> vector<256x36xbf16>
    %c0_138 = arith.constant 0 : index
    %c0_139 = arith.constant 0 : index
    %85 = vector.load %arg8[%c0_138, %c0_139] : memref<36x4xbf16, #tpu.memory_space<vmem>>, vector<36x4xbf16>
    %cst_140 = arith.constant dense<0.000000e+00> : vector<256x4xf32>
    %86 = tpu.matmul %84, %85, %cst_140 {dimension_numbers = #tpu.dot_dimension_numbers<[1], [0], [0], [1], [0, 0, 1, 1], [], []>} : vector<256x36xbf16>, vector<36x4xbf16>, vector<256x4xf32> -> vector<256x4xf32>
    %c0_141 = arith.constant 0 : index
    %c0_142 = arith.constant 0 : index
    %87 = vector.load %arg9[%c0_141, %c0_142] : memref<1x4xf32, #tpu.memory_space<vmem>>, vector<1x4xf32>
    %88 = vector.broadcast %87 : vector<1x4xf32> to vector<256x4xf32>
    %89 = arith.mulf %86, %88 : vector<256x4xf32>
    %c0_143 = arith.constant 0 : index
    %c0_144 = arith.constant 0 : index
    %90 = vector.load %arg10[%c0_143, %c0_144] : memref<1x4xf32, #tpu.memory_space<vmem>>, vector<1x4xf32>
    %91 = vector.broadcast %90 : vector<1x4xf32> to vector<256x4xf32>
    %92 = arith.addf %89, %91 : vector<256x4xf32>
    %cst_145 = arith.constant 0.000000e+00 : f32
    %93 = vector.broadcast %cst_145 : f32 to vector<256x4xf32>
    %94 = arith.maximumf %92, %93 : vector<256x4xf32>
    %95 = vector.shape_cast %94 : vector<256x4xf32> to vector<1x16x16x4xf32>
    %c0_146 = arith.constant 0 : index
    %c0_147 = arith.constant 0 : index
    %c0_148 = arith.constant 0 : index
    %c16 = arith.constant 16 : index
    %96 = vector.load %arg14[%c0_146, %c0_147, %c0_148, %c16] : memref<1x16x16x24xf32, #tpu.memory_space<vmem>>, vector<1x16x16x4xf32>
    tpu.vector_store %arg14[%c0_146, %c0_147, %c0_148, %c16], %95 {strides = array<i32>} : memref<1x16x16x24xf32, #tpu.memory_space<vmem>>, vector<1x16x16x4xf32>,
    %cst_149 = arith.constant 0xFF80 : bf16
    %97 = vector.broadcast %cst_149 : bf16 to vector<1x1x18x4xbf16>
    %cst_150 = arith.constant 0xFF80 : bf16
    %98 = vector.broadcast %cst_150 : bf16 to vector<1x18x1x4xbf16>
    %c0_151 = arith.constant 0 : index
    %c0_152 = arith.constant 0 : index
    %c0_153 = arith.constant 0 : index
    %c0_154 = arith.constant 0 : index
    %99 = vector.load %arg15[%c0_151, %c0_152, %c0_153, %c0_154] : memref<1x18x18x4xbf16, #tpu.memory_space<vmem>>, vector<1x1x18x4xbf16>
    tpu.vector_store %arg15[%c0_151, %c0_152, %c0_153, %c0_154], %97 {strides = array<i32>} : memref<1x18x18x4xbf16, #tpu.memory_space<vmem>>, vector<1x1x18x4xbf16>,
    %c0_155 = arith.constant 0 : index
    %c17_156 = arith.constant 17 : index
    %c0_157 = arith.constant 0 : index
    %c0_158 = arith.constant 0 : index
    %100 = vector.load %arg15[%c0_155, %c17_156, %c0_157, %c0_158] : memref<1x18x18x4xbf16, #tpu.memory_space<vmem>>, vector<1x1x18x4xbf16>
    tpu.vector_store %arg15[%c0_155, %c17_156, %c0_157, %c0_158], %97 {strides = array<i32>} : memref<1x18x18x4xbf16, #tpu.memory_space<vmem>>, vector<1x1x18x4xbf16>,
    %c0_159 = arith.constant 0 : index
    %c0_160 = arith.constant 0 : index
    %c0_161 = arith.constant 0 : index
    %c0_162 = arith.constant 0 : index
    %101 = vector.load %arg15[%c0_159, %c0_160, %c0_161, %c0_162] : memref<1x18x18x4xbf16, #tpu.memory_space<vmem>>, vector<1x18x1x4xbf16>
    tpu.vector_store %arg15[%c0_159, %c0_160, %c0_161, %c0_162], %98 {strides = array<i32>} : memref<1x18x18x4xbf16, #tpu.memory_space<vmem>>, vector<1x18x1x4xbf16>,
    %c0_163 = arith.constant 0 : index
    %c0_164 = arith.constant 0 : index
    %c17_165 = arith.constant 17 : index
    %c0_166 = arith.constant 0 : index
    %102 = vector.load %arg15[%c0_163, %c0_164, %c17_165, %c0_166] : memref<1x18x18x4xbf16, #tpu.memory_space<vmem>>, vector<1x18x1x4xbf16>
    tpu.vector_store %arg15[%c0_163, %c0_164, %c17_165, %c0_166], %98 {strides = array<i32>} : memref<1x18x18x4xbf16, #tpu.memory_space<vmem>>, vector<1x18x1x4xbf16>,
    %c0_167 = arith.constant 0 : index
    %c1_168 = arith.constant 1 : index
    %c1_169 = arith.constant 1 : index
    %c0_170 = arith.constant 0 : index
    %103 = vector.load %arg15[%c0_167, %c1_168, %c1_169, %c0_170] : memref<1x18x18x4xbf16, #tpu.memory_space<vmem>>, vector<1x16x16x4xbf16>
    tpu.vector_store %arg15[%c0_167, %c1_168, %c1_169, %c0_170], %0 {strides = array<i32>} : memref<1x18x18x4xbf16, #tpu.memory_space<vmem>>, vector<1x16x16x4xbf16>,
    %c0_171 = arith.constant 0 : index
    %c0_172 = arith.constant 0 : index
    %c0_173 = arith.constant 0 : index
    %c0_174 = arith.constant 0 : index
    %104 = vector.load %arg15[%c0_171, %c0_172, %c0_173, %c0_174] : memref<1x18x18x4xbf16, #tpu.memory_space<vmem>>, vector<1x18x16x4xbf16>
    %c0_175 = arith.constant 0 : index
    %c0_176 = arith.constant 0 : index
    %c1_177 = arith.constant 1 : index
    %c0_178 = arith.constant 0 : index
    %105 = vector.load %arg15[%c0_175, %c0_176, %c1_177, %c0_178] : memref<1x18x18x4xbf16, #tpu.memory_space<vmem>>, vector<1x18x16x4xbf16>
    %106 = arith.maximumf %104, %105 : vector<1x18x16x4xbf16>
    %c0_179 = arith.constant 0 : index
    %c0_180 = arith.constant 0 : index
    %c2_181 = arith.constant 2 : index
    %c0_182 = arith.constant 0 : index
    %107 = vector.load %arg15[%c0_179, %c0_180, %c2_181, %c0_182] : memref<1x18x18x4xbf16, #tpu.memory_space<vmem>>, vector<1x18x16x4xbf16>
    %108 = arith.maximumf %106, %107 : vector<1x18x16x4xbf16>
    %109 = vector.extract_strided_slice %108 {offsets = [0, 0, 0, 0], sizes = [1, 16, 16, 4], strides = [1, 1, 1, 1]} : vector<1x18x16x4xbf16> to vector<1x16x16x4xbf16>
    %110 = vector.extract_strided_slice %108 {offsets = [0, 1, 0, 0], sizes = [1, 16, 16, 4], strides = [1, 1, 1, 1]} : vector<1x18x16x4xbf16> to vector<1x16x16x4xbf16>
    %111 = arith.maximumf %109, %110 : vector<1x16x16x4xbf16>
    %112 = vector.extract_strided_slice %108 {offsets = [0, 2, 0, 0], sizes = [1, 16, 16, 4], strides = [1, 1, 1, 1]} : vector<1x18x16x4xbf16> to vector<1x16x16x4xbf16>
    %113 = arith.maximumf %111, %112 : vector<1x16x16x4xbf16>
    %114 = vector.shape_cast %113 : vector<1x16x16x4xbf16> to vector<256x4xbf16>
    %c0_183 = arith.constant 0 : index
    %c0_184 = arith.constant 0 : index
    %115 = vector.load %arg11[%c0_183, %c0_184] : memref<4x4xbf16, #tpu.memory_space<vmem>>, vector<4x4xbf16>
    %cst_185 = arith.constant dense<0.000000e+00> : vector<256x4xf32>
    %116 = tpu.matmul %114, %115, %cst_185 {dimension_numbers = #tpu.dot_dimension_numbers<[1], [0], [0], [1], [0, 0, 1, 1], [], []>} : vector<256x4xbf16>, vector<4x4xbf16>, vector<256x4xf32> -> vector<256x4xf32>
    %c0_186 = arith.constant 0 : index
    %c0_187 = arith.constant 0 : index
    %117 = vector.load %arg12[%c0_186, %c0_187] : memref<1x4xf32, #tpu.memory_space<vmem>>, vector<1x4xf32>
    %118 = vector.broadcast %117 : vector<1x4xf32> to vector<256x4xf32>
    %119 = arith.mulf %116, %118 : vector<256x4xf32>
    %c0_188 = arith.constant 0 : index
    %c0_189 = arith.constant 0 : index
    %120 = vector.load %arg13[%c0_188, %c0_189] : memref<1x4xf32, #tpu.memory_space<vmem>>, vector<1x4xf32>
    %121 = vector.broadcast %120 : vector<1x4xf32> to vector<256x4xf32>
    %122 = arith.addf %119, %121 : vector<256x4xf32>
    %cst_190 = arith.constant 0.000000e+00 : f32
    %123 = vector.broadcast %cst_190 : f32 to vector<256x4xf32>
    %124 = arith.maximumf %122, %123 : vector<256x4xf32>
    %125 = vector.shape_cast %124 : vector<256x4xf32> to vector<1x16x16x4xf32>
    %c0_191 = arith.constant 0 : index
    %c0_192 = arith.constant 0 : index
    %c0_193 = arith.constant 0 : index
    %c20 = arith.constant 20 : index
    %126 = vector.load %arg14[%c0_191, %c0_192, %c0_193, %c20] : memref<1x16x16x24xf32, #tpu.memory_space<vmem>>, vector<1x16x16x4xf32>
    tpu.vector_store %arg14[%c0_191, %c0_192, %c0_193, %c20], %125 {strides = array<i32>} : memref<1x16x16x24xf32, #tpu.memory_space<vmem>>, vector<1x16x16x4xf32>,
    return
  }
  func.func @transform_0(%arg0: i32) -> (i32, i32, i32, i32) {
    %c0_i32 = arith.constant 0 : i32
    %c0_i32_0 = arith.constant 0 : i32
    %c0_i32_1 = arith.constant 0 : i32
    %c0_i32_2 = arith.constant 0 : i32
    return %arg0, %c0_i32, %c0_i32_0, %c0_i32_1 : i32, i32, i32, i32
  }
  func.func @transform_1(%arg0: i32) -> (i32, i32) {
    %c0_i32 = arith.constant 0 : i32
    %c0_i32_0 = arith.constant 0 : i32
    %c0_i32_1 = arith.constant 0 : i32
    return %c0_i32, %c0_i32_0 : i32, i32
  }
  func.func @transform_2(%arg0: i32) -> (i32, i32) {
    %c0_i32 = arith.constant 0 : i32
    %c0_i32_0 = arith.constant 0 : i32
    %c0_i32_1 = arith.constant 0 : i32
    return %c0_i32, %c0_i32_0 : i32, i32
  }
  func.func @transform_3(%arg0: i32) -> (i32, i32) {
    %c0_i32 = arith.constant 0 : i32
    %c0_i32_0 = arith.constant 0 : i32
    %c0_i32_1 = arith.constant 0 : i32
    return %c0_i32, %c0_i32_0 : i32, i32
  }
  func.func @transform_4(%arg0: i32) -> (i32, i32) {
    %c0_i32 = arith.constant 0 : i32
    %c0_i32_0 = arith.constant 0 : i32
    %c0_i32_1 = arith.constant 0 : i32
    return %c0_i32, %c0_i32_0 : i32, i32
  }
  func.func @transform_5(%arg0: i32) -> (i32, i32) {
    %c0_i32 = arith.constant 0 : i32
    %c0_i32_0 = arith.constant 0 : i32
    %c0_i32_1 = arith.constant 0 : i32
    return %c0_i32, %c0_i32_0 : i32, i32
  }
  func.func @transform_6(%arg0: i32) -> (i32, i32) {
    %c0_i32 = arith.constant 0 : i32
    %c0_i32_0 = arith.constant 0 : i32
    %c0_i32_1 = arith.constant 0 : i32
    return %c0_i32, %c0_i32_0 : i32, i32
  }
  func.func @transform_7(%arg0: i32) -> (i32, i32) {
    %c0_i32 = arith.constant 0 : i32
    %c0_i32_0 = arith.constant 0 : i32
    %c0_i32_1 = arith.constant 0 : i32
    return %c0_i32, %c0_i32_0 : i32, i32
  }
  func.func @transform_8(%arg0: i32) -> (i32, i32) {
    %c0_i32 = arith.constant 0 : i32
    %c0_i32_0 = arith.constant 0 : i32
    %c0_i32_1 = arith.constant 0 : i32
    return %c0_i32, %c0_i32_0 : i32, i32
  }
  func.func @transform_9(%arg0: i32) -> (i32, i32) {
    %c0_i32 = arith.constant 0 : i32
    %c0_i32_0 = arith.constant 0 : i32
    %c0_i32_1 = arith.constant 0 : i32
    return %c0_i32, %c0_i32_0 : i32, i32
  }
  func.func @transform_10(%arg0: i32) -> (i32, i32) {
    %c0_i32 = arith.constant 0 : i32
    %c0_i32_0 = arith.constant 0 : i32
    %c0_i32_1 = arith.constant 0 : i32
    return %c0_i32, %c0_i32_0 : i32, i32
  }
  func.func @transform_11(%arg0: i32) -> (i32, i32) {
    %c0_i32 = arith.constant 0 : i32
    %c0_i32_0 = arith.constant 0 : i32
    %c0_i32_1 = arith.constant 0 : i32
    return %c0_i32, %c0_i32_0 : i32, i32
  }
  func.func @transform_12(%arg0: i32) -> (i32, i32) {
    %c0_i32 = arith.constant 0 : i32
    %c0_i32_0 = arith.constant 0 : i32
    %c0_i32_1 = arith.constant 0 : i32
    return %c0_i32, %c0_i32_0 : i32, i32
  }
  func.func @transform_13(%arg0: i32) -> (i32, i32, i32, i32) {
    %c0_i32 = arith.constant 0 : i32
    %c0_i32_0 = arith.constant 0 : i32
    %c0_i32_1 = arith.constant 0 : i32
    %c0_i32_2 = arith.constant 0 : i32
    return %arg0, %c0_i32, %c0_i32_0, %c0_i32_1 : i32, i32, i32, i32
  }
}

</mosaic_0001>

<bundles_post_ra>
// kernel: inception_forward.1
= control target key start
LH: loop header
LB: loop body
LE: loop exit
PB: predicated region body
PF: predicated region fallthrough
CT: control target
= control target key end

     0   :  { %s18589_s0 = inlined_call_operand.vmem [shape: bf16[2,16,16,4], index: 0, kind: input, shape index: {}]   ;;  %s18590_s1 = inlined_call_operand.vmem [shape: bf16[4,16], index: 1, kind: input, shape index: {}]   ;;  %s18591_s2 = inlined_call_operand.vmem [shape: f32[1,16], index: 2, kind: input, shape index: {}]   ;;  %s18592_s3 = inlined_call_operand.vmem [shape: f32[1,16], index: 3, kind: input, shape index: {}]   ;;  %s18593_s4 = inlined_call_operand.vmem [shape: bf16[36,8], index: 4, kind: input, shape index: {}]   ;;  %s18594_s5 = inlined_call_operand.vmem [shape: f32[1,8], index: 5, kind: input, shape index: {}]   ;;  %s18595_s6 = inlined_call_operand.vmem [shape: f32[1,8], index: 6, kind: input, shape index: {}]   ;;  %s18596_s7 = inlined_call_operand.vmem [shape: bf16[36,4], index: 7, kind: input, shape index: {}]   ;;  %s18597_s8 = inlined_call_operand.vmem [shape: f32[1,4], index: 8, kind: input, shape index: {}]   ;;  %s18598_s9 = inlined_call_operand.vmem [shape: f32[1,4], index: 9, kind: input, shape index: {}]   ;;  %s18599_s10 = inlined_call_operand.vmem [shape: bf16[4,4], index: 10, kind: input, shape index: {}]   ;;  %s18600_s11 = inlined_call_operand.vmem [shape: f32[1,4], index: 11, kind: input, shape index: {}]   ;;  %s18601_s12 = inlined_call_operand.vmem [shape: f32[1,4], index: 12, kind: input, shape index: {}]   ;;  %s18602_s13 = inlined_call_operand.hbm [shape: f32[2,16,16,24], index: 13, kind: output, shape index: {}]  }
   0x1   :  { %18686 = sst [smem:[#allocation75_spill]] %s18589_s0 }
   0x2   :  { %18687 = sst [smem:[#allocation76_spill]] %s18590_s1 }
   0x3   :  { %18688 = sst [smem:[#allocation77_spill]] %s18591_s2 }
   0x4   :  { %18689 = sst [smem:[#allocation78_spill]] %s18592_s3 }
   0x5   :  { %18 = vsyncpa [#allocation6], 0 }
   0x6   :  { %20 = vsyncpa [#allocation6 + $0x1], 0  ;;  %s11961_s25 = smov 0   ;;  %s11963_s26 = smov 0  }
   0x7   :  { %s11965_s27 = smov 0   ;;  %s11967_s28 = smov 0  }
   0x8 LB: > { %s11982_s29 = sadd.s32 4294967295, %s11875_s28   ;;  %s10767_s30 = sadd.s32 4294967294, %s11875_s28   ;;  %s11875_s28 = sphi %s11967_s28, %s19024_s28   ;;  %s11871_s27 = sphi %s11965_s27, %s19023_s27   ;;  %s11867_s26 = sphi %s11963_s26, %s19022_s26   ;;  %s11863_s25 = sphi %s11961_s25, %s19021_s25  }
   0x9   : > { %s11986_s14 = sadd.s32 1, %s11875_s28   ;;  %s311_s15 = sadd.s32 1, %s11871_s27 }
   0xa   : > { %s308_s16 = ssub.s32 %s11875_s28, %s11986_s14  ;;  %p321_p0 = scmp.ne.s32.totalorder %s11871_s27, %s11867_s26 }
   0xb   : > { %p309_p1 = scmp.eq.s32.totalorder %s308_s16, 0  ;;  %p322_p2 = scmp.eq.s32.totalorder %s11982_s29, 1 }
   0xc   : > { %p327_p3 = scmp.ne.s32.totalorder %s11867_s26, %s11863_s25  ;;  %p328_p4 = scmp.eq.s32.totalorder %s10767_s30, 1 }
   0xd   : > { %s11997_s17 = scalar_select %p309_p1, %s11871_s27, %s311_s15  }
   0xe   : > { %p11999_p5 = por %p322_p2, %p321_p0  ;;  %p12003_p6 = por %p328_p4, %p327_p3 }
   0xf   : > { %p10770_p7 = scmp.ge.s32.totalorder %s11875_s28, 1  ;;  %p390_p8 = scmp.lt.s32.totalorder %s11875_s28, 3 }
  0x11   : > { %p391_p9 = pnand %p10770_p7, %p390_p8 }
  0x13   : > { %394 = sbr.rel (%p391_p9) target bundleno = 1647 (0x66f), region = 72 }
  0x18   : > { %s18692_s1 = sld [smem:[#allocation76_spill]]  ;;  %vm603_vm0 = vcmask 1041408   ;;  %p434_p10 = scmp.lt.s32.totalorder %s11982_s29, 1  ;;  %vm930_vm1 = vcmask 24576   ;;  %vm937_vm2 = vsmask.f32 256 }
  0x19   : > { %vm993_vm3 = vsmask.f32 7938  ;;  %vm554_vm4 = vcmask 31744   ;;  %vm12018_vm5 = vmand %vm930_vm1, %vm937_vm2  ;;  %v18693_v2 = vmov 0  ;;  %v8697_v3 = vld [vmem:[#allocation2 + $0xc] sm:$0x1] }
  0x1a   : > { %s435_s22 = scalar_select %p434_p10, %s11982_s29, 1  ;;  %v18694_v2 = vsel %vm12018_vm5, 4294967295, %v18693_v2  ;;  %vm12024_vm6 = vmand %vm930_vm1, %vm993_vm3  ;;  %v18696_v4 = vmov 0  ;;  %v8698_v5 = vsel %vm12018_vm5, 4286644096, %v8697_v3  ;;  %vm927_vm7 = vcmask 27648  }
  0x1b   : > { %18695 = vst [vmem:[#allocation8_spill] sm:$0xff] %v18694_v2  ;;  %v18697_v4 = vsel %vm12024_vm6, 4294967295, %v18696_v4  ;;  %v8751_v6 = vld [vmem:[#allocation2 + $0x14] sm:$0x1]  ;;  %v8700_v7 = vld [vmem:[#allocation2 + $0x18] sm:$0x1]  ;;  %vm12066_vm10 = vmand %vm927_vm7, %vm993_vm3 }
  0x1c   : > { %18698 = vst [vmem:[#allocation9_spill] sm:$0xff] %v18697_v4  ;;  %s11323_s23 = sshll.u32 %s435_s22, 7  ;;  %8699 = vst [vmem:[#allocation2 + $0xc] sm:$0x1] %v8698_v5  ;;  %v8752_v8 = vsel %vm12024_vm6, 4286644096, %v8751_v6 }
  0x1d   : > { %v8701_v9 = vsel %vm12018_vm5, 4286644096, %v8700_v7  ;;  %s18699_s0 = sld [smem:[#allocation75_spill]]  ;;  %vm1244_vm8 = vsmask.f32 4368  ;;  %vm2533_vm11 = vcmask 1042432  }
  0x1e   : > { %v473_v0 = vld [vmem:[%s18692_s1] sm:$0x3]  ;;  %8753 = vst [vmem:[#allocation2 + $0x14] sm:$0x1] %v8752_v8  ;;  %8702 = vst [vmem:[#allocation2 + $0x18] sm:$0x1] %v8701_v9 }
  0x1f   : > { %11573 = vmatprep.subr.msk.bf16.mxu0 %vm603_vm0, %v473_v0  ;;  %v605_v1 = vsel %vm603_vm0, %v473_v0, 0  ;;  %v8754_v10 = vld [vmem:[#allocation2 + $0x20] sm:$0x1]  ;;  %v8703_v11 = vld [vmem:[#allocation2 + $0x24] sm:$0x1]  ;;  %vm12059_vm9 = vmor %vm937_vm2, %vm1244_vm8  ;;  %vm2534_vm12 = vcmask 1046532  }
  0x20   : > { %11430 = vmatpush3.bf16.msra.mxu0 %v605_v1  ;;  %v8755_v22 = vsel %vm12024_vm6, 4286644096, %v8754_v10  ;;  %v8704_v33 = vsel %vm12018_vm5, 4286644096, %v8703_v11  ;;  %v8757_v34 = vld [vmem:[#allocation2 + $0x2c] sm:$0x1]  ;;  %vm12335_vm13 = vmor %vm2533_vm11, %vm2534_vm12 }
  0x21   : > { %8756 = vst [vmem:[#allocation2 + $0x20] sm:$0x1] %v8755_v22  ;;  %8705 = vst [vmem:[#allocation2 + $0x24] sm:$0x1] %v8704_v33  ;;  %v8758_v51 = vsel %vm12024_vm6, 4286644096, %v8757_v34 }
  0x22   : > { %v8706_v53 = vld [vmem:[#allocation2 + $0x30] sm:$0x1]  ;;  %8759 = vst [vmem:[#allocation2 + $0x2c] sm:$0x1] %v8758_v51  ;;  %v8760_v58 = vld [vmem:[#allocation2 + $0x38] sm:$0x1] }
  0x23   : > { %s12037_s15 = scalar_lea.vmem %s18699_s0, %s11323_s23  ;;  %v9123_v40 = vld [vmem:[#allocation2 + $0xc] sm:$0xf]  ;;  %v8707_v6 = vsel %vm12018_vm5, 4286644096, %v8706_v53  ;;  %v8761_v10 = vsel %vm12024_vm6, 4286644096, %v8760_v58 }
  0x24   : > { %v441_v12 = vld [vmem:[%s12037_s15] sm:$0xf]  ;;  %v442_v13 = vld [vmem:[%s12037_s15 + $0x4] sm:$0xf]  ;;  %v443_v14 = vld [vmem:[%s12037_s15 + $0x8] sm:$0xf] }
  0x25   : > { %v10774_v15 = vcombine.low %v441_v12, %v442_v13  ;;  %v8803_v16 = vshrl.u32 %v441_v12, 16  ;;  %v8806_v17 = vshll.u32 %v441_v12, 16  ;;  %v8811_v18 = vshrl.u32 %v442_v13, 16  ;;  %v444_v19 = vld [vmem:[%s12037_s15 + $0xc] sm:$0xf]  ;;  %s18671_s16 = smov 24  }
  0x26   : > { %v8814_v20 = vshll.u32 %v442_v13, 16  ;;  %v10775_v21 = vcombine.low %v443_v14, %v444_v19  ;;  %v8820_v23 = vshrl.u32 %v443_v14, 16  ;;  %v12046_v24 = vld [vmem:[%s12037_s15 + $0x10] sm:$0xf]  ;;  %v8823_v27 = vshll.u32 %v443_v14, 16  ;;  %s18682_s20 = smov 8  }
  0x27   : > { %11431 = vmatprep.mubr.msk.bf16.mxu0 %vm554_vm4, %v10774_v15  ;;  %v8805_v25 = vrot.slane %v8803_v16, 7  ;;  %v8813_v26 = vrot.slane %v8811_v18, 7  ;;  %v8828_v28 = vshrl.u32 %v444_v19, 16  ;;  %v12050_v29 = vld [vmem:[%s12037_s15 + $0x14] sm:$0xf]  ;;  %v8831_v31 = vshll.u32 %v444_v19, 16 }
  0x28   : > { %11432 = vmatmul.mubr.msk.bf16.vlgmr.msra.gmra.mxu0 %vm554_vm4, %v10775_v21  ;;  %v8822_v30 = vrot.slane %v8820_v23, 7  ;;  %v10776_v32 = vcombine.low %v12046_v24, %v12050_v29  ;;  %v447_v41 = vld [vmem:[%s12037_s15 + $0x18] sm:$0xf]  ;;  %v9127_v43 = vld [vmem:[#allocation2 + $0x14] sm:$0x1]  ;;  %v8837_v57 = vshrl.u32 %v12046_v24, 16 }
  0x29   : > { %v8808_v36 = vor.u32 %v8806_v17, %v8805_v25  ;;  %v8809_v37 = vrot.slane %v8805_v25, 4  ;;  %v8816_v38 = vor.u32 %v8814_v20, %v8813_v26  ;;  %v8818_v39 = vrot.slane %v8813_v26, 4  ;;  %v9130_v47 = vld [vmem:[#allocation2 + $0x18] sm:$0xf]  ;;  %v448_v52 = vld [vmem:[%s12037_s15 + $0x1c] sm:$0xf] }
  0x2a   : > { %v8825_v44 = vor.u32 %v8823_v27, %v8822_v30  ;;  %v8826_v45 = vrot.slane %v8822_v30, 4  ;;  %v8830_v46 = vrot.slane %v8828_v28, 7  ;;  %11435 = vmatprep.mubr.msk.bf16.mxu0 %vm554_vm4, %v10776_v32  ;;  %v12085_v59 = vld [vmem:[%s12037_s15 + $0x20] sm:$0xf]  ;;  %v8840_v60 = vshll.u32 %v12046_v24, 16  ;;  %s11880_s21 = smov 4  }
  0x2b   : > { %v8817_v48 = vsel %vm12059_vm9, %v8809_v37, %v8816_v38  ;;  %v9124_v49 = vsel %vm12066_vm10, %v8808_v36, %v9123_v40  ;;  %v9128_v50 = vsel %vm12018_vm5, %v8818_v39, %v9127_v43  ;;  %v8845_v61 = vshrl.u32 %v12050_v29, 16  ;;  %v12091_v0 = vld [vmem:[%s12037_s15 + $0x24] sm:$0xf]  ;;  %v9134_v3 = vld [vmem:[#allocation2 + $0x20] sm:$0x1]  ;;  %s18674_s22 = smov 28  }
  0x2c   : > { %9125 = vst [vmem:[#allocation2 + $0xc] sm:$0xf] %v9124_v49  ;;  %9126 = vst.msk [vmem:[#allocation2 + $0x10] sm:$0xf] %vm927_vm7, %v8817_v48  ;;  %v8833_v54 = vor.u32 %v8831_v31, %v8830_v46  ;;  %v8835_v55 = vrot.slane %v8830_v46, 4  ;;  %v9131_v56 = vsel %vm12066_vm10, %v8825_v44, %v9130_v47  ;;  %v8848_v62 = vshll.u32 %v12050_v29, 16 }
  0x2d   : > { %9129 = vst [vmem:[#allocation2 + $0x14] sm:$0x1] %v9128_v50  ;;  %9132 = vst [vmem:[#allocation2 + $0x18] sm:$0xf] %v9131_v56  ;;  %v10777_v63 = vcombine.low %v447_v41, %v448_v52  ;;  %v8839_v5 = vrot.slane %v8837_v57, 7  ;;  %v8854_v7 = vshrl.u32 %v447_v41, 16  ;;  %v10778_v21 = vcombine.low %v12085_v59, %v12091_v0 }
  0x2e   : > { %v8834_v1 = vsel %vm12059_vm9, %v8826_v45, %v8833_v54  ;;  %v9135_v8 = vsel %vm12018_vm5, %v8835_v55, %v9134_v3  ;;  %v8847_v9 = vrot.slane %v8845_v61, 7  ;;  %8708 = vst [vmem:[#allocation2 + $0x30] sm:$0x1] %v8707_v6  ;;  %v8857_v11 = vshll.u32 %v447_v41, 16  ;;  %v8709_v12 = vld [vmem:[#allocation2 + $0x3c] sm:$0x1] }
  0x2f   : > { %9133 = vst.msk [vmem:[#allocation2 + $0x1c] sm:$0xf] %vm927_vm7, %v8834_v1  ;;  %9136 = vst [vmem:[#allocation2 + $0x20] sm:$0x1] %v9135_v8  ;;  %v8842_v13 = vor.u32 %v8840_v60, %v8839_v5  ;;  %v8843_v14 = vrot.slane %v8839_v5, 4  ;;  %v8856_v16 = vrot.slane %v8854_v7, 7 }
  0x30   : > { %v9137_v15 = vld [vmem:[#allocation2 + $0x24] sm:$0xf]  ;;  %11436 = vmatmul.mubr.msk.bf16.gmra.mxu0 %vm554_vm4, %v10777_v63  ;;  %8762 = vst [vmem:[#allocation2 + $0x38] sm:$0x1] %v8761_v10  ;;  %v8862_v17 = vshrl.u32 %v448_v52, 16  ;;  %v8850_v18 = vor.u32 %v8848_v62, %v8847_v9  ;;  %v8852_v19 = vrot.slane %v8847_v9, 4 }
  0x31   : > { %v8865_v20 = vshll.u32 %v448_v52, 16  ;;  %v8763_v22 = vld [vmem:[#allocation2 + $0x44] sm:$0x1]  ;;  %v451_v23 = vld [vmem:[%s12037_s15 + $0x28] sm:$0xf]  ;;  %v9138_v24 = vsel %vm12066_vm10, %v8842_v13, %v9137_v15  ;;  %v8859_v25 = vor.u32 %v8857_v11, %v8856_v16  ;;  %v8860_v26 = vrot.slane %v8856_v16, 4  ;;  %11439 = vmatprep.mubr.msk.bf16.mxu0 %vm554_vm4, %v10778_v21 }
  0x32   : > { %v8864_v27 = vrot.slane %v8862_v17, 7  ;;  %v452_v28 = vld [vmem:[%s12037_s15 + $0x2c] sm:$0xf]  ;;  %v8712_v29 = vld [vmem:[#allocation2 + $0x48] sm:$0x1]  ;;  %v8851_v30 = vsel %vm12059_vm9, %v8843_v14, %v8850_v18  ;;  %v8871_v39 = vshrl.u32 %v12085_v59, 16 }
  0x33   : > { %9139 = vst [vmem:[#allocation2 + $0x24] sm:$0xf] %v9138_v24  ;;  %v9141_v31 = vld [vmem:[#allocation2 + $0x2c] sm:$0x1]  ;;  %v8710_v32 = vsel %vm12018_vm5, 4286644096, %v8709_v12  ;;  %v10779_v34 = vcombine.low %v451_v23, %v452_v28 }
  0x34   : > { %v8764_v33 = vsel %vm12024_vm6, 4286644096, %v8763_v22  ;;  %9140 = vst.msk [vmem:[#allocation2 + $0x28] sm:$0xf] %vm927_vm7, %v8851_v30  ;;  %v9142_v36 = vsel %vm12018_vm5, %v8852_v19, %v9141_v31  ;;  %v8867_v37 = vor.u32 %v8865_v20, %v8864_v27  ;;  %v8869_v38 = vrot.slane %v8864_v27, 4  ;;  %s18710_s2 = sld [smem:[#allocation77_spill]] }
  0x35   : > { %8711 = vst [vmem:[#allocation2 + $0x3c] sm:$0x1] %v8710_v32  ;;  %8765 = vst [vmem:[#allocation2 + $0x44] sm:$0x1] %v8764_v33  ;;  %v8766_v40 = vld [vmem:[#allocation2 + $0x50] sm:$0x1] }
  0x36   : > { %9143 = vst [vmem:[#allocation2 + $0x2c] sm:$0x1] %v9142_v36  ;;  %v8874_v41 = vshll.u32 %v12085_v59, 16  ;;  %v8879_v43 = vshrl.u32 %v12091_v0, 16  ;;  %v8882_v44 = vshll.u32 %v12091_v0, 16  ;;  %v8868_v47 = vsel %vm12059_vm9, %v8860_v26, %v8867_v37  ;;  %s18711_s3 = sld [smem:[#allocation78_spill]] }
  0x37   : > { %v8713_v45 = vsel %vm12018_vm5, 4286644096, %v8712_v29  ;;  %v12126_v46 = vld [vmem:[%s12037_s15 + $0x30] sm:$0xf]  ;;  %v8873_v49 = vrot.slane %v8871_v39, 7  ;;  %v8888_v51 = vshrl.u32 %v451_v23, 16 }
  0x38   : > { %v9144_v48 = vld [vmem:[#allocation2 + $0x30] sm:$0xf]  ;;  %8714 = vst [vmem:[#allocation2 + $0x48] sm:$0x1] %v8713_v45  ;;  %v8767_v50 = vsel %vm12024_vm6, 4286644096, %v8766_v40  ;;  %11440 = vmatmul.mubr.msk.bf16.gmra.mxu0 %vm554_vm4, %v10779_v34 }
  0x39   : > { %v9145_v52 = vsel %vm12066_vm10, %v8859_v25, %v9144_v48  ;;  %9147 = vst.msk [vmem:[#allocation2 + $0x34] sm:$0xf] %vm927_vm7, %v8868_v47  ;;  %v9148_v53 = vld [vmem:[#allocation2 + $0x38] sm:$0x1]  ;;  %v8881_v54 = vrot.slane %v8879_v43, 7  ;;  %v8891_v55 = vshll.u32 %v451_v23, 16  ;;  %v8876_v58 = vor.u32 %v8874_v41, %v8873_v49 }
  0x3a   : > { %8768 = vst [vmem:[#allocation2 + $0x50] sm:$0x1] %v8767_v50  ;;  %v8896_v56 = vshrl.u32 %v452_v28, 16  ;;  %9146 = vst [vmem:[#allocation2 + $0x30] sm:$0xf] %v9145_v52  ;;  %v9149_v57 = vsel %vm12018_vm5, %v8869_v38, %v9148_v53  ;;  %v8877_v59 = vrot.slane %v8873_v49, 4 }
  0x3b   : > { %v8890_v60 = vrot.slane %v8888_v51, 7  ;;  %v454_v61 = vld [vmem:[%s12037_s15 + $0x34] sm:$0xf]  ;;  %9150 = vst [vmem:[#allocation2 + $0x38] sm:$0x1] %v9149_v57  ;;  %v8884_v63 = vor.u32 %v8882_v44, %v8881_v54  ;;  %v8886_v0 = vrot.slane %v8881_v54, 4 }
  0x3c   : > { %v8715_v62 = vld [vmem:[#allocation2 + $0x54] sm:$0x1]  ;;  %v8898_v1 = vrot.slane %v8896_v56, 7  ;;  %v8899_v3 = vshll.u32 %v452_v28, 16  ;;  %v8769_v5 = vld [vmem:[#allocation2 + $0x5c] sm:$0x1]  ;;  %v10780_v8 = vcombine.low %v12126_v46, %v454_v61 }
  0x3d   : > { %v8893_v6 = vor.u32 %v8891_v55, %v8890_v60  ;;  %v8894_v7 = vrot.slane %v8890_v60, 4  ;;  %v8716_v9 = vsel %vm12018_vm5, 4286644096, %v8715_v62  ;;  %v12143_v10 = vld [vmem:[%s12037_s15 + $0x38] sm:$0xf]  ;;  %v8885_v11 = vsel %vm12059_vm9, %v8877_v59, %v8884_v63  ;;  %s11882_s23 = smov 120  }
  0x3e   : > { %v9151_v12 = vld [vmem:[#allocation2 + $0x3c] sm:$0xf]  ;;  %v9155_v13 = vld [vmem:[#allocation2 + $0x44] sm:$0x1]  ;;  %v8901_v14 = vor.u32 %v8899_v3, %v8898_v1  ;;  %v8903_v15 = vrot.slane %v8898_v1, 4  ;;  %v8905_v16 = vshrl.u32 %v12126_v46, 16  ;;  %11443 = vmatprep.mubr.msk.bf16.mxu0 %vm554_vm4, %v10780_v8 }
  0x3f   : > { %8717 = vst [vmem:[#allocation2 + $0x54] sm:$0x1] %v8716_v9  ;;  %v9152_v17 = vsel %vm12066_vm10, %v8876_v58, %v9151_v12  ;;  %9154 = vst.msk [vmem:[#allocation2 + $0x40] sm:$0xf] %vm927_vm7, %v8885_v11  ;;  %v9156_v18 = vsel %vm12018_vm5, %v8886_v0, %v9155_v13  ;;  %v8770_v19 = vsel %vm12024_vm6, 4286644096, %v8769_v5 }
  0x40   : > { %v8908_v20 = vshll.u32 %v12126_v46, 16  ;;  %v456_v21 = vld [vmem:[%s12037_s15 + $0x3c] sm:$0xf]  ;;  %9153 = vst [vmem:[#allocation2 + $0x3c] sm:$0xf] %v9152_v17  ;;  %v8902_v22 = vsel %vm12059_vm9, %v8894_v7, %v8901_v14  ;;  %v8907_v24 = vrot.slane %v8905_v16, 7 }
  0x41   : > { %9157 = vst [vmem:[#allocation2 + $0x44] sm:$0x1] %v9156_v18  ;;  %v9158_v23 = vld [vmem:[#allocation2 + $0x48] sm:$0xf]  ;;  %8771 = vst [vmem:[#allocation2 + $0x5c] sm:$0x1] %v8770_v19  ;;  %v10781_v29 = vcombine.low %v12143_v10, %v456_v21 }
  0x42   : > { %v8913_v25 = vshrl.u32 %v454_v61, 16  ;;  %v8916_v26 = vshll.u32 %v454_v61, 16  ;;  %v9159_v27 = vsel %vm12066_vm10, %v8893_v6, %v9158_v23  ;;  %9161 = vst.msk [vmem:[#allocation2 + $0x4c] sm:$0xf] %vm927_vm7, %v8902_v22  ;;  %v9162_v28 = vld [vmem:[#allocation2 + $0x50] sm:$0x1]  ;;  %v8910_v33 = vor.u32 %v8908_v20, %v8907_v24 }
  0x43   : > { %v8718_v30 = vld [vmem:[#allocation2 + $0x60] sm:$0x1]  ;;  %v8772_v31 = vld [vmem:[#allocation2 + $0x68] sm:$0x1]  ;;  %9160 = vst [vmem:[#allocation2 + $0x48] sm:$0xf] %v9159_v27  ;;  %v9163_v32 = vsel %vm12018_vm5, %v8903_v15, %v9162_v28  ;;  %11444 = vmatmul.mubr.msk.bf16.gmra.mxu0 %vm554_vm4, %v10781_v29 }
  0x44   : > { %v8911_v34 = vrot.slane %v8907_v24, 4  ;;  %v8915_v36 = vrot.slane %v8913_v25, 7  ;;  %v457_v37 = vld [vmem:[%s12037_s15 + $0x40] sm:$0xf]  ;;  %v12168_v38 = vld [vmem:[%s12037_s15 + $0x44] sm:$0xf] }
  0x45   : > { %9164 = vst [vmem:[#allocation2 + $0x50] sm:$0x1] %v9163_v32  ;;  %v8719_v39 = vsel %vm12018_vm5, 4286644096, %v8718_v30  ;;  %v8773_v40 = vsel %vm12024_vm6, 4286644096, %v8772_v31  ;;  %v10782_v51 = vcombine.low %v457_v37, %v12168_v38 }
  0x46   : > { %v8922_v41 = vshrl.u32 %v12143_v10, 16  ;;  %v8925_v43 = vshll.u32 %v12143_v10, 16  ;;  %v8918_v44 = vor.u32 %v8916_v26, %v8915_v36  ;;  %v8920_v45 = vrot.slane %v8915_v36, 4  ;;  %8720 = vst [vmem:[#allocation2 + $0x60] sm:$0x1] %v8719_v39  ;;  %s11883_s24 = smov 116  }
  0x47   : > { %8774 = vst [vmem:[#allocation2 + $0x68] sm:$0x1] %v8773_v40  ;;  %v8930_v46 = vshrl.u32 %v456_v21, 16  ;;  %v8933_v47 = vshll.u32 %v456_v21, 16  ;;  %v8721_v48 = vld [vmem:[#allocation2 + $0x6c] sm:$0x1]  ;;  %11447 = vmatprep.mubr.msk.bf16.mxu0 %vm554_vm4, %v10782_v51 }
  0x48   : > { %v9165_v49 = vld [vmem:[#allocation2 + $0x54] sm:$0xf]  ;;  %v8924_v50 = vrot.slane %v8922_v41, 7  ;;  %v8722_v52 = vsel %vm12018_vm5, 4286644096, %v8721_v48  ;;  %v8939_v53 = vshrl.u32 %v457_v37, 16  ;;  %v8919_v54 = vsel %vm12059_vm9, %v8911_v34, %v8918_v44 }
  0x49   : > { %v9166_v55 = vsel %vm12066_vm10, %v8910_v33, %v9165_v49  ;;  %v8932_v56 = vrot.slane %v8930_v46, 7  ;;  %8723 = vst [vmem:[#allocation2 + $0x6c] sm:$0x1] %v8722_v52  ;;  %v8775_v57 = vld [vmem:[#allocation2 + $0x74] sm:$0x1]  ;;  %v8942_v58 = vshll.u32 %v457_v37, 16 }
  0x4a   : > { %v459_v59 = vld [vmem:[%s12037_s15 + $0x48] sm:$0xf]  ;;  %9167 = vst [vmem:[#allocation2 + $0x54] sm:$0xf] %v9166_v55  ;;  %9168 = vst.msk [vmem:[#allocation2 + $0x58] sm:$0xf] %vm927_vm7, %v8919_v54  ;;  %v8927_v61 = vor.u32 %v8925_v43, %v8924_v50 }
  0x4b   : > { %v9169_v60 = vld [vmem:[#allocation2 + $0x5c] sm:$0x1]  ;;  %v8928_v62 = vrot.slane %v8924_v50, 4  ;;  %v8776_v63 = vsel %vm12024_vm6, 4286644096, %v8775_v57  ;;  %v8941_v0 = vrot.slane %v8939_v53, 7  ;;  %v8935_v3 = vor.u32 %v8933_v47, %v8932_v56 }
  0x4c   : > { %v9170_v1 = vsel %vm12018_vm5, %v8920_v45, %v9169_v60  ;;  %v8937_v5 = vrot.slane %v8932_v56, 4  ;;  %8777 = vst [vmem:[#allocation2 + $0x74] sm:$0x1] %v8776_v63  ;;  %v8947_v6 = vshrl.u32 %v12168_v38, 16  ;;  %v460_v7 = vld [vmem:[%s12037_s15 + $0x4c] sm:$0xf] }
  0x4d   : > { %v8724_v8 = vld [vmem:[#allocation2 + $0x78] sm:$0x1]  ;;  %9171 = vst [vmem:[#allocation2 + $0x5c] sm:$0x1] %v9170_v1  ;;  %v8944_v9 = vor.u32 %v8942_v58, %v8941_v0  ;;  %v8945_v10 = vrot.slane %v8941_v0, 4  ;;  %v8950_v11 = vshll.u32 %v12168_v38, 16  ;;  %v10783_v12 = vcombine.low %v459_v59, %v460_v7 }
  0x4e   : > { %v8778_v13 = vld [vmem:[#allocation2 + $0x80] sm:$0x1]  ;;  %v461_v14 = vld [vmem:[%s12037_s15 + $0x50] sm:$0xf]  ;;  %v8936_v15 = vsel %vm12059_vm9, %v8928_v62, %v8935_v3  ;;  %v8949_v16 = vrot.slane %v8947_v6, 7  ;;  %v8956_v21 = vshrl.u32 %v459_v59, 16 }
  0x4f   : > { %v8725_v17 = vsel %vm12018_vm5, 4286644096, %v8724_v8  ;;  %v8779_v18 = vsel %vm12024_vm6, 4286644096, %v8778_v13  ;;  %v9172_v19 = vld [vmem:[#allocation2 + $0x60] sm:$0xf]  ;;  %11448 = vmatmul.mubr.msk.bf16.gmra.mxu0 %vm554_vm4, %v10783_v12 }
  0x50   : > { %9175 = vst.msk [vmem:[#allocation2 + $0x64] sm:$0xf] %vm927_vm7, %v8936_v15  ;;  %v9176_v20 = vld [vmem:[#allocation2 + $0x68] sm:$0x1]  ;;  %8726 = vst [vmem:[#allocation2 + $0x78] sm:$0x1] %v8725_v17  ;;  %v9173_v23 = vsel %vm12066_vm10, %v8927_v61, %v9172_v19  ;;  %v8952_v25 = vor.u32 %v8950_v11, %v8949_v16 }
  0x51   : > { %8780 = vst [vmem:[#allocation2 + $0x80] sm:$0x1] %v8779_v18  ;;  %v8959_v22 = vshll.u32 %v459_v59, 16  ;;  %v9177_v24 = vsel %vm12018_vm5, %v8937_v5, %v9176_v20  ;;  %v8954_v26 = vrot.slane %v8949_v16, 4  ;;  %v462_v27 = vld [vmem:[%s12037_s15 + $0x54] sm:$0xf] }
  0x52   : > { %v8727_v28 = vld [vmem:[#allocation2 + $0x84] sm:$0x1]  ;;  %9174 = vst [vmem:[#allocation2 + $0x60] sm:$0xf] %v9173_v23  ;;  %9178 = vst [vmem:[#allocation2 + $0x68] sm:$0x1] %v9177_v24  ;;  %v10784_v33 = vcombine.low %v461_v14, %v462_v27  ;;  %v8953_v34 = vsel %vm12059_vm9, %v8945_v10, %v8952_v25 }
  0x53   : > { %v9179_v29 = vld [vmem:[#allocation2 + $0x6c] sm:$0xf]  ;;  %v8958_v30 = vrot.slane %v8956_v21, 7  ;;  %v8964_v31 = vshrl.u32 %v460_v7, 16  ;;  %v8967_v32 = vshll.u32 %v460_v7, 16  ;;  %v8973_v39 = vshrl.u32 %v461_v14, 16 }
  0x54   : > { %v9180_v36 = vsel %vm12066_vm10, %v8944_v9, %v9179_v29  ;;  %v8728_v37 = vsel %vm12018_vm5, 4286644096, %v8727_v28  ;;  %v8781_v38 = vld [vmem:[#allocation2 + $0x8c] sm:$0x1]  ;;  %9182 = vst.msk [vmem:[#allocation2 + $0x70] sm:$0xf] %vm927_vm7, %v8953_v34  ;;  %11451 = vmatprep.mubr.msk.bf16.mxu0 %vm554_vm4, %v10784_v33 }
  0x55   : > { %9181 = vst [vmem:[#allocation2 + $0x6c] sm:$0xf] %v9180_v36  ;;  %v9183_v40 = vld [vmem:[#allocation2 + $0x74] sm:$0x1]  ;;  %v8961_v41 = vor.u32 %v8959_v22, %v8958_v30  ;;  %v8962_v43 = vrot.slane %v8958_v30, 4  ;;  %v8966_v44 = vrot.slane %v8964_v31, 7 }
  0x56   : > { %8729 = vst [vmem:[#allocation2 + $0x84] sm:$0x1] %v8728_v37  ;;  %v8782_v45 = vsel %vm12024_vm6, 4286644096, %v8781_v38  ;;  %v9184_v46 = vsel %vm12018_vm5, %v8954_v26, %v9183_v40  ;;  %v8975_v47 = vrot.slane %v8973_v39, 7  ;;  %v8976_v48 = vshll.u32 %v461_v14, 16 }
  0x57   : > { %8783 = vst [vmem:[#allocation2 + $0x8c] sm:$0x1] %v8782_v45  ;;  %v8981_v49 = vshrl.u32 %v462_v27, 16  ;;  %v463_v50 = vld [vmem:[%s12037_s15 + $0x58] sm:$0xf]  ;;  %v8969_v51 = vor.u32 %v8967_v32, %v8966_v44  ;;  %v8971_v52 = vrot.slane %v8966_v44, 4 }
  0x58   : > { %9185 = vst [vmem:[#allocation2 + $0x74] sm:$0x1] %v9184_v46  ;;  %v8984_v53 = vshll.u32 %v462_v27, 16  ;;  %v464_v54 = vld [vmem:[%s12037_s15 + $0x5c] sm:$0xf]  ;;  %v8978_v58 = vor.u32 %v8976_v48, %v8975_v47  ;;  %v8979_v59 = vrot.slane %v8975_v47, 4 }
  0x59   : > { %v8730_v55 = vld [vmem:[#allocation2 + $0x90] sm:$0x1]  ;;  %v9186_v56 = vld [vmem:[#allocation2 + $0x78] sm:$0xf]  ;;  %v9190_v57 = vld [vmem:[#allocation2 + $0x80] sm:$0x1]  ;;  %v10785_v61 = vcombine.low %v463_v50, %v464_v54  ;;  %v8970_v62 = vsel %vm12059_vm9, %v8962_v43, %v8969_v51 }
  0x5a   : > { %v8983_v60 = vrot.slane %v8981_v49, 7  ;;  %v9187_v63 = vsel %vm12066_vm10, %v8961_v41, %v9186_v56  ;;  %v9191_v0 = vsel %vm12018_vm5, %v8971_v52, %v9190_v57  ;;  %v8731_v1 = vsel %vm12018_vm5, 4286644096, %v8730_v55  ;;  %v8784_v3 = vld [vmem:[#allocation2 + $0x98] sm:$0x1]  ;;  %s18680_s30 = smov 12  }
  0x5b   : > { %v465_v5 = vld [vmem:[%s12037_s15 + $0x60] sm:$0xf]  ;;  %9188 = vst [vmem:[#allocation2 + $0x78] sm:$0xf] %v9187_v63  ;;  %9189 = vst.msk [vmem:[#allocation2 + $0x7c] sm:$0xf] %vm927_vm7, %v8970_v62  ;;  %11452 = vmatmul.mubr.msk.bf16.gmra.mxu0 %vm554_vm4, %v10785_v61 }
  0x5c   : > { %9192 = vst [vmem:[#allocation2 + $0x80] sm:$0x1] %v9191_v0  ;;  %v8986_v6 = vor.u32 %v8984_v53, %v8983_v60  ;;  %v8988_v7 = vrot.slane %v8983_v60, 4  ;;  %8732 = vst [vmem:[#allocation2 + $0x90] sm:$0x1] %v8731_v1  ;;  %v8990_v9 = vshrl.u32 %v463_v50, 16 }
  0x5d   : > { %v8785_v8 = vsel %vm12024_vm6, 4286644096, %v8784_v3  ;;  %v466_v10 = vld [vmem:[%s12037_s15 + $0x64] sm:$0xf]  ;;  %v8993_v11 = vshll.u32 %v463_v50, 16  ;;  %v8998_v12 = vshrl.u32 %v464_v54, 16 }
  0x5e   : > { %8786 = vst [vmem:[#allocation2 + $0x98] sm:$0x1] %v8785_v8  ;;  %v9001_v13 = vshll.u32 %v464_v54, 16  ;;  %v10786_v14 = vcombine.low %v465_v5, %v466_v10  ;;  %v8733_v15 = vld [vmem:[#allocation2 + $0x9c] sm:$0x1]  ;;  %v8987_v16 = vsel %vm12059_vm9, %v8979_v59, %v8986_v6  ;;  %v8992_v18 = vrot.slane %v8990_v9, 7 }
  0x5f   : > { %v9193_v17 = vld [vmem:[#allocation2 + $0x84] sm:$0xf]  ;;  %v8734_v19 = vsel %vm12018_vm5, 4286644096, %v8733_v15  ;;  %v9007_v20 = vshrl.u32 %v465_v5, 16  ;;  %v9000_v23 = vrot.slane %v8998_v12, 7 }
  0x60   : > { %v9194_v21 = vsel %vm12066_vm10, %v8978_v58, %v9193_v17  ;;  %9196 = vst.msk [vmem:[#allocation2 + $0x88] sm:$0xf] %vm927_vm7, %v8987_v16  ;;  %v9197_v22 = vld [vmem:[#allocation2 + $0x8c] sm:$0x1]  ;;  %11455 = vmatprep.mubr.msk.bf16.mxu0 %vm554_vm4, %v10786_v14  ;;  %8735 = vst [vmem:[#allocation2 + $0x9c] sm:$0x1] %v8734_v19  ;;  %v8995_v27 = vor.u32 %v8993_v11, %v8992_v18 }
  0x61   : > { %v8787_v24 = vld [vmem:[#allocation2 + $0xa4] sm:$0x1]  ;;  %v9010_v25 = vshll.u32 %v465_v5, 16  ;;  %9195 = vst [vmem:[#allocation2 + $0x84] sm:$0xf] %v9194_v21  ;;  %v9198_v26 = vsel %vm12018_vm5, %v8988_v7, %v9197_v22  ;;  %v8996_v28 = vrot.slane %v8992_v18, 4  ;;  %v9003_v31 = vor.u32 %v9001_v13, %v9000_v23 }
  0x62   : > { %v8788_v29 = vsel %vm12024_vm6, 4286644096, %v8787_v24  ;;  %v467_v30 = vld [vmem:[%s12037_s15 + $0x68] sm:$0xf]  ;;  %9199 = vst [vmem:[#allocation2 + $0x8c] sm:$0x1] %v9198_v26 }
  0x63   : > { %v9005_v32 = vrot.slane %v9000_v23, 4  ;;  %8789 = vst [vmem:[#allocation2 + $0xa4] sm:$0x1] %v8788_v29  ;;  %v9009_v33 = vrot.slane %v9007_v20, 7  ;;  %v9015_v34 = vshrl.u32 %v466_v10, 16  ;;  %v9018_v37 = vshll.u32 %v466_v10, 16 }
  0x64   : > { %v468_v36 = vld [vmem:[%s12037_s15 + $0x6c] sm:$0xf]  ;;  %v8736_v39 = vld [vmem:[#allocation2 + $0xa8] sm:$0x1]  ;;  %v8790_v40 = vld [vmem:[#allocation2 + $0xb0] sm:$0x1]  ;;  %v9004_v43 = vsel %vm12059_vm9, %v8996_v28, %v9003_v31 }
  0x65   : > { %v10787_v38 = vcombine.low %v467_v30, %v468_v36  ;;  %v9024_v41 = vshrl.u32 %v467_v30, 16  ;;  %v9200_v44 = vld [vmem:[#allocation2 + $0x90] sm:$0xf]  ;;  %v9012_v45 = vor.u32 %v9010_v25, %v9009_v33  ;;  %v9013_v46 = vrot.slane %v9009_v33, 4  ;;  %9203 = vst.msk [vmem:[#allocation2 + $0x94] sm:$0xf] %vm927_vm7, %v9004_v43 }
  0x66   : > { %v9017_v47 = vrot.slane %v9015_v34, 7  ;;  %v469_v48 = vld [vmem:[%s12037_s15 + $0x70] sm:$0xf]  ;;  %v9201_v49 = vsel %vm12066_vm10, %v8995_v27, %v9200_v44  ;;  %v9204_v50 = vld [vmem:[#allocation2 + $0x98] sm:$0x1]  ;;  %v9027_v60 = vshll.u32 %v467_v30, 16 }
  0x67   : > { %11456 = vmatmul.mubr.msk.bf16.gmra.mxu0 %vm554_vm4, %v10787_v38  ;;  %v8737_v51 = vsel %vm12018_vm5, 4286644096, %v8736_v39  ;;  %v8791_v52 = vsel %vm12024_vm6, 4286644096, %v8790_v40  ;;  %9202 = vst [vmem:[#allocation2 + $0x90] sm:$0xf] %v9201_v49  ;;  %v9205_v53 = vsel %vm12018_vm5, %v9005_v32, %v9204_v50 }
  0x68   : > { %v9020_v54 = vor.u32 %v9018_v37, %v9017_v47  ;;  %v9022_v55 = vrot.slane %v9017_v47, 4  ;;  %8738 = vst [vmem:[#allocation2 + $0xa8] sm:$0x1] %v8737_v51  ;;  %8792 = vst [vmem:[#allocation2 + $0xb0] sm:$0x1] %v8791_v52  ;;  %v9026_v56 = vrot.slane %v9024_v41, 7 }
  0x69   : > { %v470_v57 = vld [vmem:[%s12037_s15 + $0x74] sm:$0xf]  ;;  %9206 = vst [vmem:[#allocation2 + $0x98] sm:$0x1] %v9205_v53  ;;  %v9207_v59 = vld [vmem:[#allocation2 + $0x9c] sm:$0xf] }
  0x6a   : > { %v8739_v58 = vld [vmem:[#allocation2 + $0xb4] sm:$0x1]  ;;  %v9032_v61 = vshrl.u32 %v468_v36, 16  ;;  %v9035_v62 = vshll.u32 %v468_v36, 16  ;;  %v10788_v63 = vcombine.low %v469_v48, %v470_v57  ;;  %v9021_v0 = vsel %vm12059_vm9, %v9013_v46, %v9020_v54  ;;  %v8793_v6 = vld [vmem:[#allocation2 + $0xbc] sm:$0x1] }
  0x6b   : > { %v9208_v1 = vsel %vm12066_vm10, %v9012_v45, %v9207_v59  ;;  %v9030_v3 = vrot.slane %v9026_v56, 4  ;;  %v8740_v5 = vsel %vm12018_vm5, 4286644096, %v8739_v58  ;;  %9210 = vst.msk [vmem:[#allocation2 + $0xa0] sm:$0xf] %vm927_vm7, %v9021_v0  ;;  %v9029_v8 = vor.u32 %v9027_v60, %v9026_v56  ;;  %s18995_s0 = smov 8  }
  0x6c   : > { %9209 = vst [vmem:[#allocation2 + $0x9c] sm:$0xf] %v9208_v1  ;;  %v9211_v7 = vld [vmem:[#allocation2 + $0xa4] sm:$0x1]  ;;  %v9034_v9 = vrot.slane %v9032_v61, 7  ;;  %11459 = vmatprep.mubr.msk.bf16.mxu0 %vm554_vm4, %v10788_v63  ;;  %v9041_v11 = vshrl.u32 %v469_v48, 16 }
  0x6d   : > { %8741 = vst [vmem:[#allocation2 + $0xb4] sm:$0x1] %v8740_v5  ;;  %v8794_v10 = vsel %vm12024_vm6, 4286644096, %v8793_v6  ;;  %v9212_v12 = vsel %vm12018_vm5, %v9022_v55, %v9211_v7  ;;  %v9044_v13 = vshll.u32 %v469_v48, 16  ;;  %v9049_v14 = vshrl.u32 %v470_v57, 16 }
  0x6e   : > { %8795 = vst [vmem:[#allocation2 + $0xbc] sm:$0x1] %v8794_v10  ;;  %v9052_v15 = vshll.u32 %v470_v57, 16  ;;  %v471_v16 = vld [vmem:[%s12037_s15 + $0x78] sm:$0xf]  ;;  %v9037_v17 = vor.u32 %v9035_v62, %v9034_v9  ;;  %v9039_v18 = vrot.slane %v9034_v9, 4 }
  0x6f   : > { %9213 = vst [vmem:[#allocation2 + $0xa4] sm:$0x1] %v9212_v12  ;;  %v9043_v19 = vrot.slane %v9041_v11, 7  ;;  %v472_v20 = vld [vmem:[%s12037_s15 + $0x7c] sm:$0xf]  ;;  %v9051_v22 = vrot.slane %v9049_v14, 7 }
  0x70   : > { %v8742_v21 = vld [vmem:[#allocation2 + $0xc0] sm:$0x1]  ;;  %v10789_v23 = vcombine.low %v471_v16, %v472_v20  ;;  %v8796_v25 = vld [vmem:[#allocation2 + $0xc8] sm:$0x1]  ;;  %v9058_v26 = vshrl.u32 %v471_v16, 16  ;;  %v9038_v27 = vsel %vm12059_vm9, %v9030_v3, %v9037_v17  ;;  %v9061_v32 = vshll.u32 %v471_v16, 16 }
  0x71   : > { %v8743_v24 = vsel %vm12018_vm5, 4286644096, %v8742_v21  ;;  %v9214_v28 = vld [vmem:[#allocation2 + $0xa8] sm:$0xf]  ;;  %v9218_v29 = vld [vmem:[#allocation2 + $0xb0] sm:$0x1]  ;;  %v9046_v30 = vor.u32 %v9044_v13, %v9043_v19  ;;  %v9054_v36 = vor.u32 %v9052_v15, %v9051_v22 }
  0x72   : > { %v9047_v31 = vrot.slane %v9043_v19, 4  ;;  %8744 = vst [vmem:[#allocation2 + $0xc0] sm:$0x1] %v8743_v24  ;;  %v9215_v33 = vsel %vm12066_vm10, %v9029_v8, %v9214_v28  ;;  %9217 = vst.msk [vmem:[#allocation2 + $0xac] sm:$0xf] %vm927_vm7, %v9038_v27  ;;  %v9219_v34 = vsel %vm12018_vm5, %v9039_v18, %v9218_v29  ;;  %v9056_v37 = vrot.slane %v9051_v22, 4  ;;  %11460 = vmatmul.mubr.msk.bf16.gmra.mxu0 %vm554_vm4, %v10789_v23 }
  0x73   : > { %9216 = vst [vmem:[#allocation2 + $0xa8] sm:$0xf] %v9215_v33  ;;  %9220 = vst [vmem:[#allocation2 + $0xb0] sm:$0x1] %v9219_v34  ;;  %v8797_v38 = vsel %vm12024_vm6, 4286644096, %v8796_v25 }
  0x74   : > { %v9060_v39 = vrot.slane %v9058_v26, 7  ;;  %v9066_v40 = vshrl.u32 %v472_v20, 16  ;;  %v9069_v41 = vshll.u32 %v472_v20, 16  ;;  %v9055_v43 = vsel %vm12059_vm9, %v9047_v31, %v9054_v36  ;;  %v9221_v44 = vld [vmem:[#allocation2 + $0xb4] sm:$0xf]  ;;  %s18676_s15 = smov 20  }
  0x75   : > { %8798 = vst [vmem:[#allocation2 + $0xc8] sm:$0x1] %v8797_v38  ;;  %v9222_v45 = vsel %vm12066_vm10, %v9046_v30, %v9221_v44  ;;  %9224 = vst.msk [vmem:[#allocation2 + $0xb8] sm:$0xf] %vm927_vm7, %v9055_v43  ;;  %v9225_v46 = vld [vmem:[#allocation2 + $0xbc] sm:$0x1] }
  0x76   : > { %v9063_v47 = vor.u32 %v9061_v32, %v9060_v39  ;;  %v9064_v48 = vrot.slane %v9060_v39, 4  ;;  %v9068_v49 = vrot.slane %v9066_v40, 7  ;;  %v11877_v50 = vmov 0   ;;  %9223 = vst [vmem:[#allocation2 + $0xb4] sm:$0xf] %v9222_v45 }
  0x77   : > { %928 = vst.msk [vmem:[#allocation3] sm:$0xf] %vm927_vm7, %v11877_v50  ;;  %929 = vst.msk [vmem:[#allocation3 + $0x4] sm:$0xf] %vm927_vm7, %v11877_v50  ;;  %v9226_v51 = vsel %vm12018_vm5, %v9056_v37, %v9225_v46  ;;  %vm2082_vm14 = vsmask.f32 3328 }
  0x78   : > { %931 = vst.msk [vmem:[#allocation3 + $0x8] sm:$0x1] %vm930_vm1, %v11877_v50  ;;  %935 = vst.msk [vmem:[#allocation3 + $0xd4] sm:$0x1] %vm930_vm1, %v11877_v50  ;;  %v9071_v52 = vor.u32 %v9069_v41, %v9068_v49  ;;  %v9073_v53 = vrot.slane %v9068_v49, 4  ;;  %vm878_vm3 = vcmask 64512  }
  0x79   : > { %933 = vst.msk [vmem:[#allocation3 + $0xcc] sm:$0xf] %vm927_vm7, %v11877_v50  ;;  %934 = vst.msk [vmem:[#allocation3 + $0xd0] sm:$0xf] %vm927_vm7, %v11877_v50  ;;  %v9228_v54 = vld [vmem:[#allocation2 + $0xc0] sm:$0xf] }
  0x7a   : > { %1049 = vst.msk [vmem:[#allocation4] sm:$0xf] %vm927_vm7, %v11877_v50  ;;  %1050 = vst.msk [vmem:[#allocation4 + $0x4] sm:$0xf] %vm927_vm7, %v11877_v50  ;;  %v9072_v55 = vsel %vm12059_vm9, %v9064_v48, %v9071_v52  ;;  %v9229_v56 = vsel %vm12066_vm10, %v9063_v47, %v9228_v54  ;;  %vm2083_vm15 = vsmask.f32 7440 }
  0x7b   : > { %1051 = vst.msk [vmem:[#allocation4 + $0x8] sm:$0x1] %vm930_vm1, %v11877_v50  ;;  %1055 = vst.msk [vmem:[#allocation4 + $0xd4] sm:$0x1] %vm930_vm1, %v11877_v50  ;;  %vm4681_vm8 = vcmask 97280   ;;  %vm4780_vm11 = vcmask 195584  }
  0x7c   : > { %1053 = vst.msk [vmem:[#allocation4 + $0xcc] sm:$0xf] %vm927_vm7, %v11877_v50  ;;  %1054 = vst.msk [vmem:[#allocation4 + $0xd0] sm:$0xf] %vm927_vm7, %v11877_v50  ;;  %v9232_v57 = vld [vmem:[#allocation2 + $0xc8] sm:$0x1] }
  0x7d   : > { %9227 = vst [vmem:[#allocation2 + $0xbc] sm:$0x1] %v9226_v51  ;;  %9230 = vst [vmem:[#allocation2 + $0xc0] sm:$0xf] %v9229_v56  ;;  %v9233_v58 = vsel %vm12018_vm5, %v9073_v53, %v9232_v57  ;;  %vm4813_vm12 = vcmask 228352  }
  0x7e   : > { %9231 = vst.msk [vmem:[#allocation2 + $0xc4] sm:$0xf] %vm927_vm7, %v9072_v55  ;;  %v12316_v60 = vld [vmem:[#allocation3 + $0x4] sm:$0xf]  ;;  %9234 = vst [vmem:[#allocation2 + $0xc8] sm:$0x1] %v9233_v58 }
  0x7f   : > { %v995_v59 = vld [vmem:[#allocation3 + $0x8] sm:$0x1]  ;;  %v939_v62 = vld [vmem:[#allocation3] sm:$0x1]  ;;  %v2095_v63 = vshll.u32 %v12316_v60, 16  ;;  %v2538_v9 = vrot.slane %v12316_v60, 5  ;;  %vm12353_vm2 = vmor %vm2082_vm14, %vm2083_vm15 }
  0x80   : > { %v996_v61 = vsel %vm12024_vm6, 0, %v995_v59  ;;  %v940_v0 = vsel %vm12018_vm5, 0, %v939_v62  ;;  %v990_v1 = vld [vmem:[#allocation3 + $0xcc] sm:$0x1]  ;;  %v12323_v3 = vld [vmem:[#allocation3 + $0xd0] sm:$0xf] }
  0x81   : > { %997 = vst [vmem:[#allocation3 + $0x8] sm:$0x1] %v996_v61  ;;  %18704 = vst [vmem:[#allocation10_spill] sm:$0xff] %v12323_v3  ;;  %v2469_v5 = vld [vmem:[#allocation3] sm:$0xe]  ;;  %v991_v6 = vsel %vm12018_vm5, 0, %v990_v1 }
  0x82   : > { %941 = vst [vmem:[#allocation3] sm:$0x1] %v940_v0  ;;  %v3675_v7 = vshll.u32 %v12323_v3, 16  ;;  %v1046_v8 = vld [vmem:[#allocation3 + $0xd4] sm:$0x1]  ;;  %v3679_v10 = vshrl.u32 %v12323_v3, 16 }
  0x83   : > { %992 = vst [vmem:[#allocation3 + $0xcc] sm:$0x1] %v991_v6  ;;  %v2097_v11 = vrot.slane %v2095_v63, 5  ;;  %v2099_v12 = vshrl.u32 %v12316_v60, 16  ;;  %v1047_v13 = vsel %vm12024_vm6, 0, %v1046_v8  ;;  %v10840_v15 = vrot.slane %v2469_v5, 9 }
  0x84   : > { %v3677_v14 = vrot.slane %v3675_v7, 5  ;;  %v3681_v16 = vrot.slane %v3679_v10, 4  ;;  %1048 = vst [vmem:[#allocation3 + $0xd4] sm:$0x1] %v1047_v13  ;;  %v2540_v19 = vrot.slane %v2538_v9, 4  ;;  %vm4846_vm14 = vcmask 261120  }
  0x85   : > { %v2101_v17 = vrot.slane %v2099_v12, 4  ;;  %v2539_v24 = vsel %vm12335_vm13, %v10840_v15, %v2538_v9  ;;  %v945_v58 = vld [vmem:[#allocation3 + $0x18] sm:$0x1]  ;;  %v942_v61 = vld [vmem:[#allocation3 + $0xc] sm:$0x1]  ;;  %vm4899_vm15 = vcmask 293888  }
  0x86   : > { %v3682_v22 = vor.u32 %v3681_v16, %v3677_v14  ;;  %v946_v59 = vsel %vm12018_vm5, 0, %v945_v58  ;;  %v943_v62 = vsel %vm12018_vm5, 0, %v942_v61  ;;  %v12376_v63 = vld [vmem:[%s18710_s2] ss:$0 sm:$0xff]  ;;  %v1062_v0 = vld [vmem:[#allocation4 + $0x18] sm:$0x1] }
  0x87   : > { %v2102_v20 = vor.u32 %v2101_v17, %v2097_v11  ;;  %947 = vst [vmem:[#allocation3 + $0x18] sm:$0x1] %v946_v59  ;;  %944 = vst [vmem:[#allocation3 + $0xc] sm:$0x1] %v943_v62  ;;  %v1063_v1 = vsel %vm12018_vm5, 0, %v1062_v0 }
  0x88   : > { %v2066_v21 = vld [vmem:[#allocation3 + $0x8] sm:$0x1]  ;;  %v3683_v40 = vrot.slane %v3682_v22, 4  ;;  %1064 = vst [vmem:[#allocation4 + $0x18] sm:$0x1] %v1063_v1 }
  0x89   : > { %v2105_v23 = vshll.u32 %v2066_v21, 16  ;;  %v2541_v25 = vrot.slane %v2066_v21, 5  ;;  %v12341_v26 = vld [vmem:[#allocation3] sm:$0xf]  ;;  %v2103_v30 = vrot.slane %v2102_v20, 4 }
  0x8a   : > { %v3287_v27 = vld [vmem:[#allocation3 + $0xcc] sm:$0xf]  ;;  %v2086_v28 = vshrl.u32 %v12341_v26, 16  ;;  %v2089_v29 = vshll.u32 %v12341_v26, 16  ;;  %v12383_v6 = vld [vmem:[%s18711_s3] ss:$0 sm:$0xff] }
  0x8b   : > { %v2542_v31 = vsel %vm12335_vm13, %v2540_v19, %v2541_v25  ;;  %v10999_v32 = vcombine.low %v3287_v27, %v12323_v3  ;;  %v3666_v33 = vshrl.u32 %v3287_v27, 16  ;;  %v3669_v34 = vshll.u32 %v3287_v27, 16  ;;  %v12348_v39 = vld [vmem:[#allocation3 + $0xd4] sm:$0x1]  ;;  %v1059_v7 = vld [vmem:[#allocation4 + $0xc] sm:$0x1] }
  0x8c   : > { %v10920_v36 = vcombine.low %v2539_v24, %v2542_v31  ;;  %v2088_v37 = vrot.slane %v2086_v28, 4  ;;  %v2091_v38 = vrot.slane %v2089_v29, 5  ;;  %18707 = vst [vmem:[#allocation11_spill] sm:$0xff] %v12348_v39  ;;  %v2107_v45 = vrot.slane %v2105_v23, 5  ;;  %v1116_v21 = vld [vmem:[#allocation4 + $0x20] sm:$0x1] }
  0x8d   : > { %4439 = vrot.lane.b32.xlu1 %v10999_v32, %s18671_s16  ;;  %v3668_v41 = vrot.slane %v3666_v33, 4  ;;  %v3671_v43 = vrot.slane %v3669_v34, 5  ;;  %v3685_v46 = vshll.u32 %v12348_v39, 16  ;;  %v1060_v9 = vsel %vm12018_vm5, 0, %v1059_v7  ;;  %v998_v33 = vld [vmem:[#allocation3 + $0x14] sm:$0x1] }
  0x8e   : > { %4057 = vrot.lane.b32.xlu0 %v10920_v36, %s18682_s20  ;;  %v2092_v47 = vor.u32 %v2091_v38, %v2088_v37  ;;  %v2108_v51 = vsel %vm12353_vm2, %v2103_v30, %v2107_v45  ;;  %1061 = vst [vmem:[#allocation4 + $0xc] sm:$0x1] %v1060_v9  ;;  %v1117_v27 = vsel %vm12024_vm6, 0, %v1116_v21 }
  0x8f   : > { %v3672_v48 = vor.u32 %v3671_v43, %v3668_v41  ;;  %v3687_v49 = vrot.slane %v3685_v46, 5  ;;  %1118 = vst [vmem:[#allocation4 + $0x20] sm:$0x1] %v1117_v27  ;;  %v999_v41 = vsel %vm12024_vm6, 0, %v998_v33 }
  0x90   : > { %v2093_v50 = vrot.slane %v2092_v47, 4  ;;  %1000 = vst [vmem:[#allocation3 + $0x14] sm:$0x1] %v999_v41 }
  0x91   : > { %v3673_v52 = vrot.slane %v3672_v48, 4  ;;  %v3688_v53 = vsel %vm12353_vm2, %v3683_v40, %v3687_v49 }
  0x92   : > { %v2098_v54 = vsel %vm12353_vm2, %v2093_v50, %v2097_v11  ;;  %v1001_v11 = vld [vmem:[#allocation3 + $0x20] sm:$0x1] }
  0x93   : > { %v10904_v55 = vcombine.low %v2098_v54, %v2108_v51  ;;  %v3678_v56 = vsel %vm12353_vm2, %v3673_v52, %v3677_v14  ;;  %v1002_v14 = vsel %vm12024_vm6, 0, %v1001_v11 }
  0x94   : > { %v11015_v57 = vcombine.low %v3678_v56, %v3688_v53  ;;  %1003 = vst [vmem:[#allocation3 + $0x20] sm:$0x1] %v1002_v14 }
  0x95   : > { %3977 = vrot.lane.b32.xlu0 %v10904_v55, %s11880_s21 }
  0x96   : > { %4519 = vrot.lane.b32.xlu1 %v11015_v57, %s18674_s22 }
  0xe8   : > { %v11433_v5 = vpop.f32.mrf.mxu0 }
  0xe9   : > { %v777_v8 = vmul.f32 %v11433_v5, %v12376_v63 }
  0xea   : > { %v641_v10 = vpop.f32.mrf.mxu0 }
  0xeb   : > { %v816_v12 = vadd.f32 %v12383_v6, %v777_v8  ;;  %v775_v13 = vmul.f32 %v12376_v63, %v641_v10 }
  0xec   : > { %v11434_v15 = vpop.f32.mrf.mxu0 }
  0xed   : > { %v12392_v16 = vmax.f32 %v816_v12, 0.0  ;;  %v814_v17 = vadd.f32 %v12383_v6, %v775_v13  ;;  %v778_v19 = vmul.f32 %v11434_v15, %v12376_v63 }
  0xee   : > { %v644_v20 = vpop.f32.mrf.mxu0 }
  0xef   : > { %18712 = vst [vmem:[#allocation12_spill] sm:$0xff] %v12392_v16  ;;  %v11326_v22 = vpack.c.bf16 %v12392_v16, %v12392_v16  ;;  %v12398_v23 = vmax.f32 %v814_v17, 0.0  ;;  %v817_v24 = vadd.f32 %v12383_v6, %v778_v19  ;;  %v776_v25 = vmul.f32 %v12376_v63, %v644_v20 }
  0xf0   : > { %v11437_v32 = vpop.f32.mrf.mxu0 }
  0xf1   : > { %18713 = vst [vmem:[#allocation13_spill] sm:$0xff] %v12398_v23  ;;  %v11324_v28 = vpack.c.bf16 %v12398_v23, %v12398_v23  ;;  %v12406_v29 = vmax.f32 %v817_v24, 0.0  ;;  %v815_v30 = vadd.f32 %v12383_v6, %v776_v25  ;;  %v1264_v31 = vshrl.u32 %v11326_v22, 16 }
  0xf2   : > { %v1267_v37 = vshll.u32 %v11326_v22, 16  ;;  %v781_v40 = vmul.f32 %v11437_v32, %v12376_v63  ;;  %v657_v48 = vpop.f32.mrf.mxu0 }
  0xf3   : > { %18714 = vst [vmem:[#allocation14_spill] sm:$0xff] %v12406_v29  ;;  %v11327_v34 = vpack.c.bf16 %v12406_v29, %v12406_v29  ;;  %v1266_v36 = vrot.slane %v1264_v31, 7  ;;  %v1247_v38 = vshrl.u32 %v11324_v28, 16  ;;  %v12414_v43 = vmax.f32 %v815_v30, 0.0 }
  0xf4   : > { %v1250_v47 = vshll.u32 %v11324_v28, 16  ;;  %v779_v51 = vmul.f32 %v12376_v63, %v657_v48  ;;  %v820_v54 = vadd.f32 %v12383_v6, %v781_v40  ;;  %v11438_v57 = vpop.f32.mrf.mxu0 }
  0xf5   : > { %18715 = vst [vmem:[#allocation15_spill] sm:$0xff] %v12414_v43  ;;  %v1269_v45 = vor.u32 %v1267_v37, %v1266_v36  ;;  %v1249_v46 = vrot.slane %v1247_v38, 7  ;;  %v1272_v49 = vshrl.u32 %v11327_v34, 16  ;;  %v11325_v53 = vpack.c.bf16 %v12414_v43, %v12414_v43 }
  0xf6   : > { %v1275_v55 = vshll.u32 %v11327_v34, 16  ;;  %v818_v56 = vadd.f32 %v12383_v6, %v779_v51  ;;  %v782_v58 = vmul.f32 %v11438_v57, %v12376_v63  ;;  %v12425_v61 = vmax.f32 %v820_v54, 0.0  ;;  %v660_v7 = vpop.f32.mrf.mxu0 }
  0xf7   : > { %1524 = vrot.lane.b32.xlu1 %v1269_v45, %s11882_s23  ;;  %v1252_v50 = vor.u32 %v1250_v47, %v1249_v46  ;;  %v1274_v52 = vrot.slane %v1272_v49, 7  ;;  %v1255_v0 = vshrl.u32 %v11325_v53, 16  ;;  %v1270_v1 = vrot.slane %v1266_v36, 4 }
  0xf8   : > { %18716 = vst [vmem:[#allocation16_spill] sm:$0xff] %v12425_v61  ;;  %v12428_v5 = vmax.f32 %v818_v56, 0.0  ;;  %v821_v8 = vadd.f32 %v12383_v6, %v782_v58  ;;  %v11330_v10 = vpack.c.bf16 %v12425_v61, %v12425_v61  ;;  %v780_v12 = vmul.f32 %v12376_v63, %v660_v7  ;;  %v11441_v22 = vpop.f32.mrf.mxu0 }
  0xf9   : > { %1518 = vrot.lane.b32.xlu0 %v1252_v50, %s11882_s23  ;;  %v1277_v59 = vor.u32 %v1275_v55, %v1274_v52  ;;  %v1279_v62 = vrot.slane %v1274_v52, 4  ;;  %v1257_v11 = vrot.slane %v1255_v0, 7  ;;  %v1258_v14 = vshll.u32 %v11325_v53, 16 }
  0xfa   : > { %18717 = vst [vmem:[#allocation17_spill] sm:$0xff] %v12428_v5  ;;  %v11328_v13 = vpack.c.bf16 %v12428_v5, %v12428_v5  ;;  %v12441_v15 = vmax.f32 %v821_v8, 0.0  ;;  %v1298_v19 = vshrl.u32 %v11330_v10, 16  ;;  %v819_v20 = vadd.f32 %v12383_v6, %v780_v12  ;;  %v673_v36 = vpop.f32.mrf.mxu0 }
  0xfb   : > { %1783 = vrot.lane.b32.xlu1 %v1269_v45, %s11883_s24  ;;  %v1278_v9 = vsel %vm12059_vm9, %v1270_v1, %v1277_v59  ;;  %v1262_v17 = vrot.slane %v1257_v11, 4  ;;  %v1260_v21 = vor.u32 %v1258_v14, %v1257_v11  ;;  %v1253_v27 = vrot.slane %v1249_v46, 4 }
  0xfc   : > { %18718 = vst [vmem:[#allocation18_spill] sm:$0xff] %v12441_v15  ;;  %v1281_v24 = vshrl.u32 %v11328_v13, 16  ;;  %v11331_v25 = vpack.c.bf16 %v12441_v15, %v12441_v15  ;;  %v1300_v28 = vrot.slane %v1298_v19, 7  ;;  %v1301_v30 = vshll.u32 %v11330_v10, 16  ;;  %v11442_v47 = vpop.f32.mrf.mxu0 }
  0xfd   : > { %1777 = vrot.lane.b32.xlu0 %v1252_v50, %s11883_s24  ;;  %v12449_v31 = vmax.f32 %v819_v20, 0.0  ;;  %v1261_v32 = vsel %vm12059_vm9, %v1253_v27, %v1260_v21  ;;  %v1284_v34 = vshll.u32 %v11328_v13, 16  ;;  %v785_v40 = vmul.f32 %v11441_v22, %v12376_v63 }
  0xfe   : > { %v1283_v33 = vrot.slane %v1281_v24, 7  ;;  %v1306_v37 = vshrl.u32 %v11331_v25, 16  ;;  %v1303_v38 = vor.u32 %v1301_v30, %v1300_v28  ;;  %v783_v46 = vmul.f32 %v12376_v63, %v673_v36  ;;  %v676_v53 = vpop.f32.mrf.mxu0 }
  0xff   : > { %1528 = vrot.lane.b32.xlu1 %v1279_v62, %s11882_s23  ;;  %18719 = vst [vmem:[#allocation19_spill] sm:$0xff] %v12449_v31  ;;  %v11329_v41 = vpack.c.bf16 %v12449_v31, %v12449_v31  ;;  %v1309_v48 = vshll.u32 %v11331_v25, 16  ;;  %v824_v50 = vadd.f32 %v12383_v6, %v785_v40  ;;  %v786_v54 = vmul.f32 %v11442_v47, %v12376_v63 }
 0x100   : > { %v1286_v45 = vor.u32 %v1284_v34, %v1283_v33  ;;  %v1308_v49 = vrot.slane %v1306_v37, 7  ;;  %v822_v52 = vadd.f32 %v12383_v6, %v783_v46  ;;  %v1304_v55 = vrot.slane %v1300_v28, 4 }
 0x101   : > { %1526 = vrot.lane.b32.xlu0 %v1278_v9, %s11882_s23  ;;  %v1289_v51 = vshrl.u32 %v11329_v41, 16  ;;  %v12465_v57 = vmax.f32 %v824_v50, 0.0  ;;  %v1292_v0 = vshll.u32 %v11329_v41, 16  ;;  %v825_v7 = vadd.f32 %v12383_v6, %v786_v54  ;;  %v951_v50 = vld [vmem:[#allocation3 + $0x30] sm:$0x1] }
 0x102   : > { %v1311_v56 = vor.u32 %v1309_v48, %v1308_v49  ;;  %v1313_v58 = vrot.slane %v1308_v49, 4  ;;  %v12468_v1 = vmax.f32 %v822_v52, 0.0  ;;  %v784_v11 = vmul.f32 %v12376_v63, %v676_v53 }
 0x103   : > { %1787 = vrot.lane.b32.xlu1 %v1279_v62, %s11883_s24  ;;  %18720 = vst [vmem:[#allocation20_spill] sm:$0xff] %v12465_v57  ;;  %v11445_v59 = vpop.f32.mrf.mxu0  ;;  %v1291_v62 = vrot.slane %v1289_v51, 7  ;;  %v1287_v12 = vrot.slane %v1283_v33, 4 }
 0x104   : > { %18721 = vst [vmem:[#allocation21_spill] sm:$0xff] %v12468_v1  ;;  %v1312_v8 = vsel %vm12059_vm9, %v1304_v55, %v1311_v56  ;;  %v11332_v14 = vpack.c.bf16 %v12468_v1, %v12468_v1  ;;  %v823_v21 = vadd.f32 %v12383_v6, %v784_v11  ;;  %v789_v41 = vmul.f32 %v11445_v59, %v12376_v63  ;;  %v948_v55 = vld [vmem:[#allocation3 + $0x24] sm:$0x1]  ;;  %v1068_v59 = vld [vmem:[#allocation4 + $0x30] sm:$0x1] }
 0x105   : > { %1785 = vrot.lane.b32.xlu0 %v1278_v9, %s11883_s24  ;;  %v11334_v9 = vpack.c.bf16 %v12465_v57, %v12465_v57  ;;  %v689_v10 = vpop.f32.mrf.mxu0  ;;  %v1294_v13 = vor.u32 %v1292_v0, %v1291_v62  ;;  %v1296_v24 = vrot.slane %v1291_v62, 4  ;;  %v1065_v62 = vld [vmem:[#allocation4 + $0x24] sm:$0x1]  ;;  %v949_v11 = vsel %vm12018_vm5, 0, %v948_v55 }
 0x106   : > { %v1315_v25 = vshrl.u32 %v11332_v14, 16  ;;  %v12491_v33 = vmax.f32 %v823_v21, 0.0  ;;  %v1318_v36 = vshll.u32 %v11332_v14, 16  ;;  %v787_v48 = vmul.f32 %v12376_v63, %v689_v10  ;;  %950 = vst [vmem:[#allocation3 + $0x24] sm:$0x1] %v949_v11 }
 0x107   : > { %1522 = vrot.lane.b32.xlu1 %v1262_v17, %s11882_s23  ;;  %v1332_v19 = vshrl.u32 %v11334_v9, 16  ;;  %v11446_v20 = vpop.f32.mrf.mxu0  ;;  %v1295_v22 = vsel %vm12059_vm9, %v1287_v12, %v1294_v13  ;;  %v1335_v30 = vshll.u32 %v11334_v9, 16  ;;  %v828_v54 = vadd.f32 %v12383_v6, %v789_v41  ;;  %v1007_v12 = vld [vmem:[#allocation3 + $0x38] sm:$0x1] }
 0x108   : > { %18723 = vst [vmem:[#allocation23_spill] sm:$0xff] %v12491_v33  ;;  %v12494_v34 = vrot.slane %v1315_v25, 7  ;;  %v11333_v46 = vpack.c.bf16 %v12491_v33, %v12491_v33  ;;  %v826_v0 = vadd.f32 %v12383_v6, %v787_v48 }
 0x109   : > { %1781 = vrot.lane.b32.xlu0 %v1262_v17, %s11883_s24  ;;  %v12481_v17 = vmax.f32 %v825_v7, 0.0  ;;  %v1334_v28 = vrot.slane %v1332_v19, 7  ;;  %v790_v7 = vmul.f32 %v11446_v20, %v12376_v63  ;;  %v12520_v13 = vmax.f32 %v828_v54, 0.0  ;;  %v957_v54 = vld [vmem:[#allocation3 + $0x48] sm:$0x1] }
 0x10a   : > { %v1320_v47 = vor.u32 %v1318_v36, %v12494_v34  ;;  %v1323_v56 = vshrl.u32 %v11333_v46, 16  ;;  %v1069_v19 = vsel %vm12018_vm5, 0, %v1068_v59  ;;  %v1066_v20 = vsel %vm12018_vm5, 0, %v1065_v62 }
 0x10b   : > { %1779 = vrot.lane.b32.xlu1 %v1261_v32, %s11883_s24  ;;  %18722 = vst [vmem:[#allocation22_spill] sm:$0xff] %v12481_v17  ;;  %v11335_v27 = vpack.c.bf16 %v12481_v17, %v12481_v17  ;;  %v1337_v40 = vor.u32 %v1335_v30, %v1334_v28  ;;  %v1338_v9 = vrot.slane %v1334_v28, 4  ;;  %18724 = vst [vmem:[#allocation24_spill] sm:$0xff] %v12520_v13  ;;  %v12529_v25 = vmax.f32 %v826_v0, 0.0  ;;  %v1071_v0 = vld [vmem:[#allocation4 + $0x3c] sm:$0x1] }
 0x10c   : > { %v12527_v21 = vrot.slane %v1323_v56, 7  ;;  %1070 = vst [vmem:[#allocation4 + $0x30] sm:$0x1] %v1069_v19  ;;  %1067 = vst [vmem:[#allocation4 + $0x24] sm:$0x1] %v1066_v20  ;;  %v1008_v30 = vsel %vm12024_vm6, 0, %v1007_v12 }
 0x10d   : > { %1520 = vrot.lane.b32.xlu0 %v1261_v32, %s11882_s23  ;;  %v692_v32 = vpop.f32.mrf.mxu0  ;;  %v1343_v51 = vshll.u32 %v11335_v27, 16  ;;  %18725 = vst [vmem:[#allocation25_spill] sm:$0xff] %v12529_v25  ;;  %1009 = vst [vmem:[#allocation3 + $0x38] sm:$0x1] %v1008_v30  ;;  %v954_v56 = vld [vmem:[#allocation3 + $0x3c] sm:$0x1] }
 0x10e   : > { %v958_v11 = vsel %vm12018_vm5, 0, %v957_v54  ;;  %v1013_v12 = vld [vmem:[#allocation3 + $0x50] sm:$0x1]  ;;  %v955_v19 = vsel %vm12018_vm5, 0, %v954_v56  ;;  %v1010_v30 = vld [vmem:[#allocation3 + $0x44] sm:$0x1] }
 0x10f   : > { %1536 = vrot.lane.b32.xlu1 %v1303_v38, %s11882_s23  ;;  %v12496_v37 = vpop.f32.mrf.mxu0  ;;  %959 = vst [vmem:[#allocation3 + $0x48] sm:$0x1] %v958_v11  ;;  %956 = vst [vmem:[#allocation3 + $0x3c] sm:$0x1] %v955_v19  ;;  %v1679_v29 = vld [vmem:[#allocation3 + $0x24] sm:$0xf] }
 0x111   : > { %1530 = vrot.lane.b32.xlu0 %v1286_v45, %s11882_s23  ;;  %v12505_v49 = vpop.f32.mrf.mxu0 }
 0x113   : > { %1795 = vrot.lane.b32.xlu1 %v1303_v38, %s11883_s24  ;;  %v1340_v38 = vshrl.u32 %v11335_v27, 16  ;;  %v829_v27 = vadd.f32 %v12383_v6, %v790_v7 }
 0x115   : > { %1789 = vrot.lane.b32.xlu0 %v1286_v45, %s11883_s24  ;;  %v1113_v45 = vld [vmem:[#allocation4 + $0x14] sm:$0x1]  ;;  %v1342_v52 = vrot.slane %v1340_v38, 7 }
 0x116   : > { %v1114_v53 = vsel %vm12024_vm6, 0, %v1113_v45  ;;  %v1004_v38 = vld [vmem:[#allocation3 + $0x2c] sm:$0x1] }
 0x117   : > { %1540 = vrot.lane.b32.xlu1 %v1313_v58, %s11882_s23  ;;  %1115 = vst [vmem:[#allocation4 + $0x14] sm:$0x1] %v1114_v53  ;;  %v1345_v10 = vor.u32 %v1343_v51, %v1342_v52  ;;  %v1347_v14 = vrot.slane %v1342_v52, 4  ;;  %v12551_v51 = vpack.c.bf16 %v12529_v25, %v12529_v25  ;;  %v12553_v52 = vmax.f32 %v829_v27, 0.0 }
 0x118   : > { %v1005_v53 = vsel %vm12024_vm6, 0, %v1004_v38  ;;  %v1072_v27 = vsel %vm12018_vm5, 0, %v1071_v0  ;;  %v1019_v0 = vld [vmem:[#allocation3 + $0x68] sm:$0x1] }
 0x119   : > { %1538 = vrot.lane.b32.xlu0 %v1312_v8, %s11882_s23  ;;  %v1346_v36 = vsel %vm12059_vm9, %v1338_v9, %v1345_v10  ;;  %18726 = vst [vmem:[#allocation26_spill] sm:$0xff] %v12553_v52  ;;  %1006 = vst [vmem:[#allocation3 + $0x2c] sm:$0x1] %v1005_v53  ;;  %v12568_v7 = vpack.c.bf16 %v12553_v52, %v12553_v52  ;;  %v1330_v9 = vrot.slane %v12527_v21, 4  ;;  %v1349_v10 = vshrl.u32 %v12551_v51, 16 }
 0x11a   : > { %1073 = vst [vmem:[#allocation4 + $0x3c] sm:$0x1] %v1072_v27  ;;  %v1011_v53 = vsel %vm12024_vm6, 0, %v1010_v30 }
 0x11b   : > { %1799 = vrot.lane.b32.xlu1 %v1313_v58, %s11883_s24  ;;  %v952_v58 = vsel %vm12018_vm5, 0, %v951_v50  ;;  %v1119_v50 = vld [vmem:[#allocation4 + $0x2c] sm:$0x1]  ;;  %1012 = vst [vmem:[#allocation3 + $0x44] sm:$0x1] %v1011_v53 }
 0x11c   : > { %953 = vst [vmem:[#allocation3 + $0x30] sm:$0x1] %v952_v58  ;;  %v1120_v55 = vsel %vm12024_vm6, 0, %v1119_v50  ;;  %v1074_v58 = vld [vmem:[#allocation4 + $0x48] sm:$0x1] }
 0x11d   : > { %1797 = vrot.lane.b32.xlu0 %v1312_v8, %s11883_s24  ;;  %v12516_v8 = vpop.f32.mrf.mxu0  ;;  %1121 = vst [vmem:[#allocation4 + $0x2c] sm:$0x1] %v1120_v55  ;;  %v1075_v20 = vsel %vm12018_vm5, 0, %v1074_v58  ;;  %v1080_v55 = vld [vmem:[#allocation4 + $0x60] sm:$0x1] }
 0x11e   : > { %1076 = vst [vmem:[#allocation4 + $0x48] sm:$0x1] %v1075_v20  ;;  %v794_v19 = vmul.f32 %v12516_v8, %v12376_v63  ;;  %v1020_v8 = vsel %vm12024_vm6, 0, %v1019_v0 }
 0x11f   : > { %1532 = vrot.lane.b32.xlu1 %v1295_v22, %s11882_s23  ;;  %v12533_v28 = vpop.f32.mrf.mxu0  ;;  %1021 = vst [vmem:[#allocation3 + $0x68] sm:$0x1] %v1020_v8 }
 0x121   : > { %1534 = vrot.lane.b32.xlu0 %v1296_v24, %s11882_s23  ;;  %v12542_v41 = vpop.f32.mrf.mxu0 }
 0x123   : > { %1791 = vrot.lane.b32.xlu1 %v1295_v22, %s11883_s24  ;;  %v1326_v22 = vshll.u32 %v11333_v46, 16  ;;  %v788_v46 = vmul.f32 %v12376_v63, %v692_v32 }
 0x125   : > { %1793 = vrot.lane.b32.xlu0 %v1296_v24, %s11883_s24  ;;  %v1122_v24 = vld [vmem:[#allocation4 + $0x38] sm:$0x1]  ;;  %v1328_v48 = vor.u32 %v1326_v22, %v12527_v21  ;;  %v827_v59 = vadd.f32 %v12383_v6, %v788_v46  ;;  %v1128_v22 = vld [vmem:[#allocation4 + $0x50] sm:$0x1]  ;;  %v12591_v46 = vrot.slane %v1349_v10, 7  ;;  %v1377_v10 = vshll.u32 %v12568_v7, 16 }
 0x126   : > { %v1123_v45 = vsel %vm12024_vm6, 0, %v1122_v24  ;;  %v1129_v50 = vsel %vm12024_vm6, 0, %v1128_v22  ;;  %v1081_v22 = vsel %vm12018_vm5, 0, %v1080_v55 }
 0x127   : > { %1548 = vrot.lane.b32.xlu1 %v1337_v40, %s11882_s23  ;;  %1124 = vst [vmem:[#allocation4 + $0x38] sm:$0x1] %v1123_v45  ;;  %v12586_v38 = vmax.f32 %v827_v59, 0.0  ;;  %v963_v45 = vld [vmem:[#allocation3 + $0x60] sm:$0x1]  ;;  %v1355_v8 = vrot.slane %v12591_v46, 4 }
 0x128   : > { %1130 = vst [vmem:[#allocation4 + $0x50] sm:$0x1] %v1129_v50  ;;  %v964_v59 = vsel %vm12018_vm5, 0, %v963_v45  ;;  %1082 = vst [vmem:[#allocation4 + $0x60] sm:$0x1] %v1081_v22 }
 0x129   : > { %1542 = vrot.lane.b32.xlu0 %v1320_v47, %s11882_s23  ;;  %18727 = vst [vmem:[#allocation27_spill] sm:$0xff] %v12586_v38  ;;  %v11337_v11 = vpack.c.bf16 %v12586_v38, %v12586_v38  ;;  %965 = vst [vmem:[#allocation3 + $0x60] sm:$0x1] %v964_v59  ;;  %v1131_v45 = vld [vmem:[#allocation4 + $0x5c] sm:$0x1] }
 0x12a   : > { %v1132_v50 = vsel %vm12024_vm6, 0, %v1131_v45  ;;  %v969_v59 = vld [vmem:[#allocation3 + $0x78] sm:$0x1] }
 0x12b   : > { %1807 = vrot.lane.b32.xlu1 %v1337_v40, %s11883_s24  ;;  %v11338_v40 = vpack.c.bf16 %v12520_v13, %v12520_v13  ;;  %1133 = vst [vmem:[#allocation4 + $0x5c] sm:$0x1] %v1132_v50 }
 0x12d   : > { %1801 = vrot.lane.b32.xlu0 %v1320_v47, %s11883_s24  ;;  %v1321_v47 = vrot.slane %v12494_v34, 4  ;;  %v1366_v32 = vshrl.u32 %v11338_v40, 16  ;;  %v12559_v34 = vpop.f32.mrf.mxu0 }
 0x12f   : > { %1552 = vrot.lane.b32.xlu1 %v1347_v14, %s11882_s23  ;;  %v1329_v62 = vsel %vm12059_vm9, %v1321_v47, %v1328_v48  ;;  %v12580_v24 = vrot.slane %v1366_v32, 7  ;;  %v12582_v21 = vpop.f32.mrf.mxu0  ;;  %v1352_v47 = vshll.u32 %v12551_v51, 16  ;;  %v1374_v48 = vshrl.u32 %v12568_v7, 16  ;;  %v960_v32 = vld [vmem:[#allocation3 + $0x54] sm:$0x1] }
 0x130   : > { %v793_v51 = vmul.f32 %v12496_v37, %v12376_v63  ;;  %v1016_v37 = vld [vmem:[#allocation3 + $0x5c] sm:$0x1]  ;;  %v961_v7 = vsel %vm12018_vm5, 0, %v960_v32 }
 0x131   : > { %1550 = vrot.lane.b32.xlu0 %v1346_v36, %s11882_s23  ;;  %v12605_v58 = vpop.f32.mrf.mxu0  ;;  %v1376_v27 = vrot.slane %v1374_v48, 7  ;;  %962 = vst [vmem:[#allocation3 + $0x54] sm:$0x1] %v961_v7  ;;  %v1372_v55 = vrot.slane %v12580_v24, 4 }
 0x133   : > { %1811 = vrot.lane.b32.xlu1 %v1347_v14, %s11883_s24  ;;  %v1369_v14 = vshll.u32 %v11338_v40, 16  ;;  %v1014_v40 = vsel %vm12024_vm6, 0, %v1013_v12  ;;  %v1134_v12 = vld [vmem:[#allocation4 + $0x68] sm:$0x1]  ;;  %v12618_v20 = vpop.f32.mrf.mxu0  ;;  %v1381_v0 = vrot.slane %v1376_v27, 4 }
 0x134   : > { %1015 = vst [vmem:[#allocation3 + $0x50] sm:$0x1] %v1014_v40  ;;  %v1135_v40 = vsel %vm12024_vm6, 0, %v1134_v12  ;;  %v1360_v12 = vshll.u32 %v11337_v11, 16 }
 0x135   : > { %1809 = vrot.lane.b32.xlu0 %v1346_v36, %s11883_s24  ;;  %v1125_v36 = vld [vmem:[#allocation4 + $0x44] sm:$0x1]  ;;  %v1371_v56 = vor.u32 %v1369_v14, %v12580_v24  ;;  %v1354_v14 = vor.u32 %v1352_v47, %v12591_v46  ;;  %v1357_v47 = vshrl.u32 %v11337_v11, 16  ;;  %1136 = vst [vmem:[#allocation4 + $0x68] sm:$0x1] %v1135_v40  ;;  %v12640_v53 = vpop.f32.mrf.mxu0  ;;  %v797_v40 = vmul.f32 %v12542_v41, %v12376_v63 }
 0x136   : > { %v1126_v54 = vsel %vm12024_vm6, 0, %v1125_v36  ;;  %v832_v36 = vadd.f32 %v12383_v6, %v793_v51  ;;  %v1379_v51 = vor.u32 %v1377_v10, %v1376_v27  ;;  %v1086_v11 = vld [vmem:[#allocation4 + $0x78] sm:$0x1]  ;;  %v18604_v46 = vrot.slane %v12323_v3, 5 }
 0x137   : > { %1544 = vrot.lane.b32.xlu1 %v1329_v62, %s11882_s23  ;;  %1127 = vst [vmem:[#allocation4 + $0x44] sm:$0x1] %v1126_v54  ;;  %v833_v54 = vadd.f32 %v12383_v6, %v794_v19  ;;  %v966_v19 = vld [vmem:[#allocation3 + $0x6c] sm:$0x1]  ;;  %v12655_v24 = vpop.f32.mrf.mxu0  ;;  %v1087_v27 = vsel %vm12018_vm5, 0, %v1086_v11 }
 0x138   : > { %v967_v10 = vsel %vm12018_vm5, 0, %v966_v19  ;;  %v1380_v22 = vsel %vm12059_vm9, %v1372_v55, %v1379_v51  ;;  %1088 = vst [vmem:[#allocation4 + $0x78] sm:$0x1] %v1087_v27  ;;  %v12689_v55 = vpop.permute.xlu0 %4057  ;;  %v796_v51 = vmul.f32 %v12376_v63, %v12605_v58  ;;  %v12704_v58 = vrot.slane %v18604_v46, 4 }
 0x139   : > { %1546 = vrot.lane.b32.xlu0 %v1330_v9, %s11882_s23  ;;  %v12659_v7 = vmax.f32 %v833_v54, 0.0  ;;  %968 = vst [vmem:[#allocation3 + $0x6c] sm:$0x1] %v967_v10 }
 0x13a   : > { %18732 = vst [vmem:[#allocation32_spill] sm:$0xff] %v12704_v58  ;;  %v972_v58 = vld [vmem:[#allocation3 + $0x84] sm:$0x1] }
 0x13b   : > { %1803 = vrot.lane.b32.xlu1 %v1329_v62, %s11883_s24  ;;  %v1077_v62 = vld [vmem:[#allocation4 + $0x54] sm:$0x1]  ;;  %18730 = vst [vmem:[#allocation30_spill] sm:$0xff] %v12659_v7  ;;  %v11343_v45 = vpack.c.bf16 %v12659_v7, %v12659_v7 }
 0x13c   : > { %v1078_v30 = vsel %vm12018_vm5, 0, %v1077_v62  ;;  %v12645_v62 = vmax.f32 %v832_v36, 0.0 }
 0x13d   : > { %1805 = vrot.lane.b32.xlu0 %v1330_v9, %s11883_s24  ;;  %v791_v9 = vmul.f32 %v12376_v63, %v12505_v49  ;;  %v792_v49 = vmul.f32 %v12376_v63, %v12533_v28  ;;  %1079 = vst [vmem:[#allocation4 + $0x54] sm:$0x1] %v1078_v30  ;;  %v1017_v28 = vsel %vm12024_vm6, 0, %v1016_v37  ;;  %v1408_v10 = vshrl.u32 %v11343_v45, 16 }
 0x13e   : > { %1018 = vst [vmem:[#allocation3 + $0x5c] sm:$0x1] %v1017_v28  ;;  %18728 = vst [vmem:[#allocation28_spill] sm:$0xff] %v12645_v62  ;;  %v740_v28 = vpop.f32.mrf.mxu0  ;;  %v1411_v7 = vshll.u32 %v11343_v45, 16  ;;  %v1140_v45 = vld [vmem:[#allocation4 + $0x80] sm:$0x1] }
 0x13f   : > { %1560 = vrot.lane.b32.xlu1 %v1371_v56, %s11882_s23  ;;  %v830_v48 = vadd.f32 %v12383_v6, %v791_v9  ;;  %v831_v32 = vadd.f32 %v12383_v6, %v792_v49  ;;  %v970_v9 = vsel %vm12018_vm5, 0, %v969_v59  ;;  %v11342_v49 = vpack.c.bf16 %v12645_v62, %v12645_v62 }
 0x140   : > { %971 = vst [vmem:[#allocation3 + $0x78] sm:$0x1] %v970_v9  ;;  %v11461_v54 = vpop.f32.mrf.mxu0  ;;  %v1083_v9 = vld [vmem:[#allocation4 + $0x6c] sm:$0x1] }
 0x141   : > { %1554 = vrot.lane.b32.xlu0 %v1354_v14, %s11882_s23  ;;  %v12652_v37 = vmax.f32 %v830_v48, 0.0  ;;  %v795_v48 = vmul.f32 %v12376_v63, %v12559_v34  ;;  %v1400_v50 = vshrl.u32 %v11342_v49, 16  ;;  %v836_v34 = vadd.f32 %v12383_v6, %v797_v40 }
 0x142   : > { %v1403_v27 = vshll.u32 %v11342_v49, 16  ;;  %v10888_v49 = vcombine.low %v12341_v26, %v12316_v60  ;;  %v1141_v26 = vsel %vm12024_vm6, 0, %v1140_v45  ;;  %v1022_v45 = vld [vmem:[#allocation3 + $0x74] sm:$0x1] }
 0x143   : > { %1819 = vrot.lane.b32.xlu1 %v1371_v56, %s11883_s24  ;;  %v12650_v56 = vrot.slane %v1357_v47, 7  ;;  %18729 = vst [vmem:[#allocation29_spill] sm:$0xff] %v12652_v37  ;;  %v11340_v30 = vpack.c.bf16 %v12652_v37, %v12652_v37  ;;  %v834_v19 = vadd.f32 %v12383_v6, %v795_v48  ;;  %v1402_v11 = vrot.slane %v1400_v50, 7  ;;  %1142 = vst [vmem:[#allocation4 + $0x80] sm:$0x1] %v1141_v26 }
 0x144   : > { %v835_v48 = vadd.f32 %v12383_v6, %v796_v51  ;;  %v12712_v46 = vmax.f32 %v836_v34, 0.0  ;;  %v12722_v51 = vrot.slane %v1408_v10, 7  ;;  %v801_v34 = vmul.f32 %v12618_v20, %v12376_v63 }
 0x145   : > { %1813 = vrot.lane.b32.xlu0 %v1354_v14, %s11883_s24  ;;  %v12661_v14 = vmax.f32 %v831_v32, 0.0  ;;  %v1362_v36 = vor.u32 %v1360_v12, %v12650_v56  ;;  %v1383_v32 = vshrl.u32 %v11340_v30, 16  ;;  %v1364_v59 = vrot.slane %v12650_v56, 4 }
 0x146   : > { %v1386_v40 = vshll.u32 %v11340_v30, 16  ;;  %18733 = vst [vmem:[#allocation33_spill] sm:$0xff] %v12712_v46  ;;  %v802_v10 = vmul.f32 %v12655_v24, %v12376_v63  ;;  %v12739_v20 = vpack.c.bf16 %v12712_v46, %v12712_v46 }
 0x147   : > { %1564 = vrot.lane.b32.xlu1 %v1381_v0, %s11882_s23  ;;  %18731 = vst [vmem:[#allocation31_spill] sm:$0xff] %v12661_v14  ;;  %v12681_v47 = vpack.c.bf16 %v12661_v14, %v12661_v14  ;;  %v1363_v41 = vsel %vm12059_vm9, %v1355_v8, %v1362_v36  ;;  %v1025_v8 = vld [vmem:[#allocation3 + $0x80] sm:$0x1]  ;;  %v1385_v36 = vrot.slane %v1383_v32, 7  ;;  %v12720_v32 = vmax.f32 %v834_v19, 0.0 }
 0x148   : > { %v799_v19 = vmul.f32 %v12376_v63, %v12640_v53  ;;  %v1413_v53 = vor.u32 %v1411_v7, %v12722_v51  ;;  %v12782_v7 = vpop.permute.xlu1 %4439 }
 0x149   : > { %1562 = vrot.lane.b32.xlu0 %v1380_v22, %s11882_s23  ;;  %v1391_v12 = vshrl.u32 %v12681_v47, 16  ;;  %v1394_v30 = vshll.u32 %v12681_v47, 16  ;;  %18734 = vst [vmem:[#allocation34_spill] sm:$0xff] %v12720_v32  ;;  %v12730_v47 = vmax.f32 %v835_v48, 0.0  ;;  %v1389_v24 = vrot.slane %v1385_v36, 4  ;;  %18737 = vst [vmem:[#allocation37_spill] sm:$0xff] %v12782_v7 }
 0x14a   : > { %v1415_v48 = vrot.slane %v12722_v51, 4 }
 0x14b   : > { %1823 = vrot.lane.b32.xlu1 %v1381_v0, %s11883_s24  ;;  %v798_v0 = vmul.f32 %v12582_v21, %v12376_v63  ;;  %v753_v21 = vpop.f32.mrf.mxu0  ;;  %v12717_v50 = vrot.slane %v1391_v12, 7  ;;  %v1388_v12 = vor.u32 %v1386_v40, %v1385_v36  ;;  %18735 = vst [vmem:[#allocation35_spill] sm:$0xff] %v12730_v47  ;;  %v838_v36 = vadd.f32 %v12383_v6, %v799_v19 }
 0x14d   : > { %1821 = vrot.lane.b32.xlu0 %v1380_v22, %s11883_s24  ;;  %v1084_v22 = vsel %vm12018_vm5, 0, %v1083_v9  ;;  %v1026_v9 = vsel %vm12024_vm6, 0, %v1025_v8  ;;  %v837_v56 = vadd.f32 %v12383_v6, %v798_v0  ;;  %v800_v0 = vmul.f32 %v12376_v63, %v740_v28  ;;  %v11462_v60 = vpop.f32.mrf.mxu0 }
 0x14e   : > { %1085 = vst [vmem:[#allocation4 + $0x6c] sm:$0x1] %v1084_v22  ;;  %1027 = vst [vmem:[#allocation3 + $0x80] sm:$0x1] %v1026_v9  ;;  %v3978_v22 = vpop.permute.xlu0 %3977  ;;  %v12748_v8 = vpack.c.bf16 %v12720_v32, %v12720_v32  ;;  %v1396_v40 = vor.u32 %v1394_v30, %v12717_v50  ;;  %v805_v9 = vmul.f32 %v11461_v54, %v12376_v63  ;;  %v1434_v54 = vshrl.u32 %v12739_v20, 16 }
 0x14f   : > { %1556 = vrot.lane.b32.xlu1 %v1363_v41, %s11882_s23  ;;  %v12741_v28 = vmax.f32 %v837_v56, 0.0  ;;  %v840_v56 = vadd.f32 %v12383_v6, %v801_v34  ;;  %v841_v30 = vadd.f32 %v12383_v6, %v802_v10  ;;  %v803_v34 = vmul.f32 %v12376_v63, %v753_v21 }
 0x150   : > { %v12777_v19 = vsel %vm12059_vm9, %v1389_v24, %v1396_v40  ;;  %v1437_v24 = vshll.u32 %v12739_v20, 16  ;;  %v12792_v40 = vmax.f32 %v838_v36, 0.0  ;;  %v1420_v20 = vshll.u32 %v12748_v8, 16 }
 0x151   : > { %1558 = vrot.lane.b32.xlu0 %v1364_v59, %s11882_s23  ;;  %18736 = vst [vmem:[#allocation36_spill] sm:$0xff] %v12741_v28  ;;  %v12767_v51 = vpack.c.bf16 %v12741_v28, %v12741_v28  ;;  %v12784_v21 = vmax.f32 %v840_v56, 0.0 }
 0x152   : > { %18740 = vst [vmem:[#allocation40_spill] sm:$0xff] %v12792_v40 }
 0x153   : > { %1815 = vrot.lane.b32.xlu1 %v1363_v41, %s11883_s24  ;;  %v1405_v41 = vor.u32 %v1403_v27, %v1402_v11  ;;  %v12744_v27 = vsel %vm554_vm4, %v10888_v49, %v3978_v22  ;;  %v756_v49 = vpop.f32.mrf.mxu0  ;;  %v12759_v22 = vpack.c.bf16 %v12730_v47, %v12730_v47  ;;  %18738 = vst [vmem:[#allocation38_spill] sm:$0xff] %v12784_v21  ;;  %v1442_v56 = vshrl.u32 %v12767_v51, 16  ;;  %v1669_v47 = vld [vmem:[#allocation3 + $0x14] sm:$0x1] }
 0x154   : > { %v804_v10 = vmul.f32 %v12376_v63, %v756_v49  ;;  %v12794_v49 = vmax.f32 %v841_v30, 0.0  ;;  %v12811_v30 = vpack.c.bf16 %v12784_v21, %v12784_v21  ;;  %v1665_v21 = vld [vmem:[#allocation3 + $0xc] sm:$0xf] }
 0x155   : > { %1817 = vrot.lane.b32.xlu0 %v1364_v59, %s11883_s24  ;;  %v1406_v59 = vrot.slane %v1402_v11, 4  ;;  %v839_v11 = vadd.f32 %v12383_v6, %v800_v0  ;;  %v1023_v0 = vsel %vm12024_vm6, 0, %v1022_v45  ;;  %v844_v45 = vadd.f32 %v12383_v6, %v805_v9 }
 0x156   : > { %1024 = vst [vmem:[#allocation3 + $0x74] sm:$0x1] %v1023_v0  ;;  %18741 = vst [vmem:[#allocation41_spill] sm:$0xff] %v12794_v49  ;;  %v1137_v0 = vld [vmem:[#allocation4 + $0x74] sm:$0x1]  ;;  %v843_v36 = vadd.f32 %v12383_v6, %v804_v10  ;;  %v12823_v10 = vpack.c.bf16 %v12792_v40, %v12792_v40 }
 0x157   : > { %1572 = vrot.lane.b32.xlu1 %v1405_v41, %s11882_s23  ;;  %v1414_v26 = vsel %vm12059_vm9, %v1406_v59, %v1413_v53  ;;  %v12786_v3 = vmax.f32 %v839_v11, 0.0  ;;  %v806_v59 = vmul.f32 %v11462_v60, %v12376_v63  ;;  %v1425_v53 = vshrl.u32 %v12759_v22, 16 }
 0x158   : > { %v842_v11 = vadd.f32 %v12383_v6, %v803_v34  ;;  %v1138_v63 = vsel %vm12024_vm6, 0, %v1137_v0  ;;  %v1445_v60 = vshll.u32 %v12767_v51, 16  ;;  %v12817_v34 = vmax.f32 %v844_v45, 0.0  ;;  %v12834_v45 = vpop.permute.xlu1 %4519 }
 0x159   : > { %1566 = vrot.lane.b32.xlu0 %v1388_v12, %s11882_s23  ;;  %18739 = vst [vmem:[#allocation39_spill] sm:$0xff] %v12786_v3  ;;  %1139 = vst [vmem:[#allocation4 + $0x74] sm:$0x1] %v1138_v63  ;;  %v845_v51 = vadd.f32 %v12383_v6, %v806_v59  ;;  %v12827_v0 = vpack.c.bf16 %v12794_v49, %v12794_v49  ;;  %v12831_v7 = vrot.slane %v1425_v53, 7  ;;  %v12847_v53 = vmax.f32 %v843_v36, 0.0 }
 0x15a   : > { %18742 = vst [vmem:[#allocation42_spill] sm:$0xff] %v12817_v34  ;;  %18743 = vst [vmem:[#allocation43_spill] sm:$0xff] %v12834_v45  ;;  %v12841_v59 = vmax.f32 %v842_v11, 0.0  ;;  %v12856_v11 = vpack.c.bf16 %v12817_v34, %v12817_v34  ;;  %v1451_v36 = vshrl.u32 %v12823_v10, 16  ;;  %v1672_v45 = vld [vmem:[#allocation3 + $0x18] sm:$0xf] }
 0x15b   : > { %1831 = vrot.lane.b32.xlu1 %v1405_v41, %s11883_s24  ;;  %v1417_v41 = vshrl.u32 %v12748_v8, 16  ;;  %v1428_v8 = vshll.u32 %v12759_v22, 16  ;;  %v12839_v22 = vrot.slane %v1442_v56, 7  ;;  %18745 = vst [vmem:[#allocation45_spill] sm:$0xff] %v12847_v53  ;;  %v1468_v56 = vshrl.u32 %v12811_v30, 16 }
 0x15c   : > { %18744 = vst [vmem:[#allocation44_spill] sm:$0xff] %v12841_v59  ;;  %v1089_v49 = vld [vmem:[#allocation4 + $0x84] sm:$0x1]  ;;  %v12878_v40 = vpack.c.bf16 %v12847_v53, %v12847_v53  ;;  %v1031_v53 = vld [vmem:[#allocation3 + $0x98] sm:$0x1]  ;;  %v18757_v5 = vrot.slane %v12831_v7, 4 }
 0x15d   : > { %1825 = vrot.lane.b32.xlu0 %v1388_v12, %s11883_s24  ;;  %v12797_v12 = vrot.slane %v1434_v54, 7  ;;  %v12804_v9 = vrot.slane %v1417_v41, 7  ;;  %v12815_v54 = vpack.c.bf16 %v12786_v3, %v12786_v3  ;;  %v975_v41 = vld [vmem:[#allocation3 + $0x90] sm:$0x1]  ;;  %v1479_v3 = vshll.u32 %v12827_v0, 16 }
 0x15e   : > { %v976_v63 = vsel %vm12018_vm5, 0, %v975_v41  ;;  %v18752_v15 = vrot.slane %v12839_v22, 4 }
 0x15f   : > { %1576 = vrot.lane.b32.xlu1 %v1415_v48, %s11882_s23  ;;  %v12837_v6 = vor.u32 %v1437_v24, %v12797_v12  ;;  %977 = vst [vmem:[#allocation3 + $0x90] sm:$0x1] %v976_v63  ;;  %v12844_v39 = vor.u32 %v1420_v20, %v12804_v9  ;;  %v1440_v41 = vrot.slane %v12797_v12, 4  ;;  %v1459_v24 = vshrl.u32 %v12815_v54, 16  ;;  %v1092_v20 = vld [vmem:[#allocation4 + $0x90] sm:$0x1] }
 0x160   : > { %v12858_v63 = vmax.f32 %v845_v51, 0.0  ;;  %v1423_v12 = vrot.slane %v12804_v9, 4  ;;  %v1447_v51 = vor.u32 %v1445_v60, %v12839_v22  ;;  %v12872_v9 = vpack.c.bf16 %v12841_v59, %v12841_v59 }
 0x161   : > { %1574 = vrot.lane.b32.xlu0 %v1414_v26, %s11882_s23  ;;  %v1090_v60 = vsel %vm12018_vm5, 0, %v1089_v49  ;;  %v12885_v59 = vrot.slane %v1459_v24, 7  ;;  %v1453_v49 = vrot.slane %v1451_v36, 7  ;;  %v1493_v36 = vshrl.u32 %v12878_v40, 16 }
 0x162   : > { %18746 = vst [vmem:[#allocation46_spill] sm:$0xff] %v12858_v63  ;;  %1091 = vst [vmem:[#allocation4 + $0x84] sm:$0x1] %v1090_v60 }
 0x163   : > { %1835 = vrot.lane.b32.xlu1 %v1415_v48, %s11883_s24  ;;  %v973_v48 = vsel %vm12018_vm5, 0, %v972_v58  ;;  %v1476_v58 = vshrl.u32 %v12827_v0, 16  ;;  %v12889_v0 = vpack.c.bf16 %v12858_v63, %v12858_v63 }
 0x164   : > { %974 = vst [vmem:[#allocation3 + $0x84] sm:$0x1] %v973_v48  ;;  %v1430_v48 = vor.u32 %v1428_v8, %v12831_v7  ;;  %v18747_v8 = vrot.slane %v12717_v50, 4 }
 0x165   : > { %1833 = vrot.lane.b32.xlu0 %v1414_v26, %s11883_s24  ;;  %v1093_v26 = vsel %vm12018_vm5, 0, %v1092_v20  ;;  %v1462_v20 = vshll.u32 %v12815_v54, 16  ;;  %v1502_v54 = vshrl.u32 %v12856_v11, 16  ;;  %v12894_v46 = vrot.slane %v1476_v58, 7 }
 0x166   : > { %1094 = vst [vmem:[#allocation4 + $0x90] sm:$0x1] %v1093_v26  ;;  %v1470_v26 = vrot.slane %v1468_v56, 7  ;;  %v1929_v56 = vld [vmem:[#allocation4 + $0x18] sm:$0xf]  ;;  %v12902_v63 = vsel %vm12059_vm9, %v1423_v12, %v1430_v48 }
 0x167   : > { %1568 = vrot.lane.b32.xlu1 %v12777_v19, %s11882_s23  ;;  %v1146_v12 = vld [vmem:[#allocation4 + $0x98] sm:$0x1]  ;;  %v1922_v48 = vld [vmem:[#allocation4 + $0xc] sm:$0xf]  ;;  %v12918_v60 = vrot.slane %v1502_v54, 7 }
 0x168   : > { %v1676_v54 = vld [vmem:[#allocation3 + $0x20] sm:$0x1] }
 0x169   : > { %v1525_v34 = vpop.permute.xlu1 %1524  ;;  %1570 = vrot.lane.b32.xlu0 %v18747_v8, %s11882_s23  ;;  %v1032_v8 = vsel %vm12024_vm6, 0, %v1031_v53 }
 0x16a   : > { %v1673_v28 = vsel %vm12066_vm10, %v1525_v34, %v1672_v45  ;;  %v1471_v34 = vshll.u32 %v12811_v30, 16  ;;  %v1485_v45 = vshrl.u32 %v12872_v9, 16  ;;  %1033 = vst [vmem:[#allocation3 + $0x98] sm:$0x1] %v1032_v8  ;;  %v18748_v30 = vrot.slane %v12717_v50, 4 }
 0x16b   : > { %1674 = vst [vmem:[#allocation3 + $0x18] sm:$0xf] %v1673_v28  ;;  %v1519_v24 = vpop.permute.xlu0 %1518  ;;  %1827 = vrot.lane.b32.xlu1 %v12777_v19, %s11883_s24  ;;  %v12911_v28 = vsel %vm12059_vm9, %v1440_v41, %v1447_v51  ;;  %v1454_v19 = vshll.u32 %v12823_v10, 16  ;;  %v1474_v8 = vrot.slane %v1470_v26, 4  ;;  %v1147_v41 = vsel %vm12024_vm6, 0, %v1146_v12 }
 0x16c   : > { %v1666_v53 = vsel %vm12066_vm10, %v1519_v24, %v1665_v21  ;;  %v1510_v21 = vshrl.u32 %v12889_v0, 16  ;;  %v1481_v51 = vor.u32 %v1479_v3, %v12894_v46  ;;  %v1457_v24 = vrot.slane %v1453_v49, 4  ;;  %1148 = vst [vmem:[#allocation4 + $0x98] sm:$0x1] %v1147_v41 }
 0x16d   : > { %1667 = vst [vmem:[#allocation3 + $0xc] sm:$0xf] %v1666_v53  ;;  %v1784_v58 = vpop.permute.xlu1 %1783  ;;  %1829 = vrot.lane.b32.xlu0 %v18748_v30, %s11883_s24  ;;  %v1464_v53 = vor.u32 %v1462_v20, %v12885_v59  ;;  %v12929_v30 = vor.u32 %v1471_v34, %v1470_v26  ;;  %v12933_v32 = vrot.slane %v1485_v45, 7  ;;  %v1496_v20 = vshll.u32 %v12878_v40, 16 }
 0x16e   : > { %v1930_v10 = vsel %vm12066_vm10, %v1784_v58, %v1929_v56  ;;  %v12937_v56 = vrot.slane %v1493_v36, 7  ;;  %v1505_v58 = vshll.u32 %v12856_v11, 16  ;;  %v1513_v26 = vshll.u32 %v12889_v0, 16 }
 0x16f   : > { %1931 = vst [vmem:[#allocation4 + $0x18] sm:$0xf] %v1930_v10  ;;  %v1778_v50 = vpop.permute.xlu0 %1777  ;;  %1584 = vrot.lane.b32.xlu1 %v12837_v6, %s11882_s23  ;;  %v12945_v45 = vrot.slane %v1510_v21, 7  ;;  %v12954_v40 = vsel %vm12059_vm9, %v1474_v8, %v1481_v51  ;;  %v12958_v11 = vsel %vm12059_vm9, %v1457_v24, %v1464_v53 }
 0x170   : > { %v1923_v3 = vsel %vm12066_vm10, %v1778_v50, %v1922_v48  ;;  %v12950_v48 = vor.u32 %v1454_v19, %v1453_v49  ;;  %v1933_v49 = vld [vmem:[#allocation4 + $0x20] sm:$0x1]  ;;  %v1491_v19 = vrot.slane %v12933_v32, 4  ;;  %v12974_v53 = vor.u32 %v1505_v58, %v12918_v60 }
 0x171   : > { %1924 = vst [vmem:[#allocation4 + $0xc] sm:$0xf] %v1923_v3  ;;  %v1529_v41 = vpop.permute.xlu1 %1528  ;;  %1578 = vrot.lane.b32.xlu0 %v12844_v39, %s11882_s23  ;;  %v1515_v14 = vor.u32 %v1513_v26, %v12945_v45 }
 0x172   : > { %v1677_v36 = vsel %vm12018_vm5, %v1529_v41, %v1676_v54  ;;  %v12960_v0 = vld [vmem:[#allocation3 + $0x18] sm:$0xf]  ;;  %v1498_v54 = vor.u32 %v1496_v20, %v12937_v56 }
 0x173   : > { %v12962_v50 = vld [vmem:[#allocation3 + $0x18] sm:$0xf]  ;;  %1678 = vst [vmem:[#allocation3 + $0x20] sm:$0x1] %v1677_v36  ;;  %v1527_v3 = vpop.permute.xlu0 %1526  ;;  %1843 = vrot.lane.b32.xlu1 %v12837_v6, %s11883_s24  ;;  %v2721_v51 = vshrl.u32 %v12960_v0, 16  ;;  %v2724_v24 = vshll.u32 %v12960_v0, 16 }
 0x174   : > { %v12964_v21 = vld [vmem:[#allocation3 + $0x18] sm:$0xe]  ;;  %1675 = vst.msk [vmem:[#allocation3 + $0x1c] sm:$0xf] %vm927_vm7, %v1527_v3  ;;  %v3306_v41 = vshrl.u32 %v12962_v50, 16  ;;  %v3309_v6 = vshll.u32 %v12962_v50, 16 }
 0x175   : > { %v12979_v36 = vld [vmem:[#allocation3 + $0xc] sm:$0xf]  ;;  %v12981_v12 = vld [vmem:[#allocation3 + $0x18] sm:$0xe]  ;;  %v1788_v8 = vpop.permute.xlu1 %1787  ;;  %1837 = vrot.lane.b32.xlu0 %v12844_v39, %s11883_s24  ;;  %v2723_v10 = vrot.slane %v2721_v51, 4  ;;  %v2726_v58 = vrot.slane %v2724_v24, 5 }
 0x176   : > { %v12987_v20 = vld [vmem:[#allocation3 + $0xc] sm:$0xe]  ;;  %v1934_v62 = vsel %vm12018_vm5, %v1788_v8, %v1933_v49  ;;  %v2697_v37 = vshrl.u32 %v12979_v36, 16  ;;  %v2700_v52 = vshll.u32 %v12979_v36, 16  ;;  %v12996_v39 = vld [vmem:[#allocation3 + $0x18] sm:$0xf] }
 0x177   : > { %v12994_v13 = vld [vmem:[#allocation3 + $0xc] sm:$0xe]  ;;  %18749 = vst [vmem:[#allocation47_spill] sm:$0xff] %v12996_v39  ;;  %1935 = vst [vmem:[#allocation4 + $0x20] sm:$0x1] %v1934_v62  ;;  %v1786_v51 = vpop.permute.xlu0 %1785  ;;  %v18750_v24 = vrot.slane %v12839_v22, 4  ;;  %v2727_v34 = vor.u32 %v2726_v58, %v2723_v10 }
 0x178   : > { %v2134_v49 = vshrl.u32 %v12996_v39, 16  ;;  %v2137_v26 = vshll.u32 %v12996_v39, 16  ;;  %v13004_v8 = vld [vmem:[#allocation3 + $0xc] sm:$0xf]  ;;  %1932 = vst.msk [vmem:[#allocation4 + $0x1c] sm:$0xf] %vm927_vm7, %v1786_v51 }
 0x179   : > { %1588 = vrot.lane.b32.xlu1 %v18750_v24, %s11882_s23  ;;  %18751 = vst [vmem:[#allocation48_spill] sm:$0xff] %v13004_v8  ;;  %v13007_v38 = vrot.slane %v3306_v41, 4  ;;  %v13009_v25 = vrot.slane %v3309_v6, 5  ;;  %v2110_v17 = vshrl.u32 %v13004_v8, 16  ;;  %v1523_v24 = vpop.permute.xlu1 %1522  ;;  %1586 = vrot.lane.b32.xlu0 %v12911_v28, %s11882_s23  ;;  %v1926_v10 = vld [vmem:[#allocation4 + $0x14] sm:$0x1] }
 0x17a   : > { %v13015_v58 = vrot.slane %v2697_v37, 4  ;;  %v2136_v57 = vrot.slane %v2134_v49, 4  ;;  %v2139_v33 = vrot.slane %v2137_v26, 5  ;;  %v1670_v41 = vsel %vm12018_vm5, %v1523_v24, %v1669_v47  ;;  %v2681_v24 = vld [vmem:[#allocation3 + $0x20] sm:$0x1] }
 0x17b   : > { %v13020_v6 = vrot.slane %v2700_v52, 5  ;;  %v13022_v51 = vrot.slane %v2727_v34, 4  ;;  %v2113_v62 = vshll.u32 %v13004_v8, 16  ;;  %1671 = vst [vmem:[#allocation3 + $0x14] sm:$0x1] %v1670_v41  ;;  %v1782_v1 = vpop.permute.xlu0 %1781  ;;  %v18753_v37 = vshll.u32 %v12872_v9, 16 }
 0x17c   : > { %v18754_v26 = vrot.slane %v12918_v60, 4  ;;  %v13041_v47 = vsel %vm12059_vm9, %v1491_v19, %v1498_v54  ;;  %v13043_v34 = vld [vmem:[#allocation3 + $0x1c] sm:$0xf]  ;;  %v13045_v22 = vld [vmem:[#allocation3 + $0x20] sm:$0x1]  ;;  %v13057_v35 = vrot.slane %v2110_v17, 4  ;;  %v2140_v54 = vor.u32 %v2139_v33, %v2136_v57 }
 0x17d   : > { %1847 = vrot.lane.b32.xlu1 %v18752_v15, %s11883_s24  ;;  %v13031_v49 = vor.u32 %v18753_v37, %v12933_v32  ;;  %v13050_v15 = vsel %vm878_vm3, %v12744_v27, %v12689_v55  ;;  %v1927_v32 = vsel %vm12018_vm5, %v1782_v1, %v1926_v10  ;;  %v13055_v9 = vld [vmem:[#allocation3 + $0x1c] sm:$0xf]  ;;  %v1780_v19 = vpop.permute.xlu1 %1779  ;;  %1845 = vrot.lane.b32.xlu0 %v12911_v28, %s11883_s24  ;;  %v3153_v55 = vrot.slane %v13043_v34, 5  ;;  %v1686_v28 = vld [vmem:[#allocation3 + $0x30] sm:$0xf] }
 0x17e   : > { %v13037_v52 = vsel %vm12059_vm9, %v18754_v26, %v1515_v14  ;;  %18755 = vst [vmem:[#allocation49_spill] sm:$0xff] %v13050_v15  ;;  %v2734_v14 = vshrl.u32 %v13043_v34, 16  ;;  %18756 = vst [vmem:[#allocation50_spill] sm:$0xff] %v13055_v9  ;;  %v2552_v27 = vrot.slane %v13055_v9, 5  ;;  %v2730_v1 = vshll.u32 %v13043_v34, 16 }
 0x17f   : > { %1928 = vst [vmem:[#allocation4 + $0x14] sm:$0x1] %v1927_v32  ;;  %1925 = vst.msk [vmem:[#allocation4 + $0x10] sm:$0xf] %vm927_vm7, %v1780_v19  ;;  %v13067_v10 = vld [vmem:[#allocation3 + $0x1c] sm:$0xf]  ;;  %v1521_v32 = vpop.permute.xlu0 %1520 }
 0x180   : > { %v3156_v17 = vrot.slane %v2681_v24, 5  ;;  %v2555_v41 = vrot.slane %v13045_v22, 5  ;;  %v2115_v37 = vrot.slane %v2113_v62, 5  ;;  %v3155_v3 = vrot.slane %v3153_v55, 4  ;;  %1668 = vst.msk [vmem:[#allocation3 + $0x10] sm:$0xf] %vm927_vm7, %v1521_v32 }
 0x181   : > { %1580 = vrot.lane.b32.xlu1 %v12902_v63, %s11882_s23  ;;  %v2554_v60 = vrot.slane %v2552_v27, 4  ;;  %v2736_v61 = vrot.slane %v2734_v14, 4  ;;  %v2143_v57 = vshll.u32 %v13055_v9, 16  ;;  %v13078_v19 = vrot.slane %v2730_v1, 5  ;;  %v1537_v31 = vpop.permute.xlu1 %1536  ;;  %1582 = vrot.lane.b32.xlu0 %v18757_v5, %s11882_s23  ;;  %v18914_v2 = vld [vmem:[#allocation48_spill] sm:$0xff] }
 0x182   : > { %v2740_v62 = vshll.u32 %v2681_v24, 16  ;;  %v2147_v26 = vshrl.u32 %v13055_v9, 16  ;;  %v3319_v14 = vshrl.u32 %v13067_v10, 16  ;;  %v13089_v32 = vsel %vm12335_vm13, %v3155_v3, %v3156_v17  ;;  %v13101_v23 = vld [vmem:[#allocation3 + $0x14] sm:$0x1] }
 0x183   : > { %v13091_v1 = vrot.slane %v2140_v54, 4  ;;  %v1687_v24 = vsel %vm12066_vm10, %v1537_v31, %v1686_v28  ;;  %v18758_v33 = vrot.slane %v12964_v21, 9  ;;  %v18759_v16 = vrot.slane %v12981_v12, 9  ;;  %v1531_v31 = vpop.permute.xlu0 %1530  ;;  %v1943_v21 = vld [vmem:[#allocation4 + $0x30] sm:$0xf] }
 0x184   : > { %v13111_v3 = vsel %vm12335_vm13, %v2554_v60, %v2555_v41  ;;  %1688 = vst [vmem:[#allocation3 + $0x30] sm:$0xf] %v1687_v24  ;;  %v2737_v54 = vor.u32 %v2736_v61, %v13078_v19  ;;  %v13118_v17 = vrot.slane %v2143_v57, 5  ;;  %v2153_v12 = vshll.u32 %v13045_v22, 16  ;;  %v1936_v61 = vld [vmem:[#allocation4 + $0x24] sm:$0xf] }
 0x185   : > { %v13099_v5 = vsel %vm12335_vm13, %v18758_v33, %v3153_v55  ;;  %v13107_v43 = vsel %vm12335_vm13, %v18759_v16, %v2552_v27  ;;  %18761 = vst [vmem:[#allocation52_spill] sm:$0xff] %v13111_v3  ;;  %1839 = vrot.lane.b32.xlu1 %v12902_v63, %s11883_s24  ;;  %v13115_v55 = vld [vmem:[#allocation3 + $0x14] sm:$0x1]  ;;  %v2116_v16 = vor.u32 %v2115_v37, %v13057_v35  ;;  %v2742_v41 = vrot.slane %v2740_v62, 5  ;;  %v1796_v63 = vpop.permute.xlu1 %1795  ;;  %v1690_v57 = vld [vmem:[#allocation3 + $0x38] sm:$0x1] }
 0x186   : > { %18760 = vst [vmem:[#allocation51_spill] sm:$0xff] %v13107_v43  ;;  %v1680_v60 = vsel %vm12066_vm10, %v1531_v31, %v1679_v29  ;;  %v2149_v28 = vrot.slane %v2147_v26, 4  ;;  %v18762_v33 = vrot.slane %v12831_v7, 4  ;;  %v2733_v29 = vsel %vm12353_vm2, %v13022_v51, %v13078_v19  ;;  %v13140_v24 = vld [vmem:[#allocation3 + $0x20] sm:$0x1] }
 0x187   : > { %1681 = vst [vmem:[#allocation3 + $0x24] sm:$0xf] %v1680_v60  ;;  %v2738_v35 = vrot.slane %v2737_v54, 4  ;;  %v2129_v37 = vshll.u32 %v13101_v23, 16  ;;  %v1944_v26 = vsel %vm12066_vm10, %v1796_v63, %v1943_v21  ;;  %v2548_v62 = vrot.slane %v13101_v23, 5  ;;  %v1790_v60 = vpop.permute.xlu0 %1789 }
 0x188   : > { %1841 = vrot.lane.b32.xlu0 %v18762_v33, %s11883_s24  ;;  %v3149_v7 = vrot.slane %v13115_v55, 5  ;;  %v3315_v31 = vshll.u32 %v13067_v10, 16  ;;  %1945 = vst [vmem:[#allocation4 + $0x30] sm:$0xf] %v1944_v26  ;;  %v13145_v51 = vld [vmem:[#allocation3 + $0x10] sm:$0xf]  ;;  %v2150_v54 = vor.u32 %v2149_v28, %v13118_v17  ;;  %v1937_v33 = vsel %vm12066_vm10, %v1790_v60, %v1936_v61 }
 0x189   : > { %1596 = vrot.lane.b32.xlu1 %v12929_v30, %s11882_s23  ;;  %v13147_v19 = vld [vmem:[#allocation3 + $0x10] sm:$0xf]  ;;  %v13150_v21 = vrot.slane %v2153_v12, 5  ;;  %v13152_v23 = vrot.slane %v2116_v16, 4  ;;  %v18764_v22 = vor.u32 %v13009_v25, %v13007_v38  ;;  %v13164_v15 = vrot.slane %v3319_v14, 4  ;;  %v1541_v12 = vpop.permute.xlu1 %1540 }
 0x18a   : > { %18763 = vst [vmem:[#allocation53_spill] sm:$0xff] %v13147_v19  ;;  %v2545_v26 = vrot.slane %v13147_v19, 5  ;;  %1938 = vst [vmem:[#allocation4 + $0x24] sm:$0xf] %v1937_v33  ;;  %v3146_v16 = vrot.slane %v13145_v51, 5  ;;  %v2743_v28 = vsel %vm12353_vm2, %v2738_v35, %v2742_v41  ;;  %v13171_v61 = vrot.slane %v2129_v37, 5 }
 0x18b   : > { %v13162_v27 = vrot.slane %v18764_v22, 4  ;;  %v1691_v25 = vsel %vm12018_vm5, %v1541_v12, %v1690_v57  ;;  %v13176_v14 = vld [vmem:[#allocation3 + $0x30] sm:$0xf]  ;;  %v2146_v33 = vsel %vm12353_vm2, %v13091_v1, %v13118_v17  ;;  %v13184_v63 = vrot.slane %v3315_v31, 5  ;;  %v1539_v41 = vpop.permute.xlu0 %1538 }
 0x18c   : > { %1590 = vrot.lane.b32.xlu0 %v12950_v48, %s11882_s23  ;;  %v2547_v38 = vrot.slane %v2545_v26, 4  ;;  %18765 = vst [vmem:[#allocation54_spill] sm:$0xff] %v13176_v14  ;;  %v13178_v22 = vld [vmem:[#allocation3 + $0x30] sm:$0xf]  ;;  %1692 = vst [vmem:[#allocation3 + $0x38] sm:$0x1] %v1691_v25  ;;  %v13194_v17 = vcombine.low %v2733_v29, %v2743_v28 }
 0x18d   : > { %1855 = vrot.lane.b32.xlu1 %v12929_v30, %s11883_s24  ;;  %v1947_v35 = vld [vmem:[#allocation4 + $0x38] sm:$0x1]  ;;  %v3148_v37 = vrot.slane %v3146_v16, 4  ;;  %v2151_v12 = vrot.slane %v2150_v54, 4  ;;  %v2119_v60 = vshll.u32 %v13147_v19, 16  ;;  %v2769_v1 = vshrl.u32 %v13176_v14, 16  ;;  %v1800_v25 = vpop.permute.xlu1 %1799 }
 0x18e   : > { %1689 = vst.msk [vmem:[#allocation3 + $0x34] sm:$0xf] %vm927_vm7, %v1539_v41  ;;  %18766 = vst [vmem:[#allocation55_spill] sm:$0xff] %v13194_v17  ;;  %v13196_v31 = vld [vmem:[#allocation3 + $0x24] sm:$0xf]  ;;  %v2123_v30 = vshrl.u32 %v13147_v19, 16  ;;  %v13203_v54 = vsel %vm12335_vm13, %v2547_v38, %v2548_v62  ;;  %v1948_v29 = vsel %vm12018_vm5, %v1800_v25, %v1947_v35 }
 0x18f   : > { %18767 = vst [vmem:[#allocation56_spill] sm:$0xff] %v13196_v31  ;;  %18768 = vst [vmem:[#allocation57_spill] sm:$0xff] %v13203_v54  ;;  %v2772_v41 = vshll.u32 %v13176_v14, 16  ;;  %v3354_v9 = vshrl.u32 %v13178_v22, 16  ;;  %v3357_v57 = vshll.u32 %v13178_v22, 16  ;;  %v18769_v28 = vrot.slane %v12987_v20, 9  ;;  %v1798_v17 = vpop.permute.xlu0 %1797 }
 0x190   : > { %1849 = vrot.lane.b32.xlu0 %v12950_v48, %s11883_s24  ;;  %v18770_v48 = vrot.slane %v12994_v13, 9  ;;  %v13224_v38 = vsel %vm12335_vm13, %v3148_v37, %v3149_v7  ;;  %1949 = vst [vmem:[#allocation4 + $0x38] sm:$0x1] %v1948_v29  ;;  %v18773_v35 = vrot.slane %v12894_v46, 4  ;;  %v1683_v20 = vld [vmem:[#allocation3 + $0x2c] sm:$0x1]  ;;  %v2156_v13 = vsel %vm12353_vm2, %v2151_v12, %v13150_v21 }
 0x191   : > { %v13214_v39 = vsel %vm12335_vm13, %v18769_v28, %v2545_v26  ;;  %18772 = vst [vmem:[#allocation59_spill] sm:$0xff] %v13224_v38  ;;  %v3330_v26 = vshrl.u32 %v13196_v31, 16  ;;  %v3333_v25 = vshll.u32 %v13196_v31, 16  ;;  %1946 = vst.msk [vmem:[#allocation4 + $0x34] sm:$0xf] %vm927_vm7, %v1798_v17  ;;  %v13239_v37 = vrot.slane %v2769_v1, 4  ;;  %v1533_v3 = vpop.permute.xlu1 %1532 }
 0x192   : > { %v13220_v62 = vsel %vm12335_vm13, %v18770_v48, %v3146_v16  ;;  %1600 = vrot.lane.b32.xlu1 %v18773_v35, %s11882_s23  ;;  %v13234_v16 = vrot.slane %v2119_v60, 5  ;;  %v2125_v29 = vrot.slane %v2123_v30, 4  ;;  %v3322_v28 = vor.u32 %v13164_v15, %v13184_v63  ;;  %v13243_v48 = vld [vmem:[#allocation3 + $0x30] sm:$0xe]  ;;  %v13245_v35 = vld [vmem:[#allocation3 + $0x24] sm:$0xf] }
 0x193   : > { %18771 = vst [vmem:[#allocation58_spill] sm:$0xff] %v13220_v62  ;;  %18774 = vst [vmem:[#allocation60_spill] sm:$0xff] %v13245_v35  ;;  %v13249_v21 = vrot.slane %v2772_v41, 5  ;;  %v13253_v12 = vrot.slane %v3354_v9, 4  ;;  %v13255_v1 = vrot.slane %v3357_v57, 5  ;;  %v13260_v15 = vrot.slane %v3330_v26, 4  ;;  %v1535_v54 = vpop.permute.xlu0 %1534 }
 0x194   : > { %1598 = vrot.lane.b32.xlu0 %v12954_v40, %s11882_s23  ;;  %v13257_v17 = vld [vmem:[#allocation3 + $0x24] sm:$0xe]  ;;  %1682 = vst.msk [vmem:[#allocation3 + $0x28] sm:$0xf] %vm927_vm7, %v1533_v3  ;;  %v13262_v30 = vrot.slane %v3333_v25, 5  ;;  %v2126_v7 = vor.u32 %v2125_v29, %v13234_v16  ;;  %v3323_v43 = vrot.slane %v3322_v28, 4  ;;  %v13272_v60 = vcombine.low %v2146_v33, %v2156_v13 }
 0x195   : > { %v13265_v41 = vld [vmem:[#allocation3 + $0x38] sm:$0x1]  ;;  %v18775_v9 = vrot.slane %v12894_v46, 4  ;;  %v13270_v57 = vld [vmem:[#allocation3 + $0x34] sm:$0xf]  ;;  %v2122_v3 = vsel %vm12353_vm2, %v13152_v23, %v13234_v16  ;;  %v3318_v26 = vsel %vm12353_vm2, %v13162_v27, %v13184_v63  ;;  %v18777_v25 = vshll.u32 %v13140_v24, 16  ;;  %v1792_v23 = vpop.permute.xlu1 %1791 }
 0x196   : > { %18776 = vst [vmem:[#allocation61_spill] sm:$0xff] %v13272_v60  ;;  %v1684_v46 = vsel %vm12018_vm5, %v1535_v54, %v1683_v20  ;;  %v1940_v28 = vld [vmem:[#allocation4 + $0x2c] sm:$0x1]  ;;  %v10859_v33 = vrot.slane %v13243_v48, 9  ;;  %v2745_v13 = vshrl.u32 %v13245_v35, 16  ;;  %v2127_v27 = vrot.slane %v2126_v7, 4 }
 0x197   : > { %1859 = vrot.lane.b32.xlu1 %v18775_v9, %s11883_s24  ;;  %v3327_v29 = vrot.slane %v18777_v25, 5  ;;  %v2748_v9 = vshll.u32 %v13245_v35, 16  ;;  %1685 = vst [vmem:[#allocation3 + $0x2c] sm:$0x1] %v1684_v46  ;;  %v13291_v16 = vld [vmem:[#allocation3 + $0x34] sm:$0xf]  ;;  %v1794_v7 = vpop.permute.xlu0 %1793 }
 0x198   : > { %1857 = vrot.lane.b32.xlu0 %v12954_v40, %s11883_s24  ;;  %v3167_v24 = vrot.slane %v13270_v57, 5  ;;  %v3170_v63 = vrot.slane %v13265_v41, 5  ;;  %1939 = vst.msk [vmem:[#allocation4 + $0x28] sm:$0xf] %vm927_vm7, %v1792_v23  ;;  %v1700_v46 = vld [vmem:[#allocation3 + $0x48] sm:$0xf]  ;;  %v2132_v23 = vsel %vm12353_vm2, %v2127_v27, %v13171_v61 }
 0x199   : > { %v3328_v48 = vsel %vm12353_vm2, %v3323_v43, %v3327_v29  ;;  %v2706_v43 = vshll.u32 %v13145_v51, 16  ;;  %v1941_v29 = vsel %vm12018_vm5, %v1794_v7, %v1940_v28  ;;  %v1693_v25 = vld [vmem:[#allocation3 + $0x3c] sm:$0xf]  ;;  %v13315_v60 = vrot.slane %v2745_v13, 4  ;;  %v1549_v62 = vpop.permute.xlu1 %1548  ;;  %v1950_v7 = vld [vmem:[#allocation4 + $0x3c] sm:$0xf] }
 0x19a   : > { %v3169_v20 = vrot.slane %v3167_v24, 4  ;;  %v13317_v38 = vrot.slane %v2748_v9, 5  ;;  %1942 = vst [vmem:[#allocation4 + $0x2c] sm:$0x1] %v1941_v29  ;;  %v18778_v54 = vrot.slane %v12885_v59, 4  ;;  %v13324_v27 = vcombine.low %v3318_v26, %v3328_v48 }
 0x19b   : > { %1592 = vrot.lane.b32.xlu1 %v12958_v11, %s11882_s23  ;;  %v13326_v14 = vld [vmem:[#allocation3 + $0x28] sm:$0xf]  ;;  %v18780_v28 = vor.u32 %v13020_v6, %v13015_v58  ;;  %v13333_v9 = vld [vmem:[#allocation3 + $0x34] sm:$0xf]  ;;  %v1957_v29 = vld [vmem:[#allocation4 + $0x48] sm:$0xf]  ;;  %v13341_v26 = vcombine.low %v2122_v3, %v2132_v23  ;;  %v13345_v48 = vsel %vm12335_vm13, %v10859_v33, %v3167_v24 }
 0x19c   : > { %1594 = vrot.lane.b32.xlu0 %v18778_v54, %s11882_s23  ;;  %18779 = vst [vmem:[#allocation62_spill] sm:$0xff] %v13324_v27  ;;  %v1701_v54 = vsel %vm12066_vm10, %v1549_v62, %v1700_v46  ;;  %v13339_v40 = vld [vmem:[#allocation3 + $0x28] sm:$0xf]  ;;  %18782 = vst [vmem:[#allocation64_spill] sm:$0xff] %v13345_v48  ;;  %v18783_v58 = vshrl.u32 %v13145_v51, 16  ;;  %v13353_v62 = vsel %vm12335_vm13, %v3169_v20, %v3170_v63  ;;  %v2559_v3 = vrot.slane %v13326_v14, 5 }
 0x19d   : > { %v13331_v13 = vrot.slane %v18780_v28, 4  ;;  %18781 = vst [vmem:[#allocation63_spill] sm:$0xff] %v13341_v26  ;;  %1702 = vst [vmem:[#allocation3 + $0x48] sm:$0xf] %v1701_v54  ;;  %v1543_v28 = vpop.permute.xlu0 %1542  ;;  %v13356_v46 = vrot.slane %v2706_v43, 5  ;;  %v2716_v33 = vshll.u32 %v13115_v55, 16  ;;  %v1808_v20 = vpop.permute.xlu1 %1807 }
 0x19e   : > { %v2712_v6 = vrot.slane %v18783_v58, 4  ;;  %18784 = vst [vmem:[#allocation65_spill] sm:$0xff] %v13353_v62  ;;  %v1694_v24 = vsel %vm12066_vm10, %v1543_v28, %v1693_v25  ;;  %v13361_v23 = vld [vmem:[#allocation3 + $0x28] sm:$0xf]  ;;  %v13363_v54 = vld [vmem:[#allocation3 + $0x2c] sm:$0x1]  ;;  %v1958_v58 = vsel %vm12066_vm10, %v1808_v20, %v1957_v29 }
 0x19f   : > { %1851 = vrot.lane.b32.xlu1 %v12958_v11, %s11883_s24  ;;  %v2566_v11 = vrot.slane %v13333_v9, 5  ;;  %1695 = vst [vmem:[#allocation3 + $0x3c] sm:$0xf] %v1694_v24  ;;  %v18785_v55 = vrot.slane %v12885_v59, 4  ;;  %v2561_v28 = vrot.slane %v2559_v3, 4  ;;  %v2562_v61 = vrot.slane %v13363_v54, 5 }
 0x1a0   : > { %v13377_v19 = vld [vmem:[#allocation3 + $0x38] sm:$0x1]  ;;  %v2713_v63 = vor.u32 %v2712_v6, %v13356_v46  ;;  %v2473_v59 = vld [vmem:[#allocation3 + $0x30] sm:$0xe]  ;;  %1959 = vst [vmem:[#allocation4 + $0x48] sm:$0xf] %v1958_v58 }
 0x1a1   : > { %1853 = vrot.lane.b32.xlu0 %v18785_v55, %s11883_s24  ;;  %v2568_v55 = vrot.slane %v2566_v11, 4  ;;  %v1802_v25 = vpop.permute.xlu0 %1801  ;;  %v1704_v43 = vld [vmem:[#allocation3 + $0x50] sm:$0x1]  ;;  %v2718_v26 = vrot.slane %v2716_v33, 5  ;;  %v2778_v29 = vshll.u32 %v13270_v57, 16  ;;  %v2569_v24 = vrot.slane %v13377_v19, 5  ;;  %v1553_v48 = vpop.permute.xlu1 %1552 }
 0x1a2   : > { %v1951_v20 = vsel %vm12066_vm10, %v1802_v25, %v1950_v7  ;;  %v2714_v6 = vrot.slane %v2713_v63, 4  ;;  %v18786_v58 = vshrl.u32 %v13270_v57, 16  ;;  %v18787_v8 = vrot.slane %v13257_v17, 9  ;;  %v3082_v27 = vld [vmem:[#allocation3 + $0x24] sm:$0xe] }
 0x1a3   : > { %1608 = vrot.lane.b32.xlu1 %v12974_v53, %s11882_s23  ;;  %1952 = vst [vmem:[#allocation4 + $0x3c] sm:$0xf] %v1951_v20  ;;  %v13405_v7 = vsel %vm12335_vm13, %v2561_v28, %v2562_v61  ;;  %v10844_v63 = vrot.slane %v2473_v59, 9  ;;  %v13407_v25 = vrot.slane %v2778_v29, 5  ;;  %v1705_v20 = vsel %vm12018_vm5, %v1553_v48, %v1704_v43  ;;  %v13421_v61 = vld [vmem:[#allocation3 + $0x2c] sm:$0x1] }
 0x1a4   : > { %v2784_v62 = vrot.slane %v18786_v58, 4  ;;  %v13401_v33 = vsel %vm12335_vm13, %v18787_v8, %v2559_v3  ;;  %18789 = vst [vmem:[#allocation67_spill] sm:$0xff] %v13405_v7  ;;  %v2709_v17 = vsel %vm12353_vm2, %v13331_v13, %v13356_v46  ;;  %v13415_v58 = vld [vmem:[#allocation3 + $0x48] sm:$0xf]  ;;  %v13419_v8 = vsel %vm12335_vm13, %v2568_v55, %v2569_v24  ;;  %1706 = vst [vmem:[#allocation3 + $0x50] sm:$0x1] %v1705_v20 }
 0x1a5   : > { %1602 = vrot.lane.b32.xlu0 %v13031_v49, %s11882_s23  ;;  %18788 = vst [vmem:[#allocation66_spill] sm:$0xff] %v13401_v33  ;;  %18790 = vst [vmem:[#allocation68_spill] sm:$0xff] %v13419_v8  ;;  %v3160_v3 = vrot.slane %v13361_v23, 5  ;;  %v1551_v28 = vpop.permute.xlu0 %1550  ;;  %v1961_v48 = vld [vmem:[#allocation4 + $0x50] sm:$0x1]  ;;  %v2719_v43 = vsel %vm12353_vm2, %v2714_v6, %v2718_v26  ;;  %v13430_v13 = vsel %vm12335_vm13, %v10844_v63, %v2566_v11  ;;  %v2788_v59 = vshll.u32 %v13265_v41, 16  ;;  %v1812_v63 = vpop.permute.xlu1 %1811 }
 0x1a6   : > { %18791 = vst [vmem:[#allocation69_spill] sm:$0xff] %v13430_v13  ;;  %v18792_v46 = vor.u32 %v13249_v21, %v13239_v37  ;;  %1703 = vst.msk [vmem:[#allocation3 + $0x4c] sm:$0xf] %vm927_vm7, %v1551_v28  ;;  %v2820_v29 = vshll.u32 %v13415_v58, 16  ;;  %v2785_v26 = vor.u32 %v2784_v62, %v13407_v25  ;;  %v13442_v6 = vld [vmem:[#allocation3 + $0x3c] sm:$0xf]  ;;  %v13453_v62 = vcombine.low %v2709_v17, %v2719_v43 }
 0x1a7   : > { %1867 = vrot.lane.b32.xlu1 %v12974_v53, %s11883_s24  ;;  %v2817_v53 = vshrl.u32 %v13415_v58, 16  ;;  %v2040_v11 = vld [vmem:[#allocation3 + $0x24] sm:$0xf]  ;;  %v10858_v21 = vrot.slane %v3082_v27, 9  ;;  %v3162_v41 = vrot.slane %v3160_v3, 4  ;;  %v3163_v20 = vrot.slane %v13421_v61, 5 }
 0x1a8   : > { %v2776_v24 = vrot.slane %v18792_v46, 4  ;;  %v13449_v28 = vld [vmem:[#allocation3 + $0x48] sm:$0xf]  ;;  %v1962_v46 = vsel %vm12018_vm5, %v1812_v63, %v1961_v48  ;;  %18794 = vst [vmem:[#allocation71_spill] sm:$0xff] %v13453_v62  ;;  %v2786_v7 = vrot.slane %v2785_v26, 4  ;;  %v18795_v27 = vrot.slane %v12945_v45, 4 }
 0x1a9   : > { %1861 = vrot.lane.b32.xlu0 %v13031_v49, %s11883_s24  ;;  %18793 = vst [vmem:[#allocation70_spill] sm:$0xff] %v13449_v28  ;;  %1963 = vst [vmem:[#allocation4 + $0x50] sm:$0x1] %v1962_v46  ;;  %v1810_v49 = vpop.permute.xlu0 %1809  ;;  %v2790_v37 = vrot.slane %v2788_v59, 5  ;;  %v3378_v8 = vshrl.u32 %v13442_v6, 16  ;;  %v3381_v13 = vshll.u32 %v13442_v6, 16  ;;  %v1545_v26 = vpop.permute.xlu1 %1544 }
 0x1aa   : > { %v2781_v55 = vsel %vm12353_vm2, %v2776_v24, %v13407_v25  ;;  %v2158_v33 = vshrl.u32 %v2040_v11, 16  ;;  %v2042_v48 = vld [vmem:[#allocation3 + $0x30] sm:$0xf]  ;;  %1960 = vst.msk [vmem:[#allocation4 + $0x4c] sm:$0xf] %vm927_vm7, %v1810_v49  ;;  %v13464_v17 = vrot.slane %v2817_v53, 4  ;;  %v13470_v25 = vsel %vm12335_vm13, %v10858_v21, %v3160_v3 }
 0x1ab   : > { %1612 = vrot.lane.b32.xlu1 %v18795_v27, %s11882_s23  ;;  %v13466_v43 = vrot.slane %v2820_v29, 5  ;;  %18796 = vst [vmem:[#allocation72_spill] sm:$0xff] %v13470_v25  ;;  %v3402_v24 = vshrl.u32 %v13449_v28, 16  ;;  %v1697_v59 = vld [vmem:[#allocation3 + $0x44] sm:$0x1]  ;;  %v2791_v63 = vsel %vm12353_vm2, %v2786_v7, %v2790_v37  ;;  %v13479_v53 = vsel %vm12335_vm13, %v3162_v41, %v3163_v20 }
 0x1ac   : > { %18797 = vst [vmem:[#allocation73_spill] sm:$0xff] %v13479_v53  ;;  %v3405_v29 = vshll.u32 %v13449_v28, 16  ;;  %v2161_v46 = vshll.u32 %v2040_v11, 16  ;;  %1696 = vst.msk [vmem:[#allocation3 + $0x40] sm:$0xf] %vm927_vm7, %v1545_v26  ;;  %v2160_v3 = vrot.slane %v2158_v33, 4  ;;  %v13496_v26 = vcombine.low %v2781_v55, %v2791_v63 }
 0x1ad   : > { %1610 = vrot.lane.b32.xlu0 %v13037_v52, %s11882_s23  ;;  %v2167_v21 = vshll.u32 %v13326_v14, 16  ;;  %v2171_v49 = vshrl.u32 %v13326_v14, 16  ;;  %v2182_v27 = vshrl.u32 %v2042_v48, 16  ;;  %v1547_v62 = vpop.permute.xlu0 %1546  ;;  %v18798_v35 = vrot.slane %v12945_v45, 4  ;;  %v13494_v33 = vld [vmem:[#allocation3 + $0x4c] sm:$0xf]  ;;  %v1804_v45 = vpop.permute.xlu1 %1803 }
 0x1ae   : > { %v13488_v7 = vrot.slane %v3378_v8, 4  ;;  %v13490_v37 = vrot.slane %v3381_v13, 5  ;;  %v2163_v41 = vrot.slane %v2161_v46, 5  ;;  %v2185_v20 = vshll.u32 %v2042_v48, 16  ;;  %1953 = vst.msk [vmem:[#allocation4 + $0x40] sm:$0xf] %vm927_vm7, %v1804_v45 }
 0x1af   : > { %1871 = vrot.lane.b32.xlu1 %v18798_v35, %s11883_s24  ;;  %v1698_v11 = vsel %vm12018_vm5, %v1547_v62, %v1697_v59  ;;  %v13500_v31 = vrot.slane %v3402_v24, 4  ;;  %v1954_v35 = vld [vmem:[#allocation4 + $0x44] sm:$0x1]  ;;  %v13504_v8 = vrot.slane %v3405_v29, 5  ;;  %v13506_v13 = vrot.slane %v2167_v21, 5 }
 0x1b0   : > { %1699 = vst [vmem:[#allocation3 + $0x44] sm:$0x1] %v1698_v11  ;;  %v2173_v62 = vrot.slane %v2171_v49, 4  ;;  %v2177_v48 = vshll.u32 %v13363_v54, 16  ;;  %v13510_v55 = vld [vmem:[#allocation3 + $0x4c] sm:$0xf]  ;;  %v2164_v59 = vor.u32 %v2163_v41, %v2160_v3 }
 0x1b1   : > { %1869 = vrot.lane.b32.xlu0 %v13037_v52, %s11883_s24  ;;  %v2184_v24 = vrot.slane %v2182_v27, 4  ;;  %v2187_v63 = vrot.slane %v2185_v20, 5  ;;  %v2191_v46 = vshll.u32 %v13333_v9, 16  ;;  %v1806_v11 = vpop.permute.xlu0 %1805  ;;  %v1714_v52 = vld [vmem:[#allocation3 + $0x60] sm:$0xf]  ;;  %v2195_v21 = vshrl.u32 %v13333_v9, 16  ;;  %v1561_v14 = vpop.permute.xlu1 %1560 }
 0x1b2   : > { %v1955_v3 = vsel %vm12018_vm5, %v1806_v11, %v1954_v35  ;;  %v1707_v27 = vld [vmem:[#allocation3 + $0x54] sm:$0xf]  ;;  %v2174_v20 = vor.u32 %v2173_v62, %v13506_v13  ;;  %v18799_v9 = vrot.slane %v12937_v56, 4  ;;  %v2201_v11 = vshll.u32 %v13377_v19, 16  ;;  %v3290_v29 = vld [vmem:[#allocation3 + $0x2c] sm:$0x1] }
 0x1b3   : > { %1604 = vrot.lane.b32.xlu1 %v13041_v47, %s11882_s23  ;;  %v13526_v45 = vrot.slane %v2191_v46, 5  ;;  %1956 = vst [vmem:[#allocation4 + $0x44] sm:$0x1] %v1955_v3  ;;  %v2197_v35 = vrot.slane %v2195_v21, 4  ;;  %v1715_v62 = vsel %vm12066_vm10, %v1561_v14, %v1714_v52  ;;  %v1971_v46 = vld [vmem:[#allocation4 + $0x60] sm:$0xf]  ;;  %v2188_v53 = vor.u32 %v2187_v63, %v2184_v24 }
 0x1b4   : > { %v13537_v41 = vrot.slane %v2164_v59, 4  ;;  %v13539_v3 = vrot.slane %v2177_v48, 5  ;;  %1716 = vst [vmem:[#allocation3 + $0x60] sm:$0xf] %v1715_v62  ;;  %v13543_v54 = vld [vmem:[#allocation3 + $0x40] sm:$0xf]  ;;  %v18800_v19 = vor.u32 %v13262_v30, %v13260_v15 }
 0x1b5   : > { %1606 = vrot.lane.b32.xlu0 %v18799_v9, %s11882_s23  ;;  %v1555_v9 = vpop.permute.xlu0 %1554  ;;  %v2198_v21 = vor.u32 %v2197_v35, %v13526_v45  ;;  %v3339_v14 = vshll.u32 %v13339_v40, 16  ;;  %v18801_v48 = vshrl.u32 %v13339_v40, 16  ;;  %v1964_v63 = vld [vmem:[#allocation4 + $0x54] sm:$0xf]  ;;  %v2175_v52 = vrot.slane %v2174_v20, 4  ;;  %v1820_v15 = vpop.permute.xlu1 %1819  ;;  %s18678_s23 = smov 16  }
 0x1b6   : > { %v13549_v49 = vrot.slane %v18800_v19, 4  ;;  %v1708_v24 = vsel %vm12066_vm10, %v1555_v9, %v1707_v27  ;;  %v3349_v35 = vshll.u32 %v3290_v29, 16  ;;  %v18802_v30 = vrot.slane %v12937_v56, 4  ;;  %v3291_v28 = vld [vmem:[#allocation3 + $0x38] sm:$0x1] }
 0x1b7   : > { %1863 = vrot.lane.b32.xlu1 %v13041_v47, %s11883_s24  ;;  %v3345_v59 = vrot.slane %v18801_v48, 4  ;;  %v2170_v47 = vsel %vm12353_vm2, %v13537_v41, %v13506_v13  ;;  %1709 = vst [vmem:[#allocation3 + $0x54] sm:$0xf] %v1708_v24  ;;  %v2199_v62 = vrot.slane %v2198_v21, 4  ;;  %v2203_v19 = vrot.slane %v2201_v11, 5 }
 0x1b8   : > { %v3341_v48 = vrot.slane %v3339_v14, 5  ;;  %v3363_v27 = vshll.u32 %v13291_v16, 16  ;;  %v1972_v9 = vsel %vm12066_vm10, %v1820_v15, %v1971_v46  ;;  %v2189_v13 = vrot.slane %v2188_v53, 4  ;;  %v1718_v11 = vld [vmem:[#allocation3 + $0x68] sm:$0x1] }
 0x1b9   : > { %1865 = vrot.lane.b32.xlu0 %v18802_v30, %s11883_s24  ;;  %v18803_v29 = vshrl.u32 %v13291_v16, 16  ;;  %1973 = vst [vmem:[#allocation4 + $0x60] sm:$0xf] %v1972_v9  ;;  %v1814_v20 = vpop.permute.xlu0 %1813  ;;  %v18804_v56 = vcombine.low %v12960_v0, %v13043_v34  ;;  %v3351_v46 = vrot.slane %v3349_v35, 5  ;;  %v13577_v53 = vld [vmem:[#allocation3 + $0x3c] sm:$0xf]  ;;  %v2180_v30 = vsel %vm12353_vm2, %v2175_v52, %v13539_v3 }
 0x1ba   : > { %v3346_v14 = vor.u32 %v3345_v59, %v3341_v48  ;;  %v13575_v24 = vrot.slane %v3363_v27, 5  ;;  %v1965_v15 = vsel %vm12066_vm10, %v1814_v20, %v1964_v63  ;;  %v2194_v0 = vsel %vm12353_vm2, %v2189_v13, %v13526_v45  ;;  %v3085_v9 = vld [vmem:[#allocation3 + $0x48] sm:$0xe]  ;;  %v1565_v59 = vpop.permute.xlu1 %1564  ;;  %v1028_v52 = vld [vmem:[#allocation3 + $0x8c] sm:$0x1]  ;;  %s18673_s24 = sand.u32 1, %s11867_s26  }
 0x1bb   : > { %v3369_v41 = vrot.slane %v18803_v29, 4  ;;  %4155 = vrot.lane.b32.xlu1 %v18804_v56, %s18680_s30  ;;  %v3373_v34 = vshll.u32 %v3291_v28, 16  ;;  %1966 = vst [vmem:[#allocation4 + $0x54] sm:$0xf] %v1965_v15  ;;  %v18805_v35 = vcombine.low %v12962_v50, %v13067_v10  ;;  %v2204_v63 = vsel %vm12353_vm2, %v2199_v62, %v2203_v19  ;;  %v13600_v20 = vld [vmem:[#allocation3 + $0x50] sm:$0x1] }
 0x1bc   : > { %v3347_v27 = vrot.slane %v3346_v14, 4  ;;  %v3181_v3 = vrot.slane %v13494_v33, 5  ;;  %v1719_v28 = vsel %vm12018_vm5, %v1565_v59, %v1718_v11  ;;  %v18806_v45 = vor.u32 %v13255_v1, %v13253_v12  ;;  %v1721_v25 = vld [vmem:[#allocation3 + $0x6c] sm:$0xf] }
 0x1bd   : > { %4409 = vrot.lane.b32.xlu0 %v18805_v35, %s18671_s16  ;;  %v3370_v29 = vor.u32 %v3369_v41, %v13575_v24  ;;  %v2793_v50 = vshrl.u32 %v13577_v53, 16  ;;  %v2796_v10 = vshll.u32 %v13577_v53, 16  ;;  %1720 = vst [vmem:[#allocation3 + $0x68] sm:$0x1] %v1719_v28  ;;  %v1563_v62 = vpop.permute.xlu0 %1562  ;;  %v18807_v19 = vcombine.low %v13099_v5, %v13089_v32  ;;  %v1975_v41 = vld [vmem:[#allocation4 + $0x68] sm:$0x1] }
 0x1be   : > { %v3361_v13 = vrot.slane %v18806_v45, 4  ;;  %v3352_v56 = vsel %vm12353_vm2, %v3347_v27, %v3351_v46  ;;  %v10861_v1 = vrot.slane %v3085_v9, 9  ;;  %v3183_v11 = vrot.slane %v3181_v3, 4  ;;  %1717 = vst.msk [vmem:[#allocation3 + $0x64] sm:$0xf] %vm927_vm7, %v1563_v62  ;;  %v1824_v5 = vpop.permute.xlu1 %1823 }
 0x1bf   : > { %4315 = vrot.lane.b32.xlu1 %v18807_v19, %s18676_s15  ;;  %v3371_v12 = vrot.slane %v3370_v29, 4  ;;  %v13611_v14 = vcombine.low %v2170_v47, %v2180_v30  ;;  %v13613_v15 = vcombine.low %v2194_v0, %v2204_v63  ;;  %v3342_v59 = vsel %vm12353_vm2, %v13549_v49, %v3341_v48  ;;  %v13618_v32 = vld [vmem:[#allocation3 + $0x40] sm:$0xf]  ;;  %v13634_v48 = vld [vmem:[#allocation3 + $0x44] sm:$0x1] }
 0x1c0   : > { %v3375_v35 = vrot.slane %v3373_v34, 5  ;;  %v18808_v46 = vcombine.low %v12979_v36, %v13145_v51  ;;  %v3366_v47 = vsel %vm12353_vm2, %v3361_v13, %v13575_v24  ;;  %v13629_v30 = vsel %vm12335_vm13, %v10861_v1, %v3181_v3  ;;  %v1143_v34 = vld [vmem:[#allocation4 + $0x8c] sm:$0x1]  ;;  %v13640_v9 = vld [vmem:[#allocation3 + $0x40] sm:$0xf]  ;;  %v18810_v3 = vld [vmem:[#allocation57_spill] sm:$0xff] }
 0x1c1   : > { %v3184_v0 = vrot.slane %v13600_v20, 5  ;;  %v1029_v49 = vsel %vm12024_vm6, 0, %v1028_v52  ;;  %v1976_v36 = vsel %vm12018_vm5, %v1824_v5, %v1975_v41  ;;  %v13638_v51 = vcombine.low %v3342_v59, %v3352_v56  ;;  %v13646_v27 = vld [vmem:[#allocation3 + $0x60] sm:$0xf]  ;;  %v1822_v29 = vpop.permute.xlu0 %1821  ;;  %v2474_v13 = vld [vmem:[#allocation3 + $0x3c] sm:$0xe] }
 0x1c2   : > { %4153 = vrot.lane.b32.xlu0 %v18808_v46, %s18680_s30  ;;  %v13642_v24 = vrot.slane %v2793_v50, 4  ;;  %v13644_v63 = vrot.slane %v2796_v10, 5  ;;  %1030 = vst [vmem:[#allocation3 + $0x8c] sm:$0x1] %v1029_v49  ;;  %18809 = vst [vmem:[#allocation74_spill] sm:$0xff] %v13646_v27  ;;  %v18811_v52 = vcombine.low %v13214_v39, %v18810_v3  ;;  %v3376_v28 = vsel %vm12353_vm2, %v3371_v12, %v3375_v35  ;;  %v1557_v1 = vpop.permute.xlu1 %1556  ;;  %v18814_v59 = vld [vmem:[#allocation52_spill] sm:$0xff] }
 0x1c3   : > { %1977 = vst [vmem:[#allocation4 + $0x68] sm:$0x1] %v1976_v36  ;;  %v13656_v45 = vsel %vm12335_vm13, %v3183_v11, %v3184_v0  ;;  %v2573_v50 = vrot.slane %v13618_v32, 5  ;;  %v2754_v10 = vshll.u32 %v13361_v23, 16  ;;  %v981_v62 = vld [vmem:[#allocation3 + $0xa8] sm:$0x1] }
 0x1c4   : > { %4059 = vrot.lane.b32.xlu1 %v18811_v52, %s18682_s20  ;;  %1974 = vst.msk [vmem:[#allocation4 + $0x64] sm:$0xf] %vm927_vm7, %v1822_v29  ;;  %v2576_v19 = vrot.slane %v13634_v48, 5  ;;  %v18812_v39 = vshrl.u32 %v13361_v23, 16  ;;  %v2764_v56 = vshll.u32 %v13421_v61, 16  ;;  %v1144_v12 = vsel %vm12024_vm6, 0, %v1143_v34 }
 0x1c5   : > { %v18813_v11 = vld [vmem:[#allocation51_spill] sm:$0xff]  ;;  %v1711_v5 = vld [vmem:[#allocation3 + $0x5c] sm:$0x1]  ;;  %v2575_v0 = vrot.slane %v2573_v50, 4  ;;  %v13672_v49 = vrot.slane %v2754_v10, 5  ;;  %v2865_v36 = vshrl.u32 %v13646_v27, 16  ;;  %v13676_v61 = vcombine.low %v3366_v47, %v3376_v28 }
 0x1c6   : > { %v2760_v41 = vrot.slane %v18812_v39, 4  ;;  %v18815_v35 = vcombine.low %v18813_v11, %v18814_v59  ;;  %1145 = vst [vmem:[#allocation4 + $0x8c] sm:$0x1] %v1144_v12  ;;  %1710 = vst.msk [vmem:[#allocation3 + $0x58] sm:$0xf] %vm927_vm7, %v1557_v1  ;;  %v10845_v29 = vrot.slane %v2474_v13, 9  ;;  %v1559_v11 = vpop.permute.xlu0 %1558  ;;  %v18818_v28 = vor.u32 %v13317_v38, %v13315_v60 }
 0x1c7   : > { %v982_v3 = vsel %vm12018_vm5, 0, %v981_v62  ;;  %v13682_v52 = vld [vmem:[#allocation3 + $0x4c] sm:$0xf]  ;;  %v978_v39 = vld [vmem:[#allocation3 + $0x9c] sm:$0x1]  ;;  %v18816_v10 = vld [vmem:[#allocation54_spill] sm:$0xff]  ;;  %v13707_v38 = vsel %vm12335_vm13, %v2575_v0, %v2576_v19 }
 0x1c8   : > { %4061 = vrot.lane.b32.xlu0 %v18815_v35, %s18682_s20  ;;  %v18817_v12 = vcombine.low %v18816_v10, %v13270_v57  ;;  %v13693_v1 = vrot.slane %v18818_v28, 4  ;;  %v2761_v13 = vor.u32 %v2760_v41, %v13672_v49  ;;  %v2868_v62 = vshll.u32 %v13646_v27, 16  ;;  %983 = vst [vmem:[#allocation3 + $0xa8] sm:$0x1] %v982_v3  ;;  %v13697_v59 = vld [vmem:[#allocation3 + $0x48] sm:$0xe]  ;;  %v1816_v41 = vpop.permute.xlu1 %1815 }
 0x1c9   : > { %v1712_v35 = vsel %vm12018_vm5, %v1559_v11, %v1711_v5  ;;  %v1968_v57 = vld [vmem:[#allocation4 + $0x5c] sm:$0x1]  ;;  %v13703_v10 = vsel %vm12335_vm13, %v10845_v29, %v2573_v50  ;;  %18820 = vst [vmem:[#allocation51_spill] sm:$0xff] %v13707_v38  ;;  %v2766_v60 = vrot.slane %v2764_v56, 5  ;;  %v18821_v3 = vld [vmem:[#allocation58_spill] sm:$0xff]  ;;  %v18822_v28 = vld [vmem:[#allocation59_spill] sm:$0xff] }
 0x1ca   : > { %4159 = vrot.lane.b32.xlu1 %v18817_v12, %s18680_s30  ;;  %18819 = vst [vmem:[#allocation57_spill] sm:$0xff] %v13703_v10  ;;  %v1098_v12 = vld [vmem:[#allocation4 + $0xa8] sm:$0x1]  ;;  %1713 = vst [vmem:[#allocation3 + $0x5c] sm:$0x1] %v1712_v35  ;;  %v18823_v34 = vcombine.low %v18821_v3, %v18822_v28  ;;  %v2762_v5 = vrot.slane %v2761_v13, 4  ;;  %v2757_v56 = vsel %vm12353_vm2, %v13693_v1, %v13672_v49  ;;  %v1818_v35 = vpop.permute.xlu0 %1817 }
 0x1cb   : > { %v1728_v47 = vld [vmem:[#allocation3 + $0x78] sm:$0xf]  ;;  %v13713_v11 = vld [vmem:[#allocation3 + $0x64] sm:$0xf]  ;;  %v13715_v46 = vrot.slane %v2865_v36, 4  ;;  %v2580_v50 = vrot.slane %v13682_v52, 5  ;;  %v1969_v28 = vsel %vm12018_vm5, %v1818_v35, %v1968_v57 }
 0x1cc   : > { %4313 = vrot.lane.b32.xlu0 %v18823_v34, %s18676_s15  ;;  %v979_v19 = vsel %vm12018_vm5, 0, %v978_v39  ;;  %1967 = vst.msk [vmem:[#allocation4 + $0x58] sm:$0xf] %vm927_vm7, %v1816_v41  ;;  %v13725_v0 = vld [vmem:[#allocation3 + $0x50] sm:$0x1]  ;;  %v10846_v34 = vrot.slane %v13697_v59, 9  ;;  %v1573_v21 = vpop.permute.xlu1 %1572  ;;  %v2767_v57 = vsel %vm12353_vm2, %v2762_v5, %v2766_v60 }
 0x1cd   : > { %980 = vst [vmem:[#allocation3 + $0x9c] sm:$0x1] %v979_v19  ;;  %v2826_v36 = vshll.u32 %v13494_v33, 16  ;;  %v18824_v29 = vshrl.u32 %v13494_v33, 16  ;;  %v18825_v39 = vld [vmem:[#allocation55_spill] sm:$0xff]  ;;  %v13735_v3 = vrot.slane %v2868_v62, 5 }
 0x1ce   : > { %4235 = vrot.lane.b32.xlu1 %v18825_v39, %s18678_s23  ;;  %v2582_v49 = vrot.slane %v2580_v50, 4  ;;  %v1099_v1 = vsel %vm12018_vm5, 0, %v1098_v12  ;;  %v13739_v59 = vld [vmem:[#allocation3 + $0x44] sm:$0x1]  ;;  %v1095_v41 = vld [vmem:[#allocation4 + $0x9c] sm:$0x1]  ;;  %v18826_v12 = vcombine.low %v13178_v22, %v13291_v16  ;;  %v1567_v60 = vpop.permute.xlu0 %1566 }
 0x1cf   : > { %v2832_v13 = vrot.slane %v18824_v29, 4  ;;  %v13746_v39 = vrot.slane %v2826_v36, 5  ;;  %1100 = vst [vmem:[#allocation4 + $0xa8] sm:$0x1] %v1099_v1  ;;  %v13748_v62 = vld [vmem:[#allocation3 + $0x54] sm:$0xf]  ;;  %v1729_v29 = vsel %vm12066_vm10, %v1573_v21, %v1728_v47 }
 0x1d0   : > { %1970 = vst [vmem:[#allocation4 + $0x5c] sm:$0x1] %v1969_v28  ;;  %4413 = vrot.lane.b32.xlu0 %v18826_v12, %s18671_s16  ;;  %v2583_v35 = vrot.slane %v13725_v0, 5  ;;  %v2836_v36 = vshll.u32 %v13600_v20, 16  ;;  %v3174_v1 = vrot.slane %v13640_v9, 5  ;;  %v18827_v28 = vor.u32 %v13466_v43, %v13464_v17  ;;  %v18828_v5 = vld [vmem:[#allocation56_spill] sm:$0xff] }
 0x1d1   : > { %v2833_v22 = vor.u32 %v2832_v13, %v13746_v39  ;;  %v3084_v16 = vld [vmem:[#allocation3 + $0x3c] sm:$0xe]  ;;  %v3177_v12 = vrot.slane %v13739_v59, 5  ;;  %v1037_v27 = vld [vmem:[#allocation3 + $0xb0] sm:$0x1]  ;;  %v18829_v20 = vcombine.low %v18828_v5, %v13339_v40  ;;  %v1096_v43 = vsel %vm12018_vm5, 0, %v1095_v41 }
 0x1d2   : > { %v2824_v19 = vrot.slane %v18827_v28, 4  ;;  %1730 = vst [vmem:[#allocation3 + $0x78] sm:$0xf] %v1729_v29  ;;  %v1985_v38 = vld [vmem:[#allocation4 + $0x78] sm:$0xf]  ;;  %v13772_v21 = vsel %vm12335_vm13, %v2582_v49, %v2583_v35  ;;  %v3176_v17 = vrot.slane %v3174_v1, 4  ;;  %v1722_v13 = vsel %vm12066_vm10, %v1567_v60, %v1721_v25  ;;  %v1832_v35 = vpop.permute.xlu1 %1831 }
 0x1d3   : > { %4411 = vrot.lane.b32.xlu1 %v18829_v20, %s18671_s16  ;;  %v3426_v47 = vshrl.u32 %v13748_v62, 16  ;;  %v1978_v29 = vld [vmem:[#allocation4 + $0x6c] sm:$0xf]  ;;  %v13779_v28 = vcombine.low %v2757_v56, %v2767_v57  ;;  %v13783_v40 = vsel %vm12335_vm13, %v10846_v34, %v2580_v50  ;;  %v2834_v5 = vrot.slane %v2833_v22, 4  ;;  %1097 = vst [vmem:[#allocation4 + $0x9c] sm:$0x1] %v1096_v43 }
 0x1d4   : > { %v13785_v49 = vld [vmem:[#allocation3 + $0x58] sm:$0xf]  ;;  %1723 = vst [vmem:[#allocation3 + $0x6c] sm:$0xf] %v1722_v13  ;;  %v2838_v20 = vrot.slane %v2836_v36, 5  ;;  %v10860_v10 = vrot.slane %v3084_v16, 9  ;;  %v1986_v50 = vsel %vm12066_vm10, %v1832_v35, %v1985_v38  ;;  %v2829_v22 = vsel %vm12353_vm2, %v2824_v19, %v13746_v39  ;;  %v1826_v16 = vpop.permute.xlu0 %1825 }
 0x1d5   : > { %18830 = vst [vmem:[#allocation52_spill] sm:$0xff] %v13785_v49  ;;  %v18831_v41 = vld [vmem:[#allocation61_spill] sm:$0xff]  ;;  %v3429_v25 = vshll.u32 %v13748_v62, 16  ;;  %v1038_v56 = vsel %vm12024_vm6, 0, %v1037_v27  ;;  %v13801_v36 = vsel %vm12335_vm13, %v3176_v17, %v3177_v12  ;;  %1987 = vst [vmem:[#allocation4 + $0x78] sm:$0xf] %v1986_v50  ;;  %v1979_v39 = vsel %vm12066_vm10, %v1826_v16, %v1978_v29 }
 0x1d6   : > { %3981 = vrot.lane.b32.xlu0 %v18831_v41, %s11880_s21  ;;  %v2044_v57 = vld [vmem:[#allocation3 + $0x3c] sm:$0xf]  ;;  %1039 = vst [vmem:[#allocation3 + $0xb0] sm:$0x1] %v1038_v56  ;;  %v18832_v27 = vld [vmem:[#allocation63_spill] sm:$0xff]  ;;  %v2839_v38 = vsel %vm12353_vm2, %v2834_v5, %v2838_v20  ;;  %v13809_v43 = vsel %vm12335_vm13, %v10860_v10, %v3174_v1  ;;  %v13811_v13 = vrot.slane %v3426_v47, 4  ;;  %v1577_v5 = vpop.permute.xlu1 %1576 }
 0x1d7   : > { %3979 = vrot.lane.b32.xlu1 %v18832_v27, %s11880_s21  ;;  %v1732_v60 = vld [vmem:[#allocation3 + $0x80] sm:$0x1]  ;;  %v2206_v17 = vshrl.u32 %v2044_v57, 16  ;;  %v2209_v35 = vshll.u32 %v2044_v57, 16  ;;  %v1152_v41 = vld [vmem:[#allocation4 + $0xb0] sm:$0x1]  ;;  %v13830_v16 = vcombine.low %v2829_v22, %v2839_v38 }
 0x1d8   : > { %18833 = vst [vmem:[#allocation54_spill] sm:$0xff] %v13811_v13  ;;  %v2046_v56 = vld [vmem:[#allocation3 + $0x48] sm:$0xf]  ;;  %1980 = vst [vmem:[#allocation4 + $0x6c] sm:$0xf] %v1979_v39  ;;  %v18834_v20 = vld [vmem:[#allocation62_spill] sm:$0xff]  ;;  %v1733_v57 = vsel %vm12018_vm5, %v1577_v5, %v1732_v60 }
 0x1d9   : > { %v13822_v1 = vrot.slane %v3429_v25, 5  ;;  %v13824_v47 = vld [vmem:[#allocation3 + $0x60] sm:$0xf]  ;;  %v2215_v29 = vshll.u32 %v13618_v32, 16  ;;  %v2219_v50 = vshrl.u32 %v13618_v32, 16  ;;  %v2208_v27 = vrot.slane %v2206_v17, 4 }
 0x1da   : > { %4489 = vrot.lane.b32.xlu0 %v18834_v20, %s18674_s22  ;;  %v2211_v39 = vrot.slane %v2209_v35, 5  ;;  %1734 = vst [vmem:[#allocation3 + $0x80] sm:$0x1] %v1733_v57  ;;  %v1575_v20 = vpop.permute.xlu0 %1574  ;;  %v18836_v19 = vld [vmem:[#allocation64_spill] sm:$0xff]  ;;  %v18837_v12 = vld [vmem:[#allocation65_spill] sm:$0xff]  ;;  %v1153_v32 = vsel %vm12024_vm6, 0, %v1152_v41 }
 0x1db   : > { %18835 = vst [vmem:[#allocation58_spill] sm:$0xff] %v13822_v1  ;;  %v18838_v25 = vcombine.low %v18836_v19, %v18837_v12  ;;  %v1989_v10 = vld [vmem:[#allocation4 + $0x80] sm:$0x1]  ;;  %v13836_v34 = vrot.slane %v2215_v29, 5  ;;  %v2221_v1 = vrot.slane %v2219_v50, 4  ;;  %v2230_v13 = vshrl.u32 %v2046_v56, 16  ;;  %v1836_v12 = vpop.permute.xlu1 %1835 }
 0x1dc   : > { %1731 = vst.msk [vmem:[#allocation3 + $0x7c] sm:$0xf] %vm927_vm7, %v1575_v20  ;;  %v13841_v22 = vld [vmem:[#allocation3 + $0x64] sm:$0xf]  ;;  %v3450_v60 = vshrl.u32 %v13824_v47, 16  ;;  %v2225_v38 = vshll.u32 %v13634_v48, 16  ;;  %v1990_v48 = vsel %vm12018_vm5, %v1836_v12, %v1989_v10  ;;  %v2212_v20 = vor.u32 %v2211_v39, %v2208_v27 }
 0x1dd   : > { %4319 = vrot.lane.b32.xlu1 %v18838_v25, %s18676_s15  ;;  %18839 = vst [vmem:[#allocation59_spill] sm:$0xff] %v13841_v22  ;;  %1154 = vst [vmem:[#allocation4 + $0xb0] sm:$0x1] %v1153_v32  ;;  %v2233_v17 = vshll.u32 %v2046_v56, 16  ;;  %v2239_v19 = vshll.u32 %v13682_v52, 16  ;;  %v18840_v35 = vld [vmem:[#allocation60_spill] sm:$0xff]  ;;  %v2222_v29 = vor.u32 %v2221_v1, %v13836_v34 }
 0x1de   : > { %v18841_v5 = vcombine.low %v18840_v35, %v13361_v23  ;;  %v3453_v41 = vshll.u32 %v13824_v47, 16  ;;  %v2232_v50 = vrot.slane %v2230_v13, 4  ;;  %v2243_v57 = vshrl.u32 %v13682_v52, 16  ;;  %v3292_v32 = vld [vmem:[#allocation3 + $0x44] sm:$0x1]  ;;  %v1834_v49 = vpop.permute.xlu0 %1833  ;;  %v18843_v35 = vld [vmem:[#allocation67_spill] sm:$0xff] }
 0x1df   : > { %v2235_v56 = vrot.slane %v2233_v17, 5  ;;  %v13855_v25 = vrot.slane %v2239_v19, 5  ;;  %1991 = vst [vmem:[#allocation4 + $0x80] sm:$0x1] %v1990_v48  ;;  %v18842_v23 = vld [vmem:[#allocation66_spill] sm:$0xff]  ;;  %v2249_v10 = vshll.u32 %v13725_v0, 16  ;;  %v1569_v48 = vpop.permute.xlu1 %1568 }
 0x1e0   : > { %4157 = vrot.lane.b32.xlu0 %v18841_v5, %s18680_s30  ;;  %v18844_v5 = vcombine.low %v18842_v23, %v18843_v35  ;;  %v2245_v13 = vrot.slane %v2243_v57, 4  ;;  %1988 = vst.msk [vmem:[#allocation4 + $0x7c] sm:$0xf] %vm927_vm7, %v1834_v49  ;;  %v2223_v27 = vrot.slane %v2222_v29, 4  ;;  %v2227_v39 = vrot.slane %v2225_v38, 5  ;;  %v18846_v23 = vld [vmem:[#allocation71_spill] sm:$0xff] }
 0x1e1   : > { %v3387_v17 = vshll.u32 %v13543_v54, 16  ;;  %v18845_v19 = vshrl.u32 %v13543_v54, 16  ;;  %v1725_v35 = vld [vmem:[#allocation3 + $0x74] sm:$0x1]  ;;  %v2236_v1 = vor.u32 %v2235_v56, %v2232_v50  ;;  %v3397_v0 = vshll.u32 %v3292_v32, 16 }
 0x1e2   : > { %4063 = vrot.lane.b32.xlu1 %v18844_v5, %s18682_s20  ;;  %v13871_v5 = vrot.slane %v3450_v60, 4  ;;  %v2246_v57 = vor.u32 %v2245_v13, %v13855_v25  ;;  %1724 = vst.msk [vmem:[#allocation3 + $0x70] sm:$0xf] %vm927_vm7, %v1569_v48  ;;  %v13875_v49 = vrot.slane %v3453_v41, 5  ;;  %v2213_v38 = vrot.slane %v2212_v20, 4  ;;  %v1571_v22 = vpop.permute.xlu0 %1570 }
 0x1e3   : > { %v3393_v12 = vrot.slane %v18845_v19, 4  ;;  %v13877_v29 = vrot.slane %v3387_v17, 5  ;;  %v3411_v19 = vshll.u32 %v13510_v55, 16  ;;  %v1034_v52 = vld [vmem:[#allocation3 + $0xa4] sm:$0x1]  ;;  %v18848_v60 = vcombine.low %v13415_v58, %v13494_v33  ;;  %v1828_v33 = vpop.permute.xlu1 %1827 }
 0x1e4   : > { %4233 = vrot.lane.b32.xlu0 %v18846_v23, %s18678_s23  ;;  %18847 = vst [vmem:[#allocation55_spill] sm:$0xff] %v13875_v49  ;;  %v2247_v50 = vrot.slane %v2246_v57, 4  ;;  %v2251_v56 = vrot.slane %v2249_v10, 5  ;;  %v3293_v13 = vld [vmem:[#allocation3 + $0x50] sm:$0x1]  ;;  %v3408_v32 = vor.u32 %v13504_v8, %v13500_v31  ;;  %v18849_v41 = vshrl.u32 %v13510_v55, 16 }
 0x1e5   : > { %v1726_v17 = vsel %vm12018_vm5, %v1571_v22, %v1725_v35  ;;  %v1982_v48 = vld [vmem:[#allocation4 + $0x74] sm:$0x1]  ;;  %v2228_v23 = vsel %vm12353_vm2, %v2223_v27, %v2227_v39  ;;  %v3394_v49 = vor.u32 %v3393_v12, %v13877_v29  ;;  %v3399_v58 = vrot.slane %v3397_v0, 5  ;;  %v18850_v10 = vld [vmem:[#allocation69_spill] sm:$0xff]  ;;  %v18851_v57 = vld [vmem:[#allocation68_spill] sm:$0xff] }
 0x1e6   : > { %4163 = vrot.lane.b32.xlu1 %v18848_v60, %s18680_s30  ;;  %v3417_v20 = vrot.slane %v18849_v41, 4  ;;  %1727 = vst [vmem:[#allocation3 + $0x74] sm:$0x1] %v1726_v17  ;;  %v18852_v60 = vcombine.low %v18850_v10, %v18851_v57  ;;  %v1742_v31 = vld [vmem:[#allocation3 + $0x90] sm:$0xf]  ;;  %v2218_v8 = vsel %vm12353_vm2, %v2213_v38, %v13836_v34  ;;  %v2237_v22 = vrot.slane %v2236_v1, 4  ;;  %v1830_v10 = vpop.permute.xlu0 %1829 }
 0x1e7   : > { %v13900_v35 = vrot.slane %v3411_v19, 5  ;;  %v1035_v27 = vsel %vm12024_vm6, 0, %v1034_v52  ;;  %1981 = vst.msk [vmem:[#allocation4 + $0x70] sm:$0xf] %vm927_vm7, %v1828_v33  ;;  %v2252_v39 = vsel %vm12353_vm2, %v2247_v50, %v2251_v56  ;;  %v3395_v12 = vrot.slane %v3394_v49, 4 }
 0x1e8   : > { %4065 = vrot.lane.b32.xlu0 %v18852_v60, %s18682_s20  ;;  %v3421_v0 = vshll.u32 %v3293_v13, 16  ;;  %1036 = vst [vmem:[#allocation3 + $0xa4] sm:$0x1] %v1035_v27  ;;  %v3087_v41 = vld [vmem:[#allocation3 + $0x60] sm:$0xe]  ;;  %v3195_v17 = vrot.slane %v13713_v11, 5  ;;  %v13910_v1 = vcombine.low %v2218_v8, %v2228_v23  ;;  %v18853_v52 = vor.u32 %v13490_v37, %v13488_v7  ;;  %v1585_v37 = vpop.permute.xlu1 %1584 }
 0x1e9   : > { %v1735_v34 = vld [vmem:[#allocation3 + $0x84] sm:$0xf]  ;;  %v13915_v19 = vrot.slane %v3408_v32, 4  ;;  %v3418_v49 = vor.u32 %v3417_v20, %v13900_v35  ;;  %v13918_v50 = vld [vmem:[#allocation3 + $0x68] sm:$0x1]  ;;  %v1983_v56 = vsel %vm12018_vm5, %v1830_v10, %v1982_v48  ;;  %v3400_v13 = vsel %vm12353_vm2, %v3395_v12, %v3399_v58  ;;  %v18854_v32 = vld [vmem:[#allocation72_spill] sm:$0xff] }
 0x1ea   : > { %4239 = vrot.lane.b32.xlu1 %v13496_v26, %s18678_s23  ;;  %v3385_v38 = vrot.slane %v18853_v52, 4  ;;  %v2242_v26 = vsel %vm12353_vm2, %v2237_v22, %v13855_v25  ;;  %v3197_v23 = vrot.slane %v3195_v17, 4  ;;  %v13927_v33 = vld [vmem:[#allocation3 + $0x54] sm:$0xf]  ;;  %v1149_v7 = vld [vmem:[#allocation4 + $0xa4] sm:$0x1]  ;;  %v1743_v27 = vsel %vm12066_vm10, %v1585_v37, %v1742_v31 }
 0x1eb   : > { %1984 = vst [vmem:[#allocation4 + $0x74] sm:$0x1] %v1983_v56  ;;  %v18855_v20 = vld [vmem:[#allocation73_spill] sm:$0xff]  ;;  %v13933_v60 = vcombine.low %v2242_v26, %v2252_v39  ;;  %v3419_v48 = vrot.slane %v3418_v49, 4  ;;  %v10863_v8 = vrot.slane %v3087_v41, 9  ;;  %v3414_v12 = vsel %vm12353_vm2, %v13915_v19, %v13900_v35 }
 0x1ec   : > { %v18856_v57 = vcombine.low %v18854_v32, %v18855_v20  ;;  %v3390_v25 = vsel %vm12353_vm2, %v3385_v38, %v13877_v29  ;;  %v13938_v58 = vld [vmem:[#allocation3 + $0x58] sm:$0xf]  ;;  %v987_v22 = vld [vmem:[#allocation3 + $0xc0] sm:$0x1]  ;;  %v3423_v10 = vrot.slane %v3421_v0, 5  ;;  %v3198_v39 = vrot.slane %v13918_v50, 5  ;;  %v1579_v29 = vpop.permute.xlu0 %1578  ;;  %v1844_v37 = vpop.permute.xlu1 %1843 }
 0x1ed   : > { %v13947_v52 = vld [vmem:[#allocation3 + $0x58] sm:$0xf]  ;;  %v2476_v56 = vld [vmem:[#allocation3 + $0x54] sm:$0xe]  ;;  %1744 = vst [vmem:[#allocation3 + $0x90] sm:$0xf] %v1743_v27  ;;  %v18857_v41 = vcombine.low %v13442_v6, %v13543_v54  ;;  %v13953_v31 = vcombine.low %v3390_v25, %v3400_v13  ;;  %v13957_v49 = vsel %vm12335_vm13, %v10863_v8, %v3195_v17  ;;  %v1736_v26 = vsel %vm12066_vm10, %v1579_v29, %v1735_v34 }
 0x1ee   : > { %4317 = vrot.lane.b32.xlu0 %v18856_v57, %s18676_s15  ;;  %v1999_v38 = vld [vmem:[#allocation4 + $0x90] sm:$0xf]  ;;  %v2841_v35 = vshrl.u32 %v13927_v33, 16  ;;  %v2844_v0 = vshll.u32 %v13927_v33, 16  ;;  %v13961_v19 = vld [vmem:[#allocation3 + $0x5c] sm:$0x1]  ;;  %v13967_v6 = vsel %vm12335_vm13, %v3197_v23, %v3198_v39  ;;  %v3424_v34 = vsel %vm12353_vm2, %v3419_v48, %v3423_v10 }
 0x1ef   : > { %4415 = vrot.lane.b32.xlu1 %v18857_v41, %s18671_s16  ;;  %v1150_v13 = vsel %vm12024_vm6, 0, %v1149_v7  ;;  %v984_v17 = vld [vmem:[#allocation3 + $0xb4] sm:$0x1]  ;;  %1737 = vst [vmem:[#allocation3 + $0x84] sm:$0xf] %v1736_v26  ;;  %v18858_v32 = vld [vmem:[#allocation70_spill] sm:$0xff]  ;;  %v2000_v7 = vsel %vm12066_vm10, %v1844_v37, %v1999_v38 }
 0x1f0   : > { %v18859_v20 = vcombine.low %v18858_v32, %v13510_v55  ;;  %v1992_v57 = vld [vmem:[#allocation4 + $0x84] sm:$0xf]  ;;  %1151 = vst [vmem:[#allocation4 + $0xa4] sm:$0x1] %v1150_v13  ;;  %v10847_v23 = vrot.slane %v2476_v56, 9  ;;  %v2587_v25 = vrot.slane %v13947_v52, 5  ;;  %v1838_v48 = vpop.permute.xlu0 %1837 }
 0x1f1   : > { %v988_v8 = vsel %vm12018_vm5, 0, %v987_v22  ;;  %v1746_v27 = vld [vmem:[#allocation3 + $0x98] sm:$0x1]  ;;  %v2590_v39 = vrot.slane %v13961_v19, 5  ;;  %v2802_v55 = vshll.u32 %v13640_v9, 16  ;;  %v18860_v29 = vshrl.u32 %v13640_v9, 16 }
 0x1f2   : > { %4417 = vrot.lane.b32.xlu0 %v18859_v20, %s18671_s16  ;;  %989 = vst [vmem:[#allocation3 + $0xc0] sm:$0x1] %v988_v8  ;;  %2001 = vst [vmem:[#allocation4 + $0x90] sm:$0xf] %v2000_v7  ;;  %v2589_v10 = vrot.slane %v2587_v25, 4  ;;  %v2799_v22 = vor.u32 %v13644_v63, %v13642_v24  ;;  %v2812_v56 = vshll.u32 %v13739_v59, 16  ;;  %v1993_v13 = vsel %vm12066_vm10, %v1838_v48, %v1992_v57  ;;  %v1589_v59 = vpop.permute.xlu1 %1588 }
 0x1f3   : > { %v2808_v41 = vrot.slane %v18860_v29, 4  ;;  %3983 = vrot.lane.b32.xlu1 %v13611_v14, %s11880_s21  ;;  %v985_v38 = vsel %vm12018_vm5, 0, %v984_v17  ;;  %v13994_v26 = vld [vmem:[#allocation3 + $0x78] sm:$0xf]  ;;  %v14002_v32 = vrot.slane %v2802_v55, 5  ;;  %v14006_v17 = vcombine.low %v3414_v12, %v3424_v34 }
 0x1f4   : > { %18861 = vst [vmem:[#allocation56_spill] sm:$0xff] %v13994_v26  ;;  %986 = vst [vmem:[#allocation3 + $0xb4] sm:$0x1] %v985_v38  ;;  %v1104_v24 = vld [vmem:[#allocation4 + $0xc0] sm:$0x1]  ;;  %v14008_v20 = vrot.slane %v2841_v35, 4  ;;  %v14014_v8 = vsel %vm12335_vm13, %v10847_v23, %v2587_v25  ;;  %v1747_v29 = vsel %vm12018_vm5, %v1589_v59, %v1746_v27 }
 0x1f5   : > { %v1101_v63 = vld [vmem:[#allocation4 + $0xb4] sm:$0x1]  ;;  %1994 = vst [vmem:[#allocation4 + $0x84] sm:$0xf] %v1993_v13  ;;  %v14010_v57 = vrot.slane %v2844_v0, 5  ;;  %v2809_v12 = vor.u32 %v2808_v41, %v14002_v32  ;;  %v2913_v35 = vshrl.u32 %v13994_v26, 16  ;;  %v1587_v0 = vpop.permute.xlu0 %1586 }
 0x1f6   : > { %3985 = vrot.lane.b32.xlu0 %v13613_v15, %s11880_s21  ;;  %v14016_v7 = vld [vmem:[#allocation3 + $0x7c] sm:$0xf]  ;;  %v14018_v55 = vld [vmem:[#allocation3 + $0x64] sm:$0xf]  ;;  %v2003_v48 = vld [vmem:[#allocation4 + $0x98] sm:$0x1]  ;;  %v14024_v15 = vsel %vm12335_vm13, %v2589_v10, %v2590_v39 }
 0x1f7   : > { %1748 = vst [vmem:[#allocation3 + $0x98] sm:$0x1] %v1747_v29  ;;  %4491 = vrot.lane.b32.xlu1 %v13638_v51, %s18674_s22  ;;  %v14030_v34 = vrot.slane %v2799_v22, 4  ;;  %v2814_v23 = vrot.slane %v2812_v56, 5  ;;  %v2916_v25 = vshll.u32 %v13994_v26, 16  ;;  %v1105_v27 = vsel %vm12018_vm5, 0, %v1104_v24  ;;  %v1848_v56 = vpop.permute.xlu1 %1847 }
 0x1f8   : > { %v1043_v38 = vld [vmem:[#allocation3 + $0xc8] sm:$0x1]  ;;  %1745 = vst.msk [vmem:[#allocation3 + $0x94] sm:$0xf] %vm927_vm7, %v1587_v0  ;;  %1106 = vst [vmem:[#allocation4 + $0xc0] sm:$0x1] %v1105_v27  ;;  %v2004_v39 = vsel %vm12018_vm5, %v1848_v56, %v2003_v48  ;;  %v2871_v56 = vor.u32 %v13735_v3, %v13715_v46  ;;  %v18866_v46 = vcombine.low %v13577_v53, %v13640_v9 }
 0x1f9   : > { %v2477_v10 = vld [vmem:[#allocation3 + $0x60] sm:$0xe]  ;;  %v2594_v51 = vrot.slane %v14018_v55, 5  ;;  %v1102_v22 = vsel %vm12018_vm5, 0, %v1101_v63  ;;  %v2810_v24 = vrot.slane %v2809_v12, 4  ;;  %v2874_v29 = vshll.u32 %v13713_v11, 16 }
 0x1fa   : > { %4493 = vrot.lane.b32.xlu0 %v13676_v61, %s18674_s22  ;;  %v14046_v59 = vld [vmem:[#allocation3 + $0x68] sm:$0x1]  ;;  %1103 = vst [vmem:[#allocation4 + $0xb4] sm:$0x1] %v1102_v22  ;;  %v18862_v0 = vshrl.u32 %v13713_v11, 16  ;;  %v2805_v61 = vsel %vm12353_vm2, %v14030_v34, %v14002_v32  ;;  %v14057_v63 = vrot.slane %v2913_v35, 4  ;;  %v1846_v22 = vpop.permute.xlu0 %1845 }
 0x1fb   : > { %v2596_v41 = vrot.slane %v2594_v51, 4  ;;  %v14059_v12 = vld [vmem:[#allocation3 + $0x5c] sm:$0x1]  ;;  %v1158_v13 = vld [vmem:[#allocation4 + $0xc8] sm:$0x1]  ;;  %v14065_v54 = vrot.slane %v2916_v25, 5 }
 0x1fc   : > { %v2880_v27 = vrot.slane %v18862_v0, 4  ;;  %18863 = vst [vmem:[#allocation61_spill] sm:$0xff] %v14057_v63  ;;  %2005 = vst [vmem:[#allocation4 + $0x98] sm:$0x1] %v2004_v39  ;;  %v18864_v0 = vcombine.low %v13629_v30, %v13656_v45  ;;  %v10848_v48 = vrot.slane %v2477_v10, 9  ;;  %v14069_v32 = vrot.slane %v2874_v29, 5  ;;  %v1581_v10 = vpop.permute.xlu1 %1580 }
 0x1fd   : > { %18865 = vst [vmem:[#allocation63_spill] sm:$0xff] %v14065_v54  ;;  %v14071_v35 = vld [vmem:[#allocation3 + $0x6c] sm:$0xf]  ;;  %2002 = vst.msk [vmem:[#allocation4 + $0x94] sm:$0xf] %vm927_vm7, %v1846_v22  ;;  %v2597_v34 = vrot.slane %v14046_v59, 5  ;;  %v2815_v29 = vsel %vm12353_vm2, %v2810_v24, %v2814_v23 }
 0x1fe   : > { %4323 = vrot.lane.b32.xlu1 %v18864_v0, %s18676_s15  ;;  %v2884_v39 = vshll.u32 %v13918_v50, 16  ;;  %v1044_v30 = vsel %vm12024_vm6, 0, %v1043_v38  ;;  %v3086_v45 = vld [vmem:[#allocation3 + $0x54] sm:$0xe]  ;;  %v3188_v25 = vrot.slane %v13938_v58, 5  ;;  %4161 = vrot.lane.b32.xlu0 %v18866_v46, %s18680_s30  ;;  %v14087_v22 = vsel %vm12335_vm13, %v10848_v48, %v2594_v51  ;;  %v1583_v51 = vpop.permute.xlu0 %1582  ;;  %v18867_v48 = vld [vmem:[#allocation57_spill] sm:$0xff] }
 0x1ff   : > { %v1739_v3 = vld [vmem:[#allocation3 + $0x8c] sm:$0x1]  ;;  %v2881_v50 = vor.u32 %v2880_v27, %v14069_v32  ;;  %1045 = vst [vmem:[#allocation3 + $0xc8] sm:$0x1] %v1044_v30  ;;  %v3191_v38 = vrot.slane %v14059_v12, 5  ;;  %v14094_v0 = vsel %vm12335_vm13, %v2596_v41, %v2597_v34  ;;  %v3474_v23 = vshrl.u32 %v14071_v35, 16 }
 0x200   : > { %1738 = vst.msk [vmem:[#allocation3 + $0x88] sm:$0xf] %vm927_vm7, %v1581_v10  ;;  %v3190_v53 = vrot.slane %v3188_v25, 4  ;;  %v14096_v9 = vld [vmem:[#allocation3 + $0x70] sm:$0xf]  ;;  %v3477_v24 = vshll.u32 %v14071_v35, 16  ;;  %v1740_v37 = vsel %vm12018_vm5, %v1583_v51, %v1739_v3  ;;  %v14108_v54 = vcombine.low %v2805_v61, %v2815_v29 }
 0x201   : > { %v18868_v27 = vld [vmem:[#allocation51_spill] sm:$0xff]  ;;  %v2872_v46 = vrot.slane %v2871_v56, 4  ;;  %v2882_v14 = vrot.slane %v2881_v50, 4  ;;  %v10862_v10 = vrot.slane %v3086_v45, 9  ;;  %v1159_v41 = vsel %vm12024_vm6, 0, %v1158_v13 }
 0x202   : > { %v18869_v30 = vcombine.low %v18867_v48, %v18868_v27  ;;  %v2048_v34 = vld [vmem:[#allocation3 + $0x54] sm:$0xf]  ;;  %v2886_v63 = vrot.slane %v2884_v39, 5  ;;  %v14112_v26 = vsel %vm12335_vm13, %v3190_v53, %v3191_v38  ;;  %1160 = vst [vmem:[#allocation4 + $0xc8] sm:$0x1] %v1159_v41  ;;  %v1840_v48 = vpop.permute.xlu1 %1839  ;;  %4237 = vrot.lane.b32.xlu0 %v13779_v28, %s18678_s23  ;;  %v14131_v28 = vrot.slane %v3477_v24, 5 }
 0x203   : > { %1741 = vst [vmem:[#allocation3 + $0x8c] sm:$0x1] %v1740_v37  ;;  %v1996_v56 = vld [vmem:[#allocation4 + $0x8c] sm:$0x1]  ;;  %v2877_v61 = vsel %vm12353_vm2, %v2872_v46, %v14069_v32  ;;  %v14123_v39 = vsel %vm12335_vm13, %v10862_v10, %v3188_v25  ;;  %v14126_v3 = vld [vmem:[#allocation3 + $0x78] sm:$0xf]  ;;  %v1842_v32 = vpop.permute.xlu0 %1841 }
 0x204   : > { %4067 = vrot.lane.b32.xlu1 %v18869_v30, %s18682_s20  ;;  %1995 = vst.msk [vmem:[#allocation4 + $0x88] sm:$0xf] %vm927_vm7, %v1840_v48  ;;  %v14129_v37 = vrot.slane %v3474_v23, 4  ;;  %v2254_v50 = vshrl.u32 %v2048_v34, 16  ;;  %v2050_v38 = vld [vmem:[#allocation3 + $0x60] sm:$0xf]  ;;  %v2887_v27 = vsel %vm12353_vm2, %v2882_v14, %v2886_v63  ;;  %v1997_v46 = vsel %vm12018_vm5, %v1842_v32, %v1996_v56 }
 0x205   : > { %v18870_v53 = vld [vmem:[#allocation74_spill] sm:$0xff]  ;;  %v1756_v51 = vld [vmem:[#allocation3 + $0xa8] sm:$0xf]  ;;  %v2257_v24 = vshll.u32 %v2048_v34, 16  ;;  %v2263_v30 = vshll.u32 %v13947_v52, 16  ;;  %v3498_v10 = vshrl.u32 %v14126_v3, 16  ;;  %v18872_v14 = vcombine.low %v13783_v40, %v13772_v21 }
 0x206   : > { %v18871_v25 = vcombine.low %v18870_v53, %v13713_v11  ;;  %v2256_v41 = vrot.slane %v2254_v50, 4  ;;  %v2267_v48 = vshrl.u32 %v13947_v52, 16  ;;  %v1040_v11 = vld [vmem:[#allocation3 + $0xbc] sm:$0x1]  ;;  %1998 = vst [vmem:[#allocation4 + $0x8c] sm:$0x1] %v1997_v46  ;;  %v1597_v53 = vpop.permute.xlu1 %1596  ;;  %v14160_v21 = vcombine.low %v2877_v61, %v2887_v27 }
 0x207   : > { %4069 = vrot.lane.b32.xlu0 %v18872_v14, %s18682_s20  ;;  %v1749_v63 = vld [vmem:[#allocation3 + $0x9c] sm:$0xf]  ;;  %v2259_v34 = vrot.slane %v2257_v24, 5  ;;  %v2278_v45 = vshrl.u32 %v2050_v38, 16  ;;  %v2281_v29 = vshll.u32 %v2050_v38, 16  ;;  %v1757_v56 = vsel %vm12066_vm10, %v1597_v53, %v1756_v51  ;;  %v1591_v23 = vpop.permute.xlu0 %1590 }
 0x208   : > { %4167 = vrot.lane.b32.xlu1 %v18871_v25, %s18680_s30  ;;  %v14152_v25 = vrot.slane %v2263_v30, 5  ;;  %v2013_v50 = vld [vmem:[#allocation4 + $0xa8] sm:$0xf]  ;;  %v3501_v52 = vshll.u32 %v14126_v3, 16  ;;  %v2269_v32 = vrot.slane %v2267_v48, 4  ;;  %v2287_v46 = vshll.u32 %v14018_v55, 16 }
 0x209   : > { %1758 = vst [vmem:[#allocation3 + $0xa8] sm:$0xf] %v1757_v56  ;;  %v14162_v40 = vld [vmem:[#allocation3 + $0x7c] sm:$0xf]  ;;  %v2273_v38 = vshll.u32 %v13961_v19, 16  ;;  %v2280_v24 = vrot.slane %v2278_v45, 4  ;;  %v1750_v30 = vsel %vm12066_vm10, %v1591_v23, %v1749_v63  ;;  %v2260_v19 = vor.u32 %v2259_v34, %v2256_v41 }
 0x20a   : > { %v2291_v51 = vshrl.u32 %v14018_v55, 16  ;;  %v2270_v48 = vor.u32 %v2269_v32, %v14152_v25  ;;  %v2283_v53 = vrot.slane %v2281_v29, 5  ;;  %v14169_v14 = vrot.slane %v2287_v46, 5  ;;  %1751 = vst [vmem:[#allocation3 + $0x9c] sm:$0xf] %v1750_v30  ;;  %v1856_v56 = vpop.permute.xlu1 %1855  ;;  %v18881_v63 = vld [vmem:[#allocation58_spill] sm:$0xff] }
 0x20b   : > { %v2006_v61 = vld [vmem:[#allocation4 + $0x9c] sm:$0xf]  ;;  %v2297_v55 = vshll.u32 %v14046_v59, 16  ;;  %v1041_v27 = vsel %vm12024_vm6, 0, %v1040_v11  ;;  %v2014_v29 = vsel %vm12066_vm10, %v1856_v56, %v2013_v50  ;;  %v14180_v23 = vrot.slane %v3498_v10, 4 }
 0x20c   : > { %4243 = vrot.lane.b32.xlu1 %v13830_v16, %s18678_s23  ;;  %v18873_v16 = vcombine.low %v13809_v43, %v13801_v36  ;;  %v2293_v45 = vrot.slane %v2291_v51, 4  ;;  %1042 = vst [vmem:[#allocation3 + $0xbc] sm:$0x1] %v1041_v27  ;;  %v3294_v36 = vld [vmem:[#allocation3 + $0x5c] sm:$0x1]  ;;  %v1850_v43 = vpop.permute.xlu0 %1849  ;;  %v18874_v59 = vld [vmem:[#allocation52_spill] sm:$0xff]  ;;  %v2284_v56 = vor.u32 %v2283_v53, %v2280_v24 }
 0x20d   : > { %2015 = vst [vmem:[#allocation4 + $0xa8] sm:$0xf] %v2014_v29  ;;  %v18875_v41 = vcombine.low %v13748_v62, %v18874_v59  ;;  %v1760_v11 = vld [vmem:[#allocation3 + $0xb0] sm:$0x1]  ;;  %v14189_v34 = vrot.slane %v3501_v52, 5  ;;  %v2275_v50 = vrot.slane %v2273_v38, 5  ;;  %v2007_v51 = vsel %vm12066_vm10, %v1850_v43, %v2006_v61 }
 0x20e   : > { %4321 = vrot.lane.b32.xlu0 %v18873_v16, %s18676_s15  ;;  %v2294_v10 = vor.u32 %v2293_v45, %v14169_v14  ;;  %v3435_v46 = vshll.u32 %v18874_v59, 16  ;;  %v2271_v30 = vrot.slane %v2270_v48, 4  ;;  %v18877_v16 = vshrl.u32 %v18874_v59, 16  ;;  %2008 = vst [vmem:[#allocation4 + $0x9c] sm:$0xf] %v2007_v51  ;;  %v1601_v29 = vpop.permute.xlu1 %1600  ;;  %v18878_v62 = vld [vmem:[#allocation59_spill] sm:$0xff] }
 0x20f   : > { %18876 = vst [vmem:[#allocation62_spill] sm:$0xff] %v14189_v34  ;;  %v18879_v52 = vcombine.low %v13824_v47, %v18878_v62  ;;  %v2261_v38 = vrot.slane %v2260_v19, 4  ;;  %v18880_v45 = vld [vmem:[#allocation54_spill] sm:$0xff]  ;;  %v1155_v34 = vld [vmem:[#allocation4 + $0xbc] sm:$0x1]  ;;  %v1761_v24 = vsel %vm12018_vm5, %v1601_v29, %v1760_v11  ;;  %v3445_v53 = vshll.u32 %v3294_v36, 16 }
 0x210   : > { %4419 = vrot.lane.b32.xlu1 %v18875_v41, %s18671_s16  ;;  %v3441_v27 = vrot.slane %v18877_v16, 4  ;;  %v2299_v41 = vrot.slane %v2297_v55, 5  ;;  %v3432_v32 = vor.u32 %v18881_v63, %v18880_v45  ;;  %v3437_v13 = vrot.slane %v3435_v46, 5  ;;  %v3295_v61 = vld [vmem:[#allocation3 + $0x68] sm:$0x1]  ;;  %v1599_v59 = vpop.permute.xlu0 %1598 }
 0x211   : > { %v2295_v48 = vrot.slane %v2294_v10, 4  ;;  %v3459_v43 = vshll.u32 %v18878_v62, 16  ;;  %1762 = vst [vmem:[#allocation3 + $0xb0] sm:$0x1] %v1761_v24  ;;  %v2017_v47 = vld [vmem:[#allocation4 + $0xb0] sm:$0x1]  ;;  %v2266_v19 = vsel %vm12353_vm2, %v2261_v38, %v14152_v25  ;;  %v2276_v10 = vsel %vm12353_vm2, %v2271_v30, %v2275_v50 }
 0x212   : > { %4421 = vrot.lane.b32.xlu0 %v18879_v52, %s18671_s16  ;;  %v3442_v55 = vor.u32 %v3441_v27, %v3437_v13  ;;  %v18882_v63 = vld [vmem:[#allocation55_spill] sm:$0xff]  ;;  %v18883_v11 = vshrl.u32 %v18878_v62, 16  ;;  %1759 = vst.msk [vmem:[#allocation3 + $0xac] sm:$0xf] %vm927_vm7, %v1599_v59  ;;  %v2285_v51 = vrot.slane %v2284_v56, 4  ;;  %v3447_v16 = vrot.slane %v3445_v53, 5  ;;  %v1860_v52 = vpop.permute.xlu1 %1859 }
 0x213   : > { %v3456_v46 = vor.u32 %v18882_v63, %v13871_v5  ;;  %v14220_v29 = vld [vmem:[#allocation3 + $0x6c] sm:$0xf]  ;;  %v3433_v25 = vrot.slane %v3432_v32, 4  ;;  %v3469_v27 = vshll.u32 %v3295_v61, 16  ;;  %v1156_v62 = vsel %vm12024_vm6, 0, %v1155_v34 }
 0x214   : > { %3987 = vrot.lane.b32.xlu1 %v13910_v1, %s11880_s21  ;;  %v3465_v36 = vrot.slane %v18883_v11, 4  ;;  %v14218_v1 = vrot.slane %v3459_v43, 5  ;;  %v3443_v5 = vrot.slane %v3442_v55, 4  ;;  %v3089_v38 = vld [vmem:[#allocation3 + $0x78] sm:$0xe]  ;;  %v2018_v50 = vsel %vm12018_vm5, %v1860_v52, %v2017_v47 }
 0x215   : > { %v2300_v30 = vsel %vm12353_vm2, %v2295_v48, %v2299_v41  ;;  %1157 = vst [vmem:[#allocation4 + $0xbc] sm:$0x1] %v1156_v62  ;;  %v3209_v45 = vrot.slane %v14016_v7, 5  ;;  %2019 = vst [vmem:[#allocation4 + $0xb0] sm:$0x1] %v2018_v50  ;;  %v14234_v32 = vcombine.low %v2266_v19, %v2276_v10  ;;  %v3457_v24 = vrot.slane %v3456_v46, 4 }
 0x216   : > { %3989 = vrot.lane.b32.xlu0 %v13933_v60, %s11880_s21  ;;  %v3466_v56 = vor.u32 %v3465_v36, %v14218_v1  ;;  %v1858_v60 = vpop.permute.xlu0 %1857  ;;  %v3448_v34 = vsel %vm12353_vm2, %v3443_v5, %v3447_v16  ;;  %v14238_v53 = vld [vmem:[#allocation3 + $0x80] sm:$0x1]  ;;  %v2889_v41 = vshrl.u32 %v14220_v29, 16  ;;  %v14241_v48 = vld [vmem:[#allocation3 + $0x70] sm:$0xf]  ;;  %v2290_v61 = vsel %vm12353_vm2, %v2285_v51, %v14169_v14  ;;  %v1593_v19 = vpop.permute.xlu1 %1592 }
 0x217   : > { %2016 = vst.msk [vmem:[#allocation4 + $0xac] sm:$0xf] %vm927_vm7, %v1858_v60  ;;  %v3211_v59 = vrot.slane %v3209_v45, 4  ;;  %v14247_v47 = vld [vmem:[#allocation3 + $0x74] sm:$0x1]  ;;  %v14251_v63 = vcombine.low %v2290_v61, %v2300_v30  ;;  %v3438_v46 = vsel %vm12353_vm2, %v3433_v25, %v3437_v13  ;;  %v3462_v11 = vsel %vm12353_vm2, %v3457_v24, %v14218_v1 }
 0x218   : > { %4495 = vrot.lane.b32.xlu1 %v13953_v31, %s18674_s22  ;;  %v3467_v43 = vrot.slane %v3466_v56, 4  ;;  %v10865_v31 = vrot.slane %v3089_v38, 9  ;;  %v1753_v55 = vld [vmem:[#allocation3 + $0xa4] sm:$0x1]  ;;  %v3471_v14 = vrot.slane %v3469_v27, 5  ;;  %v14259_v36 = vcombine.low %v3438_v46, %v3448_v34 }
 0x219   : > { %1752 = vst.msk [vmem:[#allocation3 + $0xa0] sm:$0xf] %vm927_vm7, %v1593_v19  ;;  %v14266_v51 = vld [vmem:[#allocation3 + $0x70] sm:$0xf]  ;;  %v2478_v16 = vld [vmem:[#allocation3 + $0x6c] sm:$0xe]  ;;  %v18884_v1 = vcombine.low %v13957_v49, %v13967_v6  ;;  %v2847_v6 = vor.u32 %v14010_v57, %v14008_v20 }
 0x21a   : > { %4497 = vrot.lane.b32.xlu0 %v14006_v17, %s18674_s22  ;;  %v14263_v10 = vsel %vm12335_vm13, %v10865_v31, %v3209_v45  ;;  %v3212_v17 = vrot.slane %v14238_v53, 5  ;;  %v2601_v13 = vrot.slane %v14241_v48, 5  ;;  %v1595_v52 = vpop.permute.xlu0 %1594  ;;  %v3472_v25 = vsel %vm12353_vm2, %v3467_v43, %v3471_v14  ;;  %v14279_v38 = vld [vmem:[#allocation3 + $0x90] sm:$0xf]  ;;  %v1852_v56 = vpop.permute.xlu1 %1851  ;;  %v2010_v60 = vld [vmem:[#allocation4 + $0xa4] sm:$0x1] }
 0x21b   : > { %v14275_v5 = vrot.slane %v2889_v41, 4  ;;  %v2892_v27 = vshll.u32 %v14220_v29, 16  ;;  %v2604_v62 = vrot.slane %v14247_v47, 5  ;;  %v1754_v50 = vsel %vm12018_vm5, %v1595_v52, %v1753_v55  ;;  %2009 = vst.msk [vmem:[#allocation4 + $0xa0] sm:$0xf] %vm927_vm7, %v1852_v56 }
 0x21c   : > { %4327 = vrot.lane.b32.xlu1 %v18884_v1, %s18676_s15  ;;  %v14285_v30 = vsel %vm12335_vm13, %v3211_v59, %v3212_v17  ;;  %v2603_v49 = vrot.slane %v2601_v13, 4  ;;  %1755 = vst [vmem:[#allocation3 + $0xa4] sm:$0x1] %v1754_v50  ;;  %v18885_v45 = vcombine.low %v13927_v33, %v13938_v58  ;;  %v2850_v24 = vshll.u32 %v13938_v58, 16  ;;  %v14306_v59 = vld [vmem:[#allocation3 + $0x7c] sm:$0xf] }
 0x21d   : > { %v18886_v41 = vshrl.u32 %v13938_v58, 16  ;;  %v2860_v43 = vshll.u32 %v14059_v12, 16  ;;  %v10944_v20 = vcombine.low %v14220_v29, %v14266_v51  ;;  %v10849_v57 = vrot.slane %v2478_v16, 9  ;;  %v1770_v12 = vld [vmem:[#allocation3 + $0xc0] sm:$0xf] }
 0x21e   : > { %4165 = vrot.lane.b32.xlu0 %v18885_v45, %s18680_s30  ;;  %v14303_v33 = vsel %vm12335_vm13, %v2603_v49, %v2604_v62  ;;  %v2961_v31 = vshrl.u32 %v14279_v38, 16  ;;  %v1854_v19 = vpop.permute.xlu0 %1853  ;;  %v18887_v58 = vcombine.low %v14014_v8, %v14024_v15  ;;  %v14312_v55 = vcombine.low %v3462_v11, %v3472_v25  ;;  %v14320_v16 = vld [vmem:[#allocation3 + $0x94] sm:$0xf]  ;;  %v1609_v11 = vpop.permute.xlu1 %1608  ;;  %v14334_v49 = vld [vmem:[#allocation3 + $0x80] sm:$0x1] }
 0x21f   : > { %v2856_v61 = vrot.slane %v18886_v41, 4  ;;  %v10977_v46 = vcombine.low %v14263_v10, %v14285_v30  ;;  %v14316_v14 = vrot.slane %v2892_v27, 5  ;;  %v14318_v17 = vrot.slane %v2850_v24, 5  ;;  %v1763_v25 = vld [vmem:[#allocation3 + $0xb4] sm:$0xf] }
 0x220   : > { %4071 = vrot.lane.b32.xlu1 %v18887_v58, %s18682_s20  ;;  %v2011_v52 = vsel %vm12018_vm5, %v1854_v19, %v2010_v60  ;;  %v14326_v1 = vsel %vm12335_vm13, %v10849_v57, %v2601_v13  ;;  %v2848_v8 = vrot.slane %v2847_v6, 4  ;;  %v2964_v15 = vshll.u32 %v14279_v38, 16  ;;  %v2479_v60 = vld [vmem:[#allocation3 + $0x78] sm:$0xe]  ;;  %v18888_v41 = vld [vmem:[#allocation56_spill] sm:$0xff] }
 0x221   : > { %2012 = vst [vmem:[#allocation4 + $0xa4] sm:$0x1] %v2011_v52  ;;  %v2857_v62 = vor.u32 %v2856_v61, %v14318_v17  ;;  %v2862_v50 = vrot.slane %v2860_v43, 5  ;;  %v2608_v13 = vrot.slane %v14306_v59, 5  ;;  %v1771_v6 = vsel %vm12066_vm10, %v1609_v11, %v1770_v12  ;;  %v2027_v43 = vld [vmem:[#allocation4 + $0xc0] sm:$0xf] }
 0x222   : > { %4241 = vrot.lane.b32.xlu0 %v14108_v54, %s18678_s23  ;;  %v14339_v56 = vrot.slane %v2961_v31, 4  ;;  %v2922_v54 = vshll.u32 %v14016_v7, 16  ;;  %1772 = vst [vmem:[#allocation3 + $0xc0] sm:$0xf] %v1771_v6  ;;  %v1603_v24 = vpop.permute.xlu0 %1602  ;;  %v18889_v61 = vcombine.low %v18888_v41, %v14016_v7  ;;  %v18890_v58 = vld [vmem:[#allocation61_spill] sm:$0xff]  ;;  %v18891_v52 = vld [vmem:[#allocation63_spill] sm:$0xff] }
 0x223   : > { %v2858_v57 = vrot.slane %v2857_v62, 4  ;;  %v2610_v19 = vrot.slane %v2608_v13, 4  ;;  %v2919_v12 = vor.u32 %v18891_v52, %v18890_v58  ;;  %v18892_v31 = vshrl.u32 %v14016_v7, 16  ;;  %v14358_v41 = vld [vmem:[#allocation3 + $0x74] sm:$0x1]  ;;  %v1868_v62 = vpop.permute.xlu1 %1867 }
 0x224   : > { %4171 = vrot.lane.b32.xlu1 %v18889_v61, %s18680_s30  ;;  %v1764_v45 = vsel %vm12066_vm10, %v1603_v24, %v1763_v25  ;;  %v14353_v34 = vrot.slane %v2964_v15, 5  ;;  %v2611_v6 = vrot.slane %v14334_v49, 5  ;;  %v14356_v27 = vrot.slane %v2922_v54, 5  ;;  %v2020_v7 = vld [vmem:[#allocation4 + $0xb4] sm:$0xf] }
 0x225   : > { %v2928_v11 = vrot.slane %v18892_v31, 4  ;;  %1765 = vst [vmem:[#allocation3 + $0xb4] sm:$0xf] %v1764_v45  ;;  %v18893_v61 = vcombine.low %v14087_v22, %v14094_v0  ;;  %v2853_v25 = vsel %vm12353_vm2, %v2848_v8, %v14318_v17  ;;  %v10850_v24 = vrot.slane %v2479_v60, 9  ;;  %v14370_v58 = vld [vmem:[#allocation3 + $0x84] sm:$0xf] }
 0x226   : > { %v3202_v54 = vrot.slane %v14266_v51, 5  ;;  %v2028_v45 = vsel %vm12066_vm10, %v1868_v62, %v2027_v43  ;;  %v2863_v22 = vsel %vm12353_vm2, %v2858_v57, %v2862_v50  ;;  %v14378_v0 = vsel %vm12335_vm13, %v2610_v19, %v2611_v6  ;;  %v3088_v8 = vld [vmem:[#allocation3 + $0x6c] sm:$0xe]  ;;  %v1862_v52 = vpop.permute.xlu0 %1861  ;;  %v1774_v60 = vld [vmem:[#allocation3 + $0xc8] sm:$0x1] }
 0x227   : > { %4073 = vrot.lane.b32.xlu0 %v18893_v61, %s18682_s20  ;;  %v2932_v17 = vshll.u32 %v14238_v53, 16  ;;  %2029 = vst [vmem:[#allocation4 + $0xc0] sm:$0xf] %v2028_v45  ;;  %v14385_v31 = vsel %vm12335_vm13, %v10850_v24, %v2608_v13  ;;  %v14387_v43 = vrot.slane %v2919_v12, 4  ;;  %v2929_v50 = vor.u32 %v2928_v11, %v14356_v27  ;;  %v14390_v19 = vld [vmem:[#allocation3 + $0x90] sm:$0xf]  ;;  %v1613_v13 = vpop.permute.xlu1 %1612 }
 0x228   : > { %4247 = vrot.lane.b32.xlu1 %v14160_v21, %s18678_s23  ;;  %v3204_v57 = vrot.slane %v3202_v54, 4  ;;  %v2021_v53 = vsel %vm12066_vm10, %v1862_v52, %v2020_v7  ;;  %v3205_v6 = vrot.slane %v14358_v41, 5  ;;  %v14395_v62 = vld [vmem:[#allocation3 + $0x88] sm:$0xf]  ;;  %v3522_v21 = vshrl.u32 %v14370_v58, 16 }
 0x229   : > { %v3525_v61 = vshll.u32 %v14370_v58, 16  ;;  %2022 = vst [vmem:[#allocation4 + $0xb4] sm:$0xf] %v2021_v53  ;;  %v18894_v12 = vcombine.low %v14123_v39, %v14112_v26  ;;  %v14403_v11 = vcombine.low %v2853_v25, %v2863_v22  ;;  %v10930_v42 = vcombine.low %v14385_v31, %v14378_v0  ;;  %v2052_v45 = vld [vmem:[#allocation3 + $0x6c] sm:$0xf] }
 0x22a   : > { %v2930_v7 = vrot.slane %v2929_v50, 4  ;;  %v10864_v24 = vrot.slane %v3088_v8, 9  ;;  %v1775_v52 = vsel %vm12018_vm5, %v1613_v13, %v1774_v60  ;;  %v2925_v53 = vsel %vm12353_vm2, %v14387_v43, %v14356_v27  ;;  %v1611_v39 = vpop.permute.xlu0 %1610  ;;  %v2031_v22 = vld [vmem:[#allocation4 + $0xc8] sm:$0x1]  ;;  %v2054_v43 = vld [vmem:[#allocation3 + $0x78] sm:$0xf] }
 0x22b   : > { %4325 = vrot.lane.b32.xlu0 %v18894_v12, %s18676_s15  ;;  %v2934_v15 = vrot.slane %v2932_v17, 5  ;;  %v14415_v26 = vsel %vm12335_vm13, %v3204_v57, %v3205_v6  ;;  %1776 = vst [vmem:[#allocation3 + $0xc8] sm:$0x1] %v1775_v52  ;;  %v18895_v25 = vcombine.low %v14071_v35, %v14096_v9  ;;  %v3546_v17 = vshrl.u32 %v14390_v19, 16  ;;  %1773 = vst.msk [vmem:[#allocation3 + $0xc4] sm:$0xf] %vm927_vm7, %v1611_v39 }
 0x22c   : > { %v14423_v8 = vsel %vm12335_vm13, %v10864_v24, %v3202_v54  ;;  %v14432_v35 = vrot.slane %v3522_v21, 4  ;;  %v14434_v57 = vrot.slane %v3525_v61, 5  ;;  %v2302_v6 = vshrl.u32 %v2052_v45, 16  ;;  %v1872_v54 = vpop.permute.xlu1 %1871  ;;  %v14499_v30 = vld [vmem:[#allocation3 + $0x84] sm:$0xf] }
 0x22d   : > { %4423 = vrot.lane.b32.xlu1 %v18895_v25, %s18671_s16  ;;  %v2935_v50 = vsel %vm12353_vm2, %v2930_v7, %v2934_v15  ;;  %v18896_v13 = vcombine.low %v14126_v3, %v14162_v40  ;;  %v2305_v24 = vshll.u32 %v2052_v45, 16  ;;  %v2311_v52 = vshll.u32 %v14241_v48, 16 }
 0x22e   : > { %v2315_v39 = vshrl.u32 %v14241_v48, 16  ;;  %v2032_v15 = vsel %vm12018_vm5, %v1872_v54, %v2031_v22  ;;  %v2304_v21 = vrot.slane %v2302_v6, 4  ;;  %v2321_v61 = vshll.u32 %v14247_v47, 16  ;;  %v1870_v25 = vpop.permute.xlu0 %1869  ;;  %v14452_v48 = vld [vmem:[#allocation3 + $0x94] sm:$0xf] }
 0x22f   : > { %4425 = vrot.lane.b32.xlu0 %v18896_v13, %s18671_s16  ;;  %v2326_v7 = vshrl.u32 %v2054_v43, 16  ;;  %2033 = vst [vmem:[#allocation4 + $0xc8] sm:$0x1] %v2032_v15  ;;  %v2307_v3 = vrot.slane %v2305_v24, 5  ;;  %v14449_v13 = vrot.slane %v2311_v52, 5  ;;  %v2329_v60 = vshll.u32 %v2054_v43, 16 }
 0x230   : > { %v2317_v45 = vrot.slane %v2315_v39, 4  ;;  %2030 = vst.msk [vmem:[#allocation4 + $0xc4] sm:$0xf] %vm927_vm7, %v1870_v25  ;;  %v14454_v27 = vrot.slane %v3546_v17, 4  ;;  %v3549_v22 = vshll.u32 %v14390_v19, 16  ;;  %v2335_v47 = vshll.u32 %v14306_v59, 16 }
 0x231   : > { %3991 = vrot.lane.b32.xlu1 %v14234_v32, %s11880_s21  ;;  %v2339_v6 = vshrl.u32 %v14306_v59, 16  ;;  %v1605_v32 = vpop.permute.xlu1 %1604  ;;  %v1767_v54 = vld [vmem:[#allocation3 + $0xbc] sm:$0x1]  ;;  %v2308_v24 = vor.u32 %v2307_v3, %v2304_v21  ;;  %v2328_v52 = vrot.slane %v2326_v7, 4  ;;  %v2331_v39 = vrot.slane %v2329_v60, 5 }
 0x232   : > { %v2318_v43 = vor.u32 %v2317_v45, %v14449_v13  ;;  %1766 = vst.msk [vmem:[#allocation3 + $0xb8] sm:$0xf] %vm927_vm7, %v1605_v32  ;;  %v14463_v17 = vrot.slane %v2335_v47, 5  ;;  %v2345_v25 = vshll.u32 %v14334_v49, 16  ;;  %v3483_v12 = vshll.u32 %v14096_v9, 16  ;;  %v1607_v59 = vpop.permute.xlu0 %1606 }
 0x233   : > { %3993 = vrot.lane.b32.xlu0 %v14251_v63, %s11880_s21  ;;  %v2341_v15 = vrot.slane %v2339_v6, 4  ;;  %v14469_v63 = vcombine.low %v2925_v53, %v2935_v50  ;;  %v2323_v7 = vrot.slane %v2321_v61, 5  ;;  %v3296_v60 = vld [vmem:[#allocation3 + $0x74] sm:$0x1]  ;;  %v1768_v45 = vsel %vm12018_vm5, %v1607_v59, %v1767_v54 }
 0x234   : > { %v2319_v3 = vrot.slane %v2318_v43, 4  ;;  %v3480_v49 = vor.u32 %v14131_v28, %v14129_v37  ;;  %v3485_v6 = vrot.slane %v3483_v12, 5  ;;  %1769 = vst [vmem:[#allocation3 + $0xbc] sm:$0x1] %v1768_v45  ;;  %v2024_v53 = vld [vmem:[#allocation4 + $0xbc] sm:$0x1]  ;;  %v10994_v61 = vcombine.low %v14390_v19, %v14452_v48 }
 0x235   : > { %4499 = vrot.lane.b32.xlu1 %v14259_v36, %s18674_s22  ;;  %v2342_v47 = vor.u32 %v2341_v15, %v14463_v17  ;;  %v1864_v36 = vpop.permute.xlu1 %1863  ;;  %v14479_v50 = vrot.slane %v3549_v22, 5  ;;  %v2332_v32 = vor.u32 %v2331_v39, %v2328_v52  ;;  %v18897_v54 = vshrl.u32 %v14096_v9, 16  ;;  %v3297_v52 = vld [vmem:[#allocation3 + $0x80] sm:$0x1] }
 0x236   : > { %2023 = vst.msk [vmem:[#allocation4 + $0xb8] sm:$0xf] %vm927_vm7, %v1864_v36  ;;  %v2309_v15 = vrot.slane %v2308_v24, 4  ;;  %v2347_v28 = vrot.slane %v2345_v25, 5  ;;  %v3493_v12 = vshll.u32 %v3296_v60, 16  ;;  %v1866_v59 = vpop.permute.xlu0 %1865  ;;  %v18898_v9 = vld [vmem:[#allocation62_spill] sm:$0xff] }
 0x237   : > { %4501 = vrot.lane.b32.xlu0 %v14312_v55, %s18674_s22  ;;  %v3489_v43 = vrot.slane %v18897_v54, 4  ;;  %v2343_v37 = vrot.slane %v2342_v47, 4  ;;  %v2324_v55 = vsel %vm12353_vm2, %v2319_v3, %v2323_v7  ;;  %v3504_v39 = vor.u32 %v18898_v9, %v14180_v23  ;;  %v3091_v36 = vld [vmem:[#allocation3 + $0x90] sm:$0xe] }
 0x238   : > { %v3507_v45 = vshll.u32 %v14162_v40, 16  ;;  %v2025_v24 = vsel %vm12018_vm5, %v1866_v59, %v2024_v53  ;;  %v3481_v25 = vrot.slane %v3480_v49, 4  ;;  %v3495_v60 = vrot.slane %v3493_v12, 5 }
 0x239   : > { %4331 = vrot.lane.b32.xlu1 %v10977_v46, %s18676_s15  ;;  %v3490_v22 = vor.u32 %v3489_v43, %v3485_v6  ;;  %v18899_v47 = vshrl.u32 %v14162_v40, 16  ;;  %2026 = vst [vmem:[#allocation4 + $0xbc] sm:$0x1] %v2025_v24  ;;  %v14505_v23 = vpop.permute.xlu1 %4155  ;;  %v2314_v46 = vsel %vm12353_vm2, %v2309_v15, %v14449_v13  ;;  %v2333_v3 = vrot.slane %v2332_v32, 4  ;;  %v14514_v43 = vld [vmem:[#allocation3 + $0x98] sm:$0x1] }
 0x23a   : > { %v3509_v49 = vrot.slane %v3507_v45, 5  ;;  %v14510_v40 = vcombine.low %v2314_v46, %v2324_v55  ;;  %v2348_v53 = vsel %vm12353_vm2, %v2343_v37, %v2347_v28  ;;  %v3517_v54 = vshll.u32 %v3297_v52, 16  ;;  %v14526_v37 = vld [vmem:[#allocation3 + $0x88] sm:$0xf] }
 0x23b   : > { %v3513_v10 = vrot.slane %v18899_v47, 4  ;;  %4169 = vrot.lane.b32.xlu0 %v10944_v20, %s18680_s30  ;;  %v3491_v7 = vrot.slane %v3490_v22, 4  ;;  %v3223_v29 = vrot.slane %v14320_v16, 5  ;;  %v14517_v20 = vpop.permute.xlu0 %4409  ;;  %v18901_v13 = vcombine.low %v14326_v1, %v14303_v33  ;;  %v14533_v33 = vld [vmem:[#allocation3 + $0x8c] sm:$0x1] }
 0x23c   : > { %18900 = vst [vmem:[#allocation64_spill] sm:$0xff] %v14517_v20  ;;  %v3505_v15 = vrot.slane %v3504_v39, 4  ;;  %v2937_v59 = vshrl.u32 %v14499_v30, 16  ;;  %v2338_v28 = vsel %vm12353_vm2, %v2333_v3, %v14463_v17  ;;  %v3486_v55 = vsel %vm12353_vm2, %v3481_v25, %v3485_v6  ;;  %v14544_v24 = vld [vmem:[#allocation3 + $0x88] sm:$0xf] }
 0x23d   : > { %4075 = vrot.lane.b32.xlu1 %v18901_v13, %s18682_s20  ;;  %v3496_v32 = vsel %vm12353_vm2, %v3491_v7, %v3495_v60  ;;  %v3514_v12 = vor.u32 %v3513_v10, %v3509_v49  ;;  %v10867_v22 = vrot.slane %v3091_v36, 9  ;;  %v3225_v52 = vrot.slane %v3223_v29, 4  ;;  %v14537_v1 = vpop.permute.xlu1 %4315  ;;  %v2480_v6 = vld [vmem:[#allocation3 + $0x84] sm:$0xe] }
 0x23e   : > { %v14539_v9 = vcombine.low %v2338_v28, %v2348_v53  ;;  %v3510_v39 = vsel %vm12353_vm2, %v3505_v15, %v3509_v49  ;;  %v3226_v17 = vrot.slane %v14514_v43, 5  ;;  %v14546_v25 = vcombine.low %v3486_v55, %v3496_v32  ;;  %v14565_v53 = vld [vmem:[#allocation3 + $0xa8] sm:$0xf] }
 0x23f   : > { %4245 = vrot.lane.b32.xlu0 %v14403_v11, %s18678_s23  ;;  %v3515_v45 = vrot.slane %v3514_v12, 4  ;;  %v3519_v60 = vrot.slane %v3517_v54, 5  ;;  %v14550_v47 = vsel %vm12335_vm13, %v10867_v22, %v3223_v29  ;;  %v2615_v11 = vrot.slane %v14526_v37, 5  ;;  %v4154_v10 = vpop.permute.xlu0 %4153  ;;  %v14645_v22 = vld [vmem:[#allocation3 + $0x9c] sm:$0xf] }
 0x240   : > { %v18902_v46 = vcombine.low %v14279_v38, %v14320_v16  ;;  %v14559_v3 = vsel %vm12335_vm13, %v3225_v52, %v3226_v17  ;;  %v14561_v7 = vrot.slane %v2937_v59, 4  ;;  %v2940_v49 = vshll.u32 %v14499_v30, 16 }
 0x241   : > { %v2618_v36 = vrot.slane %v14533_v33, 5  ;;  %v3520_v54 = vsel %vm12353_vm2, %v3515_v45, %v3519_v60  ;;  %v10851_v13 = vrot.slane %v2480_v6, 9  ;;  %v2617_v38 = vrot.slane %v2615_v11, 4  ;;  %v14574_v32 = vpop.permute.xlu1 %4059  ;;  %v14607_v6 = vld [vmem:[#allocation3 + $0xac] sm:$0xf] }
 0x242   : > { %4175 = vrot.lane.b32.xlu1 %v18902_v46, %s18680_s30  ;;  %v2895_v15 = vor.u32 %v14316_v14, %v14275_v5  ;;  %v2898_v12 = vshll.u32 %v14266_v51, 16  ;;  %v18903_v59 = vshrl.u32 %v14266_v51, 16  ;;  %v2908_v55 = vshll.u32 %v14358_v41, 16  ;;  %v14591_v5 = vld [vmem:[#allocation3 + $0x94] sm:$0xf]  ;;  %v18904_v14 = vld [vmem:[#allocation49_spill] sm:$0xff] }
 0x243   : > { %4077 = vrot.lane.b32.xlu0 %v10930_v42, %s18682_s20  ;;  %v14588_v0 = vsel %vm12335_vm13, %v2617_v38, %v2618_v36  ;;  %v3009_v31 = vshrl.u32 %v14565_v53, 16  ;;  %v14595_v51 = vsel %vm4681_vm8, %v18904_v14, %v4154_v10  ;;  %v14597_v42 = vpop.permute.xlu0 %4061  ;;  %v14601_v41 = vrot.slane %v2940_v49, 5  ;;  %v14613_v38 = vld [vmem:[#allocation3 + $0x98] sm:$0x1] }
 0x244   : > { %v2904_v28 = vrot.slane %v18903_v59, 4  ;;  %v14605_v45 = vsel %vm12335_vm13, %v10851_v13, %v2615_v11  ;;  %v2900_v17 = vrot.slane %v2898_v12, 5  ;;  %v14609_v60 = vcombine.low %v3510_v39, %v3520_v54  ;;  %v2481_v54 = vld [vmem:[#allocation3 + $0x90] sm:$0xe]  ;;  %v3090_v59 = vld [vmem:[#allocation3 + $0x84] sm:$0xe] }
 0x245   : > { %v2896_v46 = vrot.slane %v2895_v15, 4  ;;  %v2910_v36 = vrot.slane %v2908_v55, 5  ;;  %v14619_v49 = vpop.permute.xlu1 %4159  ;;  %v14621_v13 = vrot.slane %v3009_v31, 4  ;;  %v3012_v39 = vshll.u32 %v14565_v53, 16 }
 0x246   : > { %4251 = vrot.lane.b32.xlu1 %v14469_v63, %s18678_s23  ;;  %v18905_v63 = vcombine.low %v14423_v8, %v14415_v26  ;;  %18906 = vst [vmem:[#allocation65_spill] sm:$0xff] %v14619_v49  ;;  %v2905_v11 = vor.u32 %v2904_v28, %v2900_v17  ;;  %v2622_v12 = vrot.slane %v14591_v5, 5  ;;  %v2967_v55 = vor.u32 %v14353_v34, %v14339_v56  ;;  %v14631_v8 = vld [vmem:[#allocation3 + $0x8c] sm:$0x1] }
 0x247   : > { %18907 = vst [vmem:[#allocation60_spill] sm:$0xff] %v14621_v13  ;;  %v2970_v26 = vshll.u32 %v14320_v16, 16  ;;  %v14633_v28 = vpop.permute.xlu0 %4313  ;;  %v18908_v31 = vcombine.low %v14370_v58, %v14395_v62  ;;  %v2625_v15 = vrot.slane %v14613_v38, 5  ;;  %v18909_v29 = vshrl.u32 %v14320_v16, 16  ;;  %v18917_v49 = vld [vmem:[#allocation47_spill] sm:$0xff] }
 0x248   : > { %4329 = vrot.lane.b32.xlu0 %v18905_v63, %s18676_s15  ;;  %v2906_v14 = vrot.slane %v2905_v11, 4  ;;  %v2624_v63 = vrot.slane %v2622_v12, 4  ;;  %v2901_v34 = vsel %vm12353_vm2, %v2896_v46, %v2900_v17  ;;  %v10852_v56 = vrot.slane %v2481_v54, 9  ;;  %v14667_v54 = vld [vmem:[#allocation3 + $0xa8] sm:$0xf] }
 0x249   : > { %v2976_v21 = vrot.slane %v18909_v29, 4  ;;  %v2972_v10 = vrot.slane %v2970_v26, 5  ;;  %v2980_v52 = vshll.u32 %v14514_v43, 16  ;;  %v14651_v58 = vpop.permute.xlu1 %4235  ;;  %v3216_v17 = vrot.slane %v14544_v24, 5 }
 0x24a   : > { %4427 = vrot.lane.b32.xlu1 %v18908_v31, %s18671_s16  ;;  %v2911_v16 = vsel %vm12353_vm2, %v2906_v14, %v2910_v36  ;;  %v14657_v29 = vsel %vm12335_vm13, %v2624_v63, %v2625_v15  ;;  %v3219_v43 = vrot.slane %v14631_v8, 5  ;;  %v14661_v46 = vrot.slane %v3012_v39, 5  ;;  %v14675_v14 = vld [vmem:[#allocation3 + $0xa0] sm:$0xf] }
 0x24b   : > { %v14665_v11 = vsel %vm12335_vm13, %v10852_v56, %v2622_v12  ;;  %v2968_v19 = vrot.slane %v2967_v55, 4  ;;  %v14669_v26 = vpop.permute.xlu0 %4413  ;;  %v14673_v36 = vcombine.low %v2901_v34, %v2911_v16  ;;  %v10866_v15 = vrot.slane %v3090_v59, 9  ;;  %v14681_v56 = vld [vmem:[#allocation3 + $0xac] sm:$0xf] }
 0x24c   : > { %4429 = vrot.lane.b32.xlu0 %v10994_v61, %s18671_s16  ;;  %18910 = vst [vmem:[#allocation66_spill] sm:$0xff] %v14661_v46  ;;  %v2977_v61 = vor.u32 %v2976_v21, %v2972_v10  ;;  %18911 = vst [vmem:[#allocation67_spill] sm:$0xff] %v14669_v26  ;;  %v3218_v31 = vrot.slane %v3216_v17, 4  ;;  %v3570_v39 = vshrl.u32 %v14645_v22, 16  ;;  %v2982_v21 = vrot.slane %v2980_v52, 5  ;;  %v18918_v46 = vld [vmem:[#allocation50_spill] sm:$0xff] }
 0x24d   : > { %v3573_v63 = vshll.u32 %v14645_v22, 16  ;;  %v2973_v59 = vsel %vm12353_vm2, %v2968_v19, %v2972_v10  ;;  %v14691_v34 = vsel %vm12335_vm13, %v10866_v15, %v3216_v17  ;;  %v3594_v52 = vshrl.u32 %v14667_v54, 16  ;;  %v2058_v19 = vld [vmem:[#allocation3 + $0x90] sm:$0xf] }
 0x24e   : > { %3995 = vrot.lane.b32.xlu1 %v14510_v40, %s11880_s21  ;;  %v2978_v55 = vrot.slane %v2977_v61, 4  ;;  %v14685_v40 = vpop.permute.xlu1 %4411  ;;  %v14695_v16 = vsel %vm12335_vm13, %v3218_v31, %v3219_v43  ;;  %v2056_v61 = vld [vmem:[#allocation3 + $0x84] sm:$0xf]  ;;  %v3597_v31 = vshll.u32 %v14667_v54, 16  ;;  %v2359_v10 = vshll.u32 %v14526_v37, 16 }
 0x24f   : > { %v3982_v17 = vpop.permute.xlu0 %3981  ;;  %v14709_v15 = vrot.slane %v3573_v63, 5  ;;  %v2353_v26 = vshll.u32 %v2056_v61, 16  ;;  %v2363_v43 = vshrl.u32 %v14526_v37, 16  ;;  %v2369_v63 = vshll.u32 %v14533_v33, 16 }
 0x250   : > { %3997 = vrot.lane.b32.xlu0 %v14539_v9, %s11880_s21  ;;  %v2983_v12 = vsel %vm12353_vm2, %v2978_v55, %v2982_v21  ;;  %v14700_v9 = vrot.slane %v3570_v39, 4  ;;  %v2350_v21 = vshrl.u32 %v2056_v61, 16  ;;  %v2374_v4 = vshrl.u32 %v2058_v19, 16 }
 0x251   : > { %18913 = vst [vmem:[#allocation69_spill] sm:$0xff] %v14709_v15  ;;  %v14713_v55 = vcombine.low %v2973_v59, %v2983_v12  ;;  %v18915_v15 = vld [vmem:[#allocation53_spill] sm:$0xff]  ;;  %v2355_v61 = vrot.slane %v2353_v26, 5  ;;  %v18919_v13 = vcombine.low %v18917_v49, %v18918_v46  ;;  %v18920_v33 = vcombine.low %v14550_v47, %v14559_v3 }
 0x252   : > { %18912 = vst [vmem:[#allocation71_spill] sm:$0xff] %v14700_v9  ;;  %4503 = vrot.lane.b32.xlu1 %v14546_v25, %s18674_s22  ;;  %v3980_v20 = vpop.permute.xlu1 %3979  ;;  %v14718_v25 = vrot.slane %v3594_v52, 4  ;;  %v18916_v39 = vcombine.low %v18914_v2, %v18915_v15  ;;  %v2352_v59 = vrot.slane %v2350_v21, 4  ;;  %v2361_v9 = vrot.slane %v2359_v10, 5 }
 0x253   : > { %v14732_v37 = vpop.permute.xlu0 %4489  ;;  %vm4714_vm9 = vcmask 130048   ;;  %v14738_v2 = vrot.slane %v3597_v31, 5  ;;  %v2376_v10 = vrot.slane %v2374_v4, 4  ;;  %v2377_v15 = vshll.u32 %v2058_v19, 16 }
 0x254   : > { %4505 = vrot.lane.b32.xlu0 %v14609_v60, %s18674_s22  ;;  %v4606_v12 = vsel %vm554_vm4, %v18916_v39, %v3980_v20  ;;  %v4609_v60 = vsel %vm554_vm4, %v18919_v13, %v3982_v17  ;;  %v2365_v20 = vrot.slane %v2363_v43, 4  ;;  %v2356_v26 = vor.u32 %v2355_v61, %v2352_v59  ;;  %v14759_v59 = vld [vmem:[#allocation3 + $0x28] sm:$0xf] }
 0x255   : > { %v4652_v52 = vsel %vm878_vm3, %v4606_v12, %v14574_v32  ;;  %v2383_v49 = vshll.u32 %v14591_v5, 16  ;;  %v18921_v32 = vcombine.low %v14499_v30, %v14544_v24  ;;  %v10996_v47 = vcombine.low %v14667_v54, %v14681_v56 }
 0x256   : > { %4335 = vrot.lane.b32.xlu1 %v18920_v33, %s18676_s15  ;;  %v14745_v13 = vpop.permute.xlu1 %4319  ;;  %v2366_v3 = vor.u32 %v2365_v20, %v2361_v9  ;;  %v2387_v46 = vshrl.u32 %v14591_v5, 16  ;;  %v2393_v17 = vshll.u32 %v14613_v38, 16  ;;  %v4654_v4 = vsel %vm878_vm3, %v4609_v60, %v14597_v42  ;;  %v14761_v38 = vld [vmem:[#allocation3 + $0x24] sm:$0xf]  ;;  %v14765_v33 = vld [vmem:[#allocation3 + $0x34] sm:$0xf] }
 0x257   : > { %vm4747_vm10 = vcmask 162816   ;;  %v2371_v19 = vrot.slane %v2369_v63, 5  ;;  %v2379_v43 = vrot.slane %v2377_v15, 5  ;;  %v2385_v31 = vrot.slane %v2383_v49, 5  ;;  %v4158_v39 = vpop.permute.xlu0 %4157  ;;  %v3298_v63 = vld [vmem:[#allocation3 + $0x8c] sm:$0x1] }
 0x258   : > { %4173 = vrot.lane.b32.xlu0 %v18921_v32, %s18680_s30  ;;  %v4685_v30 = vsel %vm4681_vm8, %v4652_v52, %v14505_v23  ;;  %v18922_v21 = vcombine.low %v14605_v45, %v14588_v0  ;;  %v2367_v12 = vrot.slane %v2366_v3, 4  ;;  %v2389_v5 = vrot.slane %v2387_v46, 4  ;;  %v14767_v23 = vld [vmem:[#allocation3 + $0x30] sm:$0xf] }
 0x259   : > { %v10891_v42 = vcombine.low %v14761_v38, %v14759_v59  ;;  %v2357_v61 = vrot.slane %v2356_v26, 4  ;;  %v2380_v60 = vor.u32 %v2379_v43, %v2376_v10  ;;  %v10892_v0 = vcombine.low %v14767_v23, %v14765_v33  ;;  %v18932_v33 = vld [vmem:[#allocation65_spill] sm:$0xff] }
 0x25a   : > { %4079 = vrot.lane.b32.xlu1 %v18922_v21, %s18682_s20  ;;  %v3531_v45 = vshll.u32 %v14395_v62, 16  ;;  %v14774_v52 = vpop.permute.xlu1 %4063  ;;  %v2390_v20 = vor.u32 %v2389_v5, %v2385_v31  ;;  %v2395_v15 = vrot.slane %v2393_v17, 5  ;;  %v3528_v26 = vor.u32 %v14434_v57, %v14432_v35 }
 0x25b   : > { %v18923_v10 = vshrl.u32 %v14395_v62, 16  ;;  %v14781_v32 = vsel %vm4681_vm8, %v4654_v4, %v4158_v39  ;;  %v2372_v3 = vsel %vm12353_vm2, %v2367_v12, %v2371_v19  ;;  %v3541_v43 = vshll.u32 %v3298_v63, 16  ;;  %v4234_v21 = vpop.permute.xlu0 %4233  ;;  %v3299_v62 = vld [vmem:[#allocation3 + $0x98] sm:$0x1] }
 0x25c   : > { %4249 = vrot.lane.b32.xlu0 %v14673_v36, %s18678_s23  ;;  %v3533_v46 = vrot.slane %v3531_v45, 5  ;;  %v18924_v36 = vcombine.low %v14565_v53, %v14607_v6  ;;  %v2362_v35 = vsel %vm12353_vm2, %v2357_v61, %v2361_v9  ;;  %v2391_v57 = vrot.slane %v2390_v20, 4 }
 0x25d   : > { %v3537_v49 = vrot.slane %v18923_v10, 4  ;;  %v3552_v17 = vor.u32 %v14479_v50, %v14454_v27  ;;  %v3555_v4 = vshll.u32 %v14452_v48, 16  ;;  %v4716_v19 = vsel %vm4714_vm9, %v14595_v51, %v4234_v21  ;;  %v3093_v10 = vld [vmem:[#allocation3 + $0xa8] sm:$0xe]  ;;  %v14824_v21 = vld [vmem:[#allocation3 + $0xb0] sm:$0x1] }
 0x25e   : > { %4179 = vrot.lane.b32.xlu1 %v18924_v36, %s18680_s30  ;;  %v2381_v39 = vrot.slane %v2380_v60, 4  ;;  %v18925_v5 = vshrl.u32 %v14452_v48, 16  ;;  %v18926_v53 = vcombine.low %v14665_v11, %v14657_v29  ;;  %v14802_v9 = vpop.permute.xlu1 %4163  ;;  %v10915_v61 = vcombine.low %v2362_v35, %v2372_v3 }
 0x25f   : > { %v3538_v12 = vor.u32 %v3537_v49, %v3533_v46  ;;  %v2396_v27 = vsel %vm12353_vm2, %v2391_v57, %v2395_v15  ;;  %v3529_v50 = vrot.slane %v3528_v26, 4  ;;  %v3543_v45 = vrot.slane %v3541_v43, 5  ;;  %v14812_v29 = vpop.permute.xlu0 %4065  ;;  %v14820_v26 = vld [vmem:[#allocation3 + $0x9c] sm:$0xf]  ;;  %v14837_v57 = vld [vmem:[#allocation3 + $0xa0] sm:$0xf] }
 0x260   : > { %v3561_v63 = vrot.slane %v18925_v5, 4  ;;  %4081 = vrot.lane.b32.xlu0 %v18926_v53, %s18682_s20  ;;  %v2386_v51 = vsel %vm12353_vm2, %v2381_v39, %v2385_v31  ;;  %v3557_v20 = vrot.slane %v3555_v4, 5  ;;  %v3565_v48 = vshll.u32 %v3299_v62, 16  ;;  %v14839_v62 = vld [vmem:[#allocation3 + $0xa0] sm:$0xf] }
 0x261   : > { %v3539_v60 = vrot.slane %v3538_v12, 4  ;;  %v14810_v49 = vsel %vm4747_vm10, %v4716_v19, %v14633_v28  ;;  %v3534_v11 = vsel %vm12353_vm2, %v3529_v50, %v3533_v46  ;;  %v3553_v15 = vrot.slane %v3552_v17, 4  ;;  %v14843_v19 = vld [vmem:[#allocation3 + $0xa4] sm:$0x1] }
 0x262   : > { %4255 = vrot.lane.b32.xlu1 %v14713_v55, %s18678_s23  ;;  %v4718_v31 = vsel %vm4714_vm9, %v4685_v30, %v14651_v58  ;;  %v10916_v3 = vcombine.low %v2386_v51, %v2396_v27  ;;  %v3562_v28 = vor.u32 %v3561_v63, %v3557_v20  ;;  %v18927_v55 = vcombine.low %v14691_v34, %v14695_v16  ;;  %v14830_v46 = vpop.permute.xlu1 %4239  ;;  %v2482_v51 = vld [vmem:[#allocation3 + $0x9c] sm:$0xe] }
 0x263   : > { %v3544_v43 = vsel %vm12353_vm2, %v3539_v60, %v3543_v45  ;;  %v3558_v58 = vsel %vm12353_vm2, %v3553_v15, %v3557_v20  ;;  %v4751_v30 = vsel %vm4747_vm10, %v4718_v31, %v14537_v1  ;;  %v10869_v36 = vrot.slane %v3093_v10, 9  ;;  %v14845_v39 = vpop.permute.xlu0 %4317  ;;  %v14865_v60 = vld [vmem:[#allocation3 + $0xc0] sm:$0xf] }
 0x264   : > { %4333 = vrot.lane.b32.xlu0 %v18927_v55, %s18676_s15  ;;  %v3237_v35 = vrot.slane %v14607_v6, 5  ;;  %v3563_v17 = vrot.slane %v3562_v28, 4  ;;  %v3567_v4 = vrot.slane %v3565_v48, 5  ;;  %v2985_v34 = vshrl.u32 %v14820_v26, 16  ;;  %v14886_v28 = vld [vmem:[#allocation3 + $0xc4] sm:$0xf] }
 0x265   : > { %v2988_v16 = vshll.u32 %v14820_v26, 16  ;;  %v18928_v1 = vcombine.low %v14645_v22, %v14675_v14  ;;  %v11009_v12 = vcombine.low %v3534_v11, %v3544_v43  ;;  %v14853_v5 = vsel %vm4780_vm11, %v4751_v30, %v14685_v40 }
 0x266   : > { %v3239_v63 = vrot.slane %v3237_v35, 4  ;;  %v3240_v53 = vrot.slane %v14824_v21, 5  ;;  %v3568_v27 = vsel %vm12353_vm2, %v3563_v17, %v3567_v4  ;;  %v14860_v50 = vsel %vm12335_vm13, %v10869_v36, %v3237_v35  ;;  %v14871_v40 = vpop.permute.xlu1 %4415 }
 0x267   : > { %4431 = vrot.lane.b32.xlu1 %v18928_v1, %s18671_s16  ;;  %v2998_v45 = vshrl.u32 %v14837_v57, 16  ;;  %v10948_v22 = vcombine.low %v14820_v26, %v14837_v57  ;;  %v14875_v48 = vrot.slane %v2985_v34, 4  ;;  %v2629_v10 = vrot.slane %v14839_v62, 5  ;;  %v14888_v55 = vpop.permute.xlu0 %4417  ;;  %v14895_v34 = vld [vmem:[#allocation3 + $0xac] sm:$0xf] }
 0x268   : > { %4433 = vrot.lane.b32.xlu0 %v10996_v47, %s18671_s16  ;;  %v3241_v20 = vsel %vm12335_vm13, %v3239_v63, %v3240_v53  ;;  %v2632_v11 = vrot.slane %v14843_v19, 5  ;;  %v14879_v15 = vrot.slane %v2988_v16, 5  ;;  %v2943_v31 = vor.u32 %v14601_v41, %v14561_v7  ;;  %v15019_v63 = vld [vmem:[#allocation3 + $0xa4] sm:$0x1] }
 0x269   : > { %v2946_v43 = vshll.u32 %v14544_v24, 16  ;;  %v18929_v54 = vshrl.u32 %v14544_v24, 16  ;;  %v10853_v30 = vrot.slane %v2482_v51, 9  ;;  %v2631_v36 = vrot.slane %v2629_v10, 4  ;;  %v2483_v51 = vld [vmem:[#allocation3 + $0xa8] sm:$0xe] }
 0x26a   : > { %v2956_v35 = vshll.u32 %v14631_v8, 16  ;;  %v3057_v17 = vshrl.u32 %v14865_v60, 16  ;;  %v11010_v4 = vcombine.low %v3558_v58, %v3568_v27  ;;  %v10981_v7 = vcombine.low %v14860_v50, %v3241_v20  ;;  %v3984_v16 = vpop.permute.xlu1 %3983 }
 0x26b   : > { %v2952_v47 = vrot.slane %v18929_v54, 4  ;;  %3999 = vrot.lane.b32.xlu1 %v10915_v61, %s11880_s21  ;;  %v2948_v41 = vrot.slane %v2946_v43, 5  ;;  %v3060_v24 = vshll.u32 %v14865_v60, 16  ;;  %v2630_v61 = vsel %vm12335_vm13, %v10853_v30, %v2629_v10  ;;  %v3986_v10 = vpop.permute.xlu0 %3985 }
 0x26c   : > { %4001 = vrot.lane.b32.xlu0 %v10916_v3, %s11880_s21  ;;  %v2633_v1 = vsel %vm12335_vm13, %v2631_v36, %v2632_v11  ;;  %v2944_v8 = vrot.slane %v2943_v31, 4  ;;  %v4612_v58 = vsel %vm554_vm4, %v10891_v42, %v3984_v16  ;;  %v2958_v27 = vrot.slane %v2956_v35, 5  ;;  %v14909_v3 = vld [vmem:[#allocation3 + $0xb0] sm:$0x1]  ;;  %v18931_v35 = vld [vmem:[#allocation66_spill] sm:$0xff] }
 0x26d   : > { %v2953_v53 = vor.u32 %v2952_v47, %v2948_v41  ;;  %v14907_v50 = vrot.slane %v3057_v17, 4  ;;  %v4656_v20 = vsel %vm878_vm3, %v4612_v58, %v14774_v52  ;;  %v10933_v11 = vcombine.low %v2630_v61, %v2633_v1  ;;  %v18930_v36 = vld [vmem:[#allocation60_spill] sm:$0xff]  ;;  %v3092_v16 = vld [vmem:[#allocation3 + $0x9c] sm:$0xe]  ;;  %v14938_v61 = vld [vmem:[#allocation3 + $0xa4] sm:$0x1] }
 0x26e   : > { %v10951_v31 = vcombine.low %v14865_v60, %v14886_v28  ;;  %v2636_v59 = vrot.slane %v14895_v34, 5  ;;  %v4615_v38 = vsel %vm554_vm4, %v10892_v0, %v3986_v10  ;;  %v2949_v42 = vsel %vm12353_vm2, %v2944_v8, %v2948_v41  ;;  %v4492_v52 = vpop.permute.xlu1 %4491  ;;  %v14940_v1 = vld [vmem:[#allocation3 + $0xb4] sm:$0xf] }
 0x26f   : > { %4507 = vrot.lane.b32.xlu1 %v11009_v12, %s18674_s22  ;;  %v2954_v43 = vrot.slane %v2953_v53, 4  ;;  %v14923_v54 = vrot.slane %v3060_v24, 5  ;;  %v10854_v12 = vrot.slane %v2483_v51, 9  ;;  %v2639_v30 = vrot.slane %v14909_v3, 5  ;;  %v14942_v8 = vpop.permute.xlu0 %4493 }
 0x270   : > { %4509 = vrot.lane.b32.xlu0 %v11010_v4, %s18674_s22  ;;  %v2638_v47 = vrot.slane %v2636_v59, 4  ;;  %v3015_v17 = vor.u32 %v18931_v35, %v18930_v36  ;;  %v14931_v23 = vsel %vm4681_vm8, %v4656_v20, %v18932_v33  ;;  %v4658_v0 = vsel %vm878_vm3, %v4615_v38, %v14812_v29  ;;  %v14968_v36 = vld [vmem:[#allocation3 + $0xb8] sm:$0xf]  ;;  %v2060_v33 = vld [vmem:[#allocation3 + $0x9c] sm:$0xf] }
 0x271   : > { %v3018_v41 = vshll.u32 %v14607_v6, 16  ;;  %v18933_v4 = vshrl.u32 %v14607_v6, 16  ;;  %v2959_v58 = vsel %vm12353_vm2, %v2954_v43, %v2958_v27  ;;  %v2637_v53 = vsel %vm12335_vm13, %v10854_v12, %v2636_v59 }
 0x272   : > { %v2640_v29 = vsel %vm12335_vm13, %v2638_v47, %v2639_v30  ;;  %v3028_v6 = vshll.u32 %v14824_v21, 16  ;;  %v14954_v51 = vsel %vm4813_vm12, %v14853_v5, %v4492_v52  ;;  %v3016_v20 = vrot.slane %v3015_v17, 4  ;;  %v14966_v5 = vld [vmem:[#allocation3 + $0xc0] sm:$0xf] }
 0x273   : > { %v3024_v24 = vrot.slane %v18933_v4, 4  ;;  %4339 = vrot.lane.b32.xlu1 %v10981_v7, %s18676_s15  ;;  %v3020_v10 = vrot.slane %v3018_v41, 5  ;;  %v3230_v38 = vrot.slane %v14837_v57, 5  ;;  %v14961_v7 = vpop.permute.xlu1 %4323  ;;  %v10868_v27 = vrot.slane %v3092_v16, 9  ;;  %v4162_v35 = vpop.permute.xlu0 %4161 }
 0x274   : > { %4177 = vrot.lane.b32.xlu0 %v10948_v22, %s18680_s30  ;;  %v3233_v59 = vrot.slane %v14938_v61, 5  ;;  %v3618_v21 = vshrl.u32 %v14940_v1, 16  ;;  %v3621_v43 = vshll.u32 %v14940_v1, 16  ;;  %v10962_v52 = vcombine.low %v2949_v42, %v2959_v58 }
 0x275   : > { %v10934_v12 = vcombine.low %v2637_v53, %v2640_v29  ;;  %v3025_v47 = vor.u32 %v3024_v24, %v3020_v10  ;;  %v3232_v30 = vrot.slane %v3230_v38, 4  ;;  %v3021_v26 = vsel %vm12353_vm2, %v3016_v20, %v3020_v10  ;;  %v14981_v24 = vld [vmem:[#allocation3 + $0xc4] sm:$0xf] }
 0x276   : > { %v3030_v22 = vrot.slane %v3028_v6, 5  ;;  %v3231_v17 = vsel %vm12335_vm13, %v10868_v27, %v3230_v38  ;;  %v14975_v16 = vrot.slane %v3618_v21, 4  ;;  %v14979_v4 = vrot.slane %v3621_v43, 5  ;;  %v2062_v21 = vld [vmem:[#allocation3 + $0xa8] sm:$0xf] }
 0x277   : > { %4083 = vrot.lane.b32.xlu1 %v10933_v11, %s18682_s20  ;;  %v3026_v41 = vrot.slane %v3025_v47, 4  ;;  %v3234_v42 = vsel %vm12335_vm13, %v3232_v30, %v3233_v59  ;;  %v3642_v11 = vshrl.u32 %v14966_v5, 16  ;;  %v14985_v58 = vsel %vm4681_vm8, %v4658_v0, %v4162_v35  ;;  %v14988_v53 = vpop.permute.xlu1 %4067  ;;  %v4238_v0 = vpop.permute.xlu0 %4237 }
 0x278   : > { %4253 = vrot.lane.b32.xlu0 %v10962_v52, %s18678_s23  ;;  %v10980_v29 = vcombine.low %v3231_v17, %v3234_v42  ;;  %v10997_v6 = vcombine.low %v14940_v1, %v14968_v36  ;;  %v3645_v38 = vshll.u32 %v14966_v5, 16  ;;  %v2398_v27 = vshrl.u32 %v2060_v33, 16 }
 0x279   : > { %v3031_v10 = vsel %vm12353_vm2, %v3026_v41, %v3030_v22  ;;  %v2401_v59 = vshll.u32 %v2060_v33, 16  ;;  %v10998_v1 = vcombine.low %v14966_v5, %v14981_v24  ;;  %v2407_v52 = vshll.u32 %v14839_v62, 16 }
 0x27a   : > { %v2411_v47 = vshrl.u32 %v14839_v62, 16  ;;  %v15005_v30 = vrot.slane %v3642_v11, 4  ;;  %v2400_v35 = vrot.slane %v2398_v27, 4  ;;  %v2417_v17 = vshll.u32 %v14843_v19, 16 }
 0x27b   : > { %4183 = vrot.lane.b32.xlu1 %v10951_v31, %s18680_s30  ;;  %v2403_v22 = vrot.slane %v2401_v59, 5  ;;  %v15009_v33 = vpop.permute.xlu1 %4167  ;;  %v10965_v60 = vcombine.low %v3021_v26, %v3031_v10  ;;  %v2409_v31 = vrot.slane %v2407_v52, 5  ;;  %v2422_v42 = vshrl.u32 %v2062_v21, 16  ;;  %v15014_v11 = vpop.permute.xlu0 %4069 }
 0x27c   : > { %4085 = vrot.lane.b32.xlu0 %v10934_v12, %s18682_s20  ;;  %v2413_v41 = vrot.slane %v2411_v47, 4  ;;  %v4720_v5 = vsel %vm4714_vm9, %v14781_v32, %v4238_v0  ;;  %v2425_v43 = vshll.u32 %v2062_v21, 16  ;;  %v2431_v62 = vshll.u32 %v14895_v34, 16 }
 0x27d   : > { %v2404_v20 = vor.u32 %v2403_v22, %v2400_v35  ;;  %v2419_v27 = vrot.slane %v2417_v17, 5  ;;  %v2424_v12 = vrot.slane %v2422_v42, 4  ;;  %v2435_v59 = vshrl.u32 %v14895_v34, 16 }
 0x27e   : > { %v2414_v19 = vor.u32 %v2413_v41, %v2409_v31  ;;  %v2427_v10 = vrot.slane %v2425_v43, 5  ;;  %v2433_v52 = vrot.slane %v2431_v62, 5  ;;  %v2441_v47 = vshll.u32 %v14909_v3, 16  ;;  %v18934_v43 = vld [vmem:[#allocation71_spill] sm:$0xff]  ;;  %v18935_v3 = vld [vmem:[#allocation69_spill] sm:$0xff] }
 0x27f   : > { %4259 = vrot.lane.b32.xlu1 %v10965_v60, %s18678_s23  ;;  %v2405_v26 = vrot.slane %v2404_v20, 4  ;;  %v15023_v32 = vsel %vm4747_vm10, %v4720_v5, %v14845_v39  ;;  %v15026_v21 = vpop.permute.xlu1 %4243  ;;  %v15028_v0 = vrot.slane %v3645_v38, 5  ;;  %v2437_v22 = vrot.slane %v2435_v59, 4 }
 0x280   : > { %4337 = vrot.lane.b32.xlu0 %v10980_v29, %s18676_s15  ;;  %v2415_v35 = vrot.slane %v2414_v19, 4  ;;  %v2428_v20 = vor.u32 %v2427_v10, %v2424_v12  ;;  %v3576_v17 = vor.u32 %v18935_v3, %v18934_v43  ;;  %v3579_v60 = vshll.u32 %v14675_v14, 16  ;;  %v15035_v41 = vpop.permute.xlu0 %4321  ;;  %v11741_v19 = vld [vmem:[#allocation3 + $0x40] sm:$0xf]  ;;  %v11742_v12 = vld [vmem:[#allocation3 + $0x3c] sm:$0xf] }
 0x281   : > { %v2410_v34 = vsel %vm12353_vm2, %v2405_v26, %v2409_v31  ;;  %v2438_v29 = vor.u32 %v2437_v22, %v2433_v52  ;;  %v18936_v38 = vshrl.u32 %v14675_v14, 16  ;;  %v3589_v5 = vshll.u32 %v15019_v63, 16  ;;  %v15043_v10 = vld [vmem:[#allocation3 + $0xb0] sm:$0x1] }
 0x282   : > { %v2420_v39 = vsel %vm12353_vm2, %v2415_v35, %v2419_v27  ;;  %v2443_v62 = vrot.slane %v2441_v47, 5  ;;  %v10893_v59 = vcombine.low %v11742_v12, %v11741_v19  ;;  %v3581_v26 = vrot.slane %v3579_v60, 5 }
 0x283   : > { %4435 = vrot.lane.b32.xlu1 %v10997_v6, %s18671_s16  ;;  %v3585_v42 = vrot.slane %v18936_v38, 4  ;;  %v10917_v31 = vcombine.low %v2410_v34, %v2420_v39  ;;  %v15046_v6 = vpop.permute.xlu1 %4419  ;;  %v2429_v43 = vrot.slane %v2428_v20, 4  ;;  %v2439_v27 = vrot.slane %v2438_v29, 4  ;;  %v11743_v38 = vld [vmem:[#allocation3 + $0x4c] sm:$0xf] }
 0x284   : > { %4437 = vrot.lane.b32.xlu0 %v10998_v1, %s18671_s16  ;;  %v3600_v14 = vor.u32 %v14738_v2, %v14718_v25  ;;  %v3603_v35 = vshll.u32 %v14681_v56, 16  ;;  %v3577_v22 = vrot.slane %v3576_v17, 4  ;;  %v3591_v47 = vrot.slane %v3589_v5, 5  ;;  %v15053_v60 = vpop.permute.xlu0 %4421  ;;  %v3095_v2 = vld [vmem:[#allocation3 + $0xc0] sm:$0xe]  ;;  %s10771_s16 = sshll.u32 %s18673_s24, 8 }
 0x285   : > { %v3586_v34 = vor.u32 %v3585_v42, %v3581_v26  ;;  %v18937_v3 = vshrl.u32 %v14681_v56, 16  ;;  %v2434_v1 = vsel %vm12353_vm2, %v2429_v43, %v2433_v52  ;;  %v2444_v20 = vsel %vm12353_vm2, %v2439_v27, %v2443_v62  ;;  %v11744_v42 = vld [vmem:[#allocation3 + $0x48] sm:$0xf]  ;;  %s15239_s24 = scalar_lea.vmem [#allocation5], %s10771_s16  ;;  %s18684_s16 = smov 32  }
 0x286   : > { %v3605_v29 = vrot.slane %v3603_v35, 5  ;;  %v3613_v25 = vshll.u32 %v15043_v10, 16  ;;  %v10918_v17 = vcombine.low %v2434_v1, %v2444_v20  ;;  %v10894_v5 = vcombine.low %v11744_v42, %v11743_v38  ;;  %v15068_v27 = vld [vmem:[#allocation3 + $0xc8] sm:$0x1]  ;;  %v15094_v38 = vld [vmem:[#allocation3 + $0xb8] sm:$0xf] }
 0x287   : > { %v3609_v39 = vrot.slane %v18937_v3, 4  ;;  %4003 = vrot.lane.b32.xlu1 %v10917_v31, %s11880_s21  ;;  %v3587_v56 = vrot.slane %v3586_v34, 4  ;;  %v4722_v19 = vsel %vm4714_vm9, %v14931_v23, %v14830_v46  ;;  %v3988_v31 = vpop.permute.xlu1 %3987  ;;  %v3582_v52 = vsel %vm12353_vm2, %v3577_v22, %v3581_v26  ;;  %v15096_v42 = vld [vmem:[#allocation3 + $0xbc] sm:$0x1] }
 0x288   : > { %v3601_v12 = vrot.slane %v3600_v14, 4  ;;  %v4755_v62 = vsel %vm4747_vm10, %v4722_v19, %v14745_v13  ;;  %4005 = vrot.lane.b32.xlu0 %v10918_v17, %s11880_s21  ;;  %v4618_v35 = vsel %vm554_vm4, %v10893_v59, %v3988_v31  ;;  %v10871_v3 = vrot.slane %v3095_v2, 9  ;;  %v3990_v26 = vpop.permute.xlu0 %3989  ;;  %v2676_v13 = vld [vmem:[#allocation3 + $0xb4] sm:$0xf]  ;;  %v15082_v2 = vld [vmem:[#allocation3 + $0xb8] sm:$0xf] }
 0x289   : > { %v3610_v43 = vor.u32 %v3609_v39, %v3605_v29  ;;  %v3592_v34 = vsel %vm12353_vm2, %v3587_v56, %v3591_v47  ;;  %v3251_v46 = vrot.slane %v14886_v28, 5  ;;  %v4660_v23 = vsel %vm878_vm3, %v4618_v35, %v14988_v53  ;;  %v2484_v56 = vld [vmem:[#allocation3 + $0xb4] sm:$0xe] }
 0x28a   : > { %v11011_v14 = vcombine.low %v3582_v52, %v3592_v34  ;;  %v3615_v39 = vrot.slane %v3613_v25, 5  ;;  %v3606_v1 = vsel %vm12353_vm2, %v3601_v12, %v3605_v29  ;;  %v4788_v59 = vsel %vm4780_vm11, %v4755_v62, %v14871_v40 }
 0x28b   : > { %v3611_v22 = vrot.slane %v3610_v43, 4  ;;  %v3253_v20 = vrot.slane %v3251_v46, 4  ;;  %v3254_v47 = vrot.slane %v15068_v27, 5  ;;  %v15086_v17 = vsel %vm4681_vm8, %v4660_v23, %v14802_v9  ;;  %v4496_v29 = vpop.permute.xlu1 %4495 }
 0x28c   : > { %v4621_v53 = vsel %vm554_vm4, %v10894_v5, %v3990_v26  ;;  %4511 = vrot.lane.b32.xlu1 %v11011_v14, %s18674_s22  ;;  %v3252_v40 = vsel %vm12335_vm13, %v10871_v3, %v3251_v46  ;;  %v3033_v31 = vshrl.u32 %v2676_v13, 16  ;;  %v3036_v5 = vshll.u32 %v2676_v13, 16  ;;  %v15103_v12 = vpop.permute.xlu0 %4497 }
 0x28d   : > { %v3616_v25 = vsel %vm12353_vm2, %v3611_v22, %v3615_v39  ;;  %v3255_v9 = vsel %vm12335_vm13, %v3253_v20, %v3254_v47  ;;  %v15101_v52 = vsel %vm4813_vm12, %v4788_v59, %v4496_v29  ;;  %v10950_v62 = vcombine.low %v2676_v13, %v15082_v2  ;;  %v2064_v29 = vld [vmem:[#allocation3 + $0xb4] sm:$0xf] }
 0x28e   : > { %v11012_v19 = vcombine.low %v3606_v1, %v3616_v25  ;;  %v10983_v43 = vcombine.low %v3252_v40, %v3255_v9  ;;  %v3046_v35 = vshrl.u32 %v15082_v2, 16  ;;  %v10855_v34 = vrot.slane %v2484_v56, 9 }
 0x28f   : > { %v2643_v3 = vrot.slane %v15094_v38, 5  ;;  %v2646_v46 = vrot.slane %v15096_v42, 5  ;;  %v2991_v23 = vor.u32 %v14879_v15, %v14875_v48  ;;  %v15113_v26 = vpop.permute.xlu1 %4327  ;;  %v2994_v14 = vshll.u32 %v14837_v57, 16 }
 0x290   : > { %4513 = vrot.lane.b32.xlu0 %v11012_v19, %s18674_s22  ;;  %4343 = vrot.lane.b32.xlu1 %v10983_v43, %s18676_s15  ;;  %v3000_v22 = vrot.slane %v2998_v45, 4  ;;  %v3004_v39 = vshll.u32 %v14938_v61, 16  ;;  %v3063_v13 = vor.u32 %v14923_v54, %v14907_v50  ;;  %v15121_v1 = vrot.slane %v3033_v31, 4  ;;  %v4166_v47 = vpop.permute.xlu0 %4165  ;;  %v15136_v19 = vld [vmem:[#allocation3 + $0xbc] sm:$0x1] }
 0x291   : > { %v15123_v59 = vrot.slane %v3036_v5, 5  ;;  %v2645_v20 = vrot.slane %v2643_v3, 4  ;;  %v3066_v48 = vshll.u32 %v14886_v28, 16  ;;  %v4662_v15 = vsel %vm878_vm3, %v4621_v53, %v15014_v11 }
 0x292   : > { %v2644_v57 = vsel %vm12335_vm13, %v10855_v34, %v2643_v3  ;;  %v2996_v45 = vrot.slane %v2994_v14, 5  ;;  %v18938_v61 = vshrl.u32 %v14886_v28, 16  ;;  %v2992_v54 = vrot.slane %v2991_v23, 4  ;;  %v3094_v28 = vld [vmem:[#allocation3 + $0xb4] sm:$0xe] }
 0x293   : > { %v2647_v50 = vsel %vm12335_vm13, %v2645_v20, %v2646_v46  ;;  %v3068_v40 = vrot.slane %v3066_v48, 5  ;;  %v3076_v56 = vshll.u32 %v15068_v27, 16  ;;  %v3006_v9 = vrot.slane %v3004_v39, 5  ;;  %v15138_v31 = vpop.permute.xlu1 %4071 }
 0x294   : > { %v3072_v25 = vrot.slane %v18938_v61, 4  ;;  %4181 = vrot.lane.b32.xlu0 %v10950_v62, %s18680_s30  ;;  %v10935_v11 = vcombine.low %v2644_v57, %v2647_v50  ;;  %v3001_v53 = vor.u32 %v3000_v22, %v2996_v45  ;;  %v3064_v5 = vrot.slane %v3063_v13, 4  ;;  %v4242_v46 = vpop.permute.xlu0 %4241 }
 0x295   : > { %v15141_v43 = vsel %vm4681_vm8, %v4662_v15, %v4166_v47  ;;  %v2997_v62 = vsel %vm12353_vm2, %v2992_v54, %v2996_v45  ;;  %v3244_v3 = vrot.slane %v15082_v2, 5  ;;  %v3247_v23 = vrot.slane %v15136_v19, 5 }
 0x296   : > { %v3073_v34 = vor.u32 %v3072_v25, %v3068_v40  ;;  %4087 = vrot.lane.b32.xlu1 %v10935_v11, %s18682_s20  ;;  %v3002_v27 = vrot.slane %v3001_v53, 4  ;;  %v2446_v14 = vshrl.u32 %v2064_v29, 16  ;;  %v2449_v22 = vshll.u32 %v2064_v29, 16 }
 0x297   : > { %v3078_v13 = vrot.slane %v3076_v56, 5  ;;  %v10870_v20 = vrot.slane %v3094_v28, 9  ;;  %v3246_v48 = vrot.slane %v3244_v3, 4  ;;  %v3069_v47 = vsel %vm12353_vm2, %v3064_v5, %v3068_v40  ;;  %v15152_v57 = vpop.permute.xlu1 %4171  ;;  %v15161_v56 = vld [vmem:[#allocation3 + $0xc8] sm:$0x1] }
 0x298   : > { %v3074_v39 = vrot.slane %v3073_v34, 4  ;;  %v3007_v15 = vsel %vm12353_vm2, %v3002_v27, %v3006_v9  ;;  %v2448_v45 = vrot.slane %v2446_v14, 4  ;;  %v2451_v61 = vrot.slane %v2449_v22, 5 }
 0x299   : > { %v10964_v25 = vcombine.low %v2997_v62, %v3007_v15  ;;  %v15156_v50 = vsel %vm4714_vm9, %v14985_v58, %v4242_v46  ;;  %v2455_v54 = vshll.u32 %v15094_v38, 16  ;;  %v3248_v40 = vsel %vm12335_vm13, %v3246_v48, %v3247_v23  ;;  %v15165_v53 = vpop.permute.xlu0 %4073 }
 0x29a   : > { %v3079_v29 = vsel %vm12353_vm2, %v3074_v39, %v3078_v13  ;;  %v2452_v9 = vor.u32 %v2451_v61, %v2448_v45  ;;  %v2459_v5 = vshrl.u32 %v15094_v38, 16  ;;  %v2465_v28 = vshll.u32 %v15096_v42, 16 }
 0x29b   : > { %v10967_v11 = vcombine.low %v3069_v47, %v3079_v29  ;;  %4257 = vrot.lane.b32.xlu0 %v10964_v25, %s18678_s23  ;;  %v2457_v58 = vrot.slane %v2455_v54, 5  ;;  %v3648_v62 = vor.u32 %v15028_v0, %v15005_v30  ;;  %v3651_v34 = vshll.u32 %v14981_v24, 16  ;;  %v15179_v22 = vpop.permute.xlu1 %4247  ;;  %v15181_v30 = vld [vmem:[#allocation3 + $0xbc] sm:$0x1] }
 0x29c   : > { %v3245_v27 = vsel %vm12335_vm13, %v10870_v20, %v3244_v3  ;;  %v2461_v46 = vrot.slane %v2459_v5, 4  ;;  %v18939_v23 = vshrl.u32 %v14981_v24, 16  ;;  %v3661_v38 = vshll.u32 %v15161_v56, 16 }
 0x29d   : > { %4263 = vrot.lane.b32.xlu1 %v10967_v11, %s18678_s23  ;;  %v10982_v39 = vcombine.low %v3245_v27, %v3248_v40  ;;  %v2453_v42 = vrot.slane %v2452_v9, 4  ;;  %v2467_v13 = vrot.slane %v2465_v28, 5  ;;  %v3653_v48 = vrot.slane %v3651_v34, 5  ;;  %v15183_v47 = vpop.permute.xlu0 %4325 }
 0x29e   : > { %v3657_v14 = vrot.slane %v18939_v23, 4  ;;  %v2462_v0 = vor.u32 %v2461_v46, %v2457_v58  ;;  %v3649_v15 = vrot.slane %v3648_v62, 4  ;;  %v3624_v3 = vor.u32 %v14979_v4, %v14975_v16 }
 0x29f   : > { %v3627_v20 = vshll.u32 %v14968_v36, 16  ;;  %4341 = vrot.lane.b32.xlu0 %v10982_v39, %s18676_s15  ;;  %v2458_v45 = vsel %vm12353_vm2, %v2453_v42, %v2457_v58  ;;  %v3663_v25 = vrot.slane %v3661_v38, 5  ;;  %v18940_v29 = vshrl.u32 %v14968_v36, 16  ;;  %v15198_v4 = vpop.permute.xlu1 %4423  ;;  %s18989_s15 = smov 24  }
 0x2a0   : > { %v3658_v61 = vor.u32 %v3657_v14, %v3653_v48  ;;  %v2463_v11 = vrot.slane %v2462_v0, 4  ;;  %v3637_v9 = vshll.u32 %v15181_v30, 16  ;;  %v3039_v16 = vor.u32 %v15123_v59, %v15121_v1  ;;  %v3690_v14 = vld [vmem:[#allocation3 + $0x24] sm:$0xe]  ;;  %v15230_v0 = vld [vmem:[#allocation3 + $0x18] sm:$0xe] }
 0x2a1   : > { %v3633_v54 = vrot.slane %v18940_v29, 4  ;;  %v15193_v40 = vrot.slane %v3627_v20, 5  ;;  %v3042_v58 = vshll.u32 %v15082_v2, 16  ;;  %v15203_v28 = vrot.slane %v3046_v35, 4  ;;  %v15213_v59 = vpop.permute.xlu0 %4425  ;;  %v11745_v20 = vld [vmem:[#allocation3 + $0x28] sm:$0xf] }
 0x2a2   : > { %v3659_v5 = vrot.slane %v3658_v61, 4  ;;  %v3052_v62 = vshll.u32 %v15136_v19, 16  ;;  %v2468_v34 = vsel %vm12353_vm2, %v2463_v11, %v2467_v13  ;;  %v15208_v27 = vrot.slane %v3624_v3, 4  ;;  %18941 = vst [vmem:[#allocation68_spill] sm:$0xff] %v15213_v59  ;;  %v11746_v61 = vld [vmem:[#allocation3 + $0x2c] sm:$0x1] }
 0x2a3   : > { %v3634_v46 = vor.u32 %v3633_v54, %v15193_v40  ;;  %v15211_v1 = vrot.slane %v3637_v9, 5  ;;  %v10919_v23 = vcombine.low %v2458_v45, %v2468_v34  ;;  %v3654_v2 = vsel %vm12353_vm2, %v3649_v15, %v3653_v48  ;;  %v15232_v48 = vpop.permute.xlu1 %3991  ;;  %v18942_v29 = vld [vmem:[#allocation12_spill] sm:$0xff]  ;;  %v18943_v54 = vld [vmem:[#allocation13_spill] sm:$0xff]  ;;  %v18944_v11 = vld [vmem:[#allocation15_spill] sm:$0xff] }
 0x2a4   : > { %v3664_v35 = vsel %vm12353_vm2, %v3659_v5, %v3663_v25  ;;  %v15220_v19 = vrot.slane %v3042_v58, 5  ;;  %v3630_v39 = vsel %vm12353_vm2, %v15208_v27, %v15193_v40  ;;  %v15228_v13 = vrot.slane %v3039_v16, 4  ;;  %881 = vst.msk [vmem:[%s15239_s24 + $0x10] sm:$0xff] %vm878_vm3, %v18942_v29  ;;  %879 = vst.msk [vmem:[%s15239_s24] sm:$0xff] %vm878_vm3, %v18943_v54  ;;  %v18945_v40 = vld [vmem:[#allocation14_spill] sm:$0xff]  ;;  %v18946_v9 = vld [vmem:[#allocation17_spill] sm:$0xff] }
 0x2a5   : > { %v11014_v38 = vcombine.low %v3654_v2, %v3664_v35  ;;  %v3635_v42 = vrot.slane %v3634_v46, 4  ;;  %4007 = vrot.lane.b32.xlu1 %v10919_v23, %s11880_s21  ;;  %v15237_v3 = vrot.slane %v3052_v62, 5  ;;  %v3762_v45 = vrot.slane %v11745_v20, 5  ;;  %880 = vst.msk [vmem:[%s15239_s24 + $0x8] sm:$0xff] %vm878_vm3, %v18944_v11  ;;  %882 = vst.msk [vmem:[%s15239_s24 + $0x18] sm:$0xff] %vm878_vm3, %v18945_v40  ;;  %v18947_v16 = vld [vmem:[#allocation19_spill] sm:$0xff] }
 0x2a6   : > { %v3049_v15 = vor.u32 %v15203_v28, %v15220_v19  ;;  %v3765_v25 = vrot.slane %v11746_v61, 5  ;;  %883 = vst.msk [vmem:[%s15239_s24 + $0x20] sm:$0xff] %vm878_vm3, %v18946_v9  ;;  %884 = vst.msk [vmem:[%s15239_s24 + $0x28] sm:$0xff] %vm878_vm3, %v18947_v16  ;;  %v18948_v5 = vld [vmem:[#allocation16_spill] sm:$0xff]  ;;  %v18949_v58 = vld [vmem:[#allocation18_spill] sm:$0xff] }
 0x2a7   : > { %885 = vst.msk [vmem:[%s15239_s24 + $0x30] sm:$0xff] %vm878_vm3, %v18948_v5  ;;  %886 = vst.msk [vmem:[%s15239_s24 + $0x38] sm:$0xff] %vm878_vm3, %v18949_v58  ;;  %v18950_v28 = vld [vmem:[#allocation21_spill] sm:$0xff]  ;;  %v18951_v62 = vld [vmem:[#allocation23_spill] sm:$0xff]  ;;  %4517 = vrot.lane.b32.xlu0 %v11014_v38, %s18674_s22 }
 0x2a8   : > { %887 = vst.msk [vmem:[%s15239_s24 + $0x40] sm:$0xff] %vm878_vm3, %v18950_v28  ;;  %888 = vst.msk [vmem:[%s15239_s24 + $0x48] sm:$0xff] %vm878_vm3, %v18951_v62  ;;  %v18952_v34 = vld [vmem:[#allocation20_spill] sm:$0xff]  ;;  %v18953_v27 = vld [vmem:[#allocation22_spill] sm:$0xff] }
 0x2a9   : > { %889 = vst.msk [vmem:[%s15239_s24 + $0x50] sm:$0xff] %vm878_vm3, %v18952_v34  ;;  %890 = vst.msk [vmem:[%s15239_s24 + $0x58] sm:$0xff] %vm878_vm3, %v18953_v27  ;;  %v18954_v46 = vld [vmem:[#allocation25_spill] sm:$0xff]  ;;  %v18955_v23 = vld [vmem:[#allocation27_spill] sm:$0xff] }
 0x2aa   : > { %891 = vst.msk [vmem:[%s15239_s24 + $0x60] sm:$0xff] %vm878_vm3, %v18954_v46  ;;  %892 = vst.msk [vmem:[%s15239_s24 + $0x68] sm:$0xff] %vm878_vm3, %v18955_v23  ;;  %v18956_v2 = vld [vmem:[#allocation24_spill] sm:$0xff]  ;;  %v18957_v35 = vld [vmem:[#allocation26_spill] sm:$0xff] }
 0x2ab   : > { %893 = vst.msk [vmem:[%s15239_s24 + $0x70] sm:$0xff] %vm878_vm3, %v18956_v2  ;;  %894 = vst.msk [vmem:[%s15239_s24 + $0x78] sm:$0xff] %vm878_vm3, %v18957_v35  ;;  %v18958_v20 = vld [vmem:[#allocation29_spill] sm:$0xff]  ;;  %v18959_v61 = vld [vmem:[#allocation31_spill] sm:$0xff]  ;;  %v3640_v2 = vsel %vm12353_vm2, %v3635_v42, %v15211_v1  ;;  %v3045_v35 = vsel %vm12353_vm2, %v15228_v13, %v15220_v19  ;;  %v4500_v19 = vpop.permute.xlu1 %4499 }
 0x2ac   : > { %895 = vst.msk [vmem:[%s15239_s24 + $0x80] sm:$0xff] %vm878_vm3, %v18958_v20  ;;  %896 = vst.msk [vmem:[%s15239_s24 + $0x88] sm:$0xff] %vm878_vm3, %v18959_v61  ;;  %v18960_v29 = vld [vmem:[#allocation28_spill] sm:$0xff]  ;;  %v18961_v54 = vld [vmem:[#allocation30_spill] sm:$0xff]  ;;  %v10873_v20 = vrot.slane %v3690_v14, 9 }
 0x2ad   : > { %897 = vst.msk [vmem:[%s15239_s24 + $0x90] sm:$0xff] %vm878_vm3, %v18960_v29  ;;  %898 = vst.msk [vmem:[%s15239_s24 + $0x98] sm:$0xff] %vm878_vm3, %v18961_v54  ;;  %v18962_v11 = vld [vmem:[#allocation34_spill] sm:$0xff]  ;;  %v18963_v40 = vld [vmem:[#allocation35_spill] sm:$0xff]  ;;  %v3994_v54 = vpop.permute.xlu0 %3993 }
 0x2ae   : > { %899 = vst.msk [vmem:[%s15239_s24 + $0xa0] sm:$0xff] %vm878_vm3, %v18962_v11  ;;  %900 = vst.msk [vmem:[%s15239_s24 + $0xa8] sm:$0xff] %vm878_vm3, %v18963_v40  ;;  %v18964_v9 = vld [vmem:[#allocation33_spill] sm:$0xff]  ;;  %v18965_v16 = vld [vmem:[#allocation36_spill] sm:$0xff]  ;;  %v11013_v11 = vcombine.low %v3630_v39, %v3640_v2  ;;  %v3050_v40 = vrot.slane %v3049_v15, 4  ;;  %v3763_v38 = vsel %vm12335_vm13, %v10873_v20, %v3762_v45 }
 0x2af   : > { %901 = vst.msk [vmem:[%s15239_s24 + $0xb0] sm:$0xff] %vm878_vm3, %v18964_v9  ;;  %902 = vst.msk [vmem:[%s15239_s24 + $0xb8] sm:$0xff] %vm878_vm3, %v18965_v16  ;;  %v18966_v5 = vld [vmem:[#allocation40_spill] sm:$0xff]  ;;  %v18967_v58 = vld [vmem:[#allocation39_spill] sm:$0xff]  ;;  %v3764_v9 = vrot.slane %v3762_v45, 4  ;;  %v10872_v16 = vrot.slane %v15230_v0, 9 }
 0x2b0   : > { %903 = vst.msk [vmem:[%s15239_s24 + $0xc0] sm:$0xff] %vm878_vm3, %v18966_v5  ;;  %904 = vst.msk [vmem:[%s15239_s24 + $0xc8] sm:$0xff] %vm878_vm3, %v18967_v58  ;;  %v18968_v28 = vld [vmem:[#allocation38_spill] sm:$0xff]  ;;  %v18969_v62 = vld [vmem:[#allocation41_spill] sm:$0xff]  ;;  %4515 = vrot.lane.b32.xlu1 %v11013_v11, %s18674_s22  ;;  %v3055_v14 = vsel %vm12353_vm2, %v3050_v40, %v15237_v3  ;;  %s18988_s22 = smov 20  }
 0x2b1   : > { %905 = vst.msk [vmem:[%s15239_s24 + $0xd0] sm:$0xff] %vm878_vm3, %v18968_v28  ;;  %906 = vst.msk [vmem:[%s15239_s24 + $0xd8] sm:$0xff] %vm878_vm3, %v18969_v62  ;;  %v18970_v34 = vld [vmem:[#allocation44_spill] sm:$0xff]  ;;  %v18971_v27 = vld [vmem:[#allocation45_spill] sm:$0xff]  ;;  %v3766_v39 = vsel %vm12335_vm13, %v3764_v9, %v3765_v25  ;;  %v10966_v45 = vcombine.low %v3045_v35, %v3055_v14  ;;  %v15360_v3 = vpop.permute.xlu0 %4501  ;;  %v15365_v25 = vsel %vm4747_vm10, %v15156_v50, %v15035_v41 }
 0x2b2   : > { %907 = vst.msk [vmem:[%s15239_s24 + $0xe0] sm:$0xff] %vm878_vm3, %v18970_v34  ;;  %908 = vst.msk [vmem:[%s15239_s24 + $0xe8] sm:$0xff] %vm878_vm3, %v18971_v27  ;;  %v18972_v46 = vld [vmem:[#allocation42_spill] sm:$0xff]  ;;  %v11747_v61 = vld [vmem:[#allocation3 + $0x1c] sm:$0xf] }
 0x2b3   : > { %909 = vst.msk [vmem:[%s15239_s24 + $0xf0] sm:$0xff] %vm878_vm3, %v18972_v46  ;;  %v18973_v23 = vld [vmem:[#allocation46_spill] sm:$0xff]  ;;  %v3755_v29 = vrot.slane %v11747_v61, 5  ;;  %v11749_v42 = vld [vmem:[#allocation3 + $0x58] sm:$0xf]  ;;  %18974 = vst [vmem:[#allocation72_spill] sm:$0xff] %v15360_v3  ;;  %4261 = vrot.lane.b32.xlu0 %v10966_v45, %s18678_s23 }
 0x2b4   : > { %910 = vst.msk [vmem:[%s15239_s24 + $0xf8] sm:$0xff] %vm878_vm3, %v18973_v23  ;;  %v11748_v58 = vld [vmem:[#allocation3 + $0x20] sm:$0x1]  ;;  %v11750_v28 = vld [vmem:[#allocation3 + $0x54] sm:$0xf] }
 0x2b5   : > { %v3757_v5 = vrot.slane %v3755_v29, 4  ;;  %v3758_v1 = vrot.slane %v11748_v58, 5  ;;  %v10895_v62 = vcombine.low %v11750_v28, %v11749_v42  ;;  %v3692_v34 = vld [vmem:[#allocation3 + $0x3c] sm:$0xe]  ;;  %v3756_v13 = vsel %vm12335_vm13, %v10872_v16, %v3755_v29  ;;  %v11751_v0 = vld [vmem:[#allocation3 + $0x40] sm:$0xf] }
 0x2b6   : > { %v3776_v15 = vrot.slane %v11751_v0, 5  ;;  %v11752_v23 = vld [vmem:[#allocation3 + $0x64] sm:$0xf]  ;;  %v11753_v2 = vld [vmem:[#allocation3 + $0x60] sm:$0xf]  ;;  %v11017_v29 = vcombine.low %v3763_v38, %v3766_v39  ;;  %v10875_v35 = vrot.slane %v3692_v34, 9 }
 0x2b7   : > { %v3759_v27 = vsel %vm12335_vm13, %v3757_v5, %v3758_v1  ;;  %v4624_v46 = vsel %vm554_vm4, %v10895_v62, %v15232_v48  ;;  %v10896_v20 = vcombine.low %v11753_v2, %v11752_v23  ;;  %v3691_v61 = vld [vmem:[#allocation3 + $0x30] sm:$0xe]  ;;  %v11754_v16 = vld [vmem:[#allocation3 + $0x44] sm:$0x1]  ;;  %v3694_v58 = vld [vmem:[#allocation3 + $0x54] sm:$0xe]  ;;  %v15371_v1 = vpop.permute.xlu1 %4331 }
 0x2b8   : > { %v11016_v11 = vcombine.low %v3756_v13, %v3759_v27  ;;  %v4664_v40 = vsel %vm878_vm3, %v4624_v46, %v15138_v31  ;;  %v3778_v9 = vrot.slane %v3776_v15, 4  ;;  %v3779_v5 = vrot.slane %v11754_v16, 5  ;;  %4571 = vrot.lane.b32.xlu1 %v11017_v29, %s18684_s16  ;;  %v11755_v38 = vld [vmem:[#allocation3 + $0x34] sm:$0xf]  ;;  %v11756_v62 = vld [vmem:[#allocation3 + $0x58] sm:$0xf]  ;;  %v4170_v13 = vpop.permute.xlu0 %4169 }
 0x2b9   : > { %v4627_v48 = vsel %vm554_vm4, %v10896_v20, %v3994_v54  ;;  %v3777_v41 = vsel %vm12335_vm13, %v10875_v35, %v3776_v15  ;;  %v10874_v50 = vrot.slane %v3691_v61, 9  ;;  %v3769_v42 = vrot.slane %v11755_v38, 5  ;;  %v11757_v14 = vld [vmem:[#allocation3 + $0x5c] sm:$0x1]  ;;  %v11758_v45 = vld [vmem:[#allocation3 + $0x38] sm:$0x1] }
 0x2ba   : > { %v4726_v31 = vsel %vm4714_vm9, %v15086_v17, %v15026_v21  ;;  %v3780_v54 = vsel %vm12335_vm13, %v3778_v9, %v3779_v5  ;;  %v3790_v34 = vrot.slane %v11756_v62, 5  ;;  %v3793_v39 = vrot.slane %v11757_v14, 5  ;;  %v3693_v23 = vld [vmem:[#allocation3 + $0x48] sm:$0xe]  ;;  %4569 = vrot.lane.b32.xlu0 %v11016_v11, %s18684_s16  ;;  %v11759_v11 = vld [vmem:[#allocation3 + $0x4c] sm:$0xf] }
 0x2bb   : > { %v4759_v28 = vsel %vm4747_vm10, %v4726_v31, %v14961_v7  ;;  %v11019_v0 = vcombine.low %v3777_v41, %v3780_v54  ;;  %v3771_v15 = vrot.slane %v3769_v42, 4  ;;  %v3772_v27 = vrot.slane %v11758_v45, 5  ;;  %v15392_v20 = vpop.permute.xlu1 %4075  ;;  %v11761_v54 = vld [vmem:[#allocation3 + $0x70] sm:$0xf]  ;;  %v11762_v14 = vld [vmem:[#allocation3 + $0x74] sm:$0x1] }
 0x2bc   : > { %v10877_v46 = vrot.slane %v3694_v58, 9  ;;  %v15386_v21 = vsel %vm4681_vm8, %v4664_v40, %v15009_v33  ;;  %v3770_v7 = vsel %vm12335_vm13, %v10874_v50, %v3769_v42  ;;  %v4792_v17 = vsel %vm4780_vm11, %v4759_v28, %v15046_v6  ;;  %v3696_v40 = vld [vmem:[#allocation3 + $0x6c] sm:$0xe]  ;;  %v11694_v6 = vld [vmem:[%s18593_s4 + $0x10] ss:$0 sps:$4 sm:$0x33]  }
 0x2bd   : > { %v3792_v2 = vrot.slane %v3790_v34, 4  ;;  %4575 = vrot.lane.b32.xlu1 %v11019_v0, %s18684_s16  ;;  %v3773_v61 = vsel %vm12335_vm13, %v3771_v15, %v3772_v27  ;;  %v15398_v29 = vsel %vm4813_vm12, %v4792_v17, %v4500_v19  ;;  %v3783_v35 = vrot.slane %v11759_v11, 5  ;;  %v11760_v58 = vld [vmem:[#allocation3 + $0x50] sm:$0x1]  ;;  %v3695_v50 = vld [vmem:[#allocation3 + $0x60] sm:$0xe]  ;;  %v4246_v19 = vpop.permute.xlu0 %4245  ;;  %11574 = vmatprep.subr.msk.bf16.mxu1 %vm603_vm0, %v11694_v6 }
 0x2be   : > { %v3791_v33 = vsel %vm12335_vm13, %v10877_v46, %v3790_v34  ;;  %v11018_v9 = vcombine.low %v3770_v7, %v3773_v61  ;;  %v10876_v5 = vrot.slane %v3693_v23, 9  ;;  %v3786_v41 = vrot.slane %v11760_v58, 5  ;;  %v11763_v0 = vld [vmem:[#allocation3 + $0x64] sm:$0xf]  ;;  %v11764_v7 = vld [vmem:[#allocation3 + $0x68] sm:$0x1] }
 0x2bf   : > { %v3794_v16 = vsel %vm12335_vm13, %v3792_v2, %v3793_v39  ;;  %v3785_v42 = vrot.slane %v3783_v35, 4  ;;  %v4666_v31 = vsel %vm878_vm3, %v4627_v48, %v15165_v53  ;;  %v3804_v28 = vrot.slane %v11761_v54, 5  ;;  %v15414_v45 = vpop.permute.xlu1 %4175  ;;  %v3698_v61 = vld [vmem:[#allocation3 + $0x84] sm:$0xe]  ;;  %v11765_v6 = vld [vmem:[#allocation3 + $0x88] sm:$0xf] }
 0x2c0   : > { %v11021_v38 = vcombine.low %v3791_v33, %v3794_v16  ;;  %4573 = vrot.lane.b32.xlu0 %v11018_v9, %s18684_s16  ;;  %v15412_v62 = vsel %vm4681_vm8, %v4666_v31, %v4170_v13  ;;  %v10879_v34 = vrot.slane %v3696_v40, 9  ;;  %v3807_v39 = vrot.slane %v11762_v14, 5  ;;  %v3697_v33 = vld [vmem:[#allocation3 + $0x78] sm:$0xe]  ;;  %v11766_v16 = vld [vmem:[#allocation3 + $0x8c] sm:$0x1] }
 0x2c1   : > { %v3797_v15 = vrot.slane %v11763_v0, 5  ;;  %v3784_v53 = vsel %vm12335_vm13, %v10876_v5, %v3783_v35  ;;  %v3787_v48 = vsel %vm12335_vm13, %v3785_v42, %v3786_v41  ;;  %v3806_v27 = vrot.slane %v3804_v28, 4  ;;  %v15423_v11 = vpop.permute.xlu0 %4077  ;;  %v11768_v0 = vld [vmem:[#allocation3 + $0x80] sm:$0x1] }
 0x2c2   : > { %4579 = vrot.lane.b32.xlu1 %v11021_v38, %s18684_s16  ;;  %v10878_v46 = vrot.slane %v3695_v50, 9  ;;  %v11020_v23 = vcombine.low %v3784_v53, %v3787_v48  ;;  %v3800_v17 = vrot.slane %v11764_v7, 5  ;;  %v4728_v2 = vsel %vm4714_vm9, %v15141_v43, %v4246_v19  ;;  %v11767_v50 = vld [vmem:[#allocation3 + $0x7c] sm:$0xf]  ;;  %v11769_v53 = vld [vmem:[#allocation3 + $0xa0] sm:$0xf] }
 0x2c3   : > { %v3799_v13 = vrot.slane %v3797_v15, 4  ;;  %v3805_v40 = vsel %vm12335_vm13, %v10879_v34, %v3804_v28  ;;  %v3808_v35 = vsel %vm12335_vm13, %v3806_v27, %v3807_v39  ;;  %v3818_v9 = vrot.slane %v11765_v6, 5  ;;  %v15434_v38 = vpop.permute.xlu1 %4251  ;;  %v3700_v34 = vld [vmem:[#allocation3 + $0x9c] sm:$0xe]  ;;  %v3699_v27 = vld [vmem:[#allocation3 + $0x90] sm:$0xe] }
 0x2c4   : > { %v3821_v5 = vrot.slane %v11766_v16, 5  ;;  %4577 = vrot.lane.b32.xlu0 %v11020_v23, %s18684_s16  ;;  %v11023_v58 = vcombine.low %v3805_v40, %v3808_v35  ;;  %v3798_v43 = vsel %vm12335_vm13, %v10878_v46, %v3797_v15  ;;  %v3811_v19 = vrot.slane %v11767_v50, 5  ;;  %v11770_v7 = vld [vmem:[#allocation3 + $0x94] sm:$0xf] }
 0x2c5   : > { %v3801_v41 = vsel %vm12335_vm13, %v3799_v13, %v3800_v17  ;;  %v15438_v42 = vsel %vm4747_vm10, %v4728_v2, %v15183_v47  ;;  %v10881_v31 = vrot.slane %v3698_v61, 9  ;;  %v3820_v54 = vrot.slane %v3818_v9, 4  ;;  %v15441_v46 = vpop.permute.xlu0 %4329  ;;  %v3702_v35 = vld [vmem:[#allocation3 + $0xb4] sm:$0xe] }
 0x2c6   : > { %v10880_v28 = vrot.slane %v3697_v33, 9  ;;  %4583 = vrot.lane.b32.xlu1 %v11023_v58, %s18684_s16  ;;  %v11022_v14 = vcombine.low %v3798_v43, %v3801_v41  ;;  %v3813_v39 = vrot.slane %v3811_v19, 4  ;;  %v3814_v15 = vrot.slane %v11768_v0, 5  ;;  %v11771_v58 = vld [vmem:[#allocation3 + $0x98] sm:$0x1] }
 0x2c7   : > { %v3832_v48 = vrot.slane %v11769_v53, 5  ;;  %v3819_v23 = vsel %vm12335_vm13, %v10881_v31, %v3818_v9  ;;  %v3822_v47 = vsel %vm12335_vm13, %v3820_v54, %v3821_v5  ;;  %v3835_v13 = vrot.slane %v15019_v63, 5  ;;  %v15453_v6 = vpop.permute.xlu1 %4427  ;;  %v3701_v43 = vld [vmem:[#allocation3 + $0xa8] sm:$0xe]  ;;  %v11772_v0 = vld [vmem:[#allocation3 + $0xac] sm:$0xf] }
 0x2c8   : > { %v3825_v17 = vrot.slane %v11770_v7, 5  ;;  %4581 = vrot.lane.b32.xlu0 %v11022_v14, %s18684_s16  ;;  %v11025_v2 = vcombine.low %v3819_v23, %v3822_v47  ;;  %v3812_v61 = vsel %vm12335_vm13, %v10880_v28, %v3811_v19  ;;  %v3815_v33 = vsel %vm12335_vm13, %v3813_v39, %v3814_v15  ;;  %v3704_v28 = vld [vmem:[#allocation3 + $0xcc] sm:$0xe] }
 0x2c9   : > { %v3834_v40 = vrot.slane %v3832_v48, 4  ;;  %v10883_v9 = vrot.slane %v3700_v34, 9  ;;  %v10882_v16 = vrot.slane %v3699_v27, 9  ;;  %v3828_v63 = vrot.slane %v11771_v58, 5  ;;  %v15460_v54 = vpop.permute.xlu0 %4429 }
 0x2ca   : > { %v3827_v5 = vrot.slane %v3825_v17, 4  ;;  %4587 = vrot.lane.b32.xlu1 %v11025_v2, %s18684_s16  ;;  %v11024_v41 = vcombine.low %v3812_v61, %v3815_v33  ;;  %v3846_v19 = vrot.slane %v14968_v36, 5  ;;  %v3849_v31 = vrot.slane %v15181_v30, 5  ;;  %18975 = vst [vmem:[#allocation73_spill] sm:$0xff] %v15460_v54  ;;  %v18978_v61 = vld [vmem:[#allocation32_spill] sm:$0xff] }
 0x2cb   : > { %v3836_v50 = vsel %vm12335_vm13, %v3834_v40, %v3835_v13  ;;  %v3833_v34 = vsel %vm12335_vm13, %v10883_v9, %v3832_v48  ;;  %v3826_v14 = vsel %vm12335_vm13, %v10882_v16, %v3825_v17  ;;  %v3839_v15 = vrot.slane %v11772_v0, 5  ;;  %v3996_v23 = vpop.permute.xlu1 %3995  ;;  %v18976_v48 = vld [vmem:[#allocation11_spill] sm:$0xff]  ;;  %v3703_v33 = vld [vmem:[#allocation3 + $0xc0] sm:$0xe] }
 0x2cc   : > { %v3829_v39 = vsel %vm12335_vm13, %v3827_v5, %v3828_v63  ;;  %4585 = vrot.lane.b32.xlu0 %v11024_v41, %s18684_s16  ;;  %v11027_v53 = vcombine.low %v3833_v34, %v3836_v50  ;;  %v10885_v36 = vrot.slane %v3702_v35, 9  ;;  %v3848_v27 = vrot.slane %v3846_v19, 4  ;;  %v5369_v5 = vld [vmem:[#allocation4 + $0xc] sm:$0xf] }
 0x2cd   : > { %v10884_v30 = vrot.slane %v3701_v43, 9  ;;  %v3841_v47 = vrot.slane %v3839_v15, 4  ;;  %v3842_v13 = vrot.slane %v15043_v10, 5  ;;  %v10887_v7 = vrot.slane %v3704_v28, 9  ;;  %v15481_v10 = vpop.permute.xlu0 %3997  ;;  %v18979_v43 = vld [vmem:[#allocation10_spill] sm:$0xff] }
 0x2ce   : > { %v18977_v2 = vrot.slane %v18976_v48, 5  ;;  %4591 = vrot.lane.b32.xlu1 %v11027_v53, %s18684_s16  ;;  %v11026_v40 = vcombine.low %v3826_v14, %v3829_v39  ;;  %v3847_v35 = vsel %vm12335_vm13, %v10885_v36, %v3846_v19  ;;  %v3850_v9 = vsel %vm12335_vm13, %v3848_v27, %v3849_v31  ;;  %v11773_v19 = vld [vmem:[#allocation3 + $0x70] sm:$0xf]  ;;  %v11774_v28 = vld [vmem:[#allocation3 + $0x6c] sm:$0xf] }
 0x2cf   : > { %v3853_v16 = vrot.slane %v14981_v24, 5  ;;  %v3840_v58 = vsel %vm12335_vm13, %v10884_v30, %v3839_v15  ;;  %v3843_v63 = vsel %vm12335_vm13, %v3841_v47, %v3842_v13  ;;  %v18980_v41 = vrot.slane %v18979_v43, 5  ;;  %v15491_v31 = vld [vmem:[#allocation4 + $0x10] sm:$0xf]  ;;  %v15494_v15 = vld [vmem:[#allocation4 + $0x14] sm:$0x1]  ;;  %v4504_v53 = vpop.permute.xlu1 %4503 }
 0x2d0   : > { %v3864_v17 = vsel %vm12335_vm13, %v18978_v61, %v18977_v2  ;;  %v10897_v34 = vcombine.low %v11774_v28, %v11773_v19  ;;  %4589 = vrot.lane.b32.xlu0 %v11026_v40, %s18684_s16  ;;  %v11029_v24 = vcombine.low %v3847_v35, %v3850_v9  ;;  %v10886_v39 = vrot.slane %v3703_v33, 9  ;;  %v1056_v13 = vld [vmem:[#allocation4] sm:$0x1]  ;;  %v15503_v33 = vld [vmem:[#allocation4 + $0x4] sm:$0xf] }
 0x2d1   : > { %v3861_v50 = vsel %vm12335_vm13, %v10887_v7, %v18980_v41  ;;  %v3855_v0 = vrot.slane %v3853_v16, 4  ;;  %v3856_v36 = vrot.slane %v15161_v56, 5  ;;  %v5440_v30 = vshrl.u32 %v5369_v5, 16  ;;  %v15505_v40 = vpop.permute.xlu0 %4505  ;;  %v11775_v35 = vld [vmem:[#allocation3 + $0x7c] sm:$0xf] }
 0x2d2   : > { %v11031_v14 = vcombine.low %v3861_v50, %v3864_v17  ;;  %v4630_v27 = vsel %vm554_vm4, %v10897_v34, %v3996_v23  ;;  %v5443_v47 = vshll.u32 %v5369_v5, 16  ;;  %4595 = vrot.lane.b32.xlu1 %v11029_v24, %s18684_s16  ;;  %v11028_v7 = vcombine.low %v3840_v58, %v3843_v63  ;;  %v1110_v17 = vld [vmem:[#allocation4 + $0x8] sm:$0x1]  ;;  %18981 = vst [vmem:[#allocation70_spill] sm:$0xff] %v15505_v40  ;;  %v11776_v9 = vld [vmem:[#allocation3 + $0x78] sm:$0xf] }
 0x2d3   : > { %v3854_v48 = vsel %vm12335_vm13, %v10886_v39, %v3853_v16  ;;  %v5449_v2 = vshll.u32 %v15491_v31, 16  ;;  %v5453_v61 = vshrl.u32 %v15491_v31, 16  ;;  %v3857_v56 = vsel %vm12335_vm13, %v3855_v0, %v3856_v36  ;;  %v15513_v50 = vpop.permute.xlu1 %4335  ;;  %v11778_v40 = vld [vmem:[#allocation3 + $0x84] sm:$0xf] }
 0x2d4   : > { %v4668_v23 = vsel %vm878_vm3, %v4630_v27, %v15392_v20  ;;  %v10898_v5 = vcombine.low %v11776_v9, %v11775_v35  ;;  %v5442_v58 = vrot.slane %v5440_v30, 4  ;;  %4593 = vrot.lane.b32.xlu0 %v11028_v7, %s18684_s16  ;;  %v5445_v16 = vrot.slane %v5443_v47, 5  ;;  %v5800_v47 = vld [vmem:[#allocation4 + $0xc] sm:$0xe] }
 0x2d5   : > { %v5451_v63 = vrot.slane %v5449_v2, 5  ;;  %v5455_v43 = vrot.slane %v5453_v61, 4  ;;  %v5459_v41 = vshll.u32 %v15494_v15, 16  ;;  %v1057_v28 = vsel %vm12018_vm5, 0, %v1056_v13  ;;  %v4174_v13 = vpop.permute.xlu0 %4173 }
 0x2d6   : > { %v1111_v24 = vsel %vm12024_vm6, 0, %v1110_v17  ;;  %v5425_v20 = vshll.u32 %v15503_v33, 16  ;;  %v5429_v39 = vshrl.u32 %v15503_v33, 16  ;;  %4599 = vrot.lane.b32.xlu1 %v11031_v14, %s18684_s16  ;;  %v11030_v0 = vcombine.low %v3854_v48, %v3857_v56  ;;  %1058 = vst [vmem:[#allocation4] sm:$0x1] %v1057_v28 }
 0x2d7   : > { %v5446_v36 = vor.u32 %v5445_v16, %v5442_v58  ;;  %v5456_v27 = vor.u32 %v5455_v43, %v5451_v63  ;;  %1112 = vst [vmem:[#allocation4 + $0x8] sm:$0x1] %v1111_v24  ;;  %v4730_v30 = vsel %vm4714_vm9, %v15386_v21, %v15179_v22  ;;  %v15527_v7 = vsel %vm4681_vm8, %v4668_v23, %v15152_v57  ;;  %v5799_v22 = vld [vmem:[#allocation4] sm:$0xe]  ;;  %v15535_v21 = vpop.permute.xlu1 %4079 }
 0x2d8   : > { %v15529_v2 = vrot.slane %v5425_v20, 5  ;;  %v5431_v61 = vrot.slane %v5429_v39, 4  ;;  %v4763_v14 = vsel %vm4747_vm10, %v4730_v30, %v15113_v26  ;;  %4597 = vrot.lane.b32.xlu0 %v11030_v0, %s18684_s16  ;;  %v5461_v56 = vrot.slane %v5459_v41, 5  ;;  %v5977_v26 = vld [vmem:[#allocation4 + $0x18] sm:$0xf] }
 0x2d9   : > { %v5447_v48 = vrot.slane %v5446_v36, 4  ;;  %v5457_v17 = vrot.slane %v5456_v27, 4  ;;  %v5872_v35 = vrot.slane %v15491_v31, 5  ;;  %v4633_v57 = vsel %vm554_vm4, %v10898_v5, %v15481_v10  ;;  %v4250_v28 = vpop.permute.xlu0 %4249  ;;  %v15555_v39 = vld [vmem:[#allocation4 + $0x1c] sm:$0xf] }
 0x2da   : > { %v5432_v23 = vor.u32 %v5431_v61, %v15529_v2  ;;  %v4796_v9 = vsel %vm4780_vm11, %v4763_v14, %v15198_v4  ;;  %v11054_v58 = vrot.slane %v5800_v47, 9  ;;  %v5875_v41 = vrot.slane %v15494_v15, 5  ;;  %v15557_v27 = vld [vmem:[#allocation4 + $0xc] sm:$0xf] }
 0x2db   : > { %v5452_v16 = vsel %vm12353_vm2, %v5447_v48, %v5451_v63  ;;  %v5462_v43 = vsel %vm12353_vm2, %v5457_v17, %v5461_v56  ;;  %v5874_v31 = vrot.slane %v5872_v35, 4  ;;  %v15548_v10 = vsel %vm4813_vm12, %v4796_v9, %v4504_v53  ;;  %v15559_v15 = vpop.permute.xlu1 %4179 }
 0x2dc   : > { %v11118_v24 = vcombine.low %v5452_v16, %v5462_v43  ;;  %18984 = vst [vmem:[#allocation57_spill] sm:$0xff] %v15548_v10  ;;  %v11053_v5 = vrot.slane %v5799_v22, 9  ;;  %v5865_v20 = vrot.slane %v15503_v33, 5  ;;  %v4670_v63 = vsel %vm878_vm3, %v4633_v57, %v15423_v11  ;;  %v15567_v22 = vld [vmem:[#allocation4 + $0x10] sm:$0xf] }
 0x2dd   : > { %v5876_v4 = vsel %vm12335_vm13, %v5874_v31, %v5875_v41  ;;  %v6048_v0 = vshrl.u32 %v5977_v26, 16  ;;  %v6051_v36 = vshll.u32 %v5977_v26, 16  ;;  %v5367_v53 = vld [vmem:[#allocation4] sm:$0xf]  ;;  %v5433_v47 = vrot.slane %v5432_v23, 4  ;;  %v15569_v57 = vpop.permute.xlu0 %4081 }
 0x2de   : > { %7306 = vrot.lane.b32.xlu1 %v11118_v24, %s11880_s21  ;;  %v5399_v30 = vld [vmem:[#allocation4 + $0x8] sm:$0x1]  ;;  %v5873_v33 = vsel %vm12335_vm13, %v11054_v58, %v5872_v35  ;;  %v5867_v61 = vrot.slane %v5865_v20, 4  ;;  %v15565_v14 = vsel %vm4681_vm8, %v4670_v63, %v4174_v13  ;;  %v5416_v11 = vshrl.u32 %v5367_v53, 16 }
 0x2df   : > { %v5419_v48 = vshll.u32 %v5367_v53, 16  ;;  %v5435_v17 = vshll.u32 %v5399_v30, 16  ;;  %v5868_v56 = vrot.slane %v5399_v30, 5  ;;  %v11134_v9 = vcombine.low %v5873_v33, %v5876_v4  ;;  %v15573_v13 = vpop.permute.xlu1 %4255 }
 0x2e0   : > { %v6050_v16 = vrot.slane %v6048_v0, 4  ;;  %v6053_v43 = vrot.slane %v6051_v36, 5  ;;  %v6024_v23 = vshrl.u32 %v15557_v27, 16  ;;  %v5418_v31 = vrot.slane %v5416_v11, 4  ;;  %v6008_v36 = vld [vmem:[#allocation4 + $0x20] sm:$0x1] }
 0x2e1   : > { %v5421_v41 = vrot.slane %v5419_v48, 5  ;;  %v5437_v35 = vrot.slane %v5435_v17, 5  ;;  %v6061_v58 = vshrl.u32 %v15555_v39, 16  ;;  %v15578_v24 = vsel %vm12335_vm13, %v11053_v5, %v5865_v20  ;;  %v15587_v48 = vpop.permute.xlu0 %4333 }
 0x2e2   : > { %7386 = vrot.lane.b32.xlu1 %v11134_v9, %s18682_s20  ;;  %v6026_v63 = vrot.slane %v6024_v23, 4  ;;  %v6027_v4 = vshll.u32 %v15557_v27, 16  ;;  %v6037_v0 = vshrl.u32 %v15567_v22, 16  ;;  %v5869_v33 = vsel %vm12335_vm13, %v5867_v61, %v5868_v56  ;;  %v15592_v23 = vld [vmem:[#allocation4 + $0x14] sm:$0x1] }
 0x2e3   : > { %v5422_v53 = vor.u32 %v5421_v41, %v5418_v31  ;;  %v5438_v30 = vsel %vm12353_vm2, %v5433_v47, %v5437_v35  ;;  %v11150_v11 = vcombine.low %v5977_v26, %v15555_v39  ;;  %v4732_v5 = vsel %vm4714_vm9, %v15412_v62, %v4250_v28  ;;  %v15595_v35 = vpop.permute.xlu1 %4431 }
 0x2e4   : > { %v6029_v17 = vrot.slane %v6027_v4, 5  ;;  %v6054_v20 = vor.u32 %v6053_v43, %v6050_v16  ;;  %v6057_v9 = vshll.u32 %v15555_v39, 16  ;;  %v6063_v41 = vrot.slane %v6061_v58, 4  ;;  %v6408_v58 = vld [vmem:[#allocation4 + $0x18] sm:$0xe] }
 0x2e5   : > { %v5423_v31 = vrot.slane %v5422_v53, 4  ;;  %v6067_v34 = vshll.u32 %v6008_v36, 16  ;;  %v6033_v47 = vshll.u32 %v15567_v22, 16  ;;  %v11133_v26 = vcombine.low %v15578_v24, %v5869_v33  ;;  %v15603_v53 = vpop.permute.xlu0 %4433 }
 0x2e6   : > { %7482 = vrot.lane.b32.xlu1 %v11150_v11, %s18680_s30  ;;  %v6059_v61 = vrot.slane %v6057_v9, 5  ;;  %v6030_v56 = vor.u32 %v6029_v17, %v6026_v63  ;;  %v6039_v4 = vrot.slane %v6037_v0, 4  ;;  %v6055_v28 = vrot.slane %v6054_v20, 4  ;;  %18985 = vst [vmem:[#allocation51_spill] sm:$0xff] %v15603_v53  ;;  %v15614_v20 = vld [vmem:[#allocation4 + $0x24] sm:$0xf] }
 0x2e7   : > { %v5428_v62 = vsel %vm12353_vm2, %v5423_v31, %v15529_v2  ;;  %v6035_v16 = vrot.slane %v6033_v47, 5  ;;  %v6043_v43 = vshll.u32 %v15592_v23, 16  ;;  %v11149_v24 = vcombine.low %v15557_v27, %v15567_v22  ;;  %v15616_v9 = vpop.permute.xlu1 %3999 }
 0x2e8   : > { %v11117_v19 = vcombine.low %v5428_v62, %v5438_v30  ;;  %v15609_v33 = vsel %vm4747_vm10, %v4732_v5, %v15441_v46  ;;  %v6064_v63 = vor.u32 %v6063_v41, %v6059_v61  ;;  %v6060_v0 = vsel %vm12353_vm2, %v6055_v28, %v6059_v61  ;;  %v6407_v46 = vld [vmem:[#allocation4 + $0xc] sm:$0xe]  ;;  %v15626_v28 = vld [vmem:[#allocation4 + $0x28] sm:$0xf] }
 0x2e9   : > { %18986 = vst [vmem:[#allocation74_spill] sm:$0xff] %v15609_v33  ;;  %v6069_v2 = vrot.slane %v6067_v34, 5  ;;  %v6040_v11 = vor.u32 %v6039_v4, %v6035_v16  ;;  %v6480_v17 = vrot.slane %v15555_v39, 5  ;;  %v6031_v27 = vrot.slane %v6030_v56, 4  ;;  %v15620_v34 = vpop.permute.xlu0 %4001 }
 0x2ea   : > { %7304 = vrot.lane.b32.xlu0 %v11117_v19, %s11880_s21  ;;  %v6065_v30 = vrot.slane %v6064_v63, 4  ;;  %v6045_v31 = vrot.slane %v6043_v43, 5  ;;  %v11070_v47 = vrot.slane %v6408_v58, 9  ;;  %v6483_v62 = vrot.slane %v6008_v36, 5  ;;  %v15630_v43 = vld [vmem:[#allocation4 + $0x18] sm:$0xf] }
 0x2eb   : > { %v6041_v5 = vrot.slane %v6040_v11, 4  ;;  %v6482_v41 = vrot.slane %v6480_v17, 4  ;;  %v6473_v61 = vrot.slane %v15567_v22, 5  ;;  %v6036_v4 = vsel %vm12353_vm2, %v6031_v27, %v6035_v16  ;;  %v15638_v11 = vpop.permute.xlu1 %4507 }
 0x2ec   : > { %v6070_v39 = vsel %vm12353_vm2, %v6065_v30, %v6069_v2  ;;  %v6657_v19 = vshrl.u32 %v15614_v20, 16  ;;  %v6660_v56 = vshll.u32 %v15614_v20, 16  ;;  %v11069_v63 = vrot.slane %v6407_v46, 9  ;;  %v15636_v2 = vld [vmem:[#allocation4 + $0x1c] sm:$0xf] }
 0x2ed   : > { %v11166_v58 = vcombine.low %v6060_v0, %v6070_v39  ;;  %v6046_v22 = vsel %vm12353_vm2, %v6041_v5, %v6045_v31  ;;  %v6484_v36 = vsel %vm12335_vm13, %v6482_v41, %v6483_v62  ;;  %v6481_v16 = vsel %vm12335_vm13, %v11070_v47, %v6480_v17  ;;  %v15651_v62 = vld [vmem:[#allocation4 + $0x2c] sm:$0x1] }
 0x2ee   : > { %7384 = vrot.lane.b32.xlu0 %v11133_v26, %s18682_s20  ;;  %v6475_v30 = vrot.slane %v6473_v61, 4  ;;  %v6476_v27 = vrot.slane %v15592_v23, 5  ;;  %v6659_v0 = vrot.slane %v6657_v19, 4  ;;  %v15647_v31 = vsel %vm12335_vm13, %v11069_v63, %v6473_v61  ;;  %v15653_v26 = vpop.permute.xlu0 %4509  ;;  %v15657_v19 = vld [vmem:[#allocation4 + $0x20] sm:$0x1] }
 0x2ef   : > { %7562 = vrot.lane.b32.xlu1 %v11166_v58, %s18678_s23  ;;  %v6662_v46 = vrot.slane %v6660_v56, 5  ;;  %v6670_v5 = vshrl.u32 %v15626_v28, 16  ;;  %v6633_v41 = vshrl.u32 %v15630_v43, 16  ;;  %18987 = vst [vmem:[#allocation52_spill] sm:$0xff] %v15653_v26  ;;  %v11165_v17 = vcombine.low %v6036_v4, %v6046_v22  ;;  %v15662_v53 = vpop.permute.xlu1 %4339 }
 0x2f0   : > { %v11182_v47 = vcombine.low %v6481_v16, %v6484_v36  ;;  %v6636_v23 = vshll.u32 %v15630_v43, 16  ;;  %v6646_v39 = vshrl.u32 %v15636_v2, 16  ;;  %v6477_v61 = vsel %vm12335_vm13, %v6475_v30, %v6476_v27 }
 0x2f1   : > { %v6635_v56 = vrot.slane %v6633_v41, 4  ;;  %v6663_v58 = vor.u32 %v6662_v46, %v6659_v0  ;;  %v6666_v63 = vshll.u32 %v15626_v28, 16  ;;  %v6672_v4 = vrot.slane %v6670_v5, 4  ;;  %v5371_v46 = vld [vmem:[#allocation4 + $0x18] sm:$0xf] }
 0x2f2   : > { %7480 = vrot.lane.b32.xlu0 %v11149_v24, %s18680_s30  ;;  %v6638_v26 = vrot.slane %v6636_v23, 5  ;;  %v6676_v22 = vshll.u32 %v15651_v62, 16  ;;  %v6642_v36 = vshll.u32 %v15636_v2, 16  ;;  %v11198_v16 = vcombine.low %v15614_v20, %v15626_v28  ;;  %v15671_v41 = vpop.permute.xlu0 %4177  ;;  %v11777_v5 = vld [vmem:[#allocation3 + $0x88] sm:$0xf] }
 0x2f3   : > { %7642 = vrot.lane.b32.xlu1 %v11182_v47, %s18988_s22  ;;  %v6668_v30 = vrot.slane %v6666_v63, 5  ;;  %v6648_v27 = vrot.slane %v6646_v39, 4  ;;  %v6652_v0 = vshll.u32 %v15657_v19, 16  ;;  %v6664_v54 = vrot.slane %v6663_v58, 4  ;;  %v15676_v63 = vpop.permute.xlu1 %4083 }
 0x2f4   : > { %v6639_v24 = vor.u32 %v6638_v26, %v6635_v56  ;;  %v6644_v23 = vrot.slane %v6642_v36, 5  ;;  %v10899_v10 = vcombine.low %v11778_v40, %v11777_v5  ;;  %v11181_v33 = vcombine.low %v15647_v31, %v6477_v61  ;;  %v15683_v56 = vld [vmem:[#allocation4 + $0x1c] sm:$0xf]  ;;  %v15686_v36 = vld [vmem:[#allocation4 + $0x20] sm:$0x1] }
 0x2f5   : > { %v11197_v47 = vcombine.low %v15630_v43, %v15636_v2  ;;  %v6673_v59 = vor.u32 %v6672_v4, %v6668_v30  ;;  %v6678_v20 = vrot.slane %v6676_v22, 5  ;;  %v6669_v39 = vsel %vm12353_vm2, %v6664_v54, %v6668_v30  ;;  %v11779_v61 = vld [vmem:[#allocation3 + $0x94] sm:$0xf]  ;;  %v11780_v4 = vld [vmem:[#allocation3 + $0x90] sm:$0xf] }
 0x2f6   : > { %7560 = vrot.lane.b32.xlu0 %v11165_v17, %s18678_s23  ;;  %v6649_v58 = vor.u32 %v6648_v27, %v6644_v23  ;;  %v4636_v26 = vsel %vm554_vm4, %v10899_v10, %v15616_v9  ;;  %v5464_v40 = vshrl.u32 %v5371_v46, 16  ;;  %v6654_v43 = vrot.slane %v6652_v0, 5  ;;  %v15688_v5 = vpop.permute.xlu0 %4253  ;;  %s18990_s23 = smov 28  }
 0x2f7   : > { %7738 = vrot.lane.b32.xlu1 %v11198_v16, %s18989_s15  ;;  %v6674_v31 = vrot.slane %v6673_v59, 4  ;;  %v10900_v22 = vcombine.low %v11780_v4, %v11779_v61  ;;  %v5467_v17 = vshll.u32 %v5371_v46, 16  ;;  %v6640_v54 = vrot.slane %v6639_v24, 4  ;;  %v7016_v61 = vld [vmem:[#allocation4 + $0x18] sm:$0xe]  ;;  %v15696_v4 = vpop.permute.xlu1 %4183 }
 0x2f8   : > { %v6650_v30 = vrot.slane %v6649_v58, 4  ;;  %v4672_v10 = vsel %vm878_vm3, %v4636_v26, %v15535_v21  ;;  %v5466_v9 = vrot.slane %v5464_v40, 4  ;;  %v5473_v59 = vshll.u32 %v15683_v56, 16 }
 0x2f9   : > { %v6679_v27 = vsel %vm12353_vm2, %v6674_v31, %v6678_v20  ;;  %v5469_v16 = vrot.slane %v5467_v17, 5  ;;  %v5477_v0 = vshrl.u32 %v15683_v56, 16  ;;  %v4639_v21 = vsel %vm554_vm4, %v10900_v22, %v15620_v34  ;;  %v5373_v20 = vld [vmem:[#allocation4 + $0x24] sm:$0xf] }
 0x2fa   : > { %7640 = vrot.lane.b32.xlu0 %v11181_v33, %s18988_s22  ;;  %v11214_v46 = vcombine.low %v6669_v39, %v6679_v27  ;;  %v6655_v24 = vsel %vm12353_vm2, %v6650_v30, %v6654_v43  ;;  %v5483_v58 = vshll.u32 %v15686_v36, 16  ;;  %v6645_v26 = vsel %vm12353_vm2, %v6640_v54, %v6644_v23  ;;  %v15706_v3 = vpop.permute.xlu0 %4085  ;;  %v15717_v30 = vld [vmem:[#allocation4 + $0x28] sm:$0xf] }
 0x2fb   : > { %v5470_v40 = vor.u32 %v5469_v16, %v5466_v9  ;;  %v5475_v31 = vrot.slane %v5473_v59, 5  ;;  %v5479_v17 = vrot.slane %v5477_v0, 4  ;;  %v15711_v33 = vsel %vm4681_vm8, %v4672_v10, %v15414_v45  ;;  %v15719_v27 = vpop.permute.xlu1 %4259  ;;  %v15725_v10 = vld [vmem:[#allocation4 + $0x2c] sm:$0x1] }
 0x2fc   : > { %7818 = vrot.lane.b32.xlu1 %v11214_v46, %s18990_s23  ;;  %v11085_v39 = vrot.slane %v7016_v61, 9  ;;  %v7082_v34 = vrot.slane %v15636_v2, 5  ;;  %v4734_v43 = vsel %vm4714_vm9, %v15527_v7, %v15434_v38  ;;  %v11213_v22 = vcombine.low %v6645_v26, %v6655_v24 }
 0x2fd   : > { %v5480_v23 = vor.u32 %v5479_v17, %v5475_v31  ;;  %v5485_v54 = vrot.slane %v5483_v58, 5  ;;  %v5488_v9 = vshrl.u32 %v5373_v20, 16  ;;  %v7085_v45 = vrot.slane %v15657_v19, 5  ;;  %v7017_v17 = vld [vmem:[#allocation4 + $0x24] sm:$0xe] }
 0x2fe   : > { %7736 = vrot.lane.b32.xlu0 %v11197_v47, %s18989_s15  ;;  %v7084_v16 = vrot.slane %v7082_v34, 4  ;;  %v4767_v2 = vsel %vm4747_vm10, %v4734_v43, %v15371_v1  ;;  %v5491_v59 = vshll.u32 %v5373_v20, 16  ;;  %v5471_v38 = vrot.slane %v5470_v40, 4  ;;  %v15729_v46 = vpop.permute.xlu0 %4337 }
 0x2ff   : > { %v5481_v7 = vrot.slane %v5480_v23, 4  ;;  %v7083_v0 = vsel %vm12335_vm13, %v11085_v39, %v7082_v34  ;;  %v5490_v61 = vrot.slane %v5488_v9, 4  ;;  %v5497_v19 = vshll.u32 %v15717_v30, 16  ;;  %v15742_v39 = vpop.permute.xlu1 %4435 }
 0x300   : > { %v7086_v47 = vsel %vm12335_vm13, %v7084_v16, %v7085_v45  ;;  %v5493_v24 = vrot.slane %v5491_v59, 5  ;;  %v5501_v58 = vshrl.u32 %v15717_v30, 16  ;;  %v5476_v1 = vsel %vm12353_vm2, %v5471_v38, %v5475_v31  ;;  %v5802_v16 = vld [vmem:[#allocation4 + $0x24] sm:$0xe] }
 0x301   : > { %v5486_v20 = vsel %vm12353_vm2, %v5481_v7, %v5485_v54  ;;  %v4800_v26 = vsel %vm4780_vm11, %v4767_v2, %v15453_v6  ;;  %v5507_v40 = vshll.u32 %v15725_v10, 16  ;;  %v5499_v23 = vrot.slane %v5497_v19, 5 }
 0x302   : > { %7816 = vrot.lane.b32.xlu0 %v11213_v22, %s18990_s23  ;;  %v11119_v34 = vcombine.low %v5476_v1, %v5486_v20  ;;  %v5494_v43 = vor.u32 %v5493_v24, %v5490_v61  ;;  %v5503_v9 = vrot.slane %v5501_v58, 4  ;;  %v11229_v45 = vcombine.low %v7083_v0, %v7086_v47  ;;  %v15751_v2 = vpop.permute.xlu0 %4437  ;;  %v5801_v61 = vld [vmem:[#allocation4 + $0x18] sm:$0xe]  ;;  %v15762_v1 = vld [vmem:[#allocation4 + $0x30] sm:$0xf] }
 0x303   : > { %v15747_v31 = vsel %vm4813_vm12, %v4800_v26, %v15638_v11  ;;  %v7089_v54 = vrot.slane %v15626_v28, 5  ;;  %v7092_v6 = vrot.slane %v15651_v62, 5  ;;  %18991 = vst [vmem:[#allocation59_spill] sm:$0xff] %v15751_v2  ;;  %v5509_v22 = vrot.slane %v5507_v40, 5  ;;  %v15764_v20 = vpop.permute.xlu1 %4003  ;;  %v15814_v2 = vld [vmem:[#allocation4 + $0x3c] sm:$0xf] }
 0x304   : > { %7308 = vrot.lane.b32.xlu1 %v11119_v34, %s11880_s21  ;;  %v5504_v59 = vor.u32 %v5503_v9, %v5499_v23  ;;  %v11086_v38 = vrot.slane %v7017_v17, 9  ;;  %v4674_v7 = vsel %vm878_vm3, %v4639_v21, %v15569_v57  ;;  %v5495_v0 = vrot.slane %v5494_v43, 4 }
 0x305   : > { %v7091_v47 = vrot.slane %v7089_v54, 4  ;;  %v11056_v24 = vrot.slane %v5802_v16, 9  ;;  %v5886_v11 = vrot.slane %v15717_v30, 5  ;;  %v5889_v19 = vrot.slane %v15725_v10, 5 }
 0x306   : > { %7896 = vrot.lane.b32.xlu0 %v11229_v45, %s18684_s16  ;;  %v5505_v28 = vrot.slane %v5504_v59, 4  ;;  %v7090_v62 = vsel %vm12335_vm13, %v11086_v38, %v7089_v54  ;;  %v5879_v58 = vrot.slane %v15683_v56, 5  ;;  %v5500_v57 = vsel %vm12353_vm2, %v5495_v0, %v5499_v23  ;;  %v15773_v56 = vld [vmem:[#allocation4 + $0x34] sm:$0xf]  ;;  %v15775_v43 = vpop.permute.xlu0 %4005  ;;  %v5979_v54 = vld [vmem:[#allocation4 + $0x24] sm:$0xf] }
 0x307   : > { %v7093_v21 = vsel %vm12335_vm13, %v7091_v47, %v7092_v6  ;;  %v5888_v30 = vrot.slane %v5886_v11, 4  ;;  %v11055_v26 = vrot.slane %v5801_v61, 9  ;;  %v5882_v10 = vrot.slane %v15686_v36, 5  ;;  %v15784_v6 = vld [vmem:[#allocation4 + $0x28] sm:$0xf] }
 0x308   : > { %v5510_v40 = vsel %vm12353_vm2, %v5505_v28, %v5509_v22  ;;  %v11230_v17 = vcombine.low %v7090_v62, %v7093_v21  ;;  %v5881_v34 = vrot.slane %v5879_v58, 4  ;;  %v15779_v23 = vsel %vm4681_vm8, %v4674_v7, %v15671_v41  ;;  %v6010_v38 = vld [vmem:[#allocation4 + $0x38] sm:$0x1] }
 0x309   : > { %v11120_v9 = vcombine.low %v5500_v57, %v5510_v40  ;;  %v5887_v16 = vsel %vm12335_vm13, %v11056_v24, %v5886_v11  ;;  %v6096_v45 = vshrl.u32 %v15762_v1, 16  ;;  %v5890_v36 = vsel %vm12335_vm13, %v5888_v30, %v5889_v19  ;;  %v6009_v19 = vld [vmem:[#allocation4 + $0x2c] sm:$0x1] }
 0x30a   : > { %7898 = vrot.lane.b32.xlu0 %v11230_v17, %s18684_s16  ;;  %v5880_v59 = vsel %vm12335_vm13, %v11055_v26, %v5879_v58  ;;  %v5883_v41 = vsel %vm12335_vm13, %v5881_v34, %v5882_v10  ;;  %v6099_v22 = vshll.u32 %v15762_v1, 16  ;;  %v15798_v61 = vsel %vm4714_vm9, %v15565_v14, %v15688_v5  ;;  %v15802_v58 = vpop.permute.xlu1 %4511  ;;  %v6410_v34 = vld [vmem:[#allocation4 + $0x30] sm:$0xe]  ;;  %v15807_v10 = vpop.permute.xlu0 %4513 }
 0x30b   : > { %7310 = vrot.lane.b32.xlu1 %v11120_v9, %s11880_s21  ;;  %v11135_v7 = vcombine.low %v5880_v59, %v5883_v41  ;;  %v6098_v0 = vrot.slane %v6096_v45, 4  ;;  %v6109_v47 = vshrl.u32 %v15773_v56, 16  ;;  %v6072_v11 = vshrl.u32 %v5979_v54, 16  ;;  %18992 = vst [vmem:[#allocation54_spill] sm:$0xff] %v15807_v10 }
 0x30c   : > { %v6101_v24 = vrot.slane %v6099_v22, 5  ;;  %v6075_v28 = vshll.u32 %v5979_v54, 16  ;;  %v6085_v62 = vshrl.u32 %v15784_v6, 16  ;;  %v11136_v57 = vcombine.low %v5887_v16, %v5890_v36 }
 0x30d   : > { %v6105_v21 = vshll.u32 %v15773_v56, 16  ;;  %v6111_v30 = vrot.slane %v6109_v47, 4  ;;  %v6115_v26 = vshll.u32 %v6010_v38, 16  ;;  %v6074_v14 = vrot.slane %v6072_v11, 4  ;;  %v6409_v47 = vld [vmem:[#allocation4 + $0x24] sm:$0xe] }
 0x30e   : > { %7388 = vrot.lane.b32.xlu0 %v11135_v7, %s18682_s20  ;;  %v6077_v5 = vrot.slane %v6075_v28, 5  ;;  %v6102_v40 = vor.u32 %v6101_v24, %v6098_v0  ;;  %v6081_v17 = vshll.u32 %v15784_v6, 16  ;;  %v11152_v9 = vcombine.low %v15762_v1, %v15773_v56 }
 0x30f   : > { %7390 = vrot.lane.b32.xlu1 %v11136_v57, %s18682_s20  ;;  %v6107_v16 = vrot.slane %v6105_v21, 5  ;;  %v6087_v45 = vrot.slane %v6085_v62, 4  ;;  %v6091_v36 = vshll.u32 %v6009_v19, 16  ;;  %v11151_v59 = vcombine.low %v5979_v54, %v15784_v6  ;;  %v15819_v54 = vpop.permute.xlu1 %4343  ;;  %s18994_s20 = smov 16  }
 0x310   : > { %v6103_v41 = vrot.slane %v6102_v40, 4  ;;  %v6078_v22 = vor.u32 %v6077_v5, %v6074_v14  ;;  %v6083_v7 = vrot.slane %v6081_v17, 5  ;;  %v6117_v24 = vrot.slane %v6115_v26, 5  ;;  %18993 = vst [vmem:[#allocation58_spill] sm:$0xff] %v15819_v54 }
 0x311   : > { %v6112_v0 = vor.u32 %v6111_v30, %v6107_v16  ;;  %v11072_v11 = vrot.slane %v6410_v34, 9  ;;  %v6494_v28 = vrot.slane %v15773_v56, 5  ;;  %v6093_v57 = vrot.slane %v6091_v36, 5  ;;  %v15823_v34 = vld [vmem:[#allocation4 + $0x40] sm:$0xf] }
 0x312   : > { %7484 = vrot.lane.b32.xlu0 %v11151_v59, %s18680_s30  ;;  %v6108_v1 = vsel %vm12353_vm2, %v6103_v41, %v6107_v16  ;;  %v6088_v62 = vor.u32 %v6087_v45, %v6083_v7  ;;  %v6497_v21 = vrot.slane %v6010_v38, 5  ;;  %v6079_v30 = vrot.slane %v6078_v22, 4  ;;  %v15826_v16 = vpop.permute.xlu0 %4181 }
 0x313   : > { %7486 = vrot.lane.b32.xlu1 %v11152_v9, %s18680_s30  ;;  %v6113_v14 = vrot.slane %v6112_v0, 4  ;;  %v6496_v26 = vrot.slane %v6494_v28, 4  ;;  %v6487_v5 = vrot.slane %v15784_v6, 5  ;;  %v11071_v40 = vrot.slane %v6409_v47, 9  ;;  %v15834_v6 = vld [vmem:[#allocation4 + $0x30] sm:$0xf] }
 0x314   : > { %v6089_v56 = vrot.slane %v6088_v62, 4  ;;  %v6490_v17 = vrot.slane %v6009_v19, 5  ;;  %v6705_v59 = vshrl.u32 %v15814_v2, 16  ;;  %v6495_v9 = vsel %vm12335_vm13, %v11072_v11, %v6494_v28  ;;  %v11705_v19 = vld [vmem:[%s18596_s7 + $0x10] ss:$0 sps:$4 sm:$0x33]  }
 0x315   : > { %v6118_v38 = vsel %vm12353_vm2, %v6113_v14, %v6117_v24  ;;  %v6498_v45 = vsel %vm12335_vm13, %v6496_v26, %v6497_v21  ;;  %v6489_v36 = vrot.slane %v6487_v5, 4  ;;  %v6084_v22 = vsel %vm12353_vm2, %v6079_v30, %v6083_v7  ;;  %v15843_v24 = vld [vmem:[#allocation4 + $0x34] sm:$0xf]  ;;  %11575 = vmatprep.subr.msk.bf16.mxu0 %vm603_vm0, %v11705_v19  ;;  %v15855_v30 = vld [vmem:[#allocation4 + $0x44] sm:$0x1]  ;;  %v15857_v26 = vpop.permute.xlu1 %4087  ;;  %s19000_s30 = smov 32  }
 0x316   : > { %v11168_v41 = vcombine.low %v6108_v1, %v6118_v38  ;;  %v6094_v47 = vsel %vm12353_vm2, %v6089_v56, %v6093_v57  ;;  %v6707_v0 = vrot.slane %v6705_v59, 4  ;;  %v6708_v62 = vshll.u32 %v15814_v2, 16  ;;  %v11781_v38 = vld [vmem:[#allocation3 + $0xa0] sm:$0xf] }
 0x317   : > { %v11167_v11 = vcombine.low %v6084_v22, %v6094_v47  ;;  %v6491_v28 = vsel %vm12335_vm13, %v6489_v36, %v6490_v17  ;;  %v6718_v21 = vshrl.u32 %v15823_v34, 16  ;;  %v11184_v1 = vcombine.low %v6495_v9, %v6498_v45  ;;  %v11782_v36 = vld [vmem:[#allocation3 + $0x9c] sm:$0xf]  ;;  %v15862_v47 = vpop.permute.xlu0 %4257 }
 0x318   : > { %7566 = vrot.lane.b32.xlu1 %v11168_v41, %s18994_s20  ;;  %v6488_v7 = vsel %vm12335_vm13, %v11071_v40, %v6487_v5  ;;  %v6681_v57 = vshrl.u32 %v15834_v6, 16  ;;  %v6684_v14 = vshll.u32 %v15834_v6, 16  ;;  %v6710_v17 = vrot.slane %v6708_v62, 5  ;;  %v11783_v5 = vld [vmem:[#allocation3 + $0xac] sm:$0xf] }
 0x319   : > { %7564 = vrot.lane.b32.xlu0 %v11167_v11, %s18994_s20  ;;  %v11183_v56 = vcombine.low %v6488_v7, %v6491_v28  ;;  %v6694_v59 = vshrl.u32 %v15843_v24, 16  ;;  %v10901_v9 = vcombine.low %v11782_v36, %v11781_v38  ;;  %v11784_v40 = vld [vmem:[#allocation3 + $0xa8] sm:$0xf]  ;;  %v6714_v22 = vshll.u32 %v15823_v34, 16  ;;  %v15867_v7 = vld [vmem:[#allocation4 + $0x38] sm:$0x1] }
 0x31a   : > { %v6683_v45 = vrot.slane %v6681_v57, 4  ;;  %v6686_v19 = vrot.slane %v6684_v14, 5  ;;  %v10902_v41 = vcombine.low %v11784_v40, %v11783_v5  ;;  %v6711_v11 = vor.u32 %v6710_v17, %v6707_v0  ;;  %v5375_v5 = vld [vmem:[#allocation4 + $0x30] sm:$0xf] }
 0x31b   : > { %v4642_v54 = vsel %vm554_vm4, %v10901_v9, %v15764_v20  ;;  %v6720_v28 = vrot.slane %v6718_v21, 4  ;;  %v6724_v62 = vshll.u32 %v15855_v30, 16  ;;  %v15872_v57 = vsel %vm4747_vm10, %v15798_v61, %v15587_v48  ;;  %v15886_v9 = vpop.permute.xlu1 %4263 }
 0x31c   : > { %7646 = vrot.lane.b32.xlu1 %v11184_v1, %s18988_s22  ;;  %v11200_v14 = vcombine.low %v15814_v2, %v15823_v34  ;;  %v6716_v38 = vrot.slane %v6714_v22, 5  ;;  %v6687_v36 = vor.u32 %v6686_v19, %v6683_v45  ;;  %v11199_v20 = vcombine.low %v15834_v6, %v15843_v24  ;;  %v15891_v19 = vld [vmem:[#allocation4 + $0x34] sm:$0xf] }
 0x31d   : > { %7644 = vrot.lane.b32.xlu0 %v11183_v56, %s18988_s22  ;;  %v4676_v0 = vsel %vm878_vm3, %v4642_v54, %v15676_v63  ;;  %v4645_v48 = vsel %vm554_vm4, %v10902_v41, %v15775_v43  ;;  %v6690_v61 = vshll.u32 %v15843_v24, 16  ;;  %v6726_v1 = vrot.slane %v6724_v62, 5  ;;  %v15893_v54 = vpop.permute.xlu0 %4341  ;;  %v15900_v41 = vld [vmem:[#allocation4 + $0x38] sm:$0x1] }
 0x31e   : > { %v6721_v21 = vor.u32 %v6720_v28, %v6716_v38  ;;  %v6696_v17 = vrot.slane %v6694_v59, 4  ;;  %v6700_v2 = vshll.u32 %v15867_v7, 16  ;;  %v6712_v45 = vrot.slane %v6711_v11, 4 }
 0x31f   : > { %v6692_v56 = vrot.slane %v6690_v61, 5  ;;  %v4738_v6 = vsel %vm4714_vm9, %v15711_v33, %v15573_v13  ;;  %v5512_v63 = vshrl.u32 %v5375_v5, 16  ;;  %v15898_v43 = vsel %vm4681_vm8, %v4676_v0, %v15559_v15  ;;  %v7018_v0 = vld [vmem:[#allocation4 + $0x30] sm:$0xe] }
 0x320   : > { %7742 = vrot.lane.b32.xlu1 %v11200_v14, %s18989_s15  ;;  %v6722_v59 = vrot.slane %v6721_v21, 4  ;;  %v6688_v40 = vrot.slane %v6687_v36, 4  ;;  %v5515_v22 = vshll.u32 %v5375_v5, 16  ;;  %v6717_v13 = vsel %vm12353_vm2, %v6712_v45, %v6716_v38  ;;  %v5377_v45 = vld [vmem:[#allocation4 + $0x3c] sm:$0xf] }
 0x321   : > { %7740 = vrot.lane.b32.xlu0 %v11199_v20, %s18989_s15  ;;  %v6697_v33 = vor.u32 %v6696_v17, %v6692_v56  ;;  %v6702_v11 = vrot.slane %v6700_v2, 5  ;;  %v5514_v28 = vrot.slane %v5512_v63, 4  ;;  %v4771_v15 = vsel %vm4747_vm10, %v4738_v6, %v15513_v50  ;;  %v15915_v63 = vpop.permute.xlu1 %4007 }
 0x322   : > { %v6727_v62 = vsel %vm12353_vm2, %v6722_v59, %v6726_v1  ;;  %v5517_v14 = vrot.slane %v5515_v22, 5  ;;  %v5521_v36 = vshll.u32 %v15891_v19, 16  ;;  %v5525_v20 = vshrl.u32 %v15891_v19, 16 }
 0x323   : > { %v11216_v61 = vcombine.low %v6717_v13, %v6727_v62  ;;  %v6698_v5 = vrot.slane %v6697_v33, 4  ;;  %v5531_v21 = vshll.u32 %v15900_v41, 16  ;;  %v6693_v38 = vsel %vm12353_vm2, %v6688_v40, %v6692_v56  ;;  %v15922_v13 = vld [vmem:[#allocation4 + $0x40] sm:$0xf]  ;;  %v15924_v56 = vpop.permute.xlu0 %4517 }
 0x324   : > { %v5518_v17 = vor.u32 %v5517_v14, %v5514_v28  ;;  %v5523_v2 = vrot.slane %v5521_v36, 5  ;;  %v7096_v1 = vrot.slane %v15843_v24, 5  ;;  %v4804_v6 = vsel %vm4780_vm11, %v4771_v15, %v15595_v35  ;;  %v5404_v36 = vld [vmem:[#allocation4 + $0x44] sm:$0x1] }
 0x325   : > { %7822 = vrot.lane.b32.xlu1 %v11216_v61, %s18990_s23  ;;  %v6703_v50 = vsel %vm12353_vm2, %v6698_v5, %v6702_v11  ;;  %v5527_v59 = vrot.slane %v5525_v20, 4  ;;  %v11087_v22 = vrot.slane %v7018_v0, 9  ;;  %v5533_v33 = vrot.slane %v5531_v21, 5  ;;  %v15935_v5 = vpop.permute.xlu1 %4515 }
 0x326   : > { %v11215_v40 = vcombine.low %v6693_v38, %v6703_v50  ;;  %v7098_v24 = vrot.slane %v7096_v1, 4  ;;  %v7099_v28 = vrot.slane %v15867_v7, 5  ;;  %v5519_v62 = vrot.slane %v5518_v17, 4 }
 0x327   : > { %v5528_v14 = vor.u32 %v5527_v59, %v5523_v2  ;;  %v5536_v61 = vshrl.u32 %v5377_v45, 16  ;;  %v5539_v10 = vshll.u32 %v5377_v45, 16  ;;  %v7097_v35 = vsel %vm12335_vm13, %v11087_v22, %v7096_v1  ;;  %v7019_v59 = vld [vmem:[#allocation4 + $0x3c] sm:$0xe] }
 0x328   : > { %7820 = vrot.lane.b32.xlu0 %v11215_v40, %s18990_s23  ;;  %v7100_v11 = vsel %vm12335_vm13, %v7098_v24, %v7099_v28  ;;  %v4678_v15 = vsel %vm878_vm3, %v4645_v48, %v15706_v3  ;;  %v5545_v0 = vshll.u32 %v15922_v13, 16  ;;  %v5524_v7 = vsel %vm12353_vm2, %v5519_v62, %v5523_v2  ;;  %v15944_v24 = vpop.permute.xlu0 %4261 }
 0x329   : > { %v5529_v20 = vrot.slane %v5528_v14, 4  ;;  %v5538_v21 = vrot.slane %v5536_v61, 4  ;;  %v5541_v38 = vrot.slane %v5539_v10, 5  ;;  %v11231_v17 = vcombine.low %v7097_v35, %v7100_v11 }
 0x32a   : > { %v5547_v45 = vrot.slane %v5545_v0, 5  ;;  %v5549_v1 = vshrl.u32 %v15922_v13, 16  ;;  %v5555_v50 = vshll.u32 %v5404_v36, 16  ;;  %v7103_v48 = vrot.slane %v15823_v34, 5  ;;  %v15955_v14 = vpop.permute.xlu1 %4571  ;;  %v15964_v0 = vld [vmem:[#allocation4 + $0x48] sm:$0xf] }
 0x32b   : > { %v5534_v22 = vsel %vm12353_vm2, %v5529_v20, %v5533_v33  ;;  %v5542_v3 = vor.u32 %v5541_v38, %v5538_v21  ;;  %v7106_v40 = vrot.slane %v15855_v30, 5  ;;  %v15948_v2 = vsel %vm4813_vm12, %v4804_v6, %v15802_v58  ;;  %v5804_v33 = vld [vmem:[#allocation4 + $0x3c] sm:$0xe]  ;;  %v5803_v58 = vld [vmem:[#allocation4 + $0x30] sm:$0xe] }
 0x32c   : > { %v11121_v10 = vcombine.low %v5524_v7, %v5534_v22  ;;  %7900 = vrot.lane.b32.xlu0 %v11231_v17, %s18684_s16  ;;  %v15953_v28 = vsel %vm4681_vm8, %v4678_v15, %v15826_v16  ;;  %v5551_v62 = vrot.slane %v5549_v1, 4  ;;  %v5557_v34 = vrot.slane %v5555_v50, 5 }
 0x32d   : > { %v11088_v61 = vrot.slane %v7019_v59, 9  ;;  %v7105_v30 = vrot.slane %v7103_v48, 4  ;;  %v15960_v35 = vsel %vm4714_vm9, %v15779_v23, %v15862_v47  ;;  %v5543_v6 = vrot.slane %v5542_v3, 4  ;;  %v15971_v47 = vpop.permute.xlu0 %4569  ;;  %v15973_v59 = vld [vmem:[#allocation4 + $0x4c] sm:$0xf] }
 0x32e   : > { %7312 = vrot.lane.b32.xlu1 %v11121_v10, %s11880_s21  ;;  %v5552_v11 = vor.u32 %v5551_v62, %v5547_v45  ;;  %v5900_v16 = vrot.slane %v15922_v13, 5  ;;  %v5903_v15 = vrot.slane %v5404_v36, 5  ;;  %v11058_v21 = vrot.slane %v5804_v33, 9 }
 0x32f   : > { %v7104_v7 = vsel %vm12335_vm13, %v11088_v61, %v7103_v48  ;;  %v7107_v20 = vsel %vm12335_vm13, %v7105_v30, %v7106_v40  ;;  %v5893_v23 = vrot.slane %v15891_v19, 5  ;;  %v11057_v50 = vrot.slane %v5803_v58, 9  ;;  %v15975_v13 = vpop.permute.xlu1 %4575  ;;  %v5983_v40 = vld [vmem:[#allocation4 + $0x3c] sm:$0xf] }
 0x330   : > { %v5553_v38 = vrot.slane %v5552_v11, 4  ;;  %v11232_v17 = vcombine.low %v7104_v7, %v7107_v20  ;;  %v5902_v1 = vrot.slane %v5900_v16, 4  ;;  %v5548_v36 = vsel %vm12353_vm2, %v5543_v6, %v5547_v45  ;;  %v15989_v45 = vld [vmem:[#allocation4 + $0x40] sm:$0xf]  ;;  %v15998_v20 = vld [vmem:[#allocation4 + $0x50] sm:$0x1] }
 0x331   : > { %v5895_v22 = vrot.slane %v5893_v23, 4  ;;  %v5896_v3 = vrot.slane %v15900_v41, 5  ;;  %v6144_v48 = vshrl.u32 %v15964_v0, 16  ;;  %v5894_v62 = vsel %vm12335_vm13, %v11057_v50, %v5893_v23  ;;  %v11695_v23 = vld [vmem:[%s18593_s4 + $0x8] sm:$0xff]  }
 0x332   : > { %v5558_v19 = vsel %vm12353_vm2, %v5553_v38, %v5557_v34  ;;  %7902 = vrot.lane.b32.xlu0 %v11232_v17, %s18684_s16  ;;  %v5904_v10 = vsel %vm12335_vm13, %v5902_v1, %v5903_v15  ;;  %v6147_v33 = vshll.u32 %v15964_v0, 16  ;;  %v6157_v58 = vshrl.u32 %v15973_v59, 16  ;;  %v15994_v34 = vpop.permute.xlu0 %4573  ;;  %s18996_s16 = smov 12  }
 0x333   : > { %v11122_v61 = vcombine.low %v5548_v36, %v5558_v19  ;;  %v5897_v41 = vsel %vm12335_vm13, %v5895_v22, %v5896_v3  ;;  %v6146_v30 = vrot.slane %v6144_v48, 4  ;;  %v5901_v6 = vsel %vm12335_vm13, %v11058_v21, %v5900_v16  ;;  %v11785_v36 = vld [vmem:[#allocation3 + $0xb8] sm:$0xf]  ;;  %v11786_v22 = vld [vmem:[#allocation3 + $0xb4] sm:$0xf] }
 0x334   : > { %v11137_v11 = vcombine.low %v5894_v62, %v5897_v41  ;;  %v6149_v15 = vrot.slane %v6147_v33, 5  ;;  %v6120_v7 = vshrl.u32 %v5983_v40, 16  ;;  %v16003_v38 = vpop.permute.xlu1 %4579  ;;  %v11138_v17 = vcombine.low %v5901_v6, %v5904_v10  ;;  %v11787_v3 = vld [vmem:[%s18593_s4 + $0x10] ss:$0 sps:$4 sm:$0x33]  }
 0x335   : > { %7314 = vrot.lane.b32.xlu1 %v11122_v61, %s11880_s21  ;;  %v6123_v1 = vshll.u32 %v5983_v40, 16  ;;  %v6133_v50 = vshrl.u32 %v15989_v45, 16  ;;  %v10903_v16 = vcombine.low %v11786_v22, %v11785_v36  ;;  %v4933_v48 = vsel %vm603_vm0, %v11787_v3, 0  ;;  %v16019_v36 = vld [vmem:[#allocation4 + $0x44] sm:$0x1] }
 0x336   : > { %7392 = vrot.lane.b32.xlu0 %v11137_v11, %s18995_s0  ;;  %v6122_v21 = vrot.slane %v6120_v7, 4  ;;  %v6150_v19 = vor.u32 %v6149_v15, %v6146_v30  ;;  %v6153_v62 = vshll.u32 %v15973_v59, 16  ;;  %11464 = vmatpush3.bf16.msra.mxu1 %v4933_v48  ;;  %v6159_v61 = vrot.slane %v6157_v58, 4  ;;  %v11696_v15 = vld [vmem:[%s18593_s4] sm:$0xff]  }
 0x337   : > { %v6125_v33 = vrot.slane %v6123_v1, 5  ;;  %v4648_v10 = vsel %vm554_vm4, %v10903_v16, %v15915_v63  ;;  %v6163_v41 = vshll.u32 %v15998_v20, 16  ;;  %v11153_v6 = vcombine.low %v5983_v40, %v15989_v45  ;;  %11465 = vmatprep.subr.bf16.mxu1 %v11695_v23  ;;  %v16025_v63 = vpop.permute.xlu0 %4577 }
 0x338   : > { %v4680_v11 = vsel %vm878_vm3, %v4648_v10, %v15857_v26  ;;  %v6155_v7 = vrot.slane %v6153_v62, 5  ;;  %v6129_v30 = vshll.u32 %v15989_v45, 16  ;;  %v16030_v58 = vsel %vm4747_vm10, %v15960_v35, %v15729_v46  ;;  %v16035_v22 = vpop.permute.xlu1 %4583 }
 0x339   : > { %7394 = vrot.lane.b32.xlu1 %v11138_v17, %s18995_s0  ;;  %v11154_v26 = vcombine.low %v15964_v0, %v15973_v59  ;;  %v6126_v40 = vor.u32 %v6125_v33, %v6122_v21  ;;  %v6135_v1 = vrot.slane %v6133_v50, 4  ;;  %v4713_v16 = vsel %vm4681_vm8, %v4680_v11, %v15696_v4 }
 0x33a   : > { %7488 = vrot.lane.b32.xlu0 %v11153_v6, %s18996_s16  ;;  %v6151_v3 = vrot.slane %v6150_v19, 4  ;;  %v6160_v48 = vor.u32 %v6159_v61, %v6155_v7  ;;  %v6131_v62 = vrot.slane %v6129_v30, 5  ;;  %v6165_v10 = vrot.slane %v6163_v41, 5  ;;  %11466 = vmatpush3.bf16.msra.mxu1 %v11695_v23  ;;  %v6412_v19 = vld [vmem:[#allocation4 + $0x48] sm:$0xe] }
 0x33b   : > { %v6139_v46 = vshll.u32 %v16019_v36, 16  ;;  %v4742_v35 = vsel %vm4714_vm9, %v15898_v43, %v15719_v27  ;;  %v4744_v0 = vsel %vm4714_vm9, %v15953_v28, %v15944_v24  ;;  %v6127_v50 = vrot.slane %v6126_v40, 4  ;;  %11467 = vmatprep.subr.bf16.mxu1 %v11696_v15  ;;  %v6411_v41 = vld [vmem:[#allocation4 + $0x3c] sm:$0xe]  ;;  %v16067_v6 = vpop.permute.xlu0 %4581 }
 0x33c   : > { %v6161_v17 = vrot.slane %v6160_v48, 4  ;;  %v6136_v21 = vor.u32 %v6135_v1, %v6131_v62  ;;  %v4775_v4 = vsel %vm4747_vm10, %v4742_v35, %v15662_v53  ;;  %v16052_v33 = vsel %vm4714_vm9, %v4713_v16, %v15886_v9  ;;  %v16060_v28 = vpop.permute.xlu1 %4587 }
 0x33d   : > { %7490 = vrot.lane.b32.xlu1 %v11154_v26, %s18996_s16  ;;  %v6156_v27 = vsel %vm12353_vm2, %v6151_v3, %v6155_v7  ;;  %v6141_v43 = vrot.slane %v6139_v46, 5  ;;  %v16058_v24 = vsel %vm4747_vm10, %v4744_v0, %v15893_v54  ;;  %v6132_v23 = vsel %vm12353_vm2, %v6127_v50, %v6131_v62  ;;  %v6594_v26 = vld [vmem:[#allocation4 + $0x54] sm:$0xf]  ;;  %v6592_v3 = vld [vmem:[#allocation4 + $0x48] sm:$0xf] }
 0x33e   : > { %v6166_v53 = vsel %vm12353_vm2, %v6161_v17, %v6165_v10  ;;  %v6137_v61 = vrot.slane %v6136_v21, 4  ;;  %v6508_v9 = vrot.slane %v15973_v59, 5  ;;  %v16071_v7 = vsel %vm4780_vm11, %v4775_v4, %v15742_v39  ;;  %11468 = vmatpush3.bf16.msra.mxu1 %v11696_v15  ;;  %v16079_v10 = vld [vmem:[#allocation4 + $0x58] sm:$0xf]  ;;  %v16095_v21 = vld [vmem:[#allocation4 + $0x4c] sm:$0xf] }
 0x33f   : > { %v11170_v11 = vcombine.low %v6156_v27, %v6166_v53  ;;  %v11074_v54 = vrot.slane %v6412_v19, 9  ;;  %v6501_v30 = vrot.slane %v15989_v45, 5  ;;  %v6511_v16 = vrot.slane %v15998_v20, 5  ;;  %v16098_v53 = vpop.permute.xlu0 %4585 }
 0x340   : > { %v6142_v40 = vsel %vm12353_vm2, %v6137_v61, %v6141_v43  ;;  %v6510_v1 = vrot.slane %v6508_v9, 4  ;;  %v6504_v59 = vrot.slane %v16019_v36, 5  ;;  %v11073_v62 = vrot.slane %v6411_v41, 9  ;;  %v16081_v45 = vpop.permute.xlu1 %4591  ;;  %v18997_v41 = vld [vmem:[#allocation64_spill] sm:$0xff] }
 0x341   : > { %7570 = vrot.lane.b32.xlu1 %v11170_v11, %s18994_s20  ;;  %v11169_v48 = vcombine.low %v6132_v23, %v6142_v40  ;;  %v6503_v39 = vrot.slane %v6501_v30, 4  ;;  %v6509_v15 = vsel %vm12335_vm13, %v11074_v54, %v6508_v9  ;;  %v6753_v20 = vshrl.u32 %v6594_v26, 16 }
 0x342   : > { %v6512_v46 = vsel %vm12335_vm13, %v6510_v1, %v6511_v16  ;;  %v6756_v35 = vshll.u32 %v6594_v26, 16  ;;  %v6502_v0 = vsel %vm12335_vm13, %v11073_v62, %v6501_v30  ;;  %v4850_v50 = vsel %vm4846_vm14, %v14954_v51, %v15955_v14  ;;  %v16105_v51 = vld [vmem:[#allocation4 + $0x5c] sm:$0x1]  ;;  %v18998_v16 = vld [vmem:[#allocation67_spill] sm:$0xff] }
 0x343   : > { %7568 = vrot.lane.b32.xlu0 %v11169_v48, %s18994_s20  ;;  %v11186_v36 = vcombine.low %v6509_v15, %v6512_v46  ;;  %v6505_v17 = vsel %vm12335_vm13, %v6503_v39, %v6504_v59  ;;  %v6755_v4 = vrot.slane %v6753_v20, 4  ;;  %v6766_v27 = vshrl.u32 %v16079_v10, 16  ;;  %v16118_v48 = vld [vmem:[#allocation4 + $0x50] sm:$0x1] }
 0x344   : > { %v6758_v19 = vrot.slane %v6756_v35, 5  ;;  %v6729_v43 = vshrl.u32 %v6592_v3, 16  ;;  %v11185_v23 = vcombine.low %v6502_v0, %v6505_v17  ;;  %v11202_v61 = vcombine.low %v6594_v26, %v16079_v10  ;;  %v16107_v14 = vpop.permute.xlu1 %4595  ;;  %v5379_v17 = vld [vmem:[#allocation4 + $0x48] sm:$0xf] }
 0x345   : > { %7650 = vrot.lane.b32.xlu1 %v11186_v36, %s18988_s22  ;;  %v6732_v9 = vshll.u32 %v6592_v3, 16  ;;  %v4782_v11 = vsel %vm4780_vm11, %v14810_v49, %v18997_v41  ;;  %v6742_v30 = vshrl.u32 %v16095_v21, 16  ;;  %v4786_v49 = vsel %vm4780_vm11, %v15023_v32, %v18998_v16 }
 0x346   : > { %v6731_v54 = vrot.slane %v6729_v43, 4  ;;  %v4815_v40 = vsel %vm4813_vm12, %v4782_v11, %v14732_v37  ;;  %v6759_v59 = vor.u32 %v6758_v19, %v6755_v4  ;;  %v4819_v62 = vsel %vm4813_vm12, %v4786_v49, %v14942_v8  ;;  %v16133_v4 = vpop.permute.xlu0 %4589  ;;  %v16144_v43 = vld [vmem:[#allocation4 + $0x4c] sm:$0xf]  ;;  %v16153_v11 = vld [vmem:[#allocation4 + $0x50] sm:$0x1] }
 0x347   : > { %7648 = vrot.lane.b32.xlu0 %v11185_v23, %s18988_s22  ;;  %v6734_v1 = vrot.slane %v6732_v9, 5  ;;  %v4848_v26 = vsel %vm4846_vm14, %v4815_v40, %v15971_v47  ;;  %v6762_v37 = vshll.u32 %v16079_v10, 16  ;;  %v6768_v39 = vrot.slane %v6766_v27, 4  ;;  %v7020_v49 = vld [vmem:[#allocation4 + $0x48] sm:$0xe] }
 0x348   : > { %11469 = vmatprep.mubr.msk.bf16.mxu1 %vm4899_vm15, %v4848_v26  ;;  %v6772_v15 = vshll.u32 %v16105_v51, 16  ;;  %v11201_v47 = vcombine.low %v6592_v3, %v16095_v21  ;;  %v4852_v32 = vsel %vm4846_vm14, %v4819_v62, %v15994_v34  ;;  %v6738_v20 = vshll.u32 %v16095_v21, 16  ;;  %v16135_v19 = vpop.permute.xlu1 %4599 }
 0x349   : > { %7746 = vrot.lane.b32.xlu1 %v11202_v61, %s18989_s15  ;;  %11470 = vmatmul.mubr.msk.bf16.vlgmr.msra.gmra.mxu1 %vm4899_vm15, %v4850_v50  ;;  %v6735_v46 = vor.u32 %v6734_v1, %v6731_v54  ;;  %v6760_v35 = vrot.slane %v6759_v59, 4  ;;  %v6764_v36 = vrot.slane %v6762_v37, 5  ;;  %v6744_v8 = vrot.slane %v6742_v30, 4 }
 0x34a   : > { %v6748_v0 = vshll.u32 %v16118_v48, 16  ;;  %11473 = vmatprep.mubr.msk.bf16.mxu1 %vm4899_vm15, %v4852_v32  ;;  %v4854_v34 = vsel %vm4846_vm14, %v15101_v52, %v15975_v13  ;;  %v6774_v3 = vrot.slane %v6772_v15, 5  ;;  %v6740_v50 = vrot.slane %v6738_v20, 5 }
 0x34b   : > { %7744 = vrot.lane.b32.xlu0 %v11201_v47, %s18989_s15  ;;  %v4790_v27 = vsel %vm4780_vm11, %v15365_v25, %v14888_v55  ;;  %v6765_v23 = vsel %vm12353_vm2, %v6760_v35, %v6764_v36  ;;  %v6769_v61 = vor.u32 %v6768_v39, %v6764_v36  ;;  %v6736_v9 = vrot.slane %v6735_v46, 4  ;;  %v16164_v39 = vpop.permute.xlu0 %4593  ;;  %v5381_v35 = vld [vmem:[#allocation4 + $0x54] sm:$0xf] }
 0x34c   : > { %v16151_v41 = vsel %vm4846_vm14, %v15398_v29, %v16003_v38  ;;  %v6745_v52 = vor.u32 %v6744_v8, %v6740_v50  ;;  %v6750_v13 = vrot.slane %v6748_v0, 5  ;;  %v4823_v54 = vsel %vm4813_vm12, %v4790_v27, %v15103_v12 }
 0x34d   : > { %v5560_v55 = vshrl.u32 %v5379_v17, 16  ;;  %v6770_v25 = vrot.slane %v6769_v61, 4  ;;  %v5563_v30 = vshll.u32 %v5379_v17, 16  ;;  %v5569_v40 = vshll.u32 %v16144_v43, 16 }
 0x34e   : > { %v5573_v1 = vshrl.u32 %v16144_v43, 16  ;;  %v6741_v26 = vsel %vm12353_vm2, %v6736_v9, %v6740_v50  ;;  %v6746_v16 = vrot.slane %v6745_v52, 4  ;;  %v5579_v38 = vshll.u32 %v16153_v11, 16 }
 0x34f   : > { %v5562_v29 = vrot.slane %v5560_v55, 4  ;;  %v6775_v59 = vsel %vm12353_vm2, %v6770_v25, %v6774_v3  ;;  %v5565_v62 = vrot.slane %v5563_v30, 5  ;;  %v5571_v12 = vrot.slane %v5569_v40, 5  ;;  %v16174_v3 = vld [vmem:[#allocation4 + $0x58] sm:$0xf] }
 0x350   : > { %v5575_v37 = vrot.slane %v5573_v1, 4  ;;  %v16166_v15 = vpop.permute.xlu1 %7306  ;;  %v11218_v47 = vcombine.low %v6765_v23, %v6775_v59  ;;  %v6751_v32 = vsel %vm12353_vm2, %v6746_v16, %v6750_v13  ;;  %v4856_v46 = vsel %vm4846_vm14, %v4823_v54, %v16025_v63  ;;  %v18999_v13 = vld [vmem:[#allocation72_spill] sm:$0xff]  ;;  %v16198_v16 = vpop.permute.xlu0 %4597 }
 0x351   : > { %v7110_v20 = vrot.slane %v16095_v21, 5  ;;  %11474 = vmatmul.mubr.msk.bf16.gmra.mxu1 %vm4899_vm15, %v4854_v34  ;;  %v11217_v36 = vcombine.low %v6741_v26, %v6751_v32  ;;  %v5566_v8 = vor.u32 %v5565_v62, %v5562_v29  ;;  %v11089_v17 = vrot.slane %v7020_v49, 9  ;;  %v16189_v55 = vld [vmem:[#allocation4 + $0x5c] sm:$0x1]  ;;  %v7021_v26 = vld [vmem:[#allocation4 + $0x54] sm:$0xe] }
 0x352   : > { %v5576_v0 = vor.u32 %v5575_v37, %v5571_v12  ;;  %11477 = vmatprep.mubr.msk.bf16.mxu1 %vm4899_vm15, %v4856_v46  ;;  %7826 = vrot.lane.b32.xlu1 %v11218_v47, %s18990_s23  ;;  %v5581_v50 = vrot.slane %v5579_v38, 5  ;;  %v7113_v23 = vrot.slane %v16118_v48, 5  ;;  %v4794_v63 = vsel %vm4780_vm11, %v15438_v42, %v15053_v60 }
 0x353   : > { %v7112_v27 = vrot.slane %v7110_v20, 4  ;;  %7824 = vrot.lane.b32.xlu0 %v11217_v36, %s18990_s23  ;;  %v5567_v21 = vrot.slane %v5566_v8, 4  ;;  %v7111_v61 = vsel %vm12335_vm13, %v11089_v17, %v7110_v20  ;;  %v5584_v9 = vshrl.u32 %v5381_v35, 16  ;;  %v19002_v36 = vld [vmem:[#allocation74_spill] sm:$0xff] }
 0x354   : > { %v5577_v34 = vrot.slane %v5576_v0, 4  ;;  %v4827_v54 = vsel %vm4813_vm12, %v4794_v63, %v18999_v13  ;;  %v5587_v48 = vshll.u32 %v5381_v35, 16  ;;  %v5593_v25 = vshll.u32 %v16174_v3, 16  ;;  %v16192_v60 = vpop.permute.xlu1 %7386  ;;  %v19001_v35 = vld [vmem:[#allocation68_spill] sm:$0xff]  ;;  %v5805_v63 = vld [vmem:[#allocation4 + $0x48] sm:$0xe] }
 0x355   : > { %v7114_v52 = vsel %vm12335_vm13, %v7112_v27, %v7113_v23  ;;  %v5572_v42 = vsel %vm12353_vm2, %v5567_v21, %v5571_v12  ;;  %v5586_v1 = vrot.slane %v5584_v9, 4  ;;  %v5597_v59 = vshrl.u32 %v16174_v3, 16  ;;  %v19004_v23 = vld [vmem:[#allocation70_spill] sm:$0xff] }
 0x356   : > { %v5582_v30 = vsel %vm12353_vm2, %v5577_v34, %v5581_v50  ;;  %v11233_v40 = vcombine.low %v7111_v61, %v7114_v52  ;;  %v5589_v38 = vrot.slane %v5587_v48, 5  ;;  %v5595_v49 = vrot.slane %v5593_v25, 5  ;;  %v16242_v48 = vld [vmem:[#allocation4 + $0x60] sm:$0xf] }
 0x357   : > { %v11123_v29 = vcombine.low %v5572_v42, %v5582_v30  ;;  %v4860_v62 = vsel %vm4846_vm14, %v4827_v54, %v16067_v6  ;;  %v5603_v12 = vshll.u32 %v16189_v55, 16  ;;  %v7117_v37 = vrot.slane %v16079_v10, 5  ;;  %v19003_v10 = vld [vmem:[#allocation57_spill] sm:$0xff] }
 0x358   : > { %7904 = vrot.lane.b32.xlu0 %v11233_v40, %s19000_s30  ;;  %v7120_v47 = vrot.slane %v16105_v51, 5  ;;  %v5590_v32 = vor.u32 %v5589_v38, %v5586_v1  ;;  %v5599_v46 = vrot.slane %v5597_v59, 4  ;;  %v11090_v20 = vrot.slane %v7021_v26, 9  ;;  %v16231_v21 = vpop.permute.xlu1 %7482  ;;  %v19005_v26 = vld [vmem:[#allocation73_spill] sm:$0xff] }
 0x359   : > { %7316 = vrot.lane.b32.xlu1 %v11123_v29, %s11880_s21  ;;  %v4798_v8 = vsel %vm4780_vm11, %v19002_v36, %v19001_v35  ;;  %11478 = vmatmul.mubr.msk.bf16.gmra.mxu1 %vm4899_vm15, %v16151_v41  ;;  %v16216_v6 = vsel %vm4813_vm12, %v16071_v7, %v15935_v5  ;;  %v4862_v51 = vsel %vm4846_vm14, %v19003_v10, %v16035_v22  ;;  %v7119_v0 = vrot.slane %v7117_v37, 4  ;;  %v5806_v7 = vld [vmem:[#allocation4 + $0x54] sm:$0xe] }
 0x35a   : > { %v16224_v17 = vsel %vm4846_vm14, %v15747_v31, %v16060_v28  ;;  %11481 = vmatprep.mubr.msk.bf16.mxu1 %vm4899_vm15, %v4860_v62  ;;  %v5600_v50 = vor.u32 %v5599_v46, %v5595_v49  ;;  %v5605_v27 = vrot.slane %v5603_v12, 5  ;;  %v7118_v41 = vsel %vm12335_vm13, %v11090_v20, %v7117_v37  ;;  %v5987_v62 = vld [vmem:[#allocation4 + $0x54] sm:$0xf]  ;;  %v16263_v12 = vld [vmem:[#allocation4 + $0x58] sm:$0xf] }
 0x35b   : > { %v4831_v5 = vsel %vm4813_vm12, %v4798_v8, %v19004_v23  ;;  %v5591_v22 = vrot.slane %v5590_v32, 4  ;;  %v7121_v34 = vsel %vm12335_vm13, %v7119_v0, %v7120_v47  ;;  %v5914_v28 = vrot.slane %v16174_v3, 5  ;;  %v19006_v46 = vld [vmem:[#allocation52_spill] sm:$0xff] }
 0x35c   : > { %v4864_v31 = vsel %vm4846_vm14, %v4831_v5, %v16098_v53  ;;  %v16238_v61 = vpop.permute.xlu0 %7304  ;;  %v5601_v9 = vrot.slane %v5600_v50, 4  ;;  %v11234_v52 = vcombine.low %v7118_v41, %v7121_v34  ;;  %v5917_v13 = vrot.slane %v16189_v55, 5  ;;  %v16253_v55 = vld [vmem:[#allocation4 + $0x64] sm:$0xf]  ;;  %v19007_v34 = vld [vmem:[#allocation51_spill] sm:$0xff] }
 0x35d   : > { %v5907_v54 = vrot.slane %v16144_v43, 5  ;;  %v5596_v25 = vsel %vm12353_vm2, %v5591_v22, %v5595_v49  ;;  %v11060_v42 = vrot.slane %v5806_v7, 9  ;;  %v5916_v30 = vrot.slane %v5914_v28, 4 }
 0x35e   : > { %v11059_v40 = vrot.slane %v5805_v63, 9  ;;  %v5606_v53 = vsel %vm12353_vm2, %v5601_v9, %v5605_v27  ;;  %7906 = vrot.lane.b32.xlu0 %v11234_v52, %s19000_s30  ;;  %v5910_v1 = vrot.slane %v16153_v11, 5  ;;  %v4802_v43 = vsel %vm4780_vm11, %v15872_v57, %v19005_v26  ;;  %v16283_v27 = vld [vmem:[#allocation4 + $0x68] sm:$0x1]  ;;  %v16296_v9 = vld [vmem:[#allocation4 + $0x5c] sm:$0x1] }
 0x35f   : > { %v5909_v3 = vrot.slane %v5907_v54, 4  ;;  %v11124_v29 = vcombine.low %v5596_v25, %v5606_v53  ;;  %v5915_v38 = vsel %vm12335_vm13, %v11060_v42, %v5914_v28  ;;  %v16260_v49 = vsel %vm4846_vm14, %v15948_v2, %v16081_v45  ;;  %v19009_v26 = vld [vmem:[#allocation58_spill] sm:$0xff] }
 0x360   : > { %v6192_v59 = vshrl.u32 %v16242_v48, 16  ;;  %v16265_v11 = vpop.permute.xlu0 %7384  ;;  %v5918_v57 = vsel %vm12335_vm13, %v5916_v30, %v5917_v13  ;;  %v5908_v37 = vsel %vm12335_vm13, %v11059_v40, %v5907_v54  ;;  %v6195_v32 = vshll.u32 %v16242_v48, 16  ;;  %v19008_v40 = vld [vmem:[#allocation54_spill] sm:$0xff] }
 0x361   : > { %v5911_v47 = vsel %vm12335_vm13, %v5909_v3, %v5910_v1  ;;  %11482 = vmatmul.mubr.msk.bf16.gmra.mxu1 %vm4899_vm15, %v4862_v51  ;;  %v16275_v2 = vpop.permute.xlu1 %7562  ;;  %7318 = vrot.lane.b32.xlu1 %v11124_v29, %s11880_s21  ;;  %v4835_v20 = vsel %vm4813_vm12, %v4802_v43, %v19006_v46  ;;  %v6205_v36 = vshrl.u32 %v16253_v55, 16  ;;  %v6168_v10 = vshrl.u32 %v5987_v62, 16 }
 0x362   : > { %v11139_v45 = vcombine.low %v5908_v37, %v5911_v47  ;;  %v6194_v35 = vrot.slane %v6192_v59, 4  ;;  %11485 = vmatprep.mubr.msk.bf16.mxu1 %vm4899_vm15, %v4864_v31  ;;  %v6197_v8 = vrot.slane %v6195_v32, 5  ;;  %v6171_v0 = vshll.u32 %v5987_v62, 16  ;;  %v19010_v59 = vld [vmem:[#allocation37_spill] sm:$0xff]  ;;  %v19011_v32 = vld [vmem:[#allocation59_spill] sm:$0xff] }
 0x363   : > { %v6181_v50 = vshrl.u32 %v16263_v12, 16  ;;  %v11140_v51 = vcombine.low %v5915_v38, %v5918_v57  ;;  %v4868_v41 = vsel %vm4846_vm14, %v4835_v20, %v16133_v4  ;;  %v11156_v23 = vcombine.low %v16242_v48, %v16253_v55 }
 0x364   : > { %7396 = vrot.lane.b32.xlu0 %v11139_v45, %s18995_s0  ;;  %v6201_v5 = vshll.u32 %v16253_v55, 16  ;;  %v16291_v7 = vpop.permute.xlu0 %7480  ;;  %v6170_v63 = vrot.slane %v6168_v10, 4  ;;  %v6173_v22 = vrot.slane %v6171_v0, 5  ;;  %v4806_v31 = vsel %vm4780_vm11, %v16030_v58, %v19007_v34  ;;  %v6414_v45 = vld [vmem:[#allocation4 + $0x60] sm:$0xe] }
 0x365   : > { %v6198_v28 = vor.u32 %v6197_v8, %v6194_v35  ;;  %v16298_v52 = vpop.permute.xlu1 %7642  ;;  %7398 = vrot.lane.b32.xlu1 %v11140_v51, %s18995_s0  ;;  %v11155_v4 = vcombine.low %v5987_v62, %v16263_v12  ;;  %v6207_v54 = vrot.slane %v6205_v36, 4  ;;  %v6211_v48 = vshll.u32 %v16283_v27, 16  ;;  %v19012_v35 = vld [vmem:[#allocation43_spill] sm:$0xff]  ;;  %v6598_v51 = vld [vmem:[#allocation4 + $0x6c] sm:$0xf] }
 0x366   : > { %v6203_v13 = vrot.slane %v6201_v5, 5  ;;  %v16306_v25 = vsel %vm4846_vm14, %v16216_v6, %v16107_v14  ;;  %v6174_v42 = vor.u32 %v6173_v22, %v6170_v63  ;;  %v6177_v58 = vshll.u32 %v16263_v12, 16 }
 0x367   : > { %v6183_v30 = vrot.slane %v6181_v50, 4  ;;  %v4839_v53 = vsel %vm4813_vm12, %v4806_v31, %v19008_v40  ;;  %v6187_v1 = vshll.u32 %v16296_v9, 16  ;;  %v4779_v43 = vsel %vm4747_vm10, %v16052_v33, %v19009_v26  ;;  %v6413_v50 = vld [vmem:[#allocation4 + $0x54] sm:$0xe]  ;;  %v16360_v40 = vld [vmem:[#allocation4 + $0x64] sm:$0xf] }
 0x368   : > { %7492 = vrot.lane.b32.xlu0 %v11155_v4, %s18996_s16  ;;  %v6208_v3 = vor.u32 %v6207_v54, %v6203_v13  ;;  %v16316_v29 = vpop.permute.xlu0 %7560  ;;  %v4872_v14 = vsel %vm4846_vm14, %v4839_v53, %v16164_v39  ;;  %v6199_v6 = vrot.slane %v6198_v28, 4  ;;  %v6179_v38 = vrot.slane %v6177_v58, 5  ;;  %v16356_v54 = vld [vmem:[#allocation4 + $0x70] sm:$0xf]  ;;  %v11789_v58 = vld [vmem:[#allocation4] sm:$0xf] }
 0x369   : > { %v4812_v62 = vsel %vm4780_vm11, %v4779_v43, %v19010_v59  ;;  %11486 = vmatmul.mubr.msk.bf16.gmra.mxu1 %vm4899_vm15, %v16224_v17  ;;  %7494 = vrot.lane.b32.xlu1 %v11156_v23, %s18996_s16  ;;  %v6213_v37 = vrot.slane %v6211_v48, 5  ;;  %v6175_v47 = vrot.slane %v6174_v42, 4  ;;  %v4810_v33 = vsel %vm4780_vm11, %v16058_v24, %v19011_v32  ;;  %v16333_v36 = vpop.permute.xlu1 %7738  ;;  %v11790_v43 = vld [vmem:[#allocation4 + $0xc] sm:$0xf] }
 0x36a   : > { %v6209_v57 = vrot.slane %v6208_v3, 4  ;;  %11489 = vmatprep.mubr.msk.bf16.mxu1 %vm4899_vm15, %v4868_v41  ;;  %v6204_v39 = vsel %vm12353_vm2, %v6199_v6, %v6203_v13  ;;  %v6184_v46 = vor.u32 %v6183_v30, %v6179_v38  ;;  %v6189_v20 = vrot.slane %v6187_v1, 5  ;;  %v6596_v30 = vld [vmem:[#allocation4 + $0x60] sm:$0xf]  ;;  %v11791_v6 = vld [vmem:[#allocation4 + $0x10] sm:$0xf] }
 0x36b   : > { %v4845_v17 = vsel %vm4813_vm12, %v4812_v62, %v19012_v35  ;;  %v6180_v10 = vsel %vm12353_vm2, %v6175_v47, %v6179_v38  ;;  %v6522_v0 = vrot.slane %v16253_v55, 5  ;;  %v4843_v63 = vsel %vm4813_vm12, %v4810_v33, %v15924_v56 }
 0x36c   : > { %v6214_v8 = vsel %vm12353_vm2, %v6209_v57, %v6213_v37  ;;  %v16341_v24 = vsel %vm4846_vm14, %v4845_v17, %v16135_v19  ;;  %v16344_v41 = vpop.permute.xlu0 %7640  ;;  %v6185_v5 = vrot.slane %v6184_v46, 4  ;;  %v11076_v22 = vrot.slane %v6414_v45, 9  ;;  %v16381_v45 = vld [vmem:[#allocation4 + $0x74] sm:$0x1]  ;;  %v16386_v17 = vld [vmem:[#allocation4 + $0x68] sm:$0x1] }
 0x36d   : > { %v11172_v23 = vcombine.low %v6204_v39, %v6214_v8  ;;  %v6524_v34 = vrot.slane %v6522_v0, 4  ;;  %v6525_v31 = vrot.slane %v16283_v27, 5  ;;  %v6515_v28 = vrot.slane %v16263_v12, 5  ;;  %v11788_v12 = vld [vmem:[#allocation4 + $0x4] sm:$0xf] }
 0x36e   : > { %v6518_v19 = vrot.slane %v16296_v9, 5  ;;  %v6190_v55 = vsel %vm12353_vm2, %v6185_v5, %v6189_v20  ;;  %v6523_v4 = vsel %vm12335_vm13, %v11076_v22, %v6522_v0  ;;  %v11075_v13 = vrot.slane %v6413_v50, 9  ;;  %v16370_v59 = vpop.permute.xlu1 %7818 }
 0x36f   : > { %7574 = vrot.lane.b32.xlu1 %v11172_v23, %s18994_s20  ;;  %v6801_v56 = vshrl.u32 %v6598_v51, 16  ;;  %v11171_v48 = vcombine.low %v6180_v10, %v6190_v55  ;;  %v6526_v27 = vsel %vm12335_vm13, %v6524_v34, %v6525_v31  ;;  %v6517_v42 = vrot.slane %v6515_v28, 4 }
 0x370   : > { %v11101_v9 = vcombine.low %v11789_v58, %v11788_v12  ;;  %v16362_v53 = vpop.permute.xlu0 %7736  ;;  %v4876_v3 = vsel %vm4846_vm14, %v4843_v63, %v16198_v16  ;;  %v11188_v1 = vcombine.low %v6523_v4, %v6526_v27  ;;  %v6516_v26 = vsel %vm12335_vm13, %v11075_v13, %v6515_v28  ;;  %v5383_v63 = vld [vmem:[#allocation4 + $0x60] sm:$0xf]  ;;  %v16397_v28 = vld [vmem:[#allocation4 + $0x64] sm:$0xf]  ;;  %v16409_v58 = vld [vmem:[#allocation4 + $0x68] sm:$0x1] }
 0x371   : > { %v11102_v38 = vcombine.low %v11790_v43, %v11791_v6  ;;  %11490 = vmatmul.mubr.msk.bf16.gmra.mxu1 %vm4899_vm15, %v16260_v49  ;;  %7572 = vrot.lane.b32.xlu0 %v11171_v48, %s18994_s20  ;;  %v6519_v62 = vsel %vm12335_vm13, %v6517_v42, %v6518_v19  ;;  %v6803_v57 = vrot.slane %v6801_v56, 4  ;;  %v6804_v37 = vshll.u32 %v6598_v51, 16 }
 0x372   : > { %v6814_v16 = vshrl.u32 %v16356_v54, 16  ;;  %11493 = vmatprep.mubr.msk.bf16.mxu1 %vm4899_vm15, %v4872_v14  ;;  %v6777_v32 = vshrl.u32 %v6596_v30, 16  ;;  %v6780_v49 = vshll.u32 %v6596_v30, 16  ;;  %v6790_v33 = vshrl.u32 %v16360_v40, 16 }
 0x373   : > { %7654 = vrot.lane.b32.xlu1 %v11188_v1, %s18988_s22  ;;  %v7933_v47 = vsel %vm554_vm4, %v11102_v38, %v16166_v15  ;;  %v11187_v39 = vcombine.low %v6516_v26, %v6519_v62  ;;  %v7930_v46 = vsel %vm554_vm4, %v11101_v9, %v16238_v61  ;;  %v6806_v20 = vrot.slane %v6804_v37, 5  ;;  %v7022_v62 = vld [vmem:[#allocation4 + $0x60] sm:$0xe] }
 0x374   : > { %v11204_v35 = vcombine.low %v6598_v51, %v16356_v54  ;;  %v16388_v14 = vpop.permute.xlu0 %7816  ;;  %v6779_v8 = vrot.slane %v6777_v32, 4  ;;  %v6782_v10 = vrot.slane %v6780_v49, 5  ;;  %v6810_v15 = vshll.u32 %v16356_v54, 16 }
 0x375   : > { %v6816_v0 = vrot.slane %v6814_v16, 4  ;;  %7652 = vrot.lane.b32.xlu0 %v11187_v39, %s18988_s22  ;;  %v6807_v50 = vor.u32 %v6806_v20, %v6803_v57  ;;  %v6820_v23 = vshll.u32 %v16381_v45, 16  ;;  %v6786_v5 = vshll.u32 %v16360_v40, 16 }
 0x376   : > { %v6792_v61 = vrot.slane %v6790_v33, 4  ;;  %v11203_v51 = vcombine.low %v6596_v30, %v16360_v40  ;;  %v6812_v22 = vrot.slane %v6810_v15, 5  ;;  %v6783_v34 = vor.u32 %v6782_v10, %v6779_v8  ;;  %v16399_v19 = vpop.permute.xlu1 %7308  ;;  %v5385_v10 = vld [vmem:[#allocation4 + $0x6c] sm:$0xf]  ;;  %v16431_v15 = vld [vmem:[#allocation4 + $0x70] sm:$0xf] }
 0x377   : > { %7750 = vrot.lane.b32.xlu1 %v11204_v35, %s18989_s15  ;;  %v6796_v31 = vshll.u32 %v16386_v17, 16  ;;  %v7979_v55 = vsel %vm878_vm3, %v7933_v47, %v16192_v60  ;;  %v16405_v4 = vsel %vm878_vm3, %v7930_v46, %v16265_v11  ;;  %v6808_v13 = vrot.slane %v6807_v50, 4 }
 0x378   : > { %v6788_v56 = vrot.slane %v6786_v5, 5  ;;  %v16407_v48 = vpop.permute.xlu0 %7896  ;;  %v6817_v27 = vor.u32 %v6816_v0, %v6812_v22  ;;  %v6822_v42 = vrot.slane %v6820_v23, 5  ;;  %v6784_v12 = vrot.slane %v6783_v34, 4 }
 0x379   : > { %v5608_v9 = vshrl.u32 %v5383_v63, 16  ;;  %11494 = vmatmul.mubr.msk.bf16.gmra.mxu1 %vm4899_vm15, %v16306_v25  ;;  %7748 = vrot.lane.b32.xlu0 %v11203_v51, %s18989_s15  ;;  %v6798_v30 = vrot.slane %v6796_v31, 5  ;;  %v5611_v1 = vshll.u32 %v5383_v63, 16  ;;  %v5617_v11 = vshll.u32 %v16397_v28, 16 }
 0x37a   : > { %v6793_v60 = vor.u32 %v6792_v61, %v6788_v56  ;;  %11497 = vmatprep.mubr.msk.bf16.mxu1 %vm4899_vm15, %v4876_v3  ;;  %v6813_v26 = vsel %vm12353_vm2, %v6808_v13, %v6812_v22  ;;  %v6818_v43 = vrot.slane %v6817_v27, 4  ;;  %v5621_v38 = vshrl.u32 %v16397_v28, 16  ;;  %v16435_v61 = vld [vmem:[#allocation4 + $0x74] sm:$0x1] }
 0x37b   : > { %v5610_v6 = vrot.slane %v5608_v9, 4  ;;  %v5613_v37 = vrot.slane %v5611_v1, 5  ;;  %v5619_v25 = vrot.slane %v5617_v11, 5  ;;  %v5627_v16 = vshll.u32 %v16409_v58, 16  ;;  %v7023_v11 = vld [vmem:[#allocation4 + $0x6c] sm:$0xe] }
 0x37c   : > { %v6794_v57 = vrot.slane %v6793_v60, 4  ;;  %v16420_v47 = vpop.permute.xlu0 %7898  ;;  %v6823_v32 = vsel %vm12353_vm2, %v6818_v43, %v6822_v42  ;;  %v6789_v3 = vsel %vm12353_vm2, %v6784_v12, %v6788_v56  ;;  %v5623_v49 = vrot.slane %v5621_v38, 4  ;;  %v5808_v38 = vld [vmem:[#allocation4 + $0x6c] sm:$0xe] }
 0x37d   : > { %v7124_v33 = vrot.slane %v16360_v40, 5  ;;  %v16427_v39 = vpop.permute.xlu1 %7310  ;;  %v11220_v46 = vcombine.low %v6813_v26, %v6823_v32  ;;  %v5614_v35 = vor.u32 %v5613_v37, %v5610_v6  ;;  %v11091_v8 = vrot.slane %v7022_v62, 9 }
 0x37e   : > { %v6799_v20 = vsel %vm12353_vm2, %v6794_v57, %v6798_v30  ;;  %v8011_v50 = vsel %vm4681_vm8, %v7979_v55, %v16231_v21  ;;  %v5624_v23 = vor.u32 %v5623_v49, %v5619_v25  ;;  %v5629_v63 = vrot.slane %v5627_v16, 5 }
 0x37f   : > { %v11219_v0 = vcombine.low %v6789_v3, %v6799_v20  ;;  %v7126_v5 = vrot.slane %v7124_v33, 4  ;;  %7830 = vrot.lane.b32.xlu1 %v11220_v46, %s18990_s23  ;;  %v5615_v40 = vrot.slane %v5614_v35, 4  ;;  %v7125_v51 = vsel %vm12335_vm13, %v11091_v8, %v7124_v33  ;;  %v5807_v33 = vld [vmem:[#allocation4 + $0x60] sm:$0xe] }
 0x380   : > { %v7127_v22 = vrot.slane %v16386_v17, 5  ;;  %v16441_v34 = vpop.permute.xlu0 %7388  ;;  %v5625_v31 = vrot.slane %v5624_v23, 4  ;;  %v5632_v13 = vshrl.u32 %v5385_v10, 16  ;;  %v5635_v21 = vshll.u32 %v5385_v10, 16 }
 0x381   : > { %7828 = vrot.lane.b32.xlu0 %v11219_v0, %s18990_s23  ;;  %v5641_v55 = vshll.u32 %v16431_v15, 16  ;;  %11498 = vmatmul.mubr.msk.bf16.gmra.mxu1 %vm4899_vm15, %v16341_v24  ;;  %v16447_v56 = vpop.permute.xlu1 %7390  ;;  %v5620_v27 = vsel %vm12353_vm2, %v5615_v40, %v5619_v25  ;;  %v5645_v42 = vshrl.u32 %v16431_v15, 16  ;;  %v5651_v12 = vshll.u32 %v16435_v61, 16 }
 0x382   : > { %v7128_v17 = vsel %vm12335_vm13, %v7126_v5, %v7127_v22  ;;  %v5630_v9 = vsel %vm12353_vm2, %v5625_v31, %v5629_v63  ;;  %v5634_v30 = vrot.slane %v5632_v13, 4  ;;  %v5637_v1 = vrot.slane %v5635_v21, 5  ;;  %v16481_v5 = vld [vmem:[#allocation4 + $0x78] sm:$0xf]  ;;  %v16487_v63 = vld [vmem:[#allocation4 + $0x7c] sm:$0xf] }
 0x383   : > { %v11235_v60 = vcombine.low %v7125_v51, %v7128_v17  ;;  %v8009_v24 = vsel %vm4681_vm8, %v16405_v4, %v16291_v7  ;;  %v11125_v26 = vcombine.low %v5620_v27, %v5630_v9  ;;  %v5643_v43 = vrot.slane %v5641_v55, 5 }
 0x384   : > { %v5647_v6 = vrot.slane %v5645_v42, 4  ;;  %v8043_v62 = vsel %vm4714_vm9, %v8011_v50, %v16275_v2  ;;  %v5638_v57 = vor.u32 %v5637_v1, %v5634_v30  ;;  %v7131_v37 = vrot.slane %v16356_v54, 5  ;;  %v16467_v32 = vpop.permute.xlu0 %7484 }
 0x385   : > { %7908 = vrot.lane.b32.xlu0 %v11235_v60, %s19000_s30  ;;  %v7134_v25 = vrot.slane %v16381_v45, 5  ;;  %v16465_v16 = vpop.permute.xlu1 %7486  ;;  %7320 = vrot.lane.b32.xlu1 %v11125_v26, %s11880_s21  ;;  %v8041_v7 = vsel %vm4714_vm9, %v8009_v24, %v16316_v29  ;;  %v5653_v3 = vrot.slane %v5651_v12, 5  ;;  %v11092_v49 = vrot.slane %v7023_v11, 9 }
 0x386   : > { %v5648_v4 = vor.u32 %v5647_v6, %v5643_v43  ;;  %v7133_v46 = vrot.slane %v7131_v37, 4  ;;  %v8075_v2 = vsel %vm4747_vm10, %v8043_v62, %v16298_v52  ;;  %v11062_v54 = vrot.slane %v5808_v38, 9  ;;  %v11707_v6 = vld [vmem:[%s18596_s7 + $0x8] sm:$0xff]  }
 0x387   : > { %v5928_v45 = vrot.slane %v16431_v15, 5  ;;  %v5639_v20 = vrot.slane %v5638_v57, 4  ;;  %v5931_v8 = vrot.slane %v16435_v61, 5  ;;  %v5921_v10 = vrot.slane %v16397_v28, 5  ;;  %v5991_v28 = vld [vmem:[#allocation4 + $0x6c] sm:$0xf] }
 0x388   : > { %v5649_v35 = vrot.slane %v5648_v4, 4  ;;  %v7132_v29 = vsel %vm12335_vm13, %v11092_v49, %v7131_v37  ;;  %v7135_v0 = vsel %vm12335_vm13, %v7133_v46, %v7134_v25  ;;  %v11061_v23 = vrot.slane %v5807_v33, 9  ;;  %v16521_v37 = vld [vmem:[#allocation4 + $0x74] sm:$0x1] }
 0x389   : > { %v5930_v50 = vrot.slane %v5928_v45, 4  ;;  %v5644_v52 = vsel %vm12353_vm2, %v5639_v20, %v5643_v43  ;;  %v11236_v40 = vcombine.low %v7132_v29, %v7135_v0  ;;  %v5923_v61 = vrot.slane %v5921_v10, 4  ;;  %v16513_v43 = vld [vmem:[#allocation4 + $0x80] sm:$0x1] }
 0x38a   : > { %v5654_v15 = vsel %vm12353_vm2, %v5649_v35, %v5653_v3  ;;  %v16489_v51 = vpop.permute.xlu1 %7566  ;;  %v8073_v31 = vsel %vm4747_vm10, %v8041_v7, %v16344_v41  ;;  %v5929_v13 = vsel %vm12335_vm13, %v11062_v54, %v5928_v45  ;;  %v5924_v21 = vrot.slane %v16409_v58, 5  ;;  %v16505_v41 = vld [vmem:[#allocation4 + $0x70] sm:$0xf]  ;;  %v11792_v49 = vld [vmem:[%s18596_s7 + $0x10] ss:$0 sps:$4 sm:$0x33]  }
 0x38b   : > { %v11126_v22 = vcombine.low %v5644_v52, %v5654_v15  ;;  %v16496_v55 = vpop.permute.xlu0 %7564  ;;  %7910 = vrot.lane.b32.xlu0 %v11236_v40, %s19000_s30  ;;  %v5932_v27 = vsel %vm12335_vm13, %v5930_v50, %v5931_v8  ;;  %v5922_v17 = vsel %vm12335_vm13, %v11061_v23, %v5921_v10  ;;  %v6240_v42 = vshrl.u32 %v16481_v5, 16  ;;  %v11709_v52 = vld [vmem:[%s18596_s7] sm:$0xff]  }
 0x38c   : > { %v6243_v12 = vshll.u32 %v16481_v5, 16  ;;  %v5925_v58 = vsel %vm12335_vm13, %v5923_v61, %v5924_v21  ;;  %v8107_v9 = vsel %vm4780_vm11, %v8075_v2, %v16333_v36  ;;  %v6253_v60 = vshrl.u32 %v16487_v63, 16  ;;  %v11793_v61 = vld [vmem:[#allocation4 + $0x18] sm:$0xf] }
 0x38d   : > { %7322 = vrot.lane.b32.xlu1 %v11126_v22, %s11880_s21  ;;  %v6216_v30 = vshrl.u32 %v5991_v28, 16  ;;  %v11141_v1 = vcombine.low %v5922_v17, %v5925_v58  ;;  %v6242_v11 = vrot.slane %v6240_v42, 4  ;;  %v6219_v26 = vshll.u32 %v5991_v28, 16  ;;  %v6415_v17 = vld [vmem:[#allocation4 + $0x6c] sm:$0xe] }
 0x38e   : > { %v6245_v24 = vrot.slane %v6243_v12, 5  ;;  %v11142_v38 = vcombine.low %v5929_v13, %v5932_v27  ;;  %v8105_v62 = vsel %vm4780_vm11, %v8073_v31, %v16362_v53  ;;  %v6229_v36 = vshrl.u32 %v16505_v41, 16  ;;  %v16523_v25 = vpop.permute.xlu1 %7646 }
 0x38f   : > { %v6218_v57 = vrot.slane %v6216_v30, 4  ;;  %v16525_v7 = vpop.permute.xlu0 %7644  ;;  %7400 = vrot.lane.b32.xlu0 %v11141_v1, %s18995_s0  ;;  %v11158_v4 = vcombine.low %v16481_v5, %v16487_v63  ;;  %v6221_v3 = vrot.slane %v6219_v26, 5  ;;  %v8253_v53 = vsel %vm603_vm0, %v11792_v49, 0  ;;  %v6416_v5 = vld [vmem:[#allocation4 + $0x78] sm:$0xe] }
 0x390   : > { %v6246_v33 = vor.u32 %v6245_v24, %v6242_v11  ;;  %11502 = vmatpush3.bf16.msra.mxu0 %v8253_v53  ;;  %v6249_v46 = vshll.u32 %v16487_v63, 16  ;;  %v6255_v2 = vrot.slane %v6253_v60, 4  ;;  %v6259_v54 = vshll.u32 %v16513_v43, 16  ;;  %v11795_v49 = vld [vmem:[#allocation4 + $0x24] sm:$0xf] }
 0x391   : > { %7402 = vrot.lane.b32.xlu1 %v11142_v38, %s18995_s0  ;;  %v6225_v45 = vshll.u32 %v16505_v41, 16  ;;  %v11157_v20 = vcombine.low %v5991_v28, %v16505_v41  ;;  %11503 = vmatprep.subr.bf16.mxu0 %v11707_v6  ;;  %v6222_v35 = vor.u32 %v6221_v3, %v6218_v57  ;;  %v6231_v8 = vrot.slane %v6229_v36, 4  ;;  %v11794_v28 = vld [vmem:[#allocation4 + $0x1c] sm:$0xf]  ;;  %v16576_v36 = vld [vmem:[#allocation4 + $0x88] sm:$0xf] }
 0x392   : > { %v6235_v10 = vshll.u32 %v16521_v37, 16  ;;  %v8139_v29 = vsel %vm4813_vm12, %v8107_v9, %v16370_v59  ;;  %v8137_v0 = vsel %vm4813_vm12, %v8105_v62, %v16388_v14  ;;  %v6251_v50 = vrot.slane %v6249_v46, 5  ;;  %v16553_v42 = vpop.permute.xlu1 %7742  ;;  %v16580_v46 = vld [vmem:[#allocation4 + $0x7c] sm:$0xf] }
 0x393   : > { %v6227_v23 = vrot.slane %v6225_v45, 5  ;;  %7496 = vrot.lane.b32.xlu0 %v11157_v20, %s18996_s16  ;;  %v6247_v15 = vrot.slane %v6246_v33, 4  ;;  %v6261_v40 = vrot.slane %v6259_v54, 5  ;;  %v11103_v22 = vcombine.low %v11793_v61, %v11794_v28  ;;  %v16550_v31 = vpop.permute.xlu0 %7740 }
 0x394   : > { %v8169_v59 = vsel %vm4846_vm14, %v8137_v0, %v16407_v48  ;;  %v6256_v14 = vor.u32 %v6255_v2, %v6251_v50  ;;  %v6223_v13 = vrot.slane %v6222_v35, 4  ;;  %v6237_v27 = vrot.slane %v6235_v10, 5  ;;  %11504 = vmatpush3.bf16.msra.mxu0 %v11707_v6  ;;  %v16568_v6 = vld [vmem:[#allocation4 + $0x84] sm:$0xf] }
 0x395   : > { %7498 = vrot.lane.b32.xlu1 %v11158_v4, %s18996_s16  ;;  %v6232_v21 = vor.u32 %v6231_v8, %v6227_v23  ;;  %v6252_v12 = vsel %vm12353_vm2, %v6247_v15, %v6251_v50  ;;  %v16559_v58 = vsel %vm554_vm4, %v11103_v22, %v16399_v19  ;;  %v11078_v48 = vrot.slane %v6416_v5, 9  ;;  %11507 = vmatprep.mubr.msk.bf16.mxu0 %vm4899_vm15, %v8169_v59  ;;  %v16599_v50 = vld [vmem:[#allocation4 + $0x8c] sm:$0x1] }
 0x396   : > { %v6536_v9 = vrot.slane %v16487_v63, 5  ;;  %v6257_v60 = vrot.slane %v6256_v14, 4  ;;  %11505 = vmatprep.subr.bf16.mxu0 %v11709_v52  ;;  %v6529_v1 = vrot.slane %v16505_v41, 5  ;;  %v6532_v11 = vrot.slane %v16521_v37, 5  ;;  %v6600_v37 = vld [vmem:[#allocation4 + $0x78] sm:$0xf] }
 0x397   : > { %v6233_v30 = vrot.slane %v6232_v21, 4  ;;  %v6228_v24 = vsel %vm12353_vm2, %v6223_v13, %v6227_v23  ;;  %v6539_v19 = vrot.slane %v16513_v43, 5  ;;  %v11077_v38 = vrot.slane %v6415_v17, 9  ;;  %v11796_v43 = vld [vmem:[#allocation4 + $0x28] sm:$0xf]  ;;  %v16590_v8 = vpop.permute.xlu1 %7822 }
 0x398   : > { %v6538_v26 = vrot.slane %v6536_v9, 4  ;;  %v6262_v63 = vsel %vm12353_vm2, %v6257_v60, %v6261_v40  ;;  %v6537_v41 = vsel %vm12335_vm13, %v11078_v48, %v6536_v9  ;;  %v6531_v57 = vrot.slane %v6529_v1, 4  ;;  %11506 = vmatpush3.bf16.msra.mxu0 %v11709_v52  ;;  %v16603_v40 = vld [vmem:[#allocation4 + $0x80] sm:$0x1]  ;;  %v5387_v60 = vld [vmem:[#allocation4 + $0x78] sm:$0xf] }
 0x399   : > { %v6238_v62 = vsel %vm12353_vm2, %v6233_v30, %v6237_v27  ;;  %v11174_v4 = vcombine.low %v6252_v12, %v6262_v63  ;;  %v11104_v53 = vcombine.low %v11795_v49, %v11796_v43  ;;  %v8171_v33 = vsel %vm4846_vm14, %v8139_v29, %v16420_v47 }
 0x39a   : > { %v11173_v3 = vcombine.low %v6228_v24, %v6238_v62  ;;  %v16582_v2 = vpop.permute.xlu0 %7820  ;;  %v6540_v54 = vsel %vm12335_vm13, %v6538_v26, %v6539_v19  ;;  %v6533_v45 = vsel %vm12335_vm13, %v6531_v57, %v6532_v11  ;;  %v6849_v20 = vshrl.u32 %v16568_v6, 16  ;;  %v16616_v26 = vld [vmem:[#allocation4 + $0x7c] sm:$0xf] }
 0x39b   : > { %v6852_v35 = vshll.u32 %v16568_v6, 16  ;;  %7578 = vrot.lane.b32.xlu1 %v11174_v4, %s18994_s20  ;;  %v6530_v47 = vsel %vm12335_vm13, %v11077_v38, %v6529_v1  ;;  %v7939_v10 = vsel %vm554_vm4, %v11104_v53, %v16427_v39  ;;  %v6862_v29 = vshrl.u32 %v16576_v36, 16  ;;  %11508 = vmatmul.mubr.msk.bf16.vlgmr.msra.gmra.mxu0 %vm4899_vm15, %v8171_v33 }
 0x39c   : > { %7576 = vrot.lane.b32.xlu0 %v11173_v3, %s18994_s20  ;;  %v6825_v0 = vshrl.u32 %v6600_v37, 16  ;;  %v6851_v23 = vrot.slane %v6849_v20, 4  ;;  %v6828_v52 = vshll.u32 %v6600_v37, 16  ;;  %v6838_v15 = vshrl.u32 %v16580_v46, 16 }
 0x39d   : > { %v6854_v5 = vrot.slane %v6852_v35, 5  ;;  %v11190_v61 = vcombine.low %v6537_v41, %v6540_v54  ;;  %v11189_v28 = vcombine.low %v6530_v47, %v6533_v45  ;;  %v11206_v22 = vcombine.low %v16568_v6, %v16576_v36  ;;  %v16625_v41 = vld [vmem:[#allocation4 + $0x80] sm:$0x1] }
 0x39e   : > { %v6827_v39 = vrot.slane %v6825_v0, 4  ;;  %v16607_v59 = vpop.permute.xlu0 %7900  ;;  %v6830_v14 = vrot.slane %v6828_v52, 5  ;;  %v6858_v21 = vshll.u32 %v16576_v36, 16  ;;  %v6864_v27 = vrot.slane %v6862_v29, 4 }
 0x39f   : > { %v6855_v13 = vor.u32 %v6854_v5, %v6851_v23  ;;  %7658 = vrot.lane.b32.xlu1 %v11190_v61, %s18988_s22  ;;  %v6868_v17 = vshll.u32 %v16599_v50, 16  ;;  %v6834_v12 = vshll.u32 %v16580_v46, 16  ;;  %v6840_v48 = vrot.slane %v6838_v15, 4 }
 0x3a0   : > { %7656 = vrot.lane.b32.xlu0 %v11189_v28, %s18988_s22  ;;  %v6844_v9 = vshll.u32 %v16603_v40, 16  ;;  %v11205_v30 = vcombine.low %v6600_v37, %v16580_v46  ;;  %v6860_v11 = vrot.slane %v6858_v21, 5  ;;  %v6831_v24 = vor.u32 %v6830_v14, %v6827_v39  ;;  %v16618_v19 = vpop.permute.xlu1 %7312  ;;  %v5389_v14 = vld [vmem:[#allocation4 + $0x84] sm:$0xf] }
 0x3a1   : > { %v6856_v1 = vrot.slane %v6855_v13, 4  ;;  %v7983_v38 = vsel %vm878_vm3, %v7939_v10, %v16447_v56  ;;  %v7981_v6 = vsel %vm878_vm3, %v16559_v58, %v16441_v34  ;;  %v6870_v63 = vrot.slane %v6868_v17, 5  ;;  %v7024_v58 = vld [vmem:[#allocation4 + $0x78] sm:$0xe]  ;;  %v16645_v13 = vld [vmem:[#allocation4 + $0x88] sm:$0xf] }
 0x3a2   : > { %v6836_v62 = vrot.slane %v6834_v12, 5  ;;  %v6865_v37 = vor.u32 %v6864_v27, %v6860_v11  ;;  %v6846_v4 = vrot.slane %v6844_v9, 5  ;;  %v5656_v3 = vshrl.u32 %v5387_v60, 16 }
 0x3a3   : > { %v6861_v57 = vsel %vm12353_vm2, %v6856_v1, %v6860_v11  ;;  %7754 = vrot.lane.b32.xlu1 %v11206_v22, %s18989_s15  ;;  %v5659_v56 = vshll.u32 %v5387_v60, 16  ;;  %v5665_v43 = vshll.u32 %v16616_v26, 16  ;;  %v5669_v34 = vshrl.u32 %v16616_v26, 16  ;;  %v5410_v11 = vld [vmem:[#allocation4 + $0x8c] sm:$0x1] }
 0x3a4   : > { %7752 = vrot.lane.b32.xlu0 %v11205_v30, %s18989_s15  ;;  %v6841_v49 = vor.u32 %v6840_v48, %v6836_v62  ;;  %v16633_v53 = vpop.permute.xlu0 %7902  ;;  %v6866_v33 = vrot.slane %v6865_v37, 4  ;;  %v6832_v54 = vrot.slane %v6831_v24, 4  ;;  %v5658_v45 = vrot.slane %v5656_v3, 4 }
 0x3a5   : > { %v5675_v20 = vshll.u32 %v16625_v41, 16  ;;  %v5661_v47 = vrot.slane %v5659_v56, 5  ;;  %v5667_v10 = vrot.slane %v5665_v43, 5  ;;  %v5671_v29 = vrot.slane %v5669_v34, 4 }
 0x3a6   : > { %v6842_v35 = vrot.slane %v6841_v49, 4  ;;  %v6871_v0 = vsel %vm12353_vm2, %v6866_v33, %v6870_v63  ;;  %v6837_v23 = vsel %vm12353_vm2, %v6832_v54, %v6836_v62  ;;  %v11093_v5 = vrot.slane %v7024_v58, 9 }
 0x3a7   : > { %v7138_v52 = vrot.slane %v16580_v46, 5  ;;  %v16641_v15 = vpop.permute.xlu1 %7314  ;;  %v11222_v61 = vcombine.low %v6861_v57, %v6871_v0  ;;  %v5662_v22 = vor.u32 %v5661_v47, %v5658_v45  ;;  %v5672_v39 = vor.u32 %v5671_v29, %v5667_v10 }
 0x3a8   : > { %v6847_v28 = vsel %vm12353_vm2, %v6842_v35, %v6846_v4  ;;  %v8015_v27 = vsel %vm4681_vm8, %v7983_v38, %v16465_v16  ;;  %v7141_v12 = vrot.slane %v16603_v40, 5  ;;  %v16650_v48 = vpop.permute.xlu0 %7392  ;;  %v5677_v60 = vrot.slane %v5675_v20, 5  ;;  %v7025_v4 = vld [vmem:[#allocation4 + $0x84] sm:$0xe] }
 0x3a9   : > { %v11221_v21 = vcombine.low %v6837_v23, %v6847_v28  ;;  %v7140_v17 = vrot.slane %v7138_v52, 4  ;;  %7834 = vrot.lane.b32.xlu1 %v11222_v61, %s18990_s23  ;;  %v5663_v46 = vrot.slane %v5662_v22, 4  ;;  %v5673_v9 = vrot.slane %v5672_v39, 4  ;;  %v5809_v23 = vld [vmem:[#allocation4 + $0x78] sm:$0xe] }
 0x3aa   : > { %v7139_v30 = vsel %vm12335_vm13, %v11093_v5, %v7138_v52  ;;  %v5680_v16 = vshrl.u32 %v5389_v14, 16  ;;  %v5683_v24 = vshll.u32 %v5389_v14, 16  ;;  %v5689_v40 = vshll.u32 %v16645_v13, 16 }
 0x3ab   : > { %7832 = vrot.lane.b32.xlu0 %v11221_v21, %s18990_s23  ;;  %v7142_v1 = vsel %vm12335_vm13, %v7140_v17, %v7141_v12  ;;  %v16659_v38 = vpop.permute.xlu1 %7394  ;;  %v5668_v63 = vsel %vm12353_vm2, %v5663_v46, %v5667_v10  ;;  %v5678_v62 = vsel %vm12353_vm2, %v5673_v9, %v5677_v60  ;;  %v5693_v37 = vshrl.u32 %v16645_v13, 16  ;;  %v16688_v12 = vld [vmem:[#allocation4 + $0x90] sm:$0xf]  ;;  %v16695_v60 = vld [vmem:[#allocation4 + $0x94] sm:$0xf] }
 0x3ac   : > { %v11237_v57 = vcombine.low %v7139_v30, %v7142_v1  ;;  %v11127_v3 = vcombine.low %v5668_v63, %v5678_v62  ;;  %v5682_v49 = vrot.slane %v5680_v16, 4  ;;  %v5685_v56 = vrot.slane %v5683_v24, 5  ;;  %v16674_v10 = vpop.permute.xlu0 %7488  ;;  %v5995_v30 = vld [vmem:[#allocation4 + $0x84] sm:$0xf]  ;;  %v16704_v24 = vld [vmem:[#allocation4 + $0x88] sm:$0xf] }
 0x3ad   : > { %v5691_v43 = vrot.slane %v5689_v40, 5  ;;  %v8013_v34 = vsel %vm4681_vm8, %v7981_v6, %v16467_v32  ;;  %v5695_v58 = vrot.slane %v5693_v37, 4  ;;  %v5699_v33 = vshll.u32 %v5410_v11, 16 }
 0x3ae   : > { %v7145_v54 = vrot.slane %v16576_v36, 5  ;;  %7324 = vrot.lane.b32.xlu1 %v11127_v3, %s11880_s21  ;;  %v8047_v45 = vsel %vm4714_vm9, %v8015_v27, %v16489_v51  ;;  %v5686_v20 = vor.u32 %v5685_v56, %v5682_v49  ;;  %v11094_v35 = vrot.slane %v7025_v4, 9  ;;  %v5810_v36 = vld [vmem:[#allocation4 + $0x84] sm:$0xe]  ;;  %v16720_v56 = vld [vmem:[#allocation4 + $0x98] sm:$0x1] }
 0x3af   : > { %7912 = vrot.lane.b32.xlu0 %v11237_v57, %s19000_s30  ;;  %v7148_v47 = vrot.slane %v16599_v50, 5  ;;  %v8045_v32 = vsel %vm4714_vm9, %v8013_v34, %v16496_v55  ;;  %v5696_v6 = vor.u32 %v5695_v58, %v5691_v43  ;;  %v5701_v29 = vrot.slane %v5699_v33, 5  ;;  %v16678_v5 = vpop.permute.xlu1 %7490 }
 0x3b0   : > { %v7147_v0 = vrot.slane %v7145_v54, 4  ;;  %v5687_v52 = vrot.slane %v5686_v20, 4  ;;  %v7146_v51 = vsel %vm12335_vm13, %v11094_v35, %v7145_v54  ;;  %v8079_v61 = vsel %vm4747_vm10, %v8047_v45, %v16523_v25  ;;  %v16723_v54 = vld [vmem:[#allocation4 + $0x8c] sm:$0x1] }
 0x3b1   : > { %v5942_v50 = vrot.slane %v16645_v13, 5  ;;  %v5697_v28 = vrot.slane %v5696_v6, 4  ;;  %v5945_v22 = vrot.slane %v5410_v11, 5  ;;  %v5935_v39 = vrot.slane %v16616_v26, 5 }
 0x3b2   : > { %v7149_v55 = vsel %vm12335_vm13, %v7147_v0, %v7148_v47  ;;  %v11064_v21 = vrot.slane %v5810_v36, 9  ;;  %v11063_v17 = vrot.slane %v5809_v23, 9  ;;  %v5692_v46 = vsel %vm12353_vm2, %v5687_v52, %v5691_v43 }
 0x3b3   : > { %v11238_v14 = vcombine.low %v7146_v51, %v7149_v55  ;;  %v5944_v27 = vrot.slane %v5942_v50, 4  ;;  %v5702_v25 = vsel %vm12353_vm2, %v5697_v28, %v5701_v29  ;;  %v5937_v13 = vrot.slane %v5935_v39, 4  ;;  %v16714_v57 = vpop.permute.xlu1 %7570 }
 0x3b4   : > { %v5938_v9 = vrot.slane %v16625_v41, 5  ;;  %v11128_v1 = vcombine.low %v5692_v46, %v5702_v25  ;;  %v8077_v26 = vsel %vm4747_vm10, %v8045_v32, %v16525_v7  ;;  %v5943_v11 = vsel %vm12335_vm13, %v11064_v21, %v5942_v50  ;;  %v11797_v25 = vld [vmem:[#allocation4 + $0x30] sm:$0xf] }
 0x3b5   : > { %7914 = vrot.lane.b32.xlu0 %v11238_v14, %s19000_s30  ;;  %v5936_v16 = vsel %vm12335_vm13, %v11063_v17, %v5935_v39  ;;  %v16706_v40 = vpop.permute.xlu0 %7568  ;;  %v5946_v41 = vsel %vm12335_vm13, %v5944_v27, %v5945_v22  ;;  %v6288_v62 = vshrl.u32 %v16688_v12, 16  ;;  %v6291_v7 = vshll.u32 %v16688_v12, 16  ;;  %v6418_v27 = vld [vmem:[#allocation4 + $0x90] sm:$0xe] }
 0x3b6   : > { %v5939_v63 = vsel %vm12335_vm13, %v5937_v13, %v5938_v9  ;;  %7326 = vrot.lane.b32.xlu1 %v11128_v1, %s11880_s21  ;;  %v8111_v4 = vsel %vm4780_vm11, %v8079_v61, %v16553_v42  ;;  %v6301_v3 = vshrl.u32 %v16695_v60, 16  ;;  %v6264_v49 = vshrl.u32 %v5995_v30, 16 }
 0x3b7   : > { %v11143_v37 = vcombine.low %v5936_v16, %v5939_v63  ;;  %v6290_v43 = vrot.slane %v6288_v62, 4  ;;  %v6293_v34 = vrot.slane %v6291_v7, 5  ;;  %v6267_v58 = vshll.u32 %v5995_v30, 16  ;;  %v16740_v55 = vpop.permute.xlu1 %7650 }
 0x3b8   : > { %v6277_v33 = vshrl.u32 %v16704_v24, 16  ;;  %v11144_v45 = vcombine.low %v5943_v11, %v5946_v41  ;;  %v8109_v20 = vsel %vm4780_vm11, %v8077_v26, %v16550_v31  ;;  %v6266_v35 = vrot.slane %v6264_v49, 4  ;;  %v6417_v26 = vld [vmem:[#allocation4 + $0x84] sm:$0xe] }
 0x3b9   : > { %7404 = vrot.lane.b32.xlu0 %v11143_v37, %s18995_s0  ;;  %v11159_v42 = vcombine.low %v5995_v30, %v16704_v24  ;;  %v6269_v47 = vrot.slane %v6267_v58, 5  ;;  %v6294_v32 = vor.u32 %v6293_v34, %v6290_v43  ;;  %v6297_v6 = vshll.u32 %v16695_v60, 16  ;;  %v16730_v0 = vpop.permute.xlu0 %7648  ;;  %v6606_v43 = vld [vmem:[#allocation4 + $0x9c] sm:$0xf]  ;;  %v16765_v34 = vld [vmem:[#allocation4 + $0xa0] sm:$0xf] }
 0x3ba   : > { %v6303_v29 = vrot.slane %v6301_v3, 4  ;;  %7406 = vrot.lane.b32.xlu1 %v11144_v45, %s18995_s0  ;;  %v6307_v36 = vshll.u32 %v16720_v56, 16  ;;  %v6273_v23 = vshll.u32 %v16704_v24, 16  ;;  %v6279_v52 = vrot.slane %v6277_v33, 4  ;;  %v6604_v45 = vld [vmem:[#allocation4 + $0x90] sm:$0xf] }
 0x3bb   : > { %v6283_v51 = vshll.u32 %v16723_v54, 16  ;;  %v11160_v31 = vcombine.low %v16688_v12, %v16695_v60  ;;  %v8141_v61 = vsel %vm4813_vm12, %v8109_v20, %v16582_v2  ;;  %v6299_v50 = vrot.slane %v6297_v6, 5  ;;  %v11798_v2 = vld [vmem:[#allocation4 + $0x34] sm:$0xf]  ;;  %v11799_v6 = vld [vmem:[#allocation4 + $0x3c] sm:$0xf] }
 0x3bc   : > { %v6270_v28 = vor.u32 %v6269_v47, %v6266_v35  ;;  %v8143_v22 = vsel %vm4813_vm12, %v8111_v4, %v16590_v8  ;;  %v6295_v39 = vrot.slane %v6294_v32, 4  ;;  %v6275_v14 = vrot.slane %v6273_v23, 5  ;;  %v16775_v20 = vld [vmem:[#allocation4 + $0x94] sm:$0xf] }
 0x3bd   : > { %7500 = vrot.lane.b32.xlu0 %v11159_v42, %s18996_s16  ;;  %v8173_v21 = vsel %vm4846_vm14, %v8141_v61, %v16607_v59  ;;  %v6304_v17 = vor.u32 %v6303_v29, %v6299_v50  ;;  %v6309_v12 = vrot.slane %v6307_v36, 5  ;;  %v6285_v46 = vrot.slane %v6283_v51, 5  ;;  %v16757_v63 = vpop.permute.xlu0 %7744  ;;  %v11800_v29 = vld [vmem:[#allocation4 + $0x40] sm:$0xf] }
 0x3be   : > { %v11105_v13 = vcombine.low %v11797_v25, %v11798_v2  ;;  %11511 = vmatprep.mubr.msk.bf16.mxu0 %vm4899_vm15, %v8173_v21  ;;  %7502 = vrot.lane.b32.xlu1 %v11160_v31, %s18996_s16  ;;  %v6300_v9 = vsel %vm12353_vm2, %v6295_v39, %v6299_v50  ;;  %v6271_v8 = vrot.slane %v6270_v28, 4  ;;  %v6280_v30 = vor.u32 %v6279_v52, %v6275_v14  ;;  %v16788_v28 = vld [vmem:[#allocation4 + $0xa4] sm:$0x1] }
 0x3bf   : > { %v6550_v1 = vrot.slane %v16695_v60, 5  ;;  %v6305_v59 = vrot.slane %v6304_v17, 4  ;;  %v11080_v16 = vrot.slane %v6418_v27, 9  ;;  %v6543_v41 = vrot.slane %v16704_v24, 5  ;;  %v16767_v24 = vpop.permute.xlu1 %7746  ;;  %v16794_v17 = vld [vmem:[#allocation4 + $0x98] sm:$0x1] }
 0x3c0   : > { %v16754_v11 = vsel %vm554_vm4, %v11105_v13, %v16618_v19  ;;  %v6281_v62 = vrot.slane %v6280_v30, 4  ;;  %v6553_v37 = vrot.slane %v16720_v56, 5  ;;  %v6546_v4 = vrot.slane %v16723_v54, 5 }
 0x3c1   : > { %v6552_v7 = vrot.slane %v6550_v1, 4  ;;  %v6310_v60 = vsel %vm12353_vm2, %v6305_v59, %v6309_v12  ;;  %v6276_v3 = vsel %vm12353_vm2, %v6271_v8, %v6275_v14  ;;  %v11079_v49 = vrot.slane %v6417_v26, 9 }
 0x3c2   : > { %v6545_v19 = vrot.slane %v6543_v41, 4  ;;  %v11176_v58 = vcombine.low %v6300_v9, %v6310_v60  ;;  %v6286_v33 = vsel %vm12353_vm2, %v6281_v62, %v6285_v46  ;;  %v8175_v54 = vsel %vm4846_vm14, %v8143_v22, %v16633_v53  ;;  %v16815_v60 = vld [vmem:[#allocation4 + $0x94] sm:$0xf] }
 0x3c3   : > { %v6554_v56 = vsel %vm12335_vm13, %v6552_v7, %v6553_v37  ;;  %v11175_v35 = vcombine.low %v6276_v3, %v6286_v33  ;;  %v6551_v42 = vsel %vm12335_vm13, %v11080_v16, %v6550_v1  ;;  %v6544_v47 = vsel %vm12335_vm13, %v11079_v49, %v6543_v41  ;;  %11512 = vmatmul.mubr.msk.bf16.gmra.mxu0 %vm4899_vm15, %v8175_v54  ;;  %v16805_v41 = vld [vmem:[#allocation4 + $0x90] sm:$0xf] }
 0x3c4   : > { %v6547_v32 = vsel %vm12335_vm13, %v6545_v19, %v6546_v4  ;;  %7582 = vrot.lane.b32.xlu1 %v11176_v58, %s18994_s20  ;;  %v11106_v53 = vcombine.low %v11799_v6, %v11800_v29  ;;  %v6897_v36 = vshrl.u32 %v6606_v43, 16  ;;  %v6900_v23 = vshll.u32 %v6606_v43, 16  ;;  %v16798_v13 = vpop.permute.xlu1 %7826  ;;  %v16819_v58 = vld [vmem:[#allocation4 + $0x98] sm:$0x1] }
 0x3c5   : > { %v6910_v52 = vshrl.u32 %v16765_v34, 16  ;;  %7580 = vrot.lane.b32.xlu0 %v11175_v35, %s18994_s20  ;;  %v11192_v51 = vcombine.low %v6551_v42, %v6554_v56  ;;  %v6873_v31 = vshrl.u32 %v6604_v45, 16  ;;  %v6876_v61 = vshll.u32 %v6604_v45, 16  ;;  %v16790_v22 = vpop.permute.xlu0 %7824 }
 0x3c6   : > { %v6886_v50 = vshrl.u32 %v16775_v20, 16  ;;  %v11191_v39 = vcombine.low %v6544_v47, %v6547_v32  ;;  %v7945_v14 = vsel %vm554_vm4, %v11106_v53, %v16641_v15  ;;  %v6899_v21 = vrot.slane %v6897_v36, 4  ;;  %v7026_v53 = vld [vmem:[#allocation4 + $0x90] sm:$0xe] }
 0x3c7   : > { %v6902_v27 = vrot.slane %v6900_v23, 5  ;;  %v11208_v12 = vcombine.low %v6606_v43, %v16765_v34  ;;  %v6875_v46 = vrot.slane %v6873_v31, 4  ;;  %v6878_v25 = vrot.slane %v6876_v61, 5  ;;  %v16836_v31 = vld [vmem:[#allocation4 + $0x9c] sm:$0xf] }
 0x3c8   : > { %v6906_v2 = vshll.u32 %v16765_v34, 16  ;;  %7662 = vrot.lane.b32.xlu1 %v11192_v51, %s18988_s22  ;;  %v6912_v8 = vrot.slane %v6910_v52, 4  ;;  %v6916_v30 = vshll.u32 %v16788_v28, 16  ;;  %v6882_v15 = vshll.u32 %v16775_v20, 16 }
 0x3c9   : > { %v6903_v9 = vor.u32 %v6902_v27, %v6899_v21  ;;  %7660 = vrot.lane.b32.xlu0 %v11191_v39, %s18988_s22  ;;  %v6879_v26 = vor.u32 %v6878_v25, %v6875_v46  ;;  %v6888_v59 = vrot.slane %v6886_v50, 4  ;;  %v6892_v16 = vshll.u32 %v16794_v17, 16  ;;  %v16843_v25 = vld [vmem:[#allocation4 + $0xa0] sm:$0xf] }
 0x3ca   : > { %v6908_v1 = vrot.slane %v6906_v2, 5  ;;  %v11207_v62 = vcombine.low %v6604_v45, %v16775_v20  ;;  %v7987_v7 = vsel %vm878_vm3, %v7945_v14, %v16659_v38  ;;  %v16813_v37 = vsel %vm878_vm3, %v16754_v11, %v16650_v48  ;;  %v16821_v33 = vpop.permute.xlu0 %7904 }
 0x3cb   : > { %v6884_v4 = vrot.slane %v6882_v15, 5  ;;  %v6904_v3 = vrot.slane %v6903_v9, 4  ;;  %v6918_v19 = vrot.slane %v6916_v30, 5  ;;  %v8019_v43 = vsel %vm4681_vm8, %v7987_v7, %v16678_v5  ;;  %v16829_v42 = vpop.permute.xlu1 %7316  ;;  %v16849_v15 = vld [vmem:[#allocation4 + $0xa4] sm:$0x1] }
 0x3cc   : > { %v6913_v49 = vor.u32 %v6912_v8, %v6908_v1  ;;  %7758 = vrot.lane.b32.xlu1 %v11208_v12, %s18989_s15  ;;  %v6880_v38 = vrot.slane %v6879_v26, 4  ;;  %v5704_v48 = vshrl.u32 %v16805_v41, 16  ;;  %v5707_v11 = vshll.u32 %v16805_v41, 16 }
 0x3cd   : > { %v6889_v56 = vor.u32 %v6888_v59, %v6884_v4  ;;  %7756 = vrot.lane.b32.xlu0 %v11207_v62, %s18989_s15  ;;  %v6894_v45 = vrot.slane %v6892_v16, 5  ;;  %v5713_v35 = vshll.u32 %v16815_v60, 16  ;;  %v5717_v5 = vshrl.u32 %v16815_v60, 16 }
 0x3ce   : > { %v6914_v54 = vrot.slane %v6913_v49, 4  ;;  %v5706_v32 = vrot.slane %v5704_v48, 4  ;;  %v5709_v6 = vrot.slane %v5707_v11, 5  ;;  %v5723_v29 = vshll.u32 %v16819_v58, 16 }
 0x3cf   : > { %v6890_v47 = vrot.slane %v6889_v56, 4  ;;  %v6909_v36 = vsel %vm12353_vm2, %v6904_v3, %v6908_v1  ;;  %v5715_v52 = vrot.slane %v5713_v35, 5  ;;  %v5719_v51 = vrot.slane %v5717_v5, 4  ;;  %v7027_v35 = vld [vmem:[#allocation4 + $0x9c] sm:$0xe] }
 0x3d0   : > { %v6919_v23 = vsel %vm12353_vm2, %v6914_v54, %v6918_v19  ;;  %v6885_v50 = vsel %vm12353_vm2, %v6880_v38, %v6884_v4  ;;  %v5710_v14 = vor.u32 %v5709_v6, %v5706_v32  ;;  %v11095_v12 = vrot.slane %v7026_v53, 9  ;;  %v16845_v2 = vpop.permute.xlu0 %7906 }
 0x3d1   : > { %v11224_v61 = vcombine.low %v6909_v36, %v6919_v23  ;;  %v6895_v39 = vsel %vm12353_vm2, %v6890_v47, %v6894_v45  ;;  %v5720_v27 = vor.u32 %v5719_v51, %v5715_v52  ;;  %v7152_v46 = vrot.slane %v16775_v20, 5 }
 0x3d2   : > { %v11223_v21 = vcombine.low %v6885_v50, %v6895_v39  ;;  %v5711_v9 = vrot.slane %v5710_v14, 4  ;;  %v5725_v8 = vrot.slane %v5723_v29, 5  ;;  %v7155_v30 = vrot.slane %v16794_v17, 5 }
 0x3d3   : > { %7838 = vrot.lane.b32.xlu1 %v11224_v61, %s18990_s23  ;;  %v5728_v1 = vshrl.u32 %v16836_v31, 16  ;;  %v5721_v26 = vrot.slane %v5720_v27, 4  ;;  %v7153_v20 = vsel %vm12335_vm13, %v11095_v12, %v7152_v46  ;;  %v7154_v59 = vrot.slane %v7152_v46, 4  ;;  %v16856_v62 = vpop.permute.xlu1 %7318 }
 0x3d4   : > { %7836 = vrot.lane.b32.xlu0 %v11223_v21, %s18990_s23  ;;  %v5731_v16 = vshll.u32 %v16836_v31, 16  ;;  %v5716_v7 = vsel %vm12353_vm2, %v5711_v9, %v5715_v52  ;;  %v5737_v17 = vshll.u32 %v16843_v25, 16  ;;  %v5741_v3 = vshrl.u32 %v16843_v25, 16 }
 0x3d5   : > { %v5730_v4 = vrot.slane %v5728_v1, 4  ;;  %v5726_v49 = vsel %vm12353_vm2, %v5721_v26, %v5725_v8  ;;  %v7156_v19 = vsel %vm12335_vm13, %v7154_v59, %v7155_v30  ;;  %v5747_v56 = vshll.u32 %v16849_v15, 16 }
 0x3d6   : > { %v5733_v38 = vrot.slane %v5731_v16, 5  ;;  %v11129_v48 = vcombine.low %v5716_v7, %v5726_v49  ;;  %v11239_v11 = vcombine.low %v7153_v20, %v7156_v19  ;;  %v5739_v54 = vrot.slane %v5737_v17, 5  ;;  %v16875_v53 = vpop.permute.xlu0 %7396  ;;  %v5999_v16 = vld [vmem:[#allocation4 + $0x9c] sm:$0xf]  ;;  %v16913_v19 = vld [vmem:[#allocation4 + $0xa0] sm:$0xf] }
 0x3d7   : > { %v5743_v45 = vrot.slane %v5741_v3, 4  ;;  %v8017_v5 = vsel %vm4681_vm8, %v16813_v37, %v16674_v10  ;;  %v8051_v47 = vsel %vm4714_vm9, %v8019_v43, %v16714_v57  ;;  %v7159_v6 = vrot.slane %v16765_v34, 5  ;;  %v16873_v29 = vpop.permute.xlu1 %7398  ;;  %v5812_v37 = vld [vmem:[#allocation4 + $0x9c] sm:$0xe] }
 0x3d8   : > { %v5734_v32 = vor.u32 %v5733_v38, %v5730_v4  ;;  %7328 = vrot.lane.b32.xlu1 %v11129_v48, %s11880_s21  ;;  %7916 = vrot.lane.b32.xlu0 %v11239_v11, %s19000_s30  ;;  %v8049_v36 = vsel %vm4714_vm9, %v8017_v5, %v16706_v40  ;;  %v5749_v52 = vrot.slane %v5747_v56, 5  ;;  %v7162_v10 = vrot.slane %v16788_v28, 5  ;;  %v5811_v40 = vld [vmem:[#allocation4 + $0x90] sm:$0xe]  ;;  %v16923_v5 = vld [vmem:[#allocation4 + $0xb0] sm:$0x1] }
 0x3d9   : > { %v5744_v23 = vor.u32 %v5743_v45, %v5739_v54  ;;  %v11096_v57 = vrot.slane %v7027_v35, 9  ;;  %v7161_v43 = vrot.slane %v7159_v6, 4  ;;  %v8083_v34 = vsel %vm4747_vm10, %v8051_v47, %v16740_v55  ;;  %v16893_v55 = vld [vmem:[#allocation4 + $0xa8] sm:$0xf] }
 0x3da   : > { %v8081_v51 = vsel %vm4747_vm10, %v8049_v36, %v16730_v0  ;;  %v5735_v61 = vrot.slane %v5734_v32, 4  ;;  %v5956_v39 = vrot.slane %v16843_v25, 5  ;;  %v5959_v14 = vrot.slane %v16849_v15, 5  ;;  %v16901_v15 = vld [vmem:[#allocation4 + $0xac] sm:$0xf]  ;;  %v16904_v7 = vpop.permute.xlu0 %7492 }
 0x3db   : > { %v5745_v50 = vrot.slane %v5744_v23, 4  ;;  %v7160_v21 = vsel %vm12335_vm13, %v11096_v57, %v7159_v6  ;;  %v7163_v28 = vsel %vm12335_vm13, %v7161_v43, %v7162_v10  ;;  %v11066_v27 = vrot.slane %v5812_v37, 9  ;;  %v16895_v46 = vpop.permute.xlu1 %7494 }
 0x3dc   : > { %v5949_v12 = vrot.slane %v16815_v60, 5  ;;  %v5740_v0 = vsel %vm12353_vm2, %v5735_v61, %v5739_v54  ;;  %v11240_v8 = vcombine.low %v7160_v21, %v7163_v28  ;;  %v5958_v30 = vrot.slane %v5956_v39, 4 }
 0x3dd   : > { %v5750_v9 = vsel %vm12353_vm2, %v5745_v50, %v5749_v52  ;;  %v11065_v26 = vrot.slane %v5811_v40, 9  ;;  %v5952_v59 = vrot.slane %v16819_v58, 5  ;;  %v5957_v4 = vsel %vm12335_vm13, %v11066_v27, %v5956_v39  ;;  %v16930_v52 = vld [vmem:[#allocation4 + $0xa4] sm:$0x1] }
 0x3de   : > { %v11130_v1 = vcombine.low %v5740_v0, %v5750_v9  ;;  %v5951_v20 = vrot.slane %v5949_v12, 4  ;;  %7918 = vrot.lane.b32.xlu0 %v11240_v8, %s19000_s30  ;;  %v5960_v17 = vsel %vm12335_vm13, %v5958_v30, %v5959_v14  ;;  %v6336_v3 = vshrl.u32 %v16893_v55, 16  ;;  %v11801_v9 = vld [vmem:[#allocation4 + $0x48] sm:$0xf]  ;;  %v11802_v8 = vld [vmem:[#allocation4 + $0x4c] sm:$0xf] }
 0x3df   : > { %v6339_v49 = vshll.u32 %v16893_v55, 16  ;;  %v5950_v58 = vsel %vm12335_vm13, %v11065_v26, %v5949_v12  ;;  %v8115_v56 = vsel %vm4780_vm11, %v8083_v34, %v16767_v24  ;;  %v6349_v48 = vshrl.u32 %v16901_v15, 16  ;;  %v6420_v26 = vld [vmem:[#allocation4 + $0xa8] sm:$0xe] }
 0x3e0   : > { %7330 = vrot.lane.b32.xlu1 %v11130_v1, %s11880_s21  ;;  %v5953_v38 = vsel %vm12335_vm13, %v5951_v20, %v5952_v59  ;;  %v6338_v54 = vrot.slane %v6336_v3, 4  ;;  %v6312_v35 = vshrl.u32 %v5999_v16, 16  ;;  %v11146_v32 = vcombine.low %v5957_v4, %v5960_v17  ;;  %v6419_v17 = vld [vmem:[#allocation4 + $0x9c] sm:$0xe] }
 0x3e1   : > { %v11145_v11 = vcombine.low %v5950_v58, %v5953_v38  ;;  %v6341_v45 = vrot.slane %v6339_v49, 5  ;;  %v16925_v47 = vpop.permute.xlu1 %7574  ;;  %v8113_v6 = vsel %vm4780_vm11, %v8081_v51, %v16757_v63  ;;  %v6315_v36 = vshll.u32 %v5999_v16, 16 }
 0x3e2   : > { %v6325_v23 = vshrl.u32 %v16913_v19, 16  ;;  %v11162_v24 = vcombine.low %v16893_v55, %v16901_v15  ;;  %v6314_v10 = vrot.slane %v6312_v35, 4  ;;  %v6345_v57 = vshll.u32 %v16901_v15, 16 }
 0x3e3   : > { %7408 = vrot.lane.b32.xlu0 %v11145_v11, %s18995_s0  ;;  %v6342_v37 = vor.u32 %v6341_v45, %v6338_v54  ;;  %v6317_v43 = vrot.slane %v6315_v36, 5  ;;  %v6351_v34 = vrot.slane %v6349_v48, 4  ;;  %v6355_v63 = vshll.u32 %v16923_v5, 16  ;;  %v16939_v61 = vpop.permute.xlu0 %7572 }
 0x3e4   : > { %7410 = vrot.lane.b32.xlu1 %v11146_v32, %s18995_s0  ;;  %v6321_v51 = vshll.u32 %v16913_v19, 16  ;;  %v11161_v50 = vcombine.low %v5999_v16, %v16913_v19  ;;  %v6347_v39 = vrot.slane %v6345_v57, 5  ;;  %v6327_v14 = vrot.slane %v6325_v23, 4  ;;  %v16980_v57 = vld [vmem:[#allocation4 + $0xac] sm:$0xf] }
 0x3e5   : > { %v6331_v40 = vshll.u32 %v16930_v52, 16  ;;  %v8145_v21 = vsel %vm4813_vm12, %v8113_v6, %v16790_v22  ;;  %v6343_v28 = vrot.slane %v6342_v37, 4  ;;  %v6318_v27 = vor.u32 %v6317_v43, %v6314_v10  ;;  %v16950_v20 = vpop.permute.xlu1 %7654  ;;  %v6610_v6 = vld [vmem:[#allocation4 + $0xb4] sm:$0xf] }
 0x3e6   : > { %v6323_v12 = vrot.slane %v6321_v51, 5  ;;  %v8147_v55 = vsel %vm4813_vm12, %v8115_v56, %v16798_v13  ;;  %v6352_v0 = vor.u32 %v6351_v34, %v6347_v39  ;;  %v11107_v30 = vcombine.low %v11801_v9, %v11802_v8  ;;  %v11803_v51 = vld [vmem:[#allocation4 + $0x54] sm:$0xf] }
 0x3e7   : > { %7504 = vrot.lane.b32.xlu0 %v11161_v50, %s18996_s16  ;;  %v8177_v1 = vsel %vm4846_vm14, %v8145_v21, %v16821_v33  ;;  %v6348_v22 = vsel %vm12353_vm2, %v6343_v28, %v6347_v39  ;;  %v6357_v59 = vrot.slane %v6355_v63, 5  ;;  %v6333_v4 = vrot.slane %v6331_v40, 5  ;;  %v16956_v13 = vpop.permute.xlu0 %7652  ;;  %v11804_v50 = vld [vmem:[#allocation4 + $0x58] sm:$0xf] }
 0x3e8   : > { %7506 = vrot.lane.b32.xlu1 %v11162_v24, %s18996_s16  ;;  %v6328_v16 = vor.u32 %v6327_v14, %v6323_v12  ;;  %11515 = vmatprep.mubr.msk.bf16.mxu0 %vm4899_vm15, %v8177_v1  ;;  %v6353_v3 = vrot.slane %v6352_v0, 4  ;;  %v6319_v49 = vrot.slane %v6318_v27, 4  ;;  %v16960_v33 = vsel %vm554_vm4, %v11107_v30, %v16829_v42  ;;  %v16972_v24 = vld [vmem:[#allocation4 + $0xb8] sm:$0xf]  ;;  %v16997_v30 = vld [vmem:[#allocation4 + $0xb0] sm:$0x1] }
 0x3e9   : > { %v6564_v58 = vrot.slane %v16901_v15, 5  ;;  %v11082_v56 = vrot.slane %v6420_v26, 9  ;;  %v6557_v48 = vrot.slane %v16913_v19, 5  ;;  %v6560_v11 = vrot.slane %v16930_v52, 5  ;;  %v6608_v19 = vld [vmem:[#allocation4 + $0xa8] sm:$0xf]  ;;  %v16982_v43 = vpop.permute.xlu1 %7750 }
 0x3ea   : > { %v6329_v38 = vrot.slane %v6328_v16, 4  ;;  %v6358_v54 = vsel %vm12353_vm2, %v6353_v3, %v6357_v59  ;;  %v6567_v35 = vrot.slane %v16923_v5, 5  ;;  %v11081_v32 = vrot.slane %v6419_v17, 9 }
 0x3eb   : > { %v6566_v45 = vrot.slane %v6564_v58, 4  ;;  %v11178_v36 = vcombine.low %v6348_v22, %v6358_v54  ;;  %v6324_v42 = vsel %vm12353_vm2, %v6319_v49, %v6323_v12  ;;  %v6559_v23 = vrot.slane %v6557_v48, 4  ;;  %v16984_v34 = vpop.permute.xlu0 %7748  ;;  %v16994_v12 = vld [vmem:[#allocation4 + $0xbc] sm:$0x1] }
 0x3ec   : > { %v6334_v15 = vsel %vm12353_vm2, %v6329_v38, %v6333_v4  ;;  %v6565_v10 = vsel %vm12335_vm13, %v11082_v56, %v6564_v58  ;;  %v8179_v37 = vsel %vm4846_vm14, %v8147_v55, %v16845_v2  ;;  %v11108_v39 = vcombine.low %v11803_v51, %v11804_v50  ;;  %v7028_v51 = vld [vmem:[#allocation4 + $0xa8] sm:$0xe] }
 0x3ed   : > { %v11177_v52 = vcombine.low %v6324_v42, %v6334_v15  ;;  %v6568_v5 = vsel %vm12335_vm13, %v6566_v45, %v6567_v35  ;;  %7586 = vrot.lane.b32.xlu1 %v11178_v36, %s18994_s20  ;;  %v6561_v63 = vsel %vm12335_vm13, %v6559_v23, %v6560_v11  ;;  %v6945_v14 = vshrl.u32 %v6610_v6, 16  ;;  %11516 = vmatmul.mubr.msk.bf16.gmra.mxu0 %vm4899_vm15, %v8179_v37 }
 0x3ee   : > { %v6948_v40 = vshll.u32 %v6610_v6, 16  ;;  %v11194_v2 = vcombine.low %v6565_v10, %v6568_v5  ;;  %v6558_v21 = vsel %vm12335_vm13, %v11081_v32, %v6557_v48  ;;  %v6958_v28 = vshrl.u32 %v16972_v24, 16 }
 0x3ef   : > { %7584 = vrot.lane.b32.xlu0 %v11177_v52, %s18994_s20  ;;  %v6921_v27 = vshrl.u32 %v6608_v19, 16  ;;  %v6947_v55 = vrot.slane %v6945_v14, 4  ;;  %v6924_v9 = vshll.u32 %v6608_v19, 16  ;;  %v6934_v8 = vshrl.u32 %v16980_v57, 16  ;;  %v17022_v52 = vld [vmem:[#allocation4 + $0xb0] sm:$0x1] }
 0x3f0   : > { %v6950_v0 = vrot.slane %v6948_v40, 5  ;;  %v11193_v1 = vcombine.low %v6558_v21, %v6561_v63  ;;  %v7951_v26 = vsel %vm554_vm4, %v11108_v39, %v16856_v62  ;;  %v11210_v22 = vcombine.low %v6610_v6, %v16972_v24  ;;  %v17008_v62 = vld [vmem:[#allocation4 + $0xa8] sm:$0xf]  ;;  %v17015_v6 = vld [vmem:[#allocation4 + $0xac] sm:$0xf] }
 0x3f1   : > { %v6923_v59 = vrot.slane %v6921_v27, 4  ;;  %7666 = vrot.lane.b32.xlu1 %v11194_v2, %s18988_s22  ;;  %v6926_v16 = vrot.slane %v6924_v9, 5  ;;  %v6954_v17 = vshll.u32 %v16972_v24, 16  ;;  %v6960_v3 = vrot.slane %v6958_v28, 4  ;;  %v17010_v48 = vpop.permute.xlu1 %7830 }
 0x3f2   : > { %v6951_v4 = vor.u32 %v6950_v0, %v6947_v55  ;;  %v6964_v49 = vshll.u32 %v16994_v12, 16  ;;  %v6930_v58 = vshll.u32 %v16980_v57, 16  ;;  %v6936_v38 = vrot.slane %v6934_v8, 4 }
 0x3f3   : > { %7664 = vrot.lane.b32.xlu0 %v11193_v1, %s18988_s22  ;;  %v6940_v56 = vshll.u32 %v16997_v30, 16  ;;  %v17012_v11 = vpop.permute.xlu0 %7828  ;;  %v11209_v54 = vcombine.low %v6608_v19, %v16980_v57  ;;  %v6956_v35 = vrot.slane %v6954_v17, 5  ;;  %v6927_v32 = vor.u32 %v6926_v16, %v6923_v59  ;;  %v17044_v17 = vld [vmem:[#allocation4 + $0xb4] sm:$0xf] }
 0x3f4   : > { %v6952_v45 = vrot.slane %v6951_v4, 4  ;;  %v7991_v36 = vsel %vm878_vm3, %v7951_v26, %v16873_v29  ;;  %v7989_v42 = vsel %vm878_vm3, %v16960_v33, %v16875_v53  ;;  %v6966_v15 = vrot.slane %v6964_v49, 5 }
 0x3f5   : > { %v6932_v23 = vrot.slane %v6930_v58, 5  ;;  %7762 = vrot.lane.b32.xlu1 %v11210_v22, %s18989_s15  ;;  %v6961_v10 = vor.u32 %v6960_v3, %v6956_v35  ;;  %v6942_v5 = vrot.slane %v6940_v56, 5  ;;  %v5752_v37 = vshrl.u32 %v17008_v62, 16  ;;  %v17046_v3 = vld [vmem:[#allocation4 + $0xb8] sm:$0xf] }
 0x3f6   : > { %v6957_v19 = vsel %vm12353_vm2, %v6952_v45, %v6956_v35  ;;  %v5755_v63 = vshll.u32 %v17008_v62, 16  ;;  %v5761_v53 = vshll.u32 %v17015_v6, 16  ;;  %v5765_v33 = vshrl.u32 %v17015_v6, 16 }
 0x3f7   : > { %7760 = vrot.lane.b32.xlu0 %v11209_v54, %s18989_s15  ;;  %v6937_v29 = vor.u32 %v6936_v38, %v6932_v23  ;;  %v6962_v50 = vrot.slane %v6961_v10, 4  ;;  %v6928_v39 = vrot.slane %v6927_v32, 4  ;;  %v5754_v14 = vrot.slane %v5752_v37, 4  ;;  %v17033_v2 = vpop.permute.xlu0 %7908  ;;  %v17035_v0 = vpop.permute.xlu1 %7320 }
 0x3f8   : > { %v5771_v40 = vshll.u32 %v17022_v52, 16  ;;  %v5757_v28 = vrot.slane %v5755_v63, 5  ;;  %v5763_v27 = vrot.slane %v5761_v53, 5  ;;  %v5767_v55 = vrot.slane %v5765_v33, 4 }
 0x3f9   : > { %v6938_v21 = vrot.slane %v6937_v29, 4  ;;  %v6967_v9 = vsel %vm12353_vm2, %v6962_v50, %v6966_v15  ;;  %v6933_v8 = vsel %vm12353_vm2, %v6928_v39, %v6932_v23  ;;  %v11097_v1 = vrot.slane %v7028_v51, 9  ;;  %v5414_v15 = vld [vmem:[#allocation4 + $0xbc] sm:$0x1]  ;;  %v7029_v29 = vld [vmem:[#allocation4 + $0xb4] sm:$0xe] }
 0x3fa   : > { %v7166_v26 = vrot.slane %v16980_v57, 5  ;;  %v11226_v22 = vcombine.low %v6957_v19, %v6967_v9  ;;  %v5758_v16 = vor.u32 %v5757_v28, %v5754_v14  ;;  %v5768_v4 = vor.u32 %v5767_v55, %v5763_v27 }
 0x3fb   : > { %v6943_v59 = vsel %vm12353_vm2, %v6938_v21, %v6942_v5  ;;  %v8023_v58 = vsel %vm4681_vm8, %v7991_v36, %v16895_v46  ;;  %v7169_v56 = vrot.slane %v16997_v30, 5  ;;  %v5773_v45 = vrot.slane %v5771_v40, 5 }
 0x3fc   : > { %v11225_v49 = vcombine.low %v6933_v8, %v6943_v59  ;;  %v7168_v38 = vrot.slane %v7166_v26, 4  ;;  %7842 = vrot.lane.b32.xlu1 %v11226_v22, %s18990_s23  ;;  %v5759_v57 = vrot.slane %v5758_v16, 4  ;;  %v5769_v54 = vrot.slane %v5768_v4, 4 }
 0x3fd   : > { %v7167_v35 = vsel %vm12335_vm13, %v11097_v1, %v7166_v26  ;;  %v5776_v23 = vshrl.u32 %v17044_v17, 16  ;;  %v5779_v46 = vshll.u32 %v17044_v17, 16  ;;  %v5785_v30 = vshll.u32 %v17046_v3, 16  ;;  %v17060_v36 = vpop.permute.xlu0 %7910 }
 0x3fe   : > { %7840 = vrot.lane.b32.xlu0 %v11225_v49, %s18990_s23  ;;  %v7170_v32 = vsel %vm12335_vm13, %v7168_v38, %v7169_v56  ;;  %v5764_v19 = vsel %vm12353_vm2, %v5759_v57, %v5763_v27  ;;  %v5774_v10 = vsel %vm12353_vm2, %v5769_v54, %v5773_v45  ;;  %v5789_v37 = vshrl.u32 %v17046_v3, 16 }
 0x3ff   : > { %v11241_v5 = vcombine.low %v7167_v35, %v7170_v32  ;;  %v17067_v63 = vpop.permute.xlu1 %7322  ;;  %v11131_v53 = vcombine.low %v5764_v19, %v5774_v10  ;;  %v5778_v33 = vrot.slane %v5776_v23, 4  ;;  %v5781_v51 = vrot.slane %v5779_v46, 5 }
 0x400   : > { %v5787_v50 = vrot.slane %v5785_v30, 5  ;;  %v8021_v39 = vsel %vm4681_vm8, %v7989_v42, %v16904_v7  ;;  %v5791_v14 = vrot.slane %v5789_v37, 4  ;;  %v5795_v40 = vshll.u32 %v5414_v15, 16 }
 0x401   : > { %v7173_v21 = vrot.slane %v16972_v24, 5  ;;  %7332 = vrot.lane.b32.xlu1 %v11131_v53, %s11880_s21  ;;  %v8055_v28 = vsel %vm4714_vm9, %v8023_v58, %v16925_v47  ;;  %v5782_v27 = vor.u32 %v5781_v51, %v5778_v33  ;;  %v11098_v55 = vrot.slane %v7029_v29, 9  ;;  %v17077_v8 = vpop.permute.xlu0 %7400  ;;  %v5813_v24 = vld [vmem:[#allocation4 + $0xa8] sm:$0xe] }
 0x402   : > { %7920 = vrot.lane.b32.xlu0 %v11241_v5, %s19000_s30  ;;  %v7176_v9 = vrot.slane %v16994_v12, 5  ;;  %v8053_v7 = vsel %vm4714_vm9, %v8021_v39, %v16939_v61  ;;  %v5792_v42 = vor.u32 %v5791_v14, %v5787_v50  ;;  %v5797_v1 = vrot.slane %v5795_v40, 5  ;;  %v5814_v61 = vld [vmem:[#allocation4 + $0xb4] sm:$0xe]  ;;  %v17110_v5 = vld [vmem:[%s18594_s5] ss:$0 sm:$0xff] }
 0x403   : > { %v7175_v26 = vrot.slane %v7173_v21, 4  ;;  %v17081_v22 = vpop.permute.xlu1 %7402  ;;  %v5783_v59 = vrot.slane %v5782_v27, 4  ;;  %v7174_v16 = vsel %vm12335_vm13, %v11098_v55, %v7173_v21  ;;  %v8087_v47 = vsel %vm4747_vm10, %v8055_v28, %v16950_v20  ;;  %v17128_v39 = vld [vmem:[%s18595_s6] ss:$0 sm:$0xff] }
 0x404   : > { %v5970_v12 = vrot.slane %v17046_v3, 5  ;;  %v5793_v4 = vrot.slane %v5792_v42, 4  ;;  %v5973_v58 = vrot.slane %v5414_v15, 5  ;;  %v5963_v38 = vrot.slane %v17015_v6, 5 }
 0x405   : > { %v7177_v49 = vsel %vm12335_vm13, %v7175_v26, %v7176_v9  ;;  %v8085_v57 = vsel %vm4747_vm10, %v8053_v7, %v16956_v13  ;;  %v11067_v45 = vrot.slane %v5813_v24, 9  ;;  %v5788_v35 = vsel %vm12353_vm2, %v5783_v59, %v5787_v50  ;;  %v17105_v10 = vpop.permute.xlu0 %7496 }
 0x406   : > { %v11242_v56 = vcombine.low %v7174_v16, %v7177_v49  ;;  %v5972_v54 = vrot.slane %v5970_v12, 4  ;;  %v5798_v20 = vsel %vm12353_vm2, %v5793_v4, %v5797_v1  ;;  %v5965_v32 = vrot.slane %v5963_v38, 4 }
 0x407   : > { %v5966_v23 = vrot.slane %v17022_v52, 5  ;;  %v11132_v46 = vcombine.low %v5788_v35, %v5798_v20  ;;  %v11068_v15 = vrot.slane %v5814_v61, 9  ;;  %v5964_v30 = vsel %vm12335_vm13, %v11067_v45, %v5963_v38  ;;  %v17103_v19 = vpop.permute.xlu1 %7498 }
 0x408   : > { %7922 = vrot.lane.b32.xlu0 %v11242_v56, %s19000_s30  ;;  %v8117_v13 = vsel %vm4780_vm11, %v8085_v57, %v16984_v34  ;;  %v5974_v52 = vsel %vm12335_vm13, %v5972_v54, %v5973_v58  ;;  %v8119_v29 = vsel %vm4780_vm11, %v8087_v47, %v16982_v43 }
 0x409   : > { %v5967_v37 = vsel %vm12335_vm13, %v5965_v32, %v5966_v23  ;;  %v8149_v34 = vsel %vm4813_vm12, %v8117_v13, %v17012_v11  ;;  %v11471_v53 = vpop.f32.mrf.mxu1  ;;  %7334 = vrot.lane.b32.xlu1 %v11132_v46, %s11880_s21  ;;  %v8151_v51 = vsel %vm4813_vm12, %v8119_v29, %v17010_v48  ;;  %v5971_v43 = vsel %vm12335_vm13, %v11068_v15, %v5970_v12  ;;  %v11805_v29 = vld [vmem:[#allocation4 + $0x60] sm:$0xf]  ;;  %s11889_s21 = smov [#allocation5]  }
 0x40a   : > { %v11147_v33 = vcombine.low %v5964_v30, %v5967_v37  ;;  %v8181_v50 = vsel %vm4846_vm14, %v8149_v34, %v17033_v2  ;;  %v8183_v11 = vsel %vm4846_vm14, %v8151_v51, %v17060_v36  ;;  %v5105_v14 = vmul.f32 %v11471_v53, %v17110_v5  ;;  %v11806_v34 = vld [vmem:[#allocation4 + $0x64] sm:$0xf] }
 0x40b   : > { %11519 = vmatprep.mubr.msk.bf16.mxu0 %vm4899_vm15, %v8181_v50  ;;  %v4969_v40 = vpop.f32.mrf.mxu1  ;;  %v11148_v48 = vcombine.low %v5971_v43, %v5974_v52  ;;  %v11109_v53 = vcombine.low %v11805_v29, %v11806_v34 }
 0x40c   : > { %7412 = vrot.lane.b32.xlu0 %v11147_v33, %s18995_s0  ;;  %11520 = vmatmul.mubr.msk.bf16.gmra.mxu0 %vm4899_vm15, %v8183_v11  ;;  %v5103_v2 = vmul.f32 %v17110_v5, %v4969_v40  ;;  %v5144_v21 = vadd.f32 %v17128_v39, %v5105_v14 }
 0x40d   : > { %v11472_v28 = vpop.f32.mrf.mxu1  ;;  %7414 = vrot.lane.b32.xlu1 %v11148_v48, %s18995_s0  ;;  %v17143_v55 = vpop.permute.xlu1 %7578  ;;  %v7954_v11 = vsel %vm554_vm4, %v11109_v53, %v17035_v0 }
 0x40e   : > { %v7577_v36 = vpop.permute.xlu0 %7576  ;;  %v5106_v9 = vmul.f32 %v11472_v28, %v17110_v5  ;;  %v5176_v7 = vmax.f32 %v5144_v21, 0.0  ;;  %v5142_v42 = vadd.f32 %v17128_v39, %v5103_v2  ;;  %v7993_v48 = vsel %vm878_vm3, %v7954_v11, %v17077_v8 }
 0x40f   : > { %v4972_v1 = vpop.f32.mrf.mxu1 }
 0x410   : > { %v5145_v24 = vadd.f32 %v17128_v39, %v5106_v9  ;;  %v5104_v59 = vmul.f32 %v17110_v5, %v4972_v1  ;;  %5242 = vrot.lane.b32.xlu0 %v5176_v7, %s18995_s0  ;;  %v5174_v56 = vmax.f32 %v5142_v42, 0.0  ;;  %v8025_v9 = vsel %vm4681_vm8, %v7993_v48, %v17105_v10 }
 0x411   : > { %v11475_v47 = vpop.f32.mrf.mxu1  ;;  %v17154_v12 = vpop.permute.xlu1 %7658  ;;  %v8057_v0 = vsel %vm4714_vm9, %v8025_v9, %v7577_v36 }
 0x412   : > { %v7657_v4 = vpop.permute.xlu0 %7656  ;;  %v5177_v49 = vmax.f32 %v5145_v24, 0.0  ;;  %v5143_v61 = vadd.f32 %v17128_v39, %v5104_v59  ;;  %v5109_v58 = vmul.f32 %v11475_v47, %v17110_v5  ;;  %v11807_v59 = vld [vmem:[#allocation4 + $0x6c] sm:$0xf]  ;;  %v11808_v47 = vld [vmem:[#allocation4 + $0x70] sm:$0xf] }
 0x413   : > { %v4985_v57 = vpop.f32.mrf.mxu1 }
 0x414   : > { %v5148_v54 = vadd.f32 %v17128_v39, %v5109_v58  ;;  %v5107_v45 = vmul.f32 %v17110_v5, %v4985_v57  ;;  %5244 = vrot.lane.b32.xlu1 %v5177_v49, %s18995_s0  ;;  %5238 = vrot.lane.b32.xlu0 %v5174_v56, %s18995_s0  ;;  %v5175_v32 = vmax.f32 %v5143_v61, 0.0  ;;  %v11110_v49 = vcombine.low %v11807_v59, %v11808_v47 }
 0x415   : > { %v11476_v35 = vpop.f32.mrf.mxu1  ;;  %v17164_v20 = vpop.permute.xlu1 %7754  ;;  %v8089_v61 = vsel %vm4747_vm10, %v8057_v0, %v7657_v4  ;;  %v17229_v0 = vld [vmem:[#allocation4 + $0xb8] sm:$0xf] }
 0x416   : > { %v5180_v23 = vmax.f32 %v5148_v54, 0.0  ;;  %v5110_v46 = vmul.f32 %v11476_v35, %v17110_v5  ;;  %v7753_v15 = vpop.permute.xlu0 %7752  ;;  %v5146_v30 = vadd.f32 %v17128_v39, %v5107_v45  ;;  %v7957_v36 = vsel %vm554_vm4, %v11110_v49, %v17067_v63 }
 0x417   : > { %v4988_v13 = vpop.f32.mrf.mxu1  ;;  %v8121_v10 = vsel %vm4780_vm11, %v8089_v61, %v7753_v15  ;;  %v7995_v4 = vsel %vm878_vm3, %v7957_v36, %v17081_v22  ;;  %v17239_v61 = vld [vmem:[#allocation4 + $0xb4] sm:$0xf] }
 0x418   : > { %v5149_v52 = vadd.f32 %v17128_v39, %v5110_v46  ;;  %v5108_v37 = vmul.f32 %v17110_v5, %v4988_v13  ;;  %5240 = vrot.lane.b32.xlu1 %v5175_v32, %s18995_s0  ;;  %5250 = vrot.lane.b32.xlu0 %v5180_v23, %s18995_s0  ;;  %v5178_v14 = vmax.f32 %v5146_v30, 0.0  ;;  %v8027_v30 = vsel %vm4681_vm8, %v7995_v4, %v17103_v19 }
 0x419   : > { %v11479_v33 = vpop.f32.mrf.mxu1 }
 0x41a   : > { %v5181_v51 = vmax.f32 %v5149_v52, 0.0  ;;  %v5147_v50 = vadd.f32 %v17128_v39, %v5108_v37  ;;  %v5113_v43 = vmul.f32 %v11479_v33, %v17110_v5  ;;  %v8059_v37 = vsel %vm4714_vm9, %v8027_v30, %v17143_v55 }
 0x41b   : > { %v5001_v40 = vpop.f32.mrf.mxu1  ;;  %v7835_v2 = vpop.permute.xlu1 %7834  ;;  %v8091_v29 = vsel %vm4747_vm10, %v8059_v37, %v17154_v12 }
 0x41c   : > { %v5152_v21 = vadd.f32 %v17128_v39, %v5113_v43  ;;  %v5111_v28 = vmul.f32 %v17110_v5, %v5001_v40  ;;  %5252 = vrot.lane.b32.xlu1 %v5181_v51, %s18995_s0  ;;  %5246 = vrot.lane.b32.xlu0 %v5178_v14, %s18995_s0  ;;  %v5179_v1 = vmax.f32 %v5147_v50, 0.0  ;;  %v8123_v53 = vsel %vm4780_vm11, %v8091_v29, %v17164_v20  ;;  %v1161_v29 = vld [vmem:[#allocation4 + $0xd4] sm:$0x1] }
 0x41d   : > { %v7833_v7 = vpop.permute.xlu0 %7832  ;;  %v11480_v42 = vpop.f32.mrf.mxu1  ;;  %v8155_v50 = vsel %vm4813_vm12, %v8123_v53, %v7835_v2 }
 0x41e   : > { %v5184_v24 = vmax.f32 %v5152_v21, 0.0  ;;  %v5114_v8 = vmul.f32 %v11480_v42, %v17110_v5  ;;  %v5150_v58 = vadd.f32 %v17128_v39, %v5111_v28  ;;  %v8153_v45 = vsel %vm4813_vm12, %v8121_v10, %v7833_v7 }
 0x41f   : > { %v5004_v56 = vpop.f32.mrf.mxu1  ;;  %v6373_v10 = vshrl.u32 %v17229_v0, 16 }
 0x420   : > { %v5153_v57 = vadd.f32 %v17128_v39, %v5114_v8  ;;  %v5112_v54 = vmul.f32 %v17110_v5, %v5004_v56  ;;  %5248 = vrot.lane.b32.xlu1 %v5179_v1, %s18995_s0  ;;  %5258 = vrot.lane.b32.xlu0 %v5184_v24, %s18995_s0  ;;  %v17202_v13 = vpop.permute.xlu1 %7324  ;;  %v5182_v63 = vmax.f32 %v5150_v58, 0.0  ;;  %v1107_v1 = vld [vmem:[#allocation4 + $0xcc] sm:$0x1]  ;;  %v17241_v56 = vld [vmem:[#allocation4 + $0xc0] sm:$0xf] }
 0x421   : > { %v7913_v35 = vpop.permute.xlu0 %7912  ;;  %v11483_v15 = vpop.f32.mrf.mxu1  ;;  %v1108_v36 = vsel %vm12018_vm5, 0, %v1107_v1  ;;  %v6384_v37 = vshrl.u32 %v17241_v56, 16 }
 0x422   : > { %v8185_v32 = vsel %vm4846_vm14, %v8153_v45, %v7913_v35  ;;  %v5185_v23 = vmax.f32 %v5153_v57, 0.0  ;;  %v5151_v46 = vadd.f32 %v17128_v39, %v5112_v54  ;;  %v5117_v52 = vmul.f32 %v11483_v15, %v17110_v5  ;;  %1109 = vst [vmem:[#allocation4 + $0xcc] sm:$0x1] %v1108_v36 }
 0x423   : > { %11523 = vmatprep.mubr.msk.bf16.mxu0 %vm4899_vm15, %v8185_v32  ;;  %v5017_v22 = vpop.f32.mrf.mxu1  ;;  %v6369_v57 = vshll.u32 %v17229_v0, 16  ;;  %v6363_v15 = vshll.u32 %v17239_v61, 16 }
 0x424   : > { %5260 = vrot.lane.b32.xlu1 %v5185_v23, %s18995_s0  ;;  %v5156_v34 = vadd.f32 %v17128_v39, %v5117_v52  ;;  %v5115_v19 = vmul.f32 %v17110_v5, %v5017_v22  ;;  %5254 = vrot.lane.b32.xlu0 %v5182_v63, %s18995_s0  ;;  %v5183_v33 = vmax.f32 %v5151_v46, 0.0  ;;  %v6360_v46 = vshrl.u32 %v17239_v61, 16 }
 0x425   : > { %v11484_v51 = vpop.f32.mrf.mxu1  ;;  %v6387_v22 = vshll.u32 %v17241_v56, 16  ;;  %v17261_v53 = vrot.slane %v6369_v57, 5 }
 0x426   : > { %v5188_v43 = vmax.f32 %v5156_v34, 0.0  ;;  %v5154_v11 = vadd.f32 %v17128_v39, %v5115_v19  ;;  %v5118_v14 = vmul.f32 %v11484_v51, %v17110_v5 }
 0x427   : > { %v7915_v55 = vpop.permute.xlu0 %7914  ;;  %v5020_v40 = vpop.f32.mrf.mxu1 }
 0x428   : > { %v8187_v12 = vsel %vm4846_vm14, %v8155_v50, %v7915_v55  ;;  %5256 = vrot.lane.b32.xlu1 %v5183_v33, %s18995_s0  ;;  %v17221_v48 = vpop.permute.xlu1 %7326  ;;  %v5157_v20 = vadd.f32 %v17128_v39, %v5118_v14  ;;  %v5116_v21 = vmul.f32 %v17110_v5, %v5020_v40  ;;  %5266 = vrot.lane.b32.xlu0 %v5188_v43, %s18995_s0  ;;  %v5186_v28 = vmax.f32 %v5154_v11, 0.0  ;;  %v17265_v11 = vld [vmem:[#allocation4 + $0xc4] sm:$0xf]  ;;  %v17267_v14 = vld [vmem:[#allocation4 + $0xbc] sm:$0x1] }
 0x429   : > { %11524 = vmatmul.mubr.msk.bf16.gmra.mxu0 %vm4899_vm15, %v8187_v12  ;;  %v11487_v2 = vpop.f32.mrf.mxu1  ;;  %v6375_v33 = vrot.slane %v6373_v10, 4  ;;  %v6362_v40 = vrot.slane %v6360_v46, 4  ;;  %v17371_v38 = vld [vmem:[#allocation4 + $0xcc] sm:$0xf] }
 0x42a   : > { %v5189_v9 = vmax.f32 %v5157_v20, 0.0  ;;  %v5155_v7 = vadd.f32 %v17128_v39, %v5116_v21  ;;  %v5121_v42 = vmul.f32 %v11487_v2, %v17110_v5  ;;  %v6365_v20 = vrot.slane %v6363_v15, 5 }
 0x42b   : > { %v17231_v24 = vpop.permute.xlu0 %7404  ;;  %v5033_v8 = vpop.f32.mrf.mxu1  ;;  %v1162_v2 = vsel %vm12024_vm6, 0, %v1161_v29 }
 0x42c   : > { %v17233_v59 = vpop.permute.xlu1 %7406  ;;  %v5160_v47 = vadd.f32 %v17128_v39, %v5121_v42  ;;  %v5119_v49 = vmul.f32 %v17110_v5, %v5033_v8  ;;  %5262 = vrot.lane.b32.xlu0 %v5186_v28, %s18995_s0  ;;  %5268 = vrot.lane.b32.xlu1 %v5189_v9, %s18995_s0  ;;  %v5187_v45 = vmax.f32 %v5155_v7, 0.0  ;;  %v6386_v7 = vrot.slane %v6384_v37, 4  ;;  %1163 = vst [vmem:[#allocation4 + $0xd4] sm:$0x1] %v1162_v2 }
 0x42d   : > { %v11488_v58 = vpop.f32.mrf.mxu1  ;;  %v6389_v42 = vrot.slane %v6387_v22, 5  ;;  %v6397_v8 = vshrl.u32 %v17265_v11, 16 }
 0x42e   : > { %v5192_v35 = vmax.f32 %v5160_v47, 0.0  ;;  %v5158_v4 = vadd.f32 %v17128_v39, %v5119_v49  ;;  %v5122_v32 = vmul.f32 %v11488_v58, %v17110_v5  ;;  %v6376_v47 = vor.u32 %v6375_v33, %v17261_v53 }
 0x42f   : > { %v5036_v23 = vpop.f32.mrf.mxu1  ;;  %v17259_v34 = vpop.permute.xlu0 %7500  ;;  %v6379_v49 = vshll.u32 %v17267_v14, 16  ;;  %v6393_v58 = vshll.u32 %v17265_v11, 16 }
 0x430   : > { %v17251_v30 = vpop.permute.xlu1 %7502  ;;  %v5161_v63 = vadd.f32 %v17128_v39, %v5122_v32  ;;  %v5120_v52 = vmul.f32 %v17110_v5, %v5036_v23  ;;  %5274 = vrot.lane.b32.xlu0 %v5192_v35, %s18995_s0  ;;  %5264 = vrot.lane.b32.xlu1 %v5187_v45, %s18995_s0  ;;  %v5190_v51 = vmax.f32 %v5158_v4, 0.0  ;;  %v6366_v23 = vor.u32 %v6365_v20, %v6362_v40 }
 0x431   : > { %v11491_v19 = vpop.f32.mrf.mxu1  ;;  %v6377_v37 = vrot.slane %v6376_v47, 4  ;;  %v6381_v22 = vrot.slane %v6379_v49, 5  ;;  %v17289_v29 = vrot.slane %v6393_v58, 5 }
 0x432   : > { %v5193_v50 = vmax.f32 %v5161_v63, 0.0  ;;  %v5159_v55 = vadd.f32 %v17128_v39, %v5120_v52  ;;  %v5125_v43 = vmul.f32 %v11491_v19, %v17110_v5  ;;  %v6390_v63 = vor.u32 %v6389_v42, %v6386_v7 }
 0x433   : > { %v5049_v12 = vpop.f32.mrf.mxu1  ;;  %v6399_v19 = vrot.slane %v6397_v8, 4  ;;  %v6367_v7 = vrot.slane %v6366_v23, 4  ;;  %v6382_v42 = vsel %vm12353_vm2, %v6377_v37, %v6381_v22  ;;  %v11810_v23 = vld [vmem:[#allocation4 + $0x7c] sm:$0xf] }
 0x434   : > { %v5164_v28 = vadd.f32 %v17128_v39, %v5125_v43  ;;  %v5123_v9 = vmul.f32 %v17110_v5, %v5049_v12  ;;  %5270 = vrot.lane.b32.xlu0 %v5190_v51, %s18995_s0  ;;  %5276 = vrot.lane.b32.xlu1 %v5193_v50, %s18995_s0  ;;  %v5191_v57 = vmax.f32 %v5159_v55, 0.0 }
 0x435   : > { %v11492_v1 = vpop.f32.mrf.mxu1  ;;  %v6400_v8 = vor.u32 %v6399_v19, %v17289_v29  ;;  %v11164_v19 = vcombine.low %v17241_v56, %v17265_v11 }
 0x436   : > { %v17279_v10 = vpop.permute.xlu1 %7582  ;;  %v5196_v36 = vmax.f32 %v5164_v28, 0.0  ;;  %v5162_v45 = vadd.f32 %v17128_v39, %v5123_v9  ;;  %v5126_v35 = vmul.f32 %v11492_v1, %v17110_v5  ;;  %v17301_v28 = vld [vmem:[#allocation4 + $0xc8] sm:$0x1]  ;;  %v17305_v1 = vrot.slane %v6390_v63, 4 }
 0x437   : > { %v17283_v4 = vpop.permute.xlu0 %7580  ;;  %v5052_v32 = vpop.f32.mrf.mxu1  ;;  %v11812_v63 = vld [vmem:[#allocation4 + $0x88] sm:$0xf] }
 0x438   : > { %v5165_v46 = vadd.f32 %v17128_v39, %v5126_v35  ;;  %v5124_v15 = vmul.f32 %v17110_v5, %v5052_v32  ;;  %5282 = vrot.lane.b32.xlu0 %v5196_v36, %s18995_s0  ;;  %5272 = vrot.lane.b32.xlu1 %v5191_v57, %s18995_s0  ;;  %v5194_v51 = vmax.f32 %v5162_v45, 0.0  ;;  %v17312_v45 = vld [vmem:[#allocation4 + $0xb4] sm:$0xe]  ;;  %v10127_v35 = vld [vmem:[%s18599_s10] sm:$0x3]  ;;  %v6396_v56 = vsel %vm12353_vm2, %v17305_v1, %v17289_v29 }
 0x439   : > { %v11495_v52 = vpop.f32.mrf.mxu1  ;;  %v11809_v32 = vld [vmem:[#allocation4 + $0x78] sm:$0xf]  ;;  %11576 = vmatprep.subr.msk.bf16.mxu1 %vm603_vm0, %v10127_v35  ;;  %v6422_v29 = vld [vmem:[#allocation4 + $0xc0] sm:$0xe] }
 0x43a   : > { %v17291_v33 = vpop.permute.xlu1 %7662  ;;  %v5197_v50 = vmax.f32 %v5165_v46, 0.0  ;;  %v5163_v55 = vadd.f32 %v17128_v39, %v5124_v15  ;;  %v5129_v43 = vmul.f32 %v11495_v52, %v17110_v5  ;;  %v11111_v46 = vcombine.low %v11809_v32, %v11810_v23  ;;  %v11811_v15 = vld [vmem:[#allocation4 + $0x84] sm:$0xf]  ;;  %v17343_v32 = vld [vmem:[#allocation4 + $0xc0] sm:$0xf] }
 0x43b   : > { %v17295_v12 = vpop.permute.xlu0 %7660  ;;  %v5065_v40 = vpop.f32.mrf.mxu1  ;;  %v11112_v52 = vcombine.low %v11811_v15, %v11812_v63  ;;  %v6574_v63 = vrot.slane %v17267_v14, 5 }
 0x43c   : > { %v5168_v20 = vadd.f32 %v17128_v39, %v5129_v43  ;;  %v5127_v2 = vmul.f32 %v17110_v5, %v5065_v40  ;;  %5278 = vrot.lane.b32.xlu0 %v5194_v51, %s18995_s0  ;;  %5284 = vrot.lane.b32.xlu1 %v5197_v50, %s18995_s0  ;;  %v5195_v49 = vmax.f32 %v5163_v55, 0.0  ;;  %v6403_v51 = vshll.u32 %v17301_v28, 16  ;;  %v17332_v43 = vld [vmem:[#allocation4 + $0xc4] sm:$0xf] }
 0x43d   : > { %v11496_v9 = vpop.f32.mrf.mxu1  ;;  %v11163_v50 = vcombine.low %v17239_v61, %v17229_v0  ;;  %v6372_v55 = vsel %vm12353_vm2, %v6367_v7, %v17261_v53  ;;  %v10257_v61 = vsel %vm603_vm0, %v10127_v35, 0  ;;  %v17341_v7 = vrot.slane %v6400_v8, 4 }
 0x43e   : > { %v17308_v47 = vpop.permute.xlu1 %7758  ;;  %v5200_v58 = vmax.f32 %v5168_v20, 0.0  ;;  %v5166_v57 = vadd.f32 %v17128_v39, %v5127_v2  ;;  %v5130_v36 = vmul.f32 %v11496_v9, %v17110_v5  ;;  %v17334_v20 = vcombine.low %v6372_v55, %v6382_v42  ;;  %11540 = vmatpush3.bf16.msra.mxu1 %v10257_v61 }
 0x43f   : > { %v7757_v37 = vpop.permute.xlu0 %7756  ;;  %v5068_v22 = vpop.f32.mrf.mxu1  ;;  %v6571_v9 = vrot.slane %v17229_v0, 5  ;;  %v17346_v15 = vrot.slane %v6403_v51, 5  ;;  %v6978_v55 = vshll.u32 %v17332_v43, 16  ;;  %v6972_v61 = vshll.u32 %v17343_v32, 16 }
 0x440   : > { %5290 = vrot.lane.b32.xlu0 %v5200_v58, %s18995_s0  ;;  %5280 = vrot.lane.b32.xlu1 %v5195_v49, %s18995_s0  ;;  %v5198_v49 = vmax.f32 %v5166_v57, 0.0  ;;  %v5169_v58 = vadd.f32 %v17128_v39, %v5130_v36  ;;  %v5128_v23 = vmul.f32 %v17110_v5, %v5068_v22  ;;  %v7960_v57 = vsel %vm554_vm4, %v11111_v46, %v17202_v13 }
 0x441   : > { %v11499_v40 = vpop.f32.mrf.mxu1  ;;  %v6982_v22 = vshrl.u32 %v17332_v43, 16  ;;  %v7997_v14 = vsel %vm878_vm3, %v7960_v57, %v17231_v24  ;;  %v6573_v13 = vrot.slane %v6571_v9, 4  ;;  %v6969_v46 = vshrl.u32 %v17343_v32, 16  ;;  %v17373_v24 = vld [vmem:[#allocation4 + $0xd0] sm:$0xf] }
 0x442   : > { %v5133_v53 = vmul.f32 %v11499_v40, %v17110_v5  ;;  %v7963_v57 = vsel %vm554_vm4, %v11112_v52, %v17221_v48  ;;  %v5167_v26 = vadd.f32 %v17128_v39, %v5128_v23  ;;  %v17380_v2 = vrot.slane %v6978_v55, 5 }
 0x443   : > { %v5081_v42 = vpop.f32.mrf.mxu1  ;;  %v6984_v48 = vrot.slane %v6982_v22, 4  ;;  %v6993_v52 = vshrl.u32 %v17371_v38, 16  ;;  %v7006_v23 = vshrl.u32 %v17373_v24, 16  ;;  %v7002_v55 = vshll.u32 %v17373_v24, 16 }
 0x444   : > { %v17355_v8 = vadd.f32 %v17128_v39, %v5133_v53  ;;  %v5131_v35 = vmul.f32 %v17110_v5, %v5081_v42  ;;  %5286 = vrot.lane.b32.xlu0 %v5198_v49, %s18995_s0  ;;  %7510 = vrot.lane.b32.xlu1 %v11164_v19, %s18996_s16  ;;  %v8029_v53 = vsel %vm4681_vm8, %v7997_v14, %v17259_v34  ;;  %v5201_v49 = vmax.f32 %v5169_v58, 0.0 }
 0x445   : > { %v17352_v36 = vpop.permute.xlu1 %7838  ;;  %v11500_v40 = vpop.f32.mrf.mxu1  ;;  %v8061_v16 = vsel %vm4714_vm9, %v8029_v53, %v17283_v4  ;;  %v5199_v22 = vmax.f32 %v5167_v26, 0.0  ;;  %v6406_v53 = vsel %vm12353_vm2, %v17341_v7, %v17346_v15  ;;  %v6974_v7 = vrot.slane %v6972_v61, 5 }
 0x446   : > { %v7837_v51 = vpop.permute.xlu0 %7836  ;;  %v5170_v19 = vadd.f32 %v17128_v39, %v5131_v35  ;;  %v5134_v42 = vmul.f32 %v11500_v40, %v17110_v5  ;;  %v8093_v34 = vsel %vm4747_vm10, %v8061_v16, %v17295_v12  ;;  %v7008_v15 = vrot.slane %v7006_v23, 4 }
 0x447   : > { %v5084_v27 = vpop.f32.mrf.mxu1  ;;  %v8125_v4 = vsel %vm4780_vm11, %v8093_v34, %v7757_v37  ;;  %v6581_v0 = vrot.slane %v17301_v28, 5  ;;  %v11211_v28 = vcombine.low %v17343_v32, %v17332_v43  ;;  %v7030_v32 = vld [vmem:[#allocation4 + $0xc0] sm:$0xe]  ;;  %vm5334_vm0 = vcmask 130112  }
 0x448   : > { %v17385_v58 = vadd.f32 %v17128_v39, %v5134_v42  ;;  %v5132_v35 = vmul.f32 %v17110_v5, %v5084_v27  ;;  %7508 = vrot.lane.b32.xlu0 %v11163_v50, %s18996_s16  ;;  %5292 = vrot.lane.b32.xlu1 %v5201_v49, %s18995_s0  ;;  %v8157_v16 = vsel %vm4813_vm12, %v8125_v4, %v7837_v51  ;;  %v5202_v14 = vmax.f32 %v5170_v19, 0.0  ;;  %v17413_v19 = vld [vmem:[#allocation4 + $0xc8] sm:$0x1] }
 0x449   : > { %v6996_v5 = vshll.u32 %v17371_v38, 16  ;;  %v7999_v27 = vsel %vm878_vm3, %v7963_v57, %v17233_v59  ;;  %v6971_v59 = vrot.slane %v6969_v46, 4  ;;  %v6578_v49 = vrot.slane %v17265_v11, 5  ;;  %v17431_v46 = vld [vmem:[#allocation4 + $0xd4] sm:$0x1] }
 0x44a   : > { %v7917_v12 = vpop.permute.xlu0 %7916  ;;  %v5171_v40 = vadd.f32 %v17128_v39, %v5132_v35  ;;  %v17399_v50 = vpop.permute.xlu1 %7328  ;;  %v8031_v51 = vsel %vm4681_vm8, %v7999_v27, %v17251_v30  ;;  %v6575_v39 = vsel %vm12335_vm13, %v6573_v13, %v6574_v63  ;;  %v6985_v30 = vor.u32 %v6984_v48, %v17380_v2 }
 0x44b   : > { %v8189_v37 = vsel %vm4846_vm14, %v8157_v16, %v7917_v12  ;;  %v8063_v26 = vsel %vm4714_vm9, %v8031_v51, %v17279_v10  ;;  %v6995_v57 = vrot.slane %v6993_v52, 4  ;;  %v6998_v34 = vrot.slane %v6996_v5, 5 }
 0x44c   : > { %11527 = vmatprep.mubr.msk.bf16.mxu0 %vm4899_vm15, %v8189_v37  ;;  %5294 = vrot.lane.b32.xlu0 %v5202_v14, %s18995_s0  ;;  %v8095_v42 = vsel %vm4747_vm10, %v8063_v26, %v17291_v33  ;;  %v17421_v63 = vrot.slane %v7002_v55, 5  ;;  %v11180_v10 = vcombine.low %v6396_v56, %v6406_v53  ;;  %v6988_v13 = vshll.u32 %v17413_v19, 16 }
 0x44d   : > { %5288 = vrot.lane.b32.xlu1 %v5199_v22, %s18995_s0  ;;  %v8127_v11 = vsel %vm4780_vm11, %v8095_v42, %v17308_v47  ;;  %v19015_v47 = vrot.slane %v17312_v45, 9  ;;  %v6580_v1 = vrot.slane %v6578_v49, 4  ;;  %v6975_v4 = vor.u32 %v6974_v7, %v6971_v59  ;;  %v7031_v59 = vld [vmem:[#allocation4 + $0xcc] sm:$0xe] }
 0x44e   : > { %v8159_v33 = vsel %vm4813_vm12, %v8127_v11, %v17352_v36  ;;  %v6986_v52 = vrot.slane %v6985_v30, 4  ;;  %v7009_v45 = vor.u32 %v7008_v15, %v17421_v63  ;;  %v5203_v23 = vmax.f32 %v5171_v40, 0.0 }
 0x44f   : > { %v6572_v35 = vsel %vm12335_vm13, %v19015_v47, %v6571_v9  ;;  %v7012_v9 = vshll.u32 %v17431_v46, 16  ;;  %v11084_v55 = vrot.slane %v6422_v29, 9  ;;  %v6990_v16 = vrot.slane %v6988_v13, 5 }
 0x450   : > { %v7919_v61 = vpop.permute.xlu0 %7918  ;;  %7588 = vrot.lane.b32.xlu0 %v17334_v20, %s18994_s20  ;;  %v11195_v36 = vcombine.low %v6572_v35, %v6575_v39  ;;  %v6999_v20 = vor.u32 %v6998_v34, %v6995_v57  ;;  %v7180_v12 = vrot.slane %v17332_v43, 5  ;;  %v6582_v5 = vsel %vm12335_vm13, %v6580_v1, %v6581_v0  ;;  %v17503_v0 = vld [vmem:[%s18598_s9] ss:$0 sm:$0xff] }
 0x451   : > { %v8191_v48 = vsel %vm4846_vm14, %v8159_v33, %v7919_v61  ;;  %7590 = vrot.lane.b32.xlu1 %v11180_v10, %s18994_s20  ;;  %v6579_v40 = vsel %vm12335_vm13, %v11084_v55, %v6578_v49  ;;  %v6976_v37 = vrot.slane %v6975_v4, 4  ;;  %v6991_v22 = vsel %vm12353_vm2, %v6986_v52, %v6990_v16 }
 0x452   : > { %v17443_v56 = vpop.permute.xlu1 %7330  ;;  %11528 = vmatmul.mubr.msk.bf16.gmra.mxu0 %vm4899_vm15, %v8191_v48  ;;  %v7000_v53 = vrot.slane %v6999_v20, 4  ;;  %v7010_v51 = vrot.slane %v7009_v45, 4  ;;  %v7014_v39 = vrot.slane %v7012_v9, 5  ;;  %v7187_v26 = vrot.slane %v17373_v24, 5 }
 0x453   : > { %v11196_v7 = vcombine.low %v6579_v40, %v6582_v5  ;;  %v7182_v30 = vrot.slane %v7180_v12, 4  ;;  %v6981_v43 = vsel %vm12353_vm2, %v6976_v37, %v17380_v2  ;;  %v11212_v42 = vcombine.low %v17371_v38, %v17373_v24 }
 0x454   : > { %7668 = vrot.lane.b32.xlu0 %v11195_v36, %s18988_s22  ;;  %v11227_v15 = vcombine.low %v6981_v43, %v6991_v22  ;;  %v7183_v57 = vrot.slane %v17413_v19, 5  ;;  %v11100_v34 = vrot.slane %v7031_v59, 9  ;;  %v7005_v10 = vsel %vm12353_vm2, %v7000_v53, %v17421_v63  ;;  %v17492_v19 = vld [vmem:[%s18597_s8] ss:$0 sm:$0xff] }
 0x455   : > { %v17452_v14 = vpop.permute.xlu0 %7408  ;;  %5296 = vrot.lane.b32.xlu1 %v5203_v23, %s18995_s0  ;;  %v7015_v2 = vsel %vm12353_vm2, %v7010_v51, %v7014_v39  ;;  %v7189_v13 = vrot.slane %v7187_v26, 4  ;;  %v7190_v33 = vrot.slane %v17431_v46, 5  ;;  %v11099_v61 = vrot.slane %v7030_v32, 9 }
 0x456   : > { %v17457_v27 = vpop.permute.xlu1 %7410  ;;  %v7184_v47 = vsel %vm12335_vm13, %v7182_v30, %v7183_v57  ;;  %v11228_v24 = vcombine.low %v7005_v10, %v7015_v2  ;;  %v7188_v29 = vsel %vm12335_vm13, %v11100_v34, %v7187_v26  ;;  %v5204_v45 = vmax.f32 %v17355_v8, 0.0 }
 0x457   : > { %v7181_v38 = vsel %vm12335_vm13, %v11099_v61, %v7180_v12  ;;  %v7191_v1 = vsel %vm12335_vm13, %v7189_v13, %v7190_v33  ;;  %v5205_v37 = vmax.f32 %v17385_v58, 0.0  ;;  %v19016_v58 = vcombine.low %v16805_v41, %v16815_v60  ;;  %v17547_v33 = vld [vmem:[#allocation2 + $0xc] sm:$0xf] }
 0x458   : > { %7764 = vrot.lane.b32.xlu0 %v11211_v28, %s18989_s15  ;;  %v11243_v46 = vcombine.low %v7181_v38, %v7184_v47  ;;  %v11244_v20 = vcombine.low %v7188_v29, %v7191_v1  ;;  %v19017_v34 = vcombine.low %v16836_v31, %v16843_v25  ;;  %v11888_v47 = vmov 4286644096  }
 0x459   : > { %7670 = vrot.lane.b32.xlu1 %v11196_v7, %s18988_s22  ;;  %v7505_v11 = vpop.permute.xlu0 %7504  ;;  %v7966_v7 = vsel %vm554_vm4, %v19016_v58, %v17399_v50  ;;  %8687 = vst.msk [vmem:[#allocation2] sm:$0xf] %vm927_vm7, %v11888_v47  ;;  %8688 = vst.msk [vmem:[#allocation2 + $0x4] sm:$0xf] %vm927_vm7, %v11888_v47 }
 0x45a   : > { %v17471_v49 = vpop.permute.xlu1 %7506  ;;  %v8001_v30 = vsel %vm878_vm3, %v7966_v7, %v17452_v14  ;;  %v7969_v41 = vsel %vm554_vm4, %v19017_v34, %v17443_v56  ;;  %8689 = vst.msk [vmem:[#allocation2 + $0x8] sm:$0x1] %vm930_vm1, %v11888_v47  ;;  %8693 = vst.msk [vmem:[#allocation2 + $0xd4] sm:$0x1] %vm930_vm1, %v11888_v47  ;;  %vm8654_vm1 = vcmask 162944  }
 0x45b   : > { %v11509_v35 = vpop.f32.mrf.mxu0  ;;  %v8033_v43 = vsel %vm4681_vm8, %v8001_v30, %v7505_v11  ;;  %v8003_v50 = vsel %vm878_vm3, %v7969_v41, %v17457_v27  ;;  %v17549_v27 = vld [vmem:[#allocation2 + $0x10] sm:$0xf]  ;;  %8691 = vst.msk [vmem:[#allocation2 + $0xcc] sm:$0xf] %vm927_vm7, %v11888_v47  ;;  %8692 = vst.msk [vmem:[#allocation2 + $0xd0] sm:$0xf] %vm927_vm7, %v11888_v47 }
 0x45c   : > { %7844 = vrot.lane.b32.xlu0 %v11227_v15, %s18990_s23  ;;  %v8425_v9 = vmul.f32 %v11509_v35, %v17492_v19  ;;  %v8035_v11 = vsel %vm4681_vm8, %v8003_v50, %v17471_v49  ;;  %v17555_v49 = vld [vmem:[#allocation2 + $0x18] sm:$0xf]  ;;  %v17557_v35 = vld [vmem:[#allocation2 + $0x1c] sm:$0xf]  ;;  %v9323_v29 = vshll.u32 %v17549_v27, 16  ;;  %v9327_v1 = vshrl.u32 %v17549_v27, 16 }
 0x45d   : > { %7766 = vrot.lane.b32.xlu1 %v11212_v42, %s18989_s15  ;;  %v8289_v63 = vpop.f32.mrf.mxu0 }
 0x45e   : > { %v8423_v36 = vmul.f32 %v17492_v19, %v8289_v63  ;;  %v8464_v28 = vadd.f32 %v17503_v0, %v8425_v9  ;;  %v9314_v63 = vshrl.u32 %v17547_v33, 16 }
 0x45f   : > { %v7587_v48 = vpop.permute.xlu1 %7586  ;;  %v11510_v52 = vpop.f32.mrf.mxu0 }
 0x460   : > { %7924 = vrot.lane.b32.xlu0 %v11243_v46, %s19000_s30  ;;  %v8462_v23 = vadd.f32 %v17503_v0, %v8423_v36  ;;  %v8426_v8 = vmul.f32 %v11510_v52, %v17492_v19  ;;  %v8496_v39 = vmax.f32 %v8464_v28, 0.0  ;;  %v8067_v13 = vsel %vm4714_vm9, %v8035_v11, %v7587_v48  ;;  %v8694_v58 = vld [vmem:[#allocation2] sm:$0x1]  ;;  %v17592_v30 = vld [vmem:[#allocation2 + $0x4] sm:$0xf] }
 0x461   : > { %v7585_v4 = vpop.permute.xlu0 %7584  ;;  %7846 = vrot.lane.b32.xlu1 %v11228_v24, %s18990_s23  ;;  %v8292_v55 = vpop.f32.mrf.mxu0  ;;  %v17563_v24 = vld [vmem:[#allocation2 + $0x14] sm:$0x1]  ;;  %v9317_v46 = vshll.u32 %v17547_v33, 16  ;;  %v9341_v52 = vshll.u32 %v17555_v49, 16  ;;  %v9316_v9 = vrot.slane %v9314_v63, 4  ;;  %s11819_s23 = sshll.u32 %s11889_s21, 4  ;;  %s11820_s23 = int_to_ptr.vmem [resolvable:$false] %s11819_s23 }
 0x462   : > { %v8424_v12 = vmul.f32 %v17492_v19, %v8292_v55  ;;  %v8494_v40 = vmax.f32 %v8462_v23, 0.0  ;;  %v8465_v59 = vadd.f32 %v17503_v0, %v8426_v8  ;;  %v8065_v57 = vsel %vm4714_vm9, %v8033_v43, %v7585_v4  ;;  %v8748_v7 = vld [vmem:[#allocation2 + $0x8] sm:$0x1]  ;;  %v17594_v43 = vld [vmem:[#allocation2 + $0x24] sm:$0xf] }
 0x463   : > { %v7667_v16 = vpop.permute.xlu1 %7666  ;;  %v9333_v36 = vshll.u32 %v17563_v24, 16  ;;  %v9338_v4 = vshrl.u32 %v17555_v49, 16  ;;  %v9319_v23 = vrot.slane %v9317_v46, 5  ;;  %v17574_v55 = vrot.slane %v9323_v29, 5 }
 0x464   : > { %5298 = vrot.lane.b32.xlu0 %v5204_v45, %s18995_s0  ;;  %v8463_v22 = vadd.f32 %v17503_v0, %v8424_v12  ;;  %v8497_v42 = vmax.f32 %v8465_v59, 0.0  ;;  %v8099_v25 = vsel %vm4747_vm10, %v8067_v13, %v7667_v16  ;;  %v9329_v12 = vrot.slane %v9327_v1, 4 }
 0x465   : > { %v7665_v5 = vpop.permute.xlu0 %7664  ;;  %7926 = vrot.lane.b32.xlu1 %v11244_v20, %s19000_s30  ;;  %v9347_v20 = vshll.u32 %v17557_v35, 16  ;;  %v9343_v28 = vrot.slane %v9341_v52, 5  ;;  %v17579_v8 = vrot.slane %v9333_v36, 5  ;;  %v9362_v46 = vshrl.u32 %v17594_v43, 16 }
 0x466   : > { %v8495_v26 = vmax.f32 %v8463_v22, 0.0  ;;  %v8097_v60 = vsel %vm4747_vm10, %v8065_v57, %v7665_v5  ;;  %v9340_v5 = vrot.slane %v9338_v4, 4  ;;  %v9351_v22 = vshrl.u32 %v17557_v35, 16 }
 0x467   : > { %v7763_v53 = vpop.permute.xlu1 %7762  ;;  %v9303_v57 = vshrl.u32 %v17592_v30, 16  ;;  %v9365_v29 = vshll.u32 %v17594_v43, 16 }
 0x468   : > { %8558 = vrot.lane.b32.xlu0 %v8494_v40, %s18994_s20  ;;  %v8131_v61 = vsel %vm4780_vm11, %v8099_v25, %v7763_v53  ;;  %v17577_v40 = vld [vmem:[#allocation2 + $0x20] sm:$0x1]  ;;  %v19018_v53 = vcombine.low %v17008_v62, %v17015_v6  ;;  %v8695_v62 = vsel %vm12018_vm5, 4286644096, %v8694_v58  ;;  %v8749_v6 = vsel %vm12024_vm6, 4286644096, %v8748_v7 }
 0x469   : > { %v7761_v51 = vpop.permute.xlu0 %7760  ;;  %5300 = vrot.lane.b32.xlu1 %v5205_v37, %s18995_s0  ;;  %v9320_v37 = vor.u32 %v9319_v23, %v9316_v9  ;;  %8696 = vst [vmem:[#allocation2] sm:$0x1] %v8695_v62  ;;  %8750 = vst [vmem:[#allocation2 + $0x8] sm:$0x1] %v8749_v6  ;;  %v9364_v9 = vrot.slane %v9362_v46, 4  ;;  %v9367_v23 = vrot.slane %v9365_v29, 5 }
 0x46a   : > { %v8129_v14 = vsel %vm4780_vm11, %v8097_v60, %v7761_v51 }
 0x46b   : > { %v17607_v34 = vrot.slane %v9320_v37, 4  ;;  %v9368_v7 = vor.u32 %v9367_v23, %v9364_v9 }
 0x46c   : > { %8562 = vrot.lane.b32.xlu0 %v8496_v39, %s18994_s20  ;;  %v19019_v39 = vcombine.low %v17044_v17, %v17046_v3  ;;  %v9299_v17 = vshll.u32 %v17592_v30, 16  ;;  %v17602_v3 = vrot.slane %v9347_v20, 5 }
 0x46d   : > { %8560 = vrot.lane.b32.xlu1 %v8495_v26, %s18994_s20  ;;  %v9326_v25 = vsel %vm12353_vm2, %v17607_v34, %v17574_v55 }
 0x46e   : > { %v7843_v32 = vpop.permute.xlu1 %7842  ;;  %v17618_v11 = vrot.slane %v9299_v17, 5  ;;  %v9759_v23 = vmax.bf16 %v9326_v25, %v17547_v33 }
 0x46f   : > { %v8163_v38 = vsel %vm4813_vm12, %v8131_v61, %v7843_v32  ;;  %v9330_v32 = vor.u32 %v9329_v12, %v17574_v55 }
 0x470   : > { %v7841_v15 = vpop.permute.xlu0 %7840 }
 0x471   : > { %8564 = vrot.lane.b32.xlu1 %v8497_v42, %s18994_s20  ;;  %v8161_v10 = vsel %vm4813_vm12, %v8129_v14, %v7841_v15  ;;  %v9344_v15 = vor.u32 %v9343_v28, %v9340_v5  ;;  %v17604_v42 = vld [vmem:[#allocation2 + $0x28] sm:$0xf]  ;;  %v17609_v41 = vrot.slane %v9330_v32, 4  ;;  %v17616_v14 = vld [vmem:[#allocation2 + $0x2c] sm:$0x1] }
 0x472   : > { %v9371_v36 = vshll.u32 %v17604_v42, 16  ;;  %v9375_v4 = vshrl.u32 %v17604_v42, 16  ;;  %v9381_v52 = vshll.u32 %v17616_v14, 16 }
 0x473   : > { %v7333_v56 = vpop.permute.xlu1 %7332  ;;  %v17611_v60 = vrot.slane %v9344_v15, 4 }
 0x474   : > { %v7921_v2 = vpop.permute.xlu0 %7920  ;;  %v7972_v51 = vsel %vm554_vm4, %v19018_v53, %v7333_v56  ;;  %v9336_v56 = vsel %vm12353_vm2, %v17609_v41, %v17579_v8  ;;  %v9373_v5 = vrot.slane %v9371_v36, 5  ;;  %v9377_v28 = vrot.slane %v9375_v4, 4  ;;  %v9795_v41 = vld [vmem:[#allocation2 + $0x18] sm:$0xe] }
 0x475   : > { %v8193_v31 = vsel %vm4846_vm14, %v8161_v10, %v7921_v2  ;;  %v9353_v10 = vrot.slane %v9351_v22, 4  ;;  %v9357_v2 = vshll.u32 %v17577_v40, 16  ;;  %v9350_v61 = vsel %vm12353_vm2, %v17611_v60, %v17602_v3 }
 0x476   : > { %11531 = vmatprep.mubr.msk.bf16.mxu0 %vm4899_vm15, %v8193_v31  ;;  %v9305_v31 = vrot.slane %v9303_v57, 4  ;;  %v9383_v37 = vrot.slane %v9381_v52, 5  ;;  %v9378_v17 = vor.u32 %v9377_v28, %v9373_v5  ;;  %v9761_v25 = vmax.bf16 %v9350_v61, %v17555_v49 }
 0x477   : > { %v17636_v63 = vrot.slane %v9357_v2, 5  ;;  %v9369_v2 = vrot.slane %v9368_v7, 4  ;;  %v9874_v61 = vrot.slane %v17549_v27, 5 }
 0x478   : > { %v9379_v29 = vrot.slane %v9378_v17, 4 }
 0x479   : > { %v9374_v52 = vsel %vm12353_vm2, %v9369_v2, %v9373_v5 }
 0x47a   : > { %v7923_v48 = vpop.permute.xlu0 %7922  ;;  %v9384_v9 = vsel %vm12353_vm2, %v9379_v29, %v9383_v37  ;;  %v9794_v37 = vld [vmem:[#allocation2 + $0xc] sm:$0xe] }
 0x47b   : > { %v8195_v45 = vsel %vm4846_vm14, %v8163_v38, %v7923_v48  ;;  %v7335_v16 = vpop.permute.xlu1 %7334  ;;  %v9354_v38 = vor.u32 %v9353_v10, %v17602_v3  ;;  %v9306_v48 = vor.u32 %v9305_v31, %v17618_v11  ;;  %v9764_v8 = vmax.bf16 %v9384_v9, %v17604_v42  ;;  %v9796_v3 = vld [vmem:[#allocation2 + $0x24] sm:$0xe] }
 0x47c   : > { %11532 = vmatmul.mubr.msk.bf16.gmra.mxu0 %vm4899_vm15, %v8195_v45  ;;  %v17590_v59 = vsel %vm554_vm4, %v19019_v39, %v7335_v16  ;;  %v9235_v39 = vld [vmem:[#allocation2] sm:$0xf]  ;;  %v11267_v60 = vrot.slane %v9794_v37, 9  ;;  %v11269_v2 = vrot.slane %v9796_v3, 9 }
 0x47d   : > { %v9355_v45 = vrot.slane %v9354_v38, 4  ;;  %v9307_v12 = vrot.slane %v9306_v48, 4  ;;  %v9290_v15 = vshrl.u32 %v9235_v39, 16  ;;  %v9293_v62 = vshll.u32 %v9235_v39, 16 }
 0x47e   : > { %v7413_v26 = vpop.permute.xlu0 %7412  ;;  %v9875_v17 = vsel %vm12335_vm13, %v11267_v60, %v9874_v61 }
 0x47f   : > { %v17614_v50 = vsel %vm878_vm3, %v7972_v51, %v7413_v26  ;;  %v17621_v13 = vpop.permute.xlu1 %7414  ;;  %v17651_v26 = vld [vmem:[#allocation2 + $0x8] sm:$0x1]  ;;  %v9360_v58 = vsel %vm12353_vm2, %v9355_v45, %v17636_v63  ;;  %v9292_v38 = vrot.slane %v9290_v15, 4  ;;  %v9295_v63 = vrot.slane %v9293_v62, 5 }
 0x480   : > { %v9309_v6 = vshll.u32 %v17651_v26, 16  ;;  %v9867_v15 = vrot.slane %v17592_v30, 5 }
 0x482   : > { %v5243_v47 = vpop.permute.xlu0 %5242  ;;  %v9311_v46 = vrot.slane %v9309_v6, 5  ;;  %v9869_v62 = vrot.slane %v9867_v15, 4  ;;  %v9877_v6 = vrot.slane %v17563_v24, 5 }
 0x483   : > { %v11513_v1 = vpop.f32.mrf.mxu0  ;;  %5337 = vst.msk [vmem:[%s15239_s24 + $0x10] sm:$0xff] %vm5334_vm0, %v5243_v47 }
 0x484   : > { %v8429_v20 = vmul.f32 %v11513_v1, %v17492_v19  ;;  %v9312_v45 = vsel %vm12353_vm2, %v9307_v12, %v9311_v46  ;;  %v9760_v12 = vmax.bf16 %v9336_v56, %v17549_v27  ;;  %v9881_v27 = vrot.slane %v17557_v35, 5 }
 0x485   : > { %v8305_v55 = vpop.f32.mrf.mxu0  ;;  %v17677_v5 = vmax.bf16 %v9312_v45, %v17592_v30 }
 0x486   : > { %v5245_v16 = vpop.permute.xlu1 %5244  ;;  %v8468_v22 = vadd.f32 %v17503_v0, %v8429_v20  ;;  %v8427_v53 = vmul.f32 %v17492_v19, %v8305_v55  ;;  %v5239_v51 = vpop.permute.xlu0 %5238  ;;  %v9296_v20 = vor.u32 %v9295_v63, %v9292_v38  ;;  %v9793_v55 = vld [vmem:[#allocation2] sm:$0xe]  ;;  %v9891_v38 = vrot.slane %v17616_v14, 5  ;;  %v17735_v14 = vld [vmem:[#allocation2 + $0x34] sm:$0xf] }
 0x487   : > { %5338 = vst.msk [vmem:[%s15239_s24 + $0x18] sm:$0xff] %vm5334_vm0, %v5245_v16  ;;  %v11514_v32 = vpop.f32.mrf.mxu0  ;;  %5335 = vst.msk [vmem:[%s15239_s24] sm:$0xff] %vm5334_vm0, %v5239_v51  ;;  %v9763_v51 = vmax.bf16 %v9374_v52, %v17594_v43  ;;  %v11266_v56 = vrot.slane %v9793_v55, 9  ;;  %v9870_v43 = vrot.slane %v17651_v26, 5  ;;  %v9876_v26 = vrot.slane %v9874_v61, 4 }
 0x488   : > { %v8500_v57 = vmax.f32 %v8468_v22, 0.0  ;;  %v8466_v34 = vadd.f32 %v17503_v0, %v8427_v53  ;;  %v8430_v10 = vmul.f32 %v11514_v32, %v17492_v19  ;;  %v9297_v33 = vrot.slane %v9296_v20, 4  ;;  %v17733_v52 = vld [vmem:[#allocation2 + $0x30] sm:$0xf] }
 0x489   : > { %v8308_v31 = vpop.f32.mrf.mxu0  ;;  %v9762_v53 = vmax.bf16 %v9360_v58, %v17557_v35  ;;  %v9868_v30 = vsel %vm12335_vm13, %v11266_v56, %v9867_v15  ;;  %v9878_v24 = vsel %vm12335_vm13, %v9876_v26, %v9877_v6  ;;  %v9883_v35 = vrot.slane %v9881_v27, 4  ;;  %v17771_v26 = vld [vmem:[#allocation2 + $0x40] sm:$0xf] }
 0x48a   : > { %v5241_v47 = vpop.permute.xlu1 %5240  ;;  %v8498_v1 = vmax.f32 %v8466_v34, 0.0  ;;  %v8469_v48 = vadd.f32 %v17503_v0, %v8430_v10  ;;  %v8428_v36 = vmul.f32 %v17492_v19, %v8308_v31  ;;  %v5251_v4 = vpop.permute.xlu0 %5250  ;;  %v9302_v49 = vsel %vm12353_vm2, %v9297_v33, %v17618_v11 }
 0x48b   : > { %5336 = vst.msk [vmem:[%s15239_s24 + $0x8] sm:$0xff] %vm5334_vm0, %v5241_v47  ;;  %5341 = vst.msk [vmem:[%s15239_s24 + $0x30] sm:$0xff] %vm5334_vm0, %v5251_v4  ;;  %v9757_v58 = vmax.bf16 %v9302_v49, %v9235_v39  ;;  %v11268_v34 = vrot.slane %v9795_v41, 9  ;;  %v9871_v39 = vsel %vm12335_vm13, %v9869_v62, %v9870_v43  ;;  %v9888_v31 = vrot.slane %v17604_v42, 5 }
 0x48c   : > { %v8501_v16 = vmax.f32 %v8469_v48, 0.0  ;;  %v8467_v28 = vadd.f32 %v17503_v0, %v8428_v36  ;;  %8566 = vrot.lane.b32.xlu0 %v8498_v1, %s18994_s20  ;;  %v10028_v46 = vmax.bf16 %v9871_v39, %v17677_v5  ;;  %v10029_v48 = vmax.bf16 %v9875_v17, %v9759_v23 }
 0x48d   : > { %v9882_v47 = vsel %vm12335_vm13, %v11268_v34, %v9881_v27  ;;  %v9890_v63 = vrot.slane %v9888_v31, 4  ;;  %v10027_v42 = vmax.bf16 %v9868_v30, %v9757_v58  ;;  %v10030_v36 = vmax.bf16 %v9878_v24, %v9760_v12  ;;  %v17768_v30 = vld [vmem:[#allocation2 + $0x3c] sm:$0xf] }
 0x48e   : > { %v5253_v22 = vpop.permute.xlu1 %5252  ;;  %v8499_v7 = vmax.f32 %v8467_v28, 0.0  ;;  %v5247_v32 = vpop.permute.xlu0 %5246  ;;  %v17731_v4 = vmax.bf16 %v9882_v47, %v9761_v25  ;;  %v17740_v20 = vsel %vm878_vm3, %v17590_v59, %v17621_v13  ;;  %v9275_v13 = vld [vmem:[#allocation2 + $0x38] sm:$0x1]  ;;  %v9386_v37 = vshrl.u32 %v17733_v52, 16  ;;  %v9797_v25 = vld [vmem:[#allocation2 + $0x30] sm:$0xe] }
 0x48f   : > { %5342 = vst.msk [vmem:[%s15239_s24 + $0x38] sm:$0xff] %vm5334_vm0, %v5253_v22  ;;  %5339 = vst.msk [vmem:[%s15239_s24 + $0x20] sm:$0xff] %vm5334_vm0, %v5247_v32  ;;  %v9892_v9 = vsel %vm12335_vm13, %v9890_v63, %v9891_v38  ;;  %v10063_v28 = vmax.bf16 %v10029_v48, %v10027_v42  ;;  %v10064_v5 = vmax.bf16 %v10030_v36, %v10028_v46  ;;  %v9389_v22 = vshll.u32 %v17733_v52, 16 }
 0x490   : > { %8570 = vrot.lane.b32.xlu0 %v8500_v57, %s18994_s20  ;;  %8568 = vrot.lane.b32.xlu1 %v8499_v7, %s18994_s20  ;;  %v9884_v57 = vrot.slane %v17577_v40, 5  ;;  %v9889_v40 = vsel %vm12335_vm13, %v11269_v2, %v9888_v31  ;;  %v10065_v59 = vmax.bf16 %v17731_v4, %v10029_v48  ;;  %v9395_v33 = vshll.u32 %v17735_v14, 16 }
 0x491   : > { %v17748_v23 = vmax.bf16 %v9889_v40, %v9763_v51  ;;  %v10095_v51 = vmax.bf16 %v10063_v28, %v17731_v4  ;;  %v9388_v15 = vrot.slane %v9386_v37, 4  ;;  %v9391_v49 = vrot.slane %v9389_v22, 5 }
 0x492   : > { %v5249_v11 = vpop.permute.xlu1 %5248  ;;  %v5259_v10 = vpop.permute.xlu0 %5258  ;;  %v9885_v1 = vsel %vm12335_vm13, %v9883_v35, %v9884_v57  ;;  %v9397_v3 = vrot.slane %v9395_v33, 5  ;;  %v9405_v61 = vshll.u32 %v9275_v13, 16  ;;  %v11270_v58 = vrot.slane %v9797_v25, 9  ;;  %v9276_v57 = vld [vmem:[#allocation2 + $0x44] sm:$0x1] }
 0x493   : > { %5340 = vst.msk [vmem:[%s15239_s24 + $0x28] sm:$0xff] %vm5334_vm0, %v5249_v11  ;;  %5345 = vst.msk [vmem:[%s15239_s24 + $0x50] sm:$0xff] %vm5334_vm0, %v5259_v10  ;;  %v17746_v55 = vmax.bf16 %v9885_v1, %v9762_v53  ;;  %v10097_v32 = vmax.bf16 %v10065_v59, %v17748_v23  ;;  %v9392_v6 = vor.u32 %v9391_v49, %v9388_v15  ;;  %v9895_v11 = vrot.slane %v17735_v14, 5 }
 0x494   : > { %8572 = vrot.lane.b32.xlu1 %v8501_v16, %s18994_s20  ;;  %v17752_v16 = vmax.bf16 %v9892_v9, %v9764_v8  ;;  %v9399_v8 = vshrl.u32 %v17735_v14, 16  ;;  %v9898_v17 = vrot.slane %v9275_v13, 5  ;;  %v9407_v27 = vrot.slane %v9405_v61, 5 }
 0x495   : > { %v10066_v12 = vmax.bf16 %v17746_v55, %v10030_v36  ;;  %v10096_v7 = vmax.bf16 %v10064_v5, %v17746_v55  ;;  %v10067_v10 = vmax.bf16 %v17748_v23, %v17731_v4  ;;  %v9393_v24 = vrot.slane %v9392_v6, 4  ;;  %v17796_v5 = vld [vmem:[#allocation2 + $0x48] sm:$0xf] }
 0x496   : > { %v5261_v29 = vpop.permute.xlu1 %5260  ;;  %v5255_v45 = vpop.permute.xlu0 %5254  ;;  %v9401_v60 = vrot.slane %v9399_v8, 4  ;;  %v10068_v39 = vmax.bf16 %v17752_v16, %v17746_v55  ;;  %v9896_v47 = vsel %vm12335_vm13, %v11270_v58, %v9895_v11  ;;  %v9897_v35 = vrot.slane %v9895_v11, 4  ;;  %v9277_v11 = vld [vmem:[#allocation2 + $0x50] sm:$0x1] }
 0x497   : > { %5346 = vst.msk [vmem:[%s15239_s24 + $0x58] sm:$0xff] %vm5334_vm0, %v5261_v29  ;;  %5343 = vst.msk [vmem:[%s15239_s24 + $0x40] sm:$0xff] %vm5334_vm0, %v5255_v45  ;;  %v10098_v56 = vmax.bf16 %v10066_v12, %v17752_v16  ;;  %v11284_v43 = vcombine.low %v10095_v51, %v10096_v7  ;;  %v9410_v38 = vshrl.u32 %v17768_v30, 16  ;;  %v9413_v63 = vshll.u32 %v17768_v30, 16  ;;  %v9798_v29 = vld [vmem:[#allocation2 + $0x3c] sm:$0xe] }
 0x498   : > { %v9402_v34 = vor.u32 %v9401_v60, %v9397_v3  ;;  %v9419_v42 = vshll.u32 %v17771_v26, 16  ;;  %v9423_v46 = vshrl.u32 %v17771_v26, 16  ;;  %v9398_v1 = vsel %vm12353_vm2, %v9393_v24, %v9397_v3  ;;  %v17813_v3 = vld [vmem:[#allocation2 + $0x4c] sm:$0xf] }
 0x499   : > { %v11285_v62 = vcombine.low %v10097_v32, %v10098_v56  ;;  %11541 = vmatprep.mubr.msk.bf16.mxu1 %vm554_vm4, %v11284_v43  ;;  %v9899_v48 = vsel %vm12335_vm13, %v9897_v35, %v9898_v17  ;;  %v9412_v36 = vrot.slane %v9410_v38, 4  ;;  %v9429_v4 = vshll.u32 %v9276_v57, 16 }
 0x49a   : > { %v5257_v53 = vpop.permute.xlu1 %5256  ;;  %v5267_v41 = vpop.permute.xlu0 %5266  ;;  %v9403_v40 = vrot.slane %v9402_v34, 4  ;;  %v9765_v9 = vmax.bf16 %v9398_v1, %v17733_v52  ;;  %v9415_v55 = vrot.slane %v9413_v63, 5  ;;  %v9421_v28 = vrot.slane %v9419_v42, 5 }
 0x49b   : > { %5344 = vst.msk [vmem:[%s15239_s24 + $0x48] sm:$0xff] %vm5334_vm0, %v5257_v53  ;;  %5349 = vst.msk [vmem:[%s15239_s24 + $0x70] sm:$0xff] %vm5334_vm0, %v5267_v41  ;;  %11542 = vmatmul.mubr.msk.bf16.vlgmr.msra.gmra.mxu1 %vm554_vm4, %v11285_v62  ;;  %v9425_v37 = vrot.slane %v9423_v46, 4  ;;  %v9431_v22 = vrot.slane %v9429_v4, 5  ;;  %v11271_v33 = vrot.slane %v9798_v29, 9  ;;  %v9902_v52 = vrot.slane %v17771_v26, 5 }
 0x49c   : > { %v9408_v45 = vsel %vm12353_vm2, %v9403_v40, %v9407_v27  ;;  %v17803_v25 = vmax.bf16 %v9896_v47, %v9765_v9  ;;  %v9416_v53 = vor.u32 %v9415_v55, %v9412_v36  ;;  %v9905_v51 = vrot.slane %v9276_v57, 5  ;;  %v17847_v55 = vld [vmem:[#allocation2 + $0x54] sm:$0xf] }
 0x49d   : > { %v9766_v12 = vmax.bf16 %v9408_v45, %v17735_v14  ;;  %v9426_v32 = vor.u32 %v9425_v37, %v9421_v28  ;;  %v9434_v14 = vshrl.u32 %v17796_v5, 16  ;;  %v9437_v8 = vshll.u32 %v17796_v5, 16 }
 0x49e   : > { %v5263_v2 = vpop.permute.xlu0 %5262  ;;  %v5269_v31 = vpop.permute.xlu1 %5268  ;;  %v10099_v41 = vmax.bf16 %v10067_v10, %v17803_v25  ;;  %v9417_v56 = vrot.slane %v9416_v53, 4  ;;  %v9903_v15 = vsel %vm12335_vm13, %v11271_v33, %v9902_v52  ;;  %v9904_v49 = vrot.slane %v9902_v52, 4 }
 0x49f   : > { %5347 = vst.msk [vmem:[%s15239_s24 + $0x60] sm:$0xff] %vm5334_vm0, %v5263_v2  ;;  %5350 = vst.msk [vmem:[%s15239_s24 + $0x78] sm:$0xff] %vm5334_vm0, %v5269_v31  ;;  %v17806_v7 = vmax.bf16 %v9899_v48, %v9766_v12  ;;  %v9427_v58 = vrot.slane %v9426_v32, 4  ;;  %v10069_v62 = vmax.bf16 %v17803_v25, %v17748_v23  ;;  %v9436_v27 = vrot.slane %v9434_v14, 4 }
 0x4a0   : > { %v9422_v17 = vsel %vm12353_vm2, %v9417_v56, %v9421_v28  ;;  %v9906_v34 = vsel %vm12335_vm13, %v9904_v49, %v9905_v51  ;;  %v9439_v10 = vrot.slane %v9437_v8, 5  ;;  %v9443_v2 = vshll.u32 %v17813_v3, 16 }
 0x4a1   : > { %v10100_v61 = vmax.bf16 %v10068_v39, %v17806_v7  ;;  %v10070_v6 = vmax.bf16 %v17806_v7, %v17752_v16  ;;  %v9799_v39 = vld [vmem:[#allocation2 + $0x48] sm:$0xe]  ;;  %v9432_v23 = vsel %vm12353_vm2, %v9427_v58, %v9431_v22  ;;  %v9767_v16 = vmax.bf16 %v9422_v17, %v17768_v30  ;;  %v17854_v22 = vld [vmem:[#allocation2 + $0x58] sm:$0xf] }
 0x4a2   : > { %v5275_v59 = vpop.permute.xlu0 %5274  ;;  %v5265_v13 = vpop.permute.xlu1 %5264  ;;  %v9768_v31 = vmax.bf16 %v9432_v23, %v17771_v26  ;;  %v9440_v24 = vor.u32 %v9439_v10, %v9436_v27  ;;  %v9447_v47 = vshrl.u32 %v17813_v3, 16  ;;  %v9453_v35 = vshll.u32 %v9277_v11, 16  ;;  %v9800_v23 = vld [vmem:[#allocation2 + $0x54] sm:$0xe] }
 0x4a3   : > { %5353 = vst.msk [vmem:[%s15239_s24 + $0x90] sm:$0xff] %vm5334_vm0, %v5275_v59  ;;  %5348 = vst.msk [vmem:[%s15239_s24 + $0x68] sm:$0xff] %vm5334_vm0, %v5265_v13  ;;  %v11286_v57 = vcombine.low %v10099_v41, %v10100_v61  ;;  %v17835_v63 = vmax.bf16 %v9903_v15, %v9767_v16  ;;  %v9445_v42 = vrot.slane %v9443_v2, 5  ;;  %v11272_v46 = vrot.slane %v9799_v39, 9 }
 0x4a4   : > { %v9909_v29 = vrot.slane %v17813_v3, 5  ;;  %v17842_v30 = vmax.bf16 %v9906_v34, %v9768_v31  ;;  %v9441_v26 = vrot.slane %v9440_v24, 4  ;;  %v9449_v1 = vrot.slane %v9447_v47, 4 }
 0x4a5   : > { %11545 = vmatprep.mubr.msk.bf16.mxu1 %vm554_vm4, %v11286_v57  ;;  %v9455_v48 = vrot.slane %v9453_v35, 5  ;;  %v10101_v36 = vmax.bf16 %v10069_v62, %v17835_v63  ;;  %v9912_v9 = vrot.slane %v9277_v11, 5  ;;  %v10071_v37 = vmax.bf16 %v17835_v63, %v17803_v25  ;;  %v9278_v57 = vld [vmem:[#allocation2 + $0x5c] sm:$0x1] }
 0x4a6   : > { %v5271_v43 = vpop.permute.xlu0 %5270  ;;  %v5277_v60 = vpop.permute.xlu1 %5276  ;;  %v9910_v4 = vsel %vm12335_vm13, %v11272_v46, %v9909_v29  ;;  %v9911_v45 = vrot.slane %v9909_v29, 4  ;;  %v10102_v59 = vmax.bf16 %v10070_v6, %v17842_v30  ;;  %v9446_v13 = vsel %vm12353_vm2, %v9441_v26, %v9445_v42 }
 0x4a7   : > { %5351 = vst.msk [vmem:[%s15239_s24 + $0x80] sm:$0xff] %vm5334_vm0, %v5271_v43  ;;  %5354 = vst.msk [vmem:[%s15239_s24 + $0x98] sm:$0xff] %vm5334_vm0, %v5277_v60  ;;  %v9450_v12 = vor.u32 %v9449_v1, %v9445_v42  ;;  %v9769_v51 = vmax.bf16 %v9446_v13, %v17796_v5  ;;  %v10072_v14 = vmax.bf16 %v17842_v30, %v17806_v7  ;;  %v9458_v56 = vshrl.u32 %v17847_v55, 16 }
 0x4a8   : > { %v9913_v32 = vsel %vm12335_vm13, %v9911_v45, %v9912_v9  ;;  %v11287_v25 = vcombine.low %v10101_v36, %v10102_v59  ;;  %v9461_v15 = vshll.u32 %v17847_v55, 16  ;;  %v9467_v60 = vshll.u32 %v17854_v22, 16 }
 0x4a9   : > { %v9451_v41 = vrot.slane %v9450_v12, 4  ;;  %v17870_v43 = vmax.bf16 %v9910_v4, %v9769_v51  ;;  %v9460_v58 = vrot.slane %v9458_v56, 4  ;;  %v9471_v6 = vshrl.u32 %v17854_v22, 16 }
 0x4aa   : > { %v5283_v38 = vpop.permute.xlu0 %5282  ;;  %v5273_v40 = vpop.permute.xlu1 %5272  ;;  %11546 = vmatmul.mubr.msk.bf16.gmra.mxu1 %vm554_vm4, %v11287_v25  ;;  %v9463_v62 = vrot.slane %v9461_v15, 5  ;;  %v9469_v24 = vrot.slane %v9467_v60, 5  ;;  %v9477_v29 = vshll.u32 %v9278_v57, 16  ;;  %v11273_v26 = vrot.slane %v9800_v23, 9  ;;  %v9279_v15 = vld [vmem:[#allocation2 + $0x68] sm:$0x1] }
 0x4ab   : > { %5357 = vst.msk [vmem:[%s15239_s24 + $0xb0] sm:$0xff] %vm5334_vm0, %v5283_v38  ;;  %5352 = vst.msk [vmem:[%s15239_s24 + $0x88] sm:$0xff] %vm5334_vm0, %v5273_v40  ;;  %v9456_v61 = vsel %vm12353_vm2, %v9451_v41, %v9455_v48  ;;  %v10103_v2 = vmax.bf16 %v10071_v37, %v17870_v43  ;;  %v9473_v47 = vrot.slane %v9471_v6, 4  ;;  %v9916_v9 = vrot.slane %v17854_v22, 5 }
 0x4ac   : > { %v9770_v39 = vmax.bf16 %v9456_v61, %v17813_v3  ;;  %v9464_v31 = vor.u32 %v9463_v62, %v9460_v58  ;;  %v9479_v13 = vrot.slane %v9477_v29, 5  ;;  %v9926_v23 = vrot.slane %v9279_v15, 5 }
 0x4ad   : > { %v11517_v28 = vpop.f32.mrf.mxu0  ;;  %v9474_v46 = vor.u32 %v9473_v47, %v9469_v24  ;;  %v9918_v51 = vrot.slane %v9916_v9, 4 }
 0x4ae   : > { %v8433_v33 = vmul.f32 %v11517_v28, %v17492_v19  ;;  %v5279_v53 = vpop.permute.xlu0 %5278  ;;  %v5285_v52 = vpop.permute.xlu1 %5284  ;;  %v17887_v42 = vmax.bf16 %v9913_v32, %v9770_v39  ;;  %v9465_v3 = vrot.slane %v9464_v31, 4  ;;  %v9919_v32 = vrot.slane %v9278_v57, 5 }
 0x4af   : > { %v8321_v8 = vpop.f32.mrf.mxu0  ;;  %5355 = vst.msk [vmem:[%s15239_s24 + $0xa0] sm:$0xff] %vm5334_vm0, %v5279_v53  ;;  %5358 = vst.msk [vmem:[%s15239_s24 + $0xb8] sm:$0xff] %vm5334_vm0, %v5285_v52  ;;  %v9475_v59 = vrot.slane %v9474_v46, 4  ;;  %v9917_v53 = vsel %vm12335_vm13, %v11273_v26, %v9916_v9  ;;  %v17906_v52 = vld [vmem:[#allocation2 + $0x64] sm:$0xf] }
 0x4b0   : > { %v8472_v49 = vadd.f32 %v17503_v0, %v8433_v33  ;;  %v8431_v5 = vmul.f32 %v17492_v19, %v8321_v8  ;;  %v10104_v45 = vmax.bf16 %v10072_v14, %v17887_v42  ;;  %v9470_v28 = vsel %vm12353_vm2, %v9465_v3, %v9469_v24 }
 0x4b1   : > { %v11518_v7 = vpop.f32.mrf.mxu0  ;;  %v9771_v33 = vmax.bf16 %v9470_v28, %v17847_v55  ;;  %v10073_v14 = vmax.bf16 %v17870_v43, %v17835_v63  ;;  %v10074_v56 = vmax.bf16 %v17887_v42, %v17842_v30  ;;  %v9920_v60 = vsel %vm12335_vm13, %v9918_v51, %v9919_v32 }
 0x4b2   : > { %v8504_v11 = vmax.f32 %v8472_v49, 0.0  ;;  %v8470_v17 = vadd.f32 %v17503_v0, %v8431_v5  ;;  %v8434_v34 = vmul.f32 %v11518_v7, %v17492_v19  ;;  %v5291_v27 = vpop.permute.xlu0 %5290  ;;  %v5281_v10 = vpop.permute.xlu1 %5280  ;;  %v11288_v37 = vcombine.low %v10103_v2, %v10104_v45  ;;  %v9801_v5 = vld [vmem:[#allocation2 + $0x60] sm:$0xe] }
 0x4b3   : > { %v8324_v16 = vpop.f32.mrf.mxu0  ;;  %5361 = vst.msk [vmem:[%s15239_s24 + $0xd0] sm:$0xff] %vm5334_vm0, %v5291_v27  ;;  %5356 = vst.msk [vmem:[%s15239_s24 + $0xa8] sm:$0xff] %vm5334_vm0, %v5281_v10  ;;  %v17915_v41 = vmax.bf16 %v9917_v53, %v9771_v33  ;;  %v9491_v7 = vshll.u32 %v17906_v52, 16  ;;  %v9495_v62 = vshrl.u32 %v17906_v52, 16  ;;  %v9923_v57 = vrot.slane %v17906_v52, 5 }
 0x4b4   : > { %v8502_v35 = vmax.f32 %v8470_v17, 0.0  ;;  %v8473_v38 = vadd.f32 %v17503_v0, %v8434_v34  ;;  %v8432_v40 = vmul.f32 %v17492_v19, %v8324_v16  ;;  %11549 = vmatprep.mubr.msk.bf16.mxu1 %vm554_vm4, %v11288_v37  ;;  %v11274_v17 = vrot.slane %v9801_v5, 9  ;;  %v17933_v34 = vld [vmem:[#allocation2 + $0x6c] sm:$0xf]  ;;  %v17938_v16 = vld [vmem:[#allocation2 + $0x70] sm:$0xf] }
 0x4b5   : > { %v10105_v30 = vmax.bf16 %v10073_v14, %v17915_v41  ;;  %v9493_v6 = vrot.slane %v9491_v7, 5  ;;  %v9497_v39 = vrot.slane %v9495_v62, 4  ;;  %v10075_v47 = vmax.bf16 %v17915_v41, %v17870_v43  ;;  %v9802_v33 = vld [vmem:[#allocation2 + $0x6c] sm:$0xe] }
 0x4b6   : > { %v8505_v1 = vmax.f32 %v8473_v38, 0.0  ;;  %v8471_v48 = vadd.f32 %v17503_v0, %v8432_v40  ;;  %8574 = vrot.lane.b32.xlu0 %v8502_v35, %s18994_s20  ;;  %v5287_v36 = vpop.permute.xlu0 %5286  ;;  %v7511_v4 = vpop.permute.xlu1 %7510  ;;  %v17901_v0 = vld [vmem:[#allocation2 + $0x60] sm:$0xf]  ;;  %v9280_v38 = vld [vmem:[#allocation2 + $0x74] sm:$0x1]  ;;  %v9924_v46 = vsel %vm12335_vm13, %v11274_v17, %v9923_v57  ;;  %v9925_v29 = vrot.slane %v9923_v57, 4 }
 0x4b7   : > { %5359 = vst.msk [vmem:[%s15239_s24 + $0xc0] sm:$0xff] %vm5334_vm0, %v5287_v36  ;;  %v17897_v19 = vsel %vm4681_vm8, %v17740_v20, %v7511_v4  ;;  %v9480_v20 = vsel %vm12353_vm2, %v9475_v59, %v9479_v13  ;;  %v9482_v49 = vshrl.u32 %v17901_v0, 16  ;;  %v9498_v3 = vor.u32 %v9497_v39, %v9493_v6 }
 0x4b8   : > { %v8503_v12 = vmax.f32 %v8471_v48, 0.0  ;;  %v9772_v25 = vmax.bf16 %v9480_v20, %v17854_v22  ;;  %v9485_v22 = vshll.u32 %v17901_v0, 16  ;;  %v9509_v48 = vshll.u32 %v17933_v34, 16 }
 0x4b9   : > { %v9484_v58 = vrot.slane %v9482_v49, 4  ;;  %v9515_v36 = vshll.u32 %v17938_v16, 16  ;;  %v9927_v4 = vsel %vm12335_vm13, %v9925_v29, %v9926_v23  ;;  %v9519_v45 = vshrl.u32 %v17938_v16, 16 }
 0x4ba   : > { %8578 = vrot.lane.b32.xlu0 %v8504_v11, %s18994_s20  ;;  %8576 = vrot.lane.b32.xlu1 %v8503_v12, %s18994_s20  ;;  %v7509_v8 = vpop.permute.xlu0 %7508  ;;  %v5293_v55 = vpop.permute.xlu1 %5292  ;;  %v17929_v61 = vmax.bf16 %v9920_v60, %v9772_v25  ;;  %v9501_v11 = vshll.u32 %v9279_v15, 16  ;;  %v9525_v9 = vshll.u32 %v9280_v38, 16  ;;  %v9511_v37 = vrot.slane %v9509_v48, 5 }
 0x4bb   : > { %v8037_v63 = vsel %vm4681_vm8, %v17614_v50, %v7509_v8  ;;  %5362 = vst.msk [vmem:[%s15239_s24 + $0xd8] sm:$0xff] %vm5334_vm0, %v5293_v55  ;;  %v9487_v50 = vrot.slane %v9485_v22, 5  ;;  %v9517_v32 = vrot.slane %v9515_v36, 5  ;;  %v9521_v55 = vrot.slane %v9519_v45, 4 }
 0x4bc   : > { %v10106_v10 = vmax.bf16 %v10074_v56, %v17929_v61  ;;  %v9503_v24 = vrot.slane %v9501_v11, 5  ;;  %v10076_v35 = vmax.bf16 %v17929_v61, %v17887_v42  ;;  %v9499_v42 = vrot.slane %v9498_v3, 4 }
 0x4bd   : > { %v9488_v31 = vor.u32 %v9487_v50, %v9484_v58  ;;  %v9527_v25 = vrot.slane %v9525_v9, 5  ;;  %v11275_v49 = vrot.slane %v9802_v33, 9  ;;  %v9930_v5 = vrot.slane %v17938_v16, 5 }
 0x4be   : > { %8580 = vrot.lane.b32.xlu1 %v8505_v1, %s18994_s20  ;;  %v5295_v27 = vpop.permute.xlu0 %5294  ;;  %v11289_v40 = vcombine.low %v10105_v30, %v10106_v10  ;;  %v9506_v1 = vshrl.u32 %v17933_v34, 16  ;;  %v9504_v20 = vsel %vm12353_vm2, %v9499_v42, %v9503_v24  ;;  %v9522_v7 = vor.u32 %v9521_v55, %v9517_v32  ;;  %v17972_v30 = vld [vmem:[#allocation2 + $0x78] sm:$0xf] }
 0x4bf   : > { %5363 = vst.msk [vmem:[%s15239_s24 + $0xe0] sm:$0xff] %vm5334_vm0, %v5295_v27  ;;  %v5289_v2 = vpop.permute.xlu1 %5288  ;;  %v9489_v26 = vrot.slane %v9488_v31, 4  ;;  %v9774_v14 = vmax.bf16 %v9504_v20, %v17906_v52  ;;  %v9931_v58 = vsel %vm12335_vm13, %v11275_v49, %v9930_v5  ;;  %v9932_v62 = vrot.slane %v9930_v5, 4 }
 0x4c0   : > { %5360 = vst.msk [vmem:[%s15239_s24 + $0xc8] sm:$0xff] %vm5334_vm0, %v5289_v2  ;;  %11550 = vmatmul.mubr.msk.bf16.gmra.mxu1 %vm554_vm4, %v11289_v40  ;;  %v9508_v12 = vrot.slane %v9506_v1, 4  ;;  %v9523_v27 = vrot.slane %v9522_v7, 4  ;;  %v9530_v2 = vshrl.u32 %v17972_v30, 16 }
 0x4c1   : > { %v9494_v13 = vsel %vm12353_vm2, %v9489_v26, %v9493_v6  ;;  %v17970_v22 = vmax.bf16 %v9927_v4, %v9774_v14  ;;  %v17981_v6 = vld [vmem:[#allocation2 + $0x7c] sm:$0xf]  ;;  %v18007_v26 = vld [vmem:[#allocation2 + $0x80] sm:$0x1] }
 0x4c2   : > { %v7589_v43 = vpop.permute.xlu0 %7588  ;;  %v9773_v51 = vmax.bf16 %v9494_v13, %v17901_v0  ;;  %v9512_v8 = vor.u32 %v9511_v37, %v9508_v12  ;;  %v9532_v48 = vrot.slane %v9530_v2, 4  ;;  %v9543_v42 = vshrl.u32 %v17981_v6, 16  ;;  %v18014_v4 = vld [vmem:[%s18598_s9] ss:$0 sm:$0xff]  ;;  %v18039_v2 = vld [vmem:[#allocation2 + $0x88] sm:$0xf] }
 0x4c3   : > { %v8069_v28 = vsel %vm4714_vm9, %v8037_v63, %v7589_v43  ;;  %v7591_v59 = vpop.permute.xlu1 %7590  ;;  %v9933_v63 = vrot.slane %v9280_v38, 5  ;;  %v10108_v11 = vmax.bf16 %v10076_v35, %v17970_v22  ;;  %v10078_v10 = vmax.bf16 %v17970_v22, %v17929_v61 }
 0x4c4   : > { %v8071_v53 = vsel %vm4714_vm9, %v17897_v19, %v7591_v59  ;;  %v17966_v15 = vmax.bf16 %v9924_v46, %v9773_v51  ;;  %v9513_v0 = vrot.slane %v9512_v8, 4  ;;  %v9528_v38 = vsel %vm12353_vm2, %v9523_v27, %v9527_v25  ;;  %v9803_v51 = vld [vmem:[#allocation2 + $0x78] sm:$0xe]  ;;  %v18032_v27 = vld [vmem:[#allocation2 + $0x84] sm:$0xf] }
 0x4c5   : > { %v9934_v23 = vsel %vm12335_vm13, %v9932_v62, %v9933_v63  ;;  %v9539_v61 = vshll.u32 %v17981_v6, 16  ;;  %v9776_v46 = vmax.bf16 %v9528_v38, %v17938_v16  ;;  %v9549_v20 = vshll.u32 %v18007_v26, 16 }
 0x4c6   : > { %v7669_v56 = vpop.permute.xlu0 %7668  ;;  %v10107_v52 = vmax.bf16 %v10075_v47, %v17966_v15  ;;  %v10077_v50 = vmax.bf16 %v17966_v15, %v17915_v41  ;;  %v9518_v17 = vsel %vm12353_vm2, %v9513_v0, %v9517_v32  ;;  %v9533_v41 = vshll.u32 %v17972_v30, 16 }
 0x4c7   : > { %v8101_v19 = vsel %vm4747_vm10, %v8069_v28, %v7669_v56  ;;  %v5297_v60 = vpop.permute.xlu1 %5296  ;;  %v9775_v57 = vmax.bf16 %v9518_v17, %v17933_v34  ;;  %v18000_v34 = vld [vmem:[%s18597_s8] ss:$0 sm:$0xff]  ;;  %v9541_v43 = vrot.slane %v9539_v61, 5  ;;  %v18018_v28 = vmax.bf16 %v9934_v23, %v9776_v46 }
 0x4c8   : > { %5364 = vst.msk [vmem:[%s15239_s24 + $0xe8] sm:$0xff] %vm5334_vm0, %v5297_v60  ;;  %v11290_v35 = vcombine.low %v10107_v52, %v10108_v11  ;;  %v9535_v36 = vrot.slane %v9533_v41, 5  ;;  %v9551_v63 = vrot.slane %v9549_v20, 5  ;;  %v11276_v52 = vrot.slane %v9803_v51, 9  ;;  %v18070_v20 = vld [vmem:[#allocation2 + $0x90] sm:$0xf] }
 0x4c9   : > { %v18005_v29 = vmax.bf16 %v9931_v58, %v9775_v57  ;;  %v10110_v56 = vmax.bf16 %v10078_v10, %v18018_v28 }
 0x4ca   : > { %v7765_v39 = vpop.permute.xlu0 %7764  ;;  %11553 = vmatprep.mubr.msk.bf16.mxu1 %vm554_vm4, %v11290_v35  ;;  %v9536_v33 = vor.u32 %v9535_v36, %v9532_v48  ;;  %v9557_v48 = vshll.u32 %v18032_v27, 16  ;;  %v9804_v36 = vld [vmem:[#allocation2 + $0x84] sm:$0xe] }
 0x4cb   : > { %v8133_v24 = vsel %vm4780_vm11, %v8101_v19, %v7765_v39  ;;  %v7671_v47 = vpop.permute.xlu1 %7670  ;;  %v10109_v59 = vmax.bf16 %v10077_v50, %v18005_v29 }
 0x4cc   : > { %v11521_v31 = vpop.f32.mrf.mxu0  ;;  %v8103_v3 = vsel %vm4747_vm10, %v8071_v53, %v7671_v47  ;;  %v9545_v53 = vrot.slane %v9543_v42, 4  ;;  %v9537_v49 = vrot.slane %v9536_v33, 4  ;;  %v10079_v47 = vmax.bf16 %v18005_v29, %v17966_v15 }
 0x4cd   : > { %v8437_v40 = vmul.f32 %v18000_v34, %v11521_v31  ;;  %v11291_v50 = vcombine.low %v10109_v59, %v10110_v56  ;;  %v9937_v31 = vrot.slane %v17981_v6, 5  ;;  %v9563_v15 = vshll.u32 %v18039_v2, 16 }
 0x4ce   : > { %v8337_v1 = vpop.f32.mrf.mxu0  ;;  %v7845_v9 = vpop.permute.xlu0 %7844  ;;  %v9546_v5 = vor.u32 %v9545_v53, %v9541_v43  ;;  %v9542_v11 = vsel %vm12353_vm2, %v9537_v49, %v9541_v43  ;;  %v9567_v42 = vshrl.u32 %v18039_v2, 16  ;;  %v11277_v53 = vrot.slane %v9804_v36, 9 }
 0x4cf   : > { %v8476_v45 = vadd.f32 %v18014_v4, %v8437_v40  ;;  %v8435_v16 = vmul.f32 %v18000_v34, %v8337_v1  ;;  %v8165_v12 = vsel %vm4813_vm12, %v8133_v24, %v7845_v9  ;;  %v7767_v37 = vpop.permute.xlu1 %7766  ;;  %v9777_v23 = vmax.bf16 %v9542_v11, %v17972_v30  ;;  %11554 = vmatmul.mubr.msk.bf16.gmra.mxu1 %vm554_vm4, %v11291_v50  ;;  %v9282_v40 = vld [vmem:[#allocation2 + $0x8c] sm:$0x1] }
 0x4d0   : > { %v11522_v13 = vpop.f32.mrf.mxu0  ;;  %v8135_v55 = vsel %vm4780_vm11, %v8103_v3, %v7767_v37  ;;  %v9547_v17 = vrot.slane %v9546_v5, 4  ;;  %v9940_v24 = vrot.slane %v18007_v26, 5  ;;  %v10080_v30 = vmax.bf16 %v18018_v28, %v17970_v22 }
 0x4d1   : > { %v8508_v32 = vmax.f32 %v8476_v45, 0.0  ;;  %v8474_v14 = vadd.f32 %v18014_v4, %v8435_v16  ;;  %v8438_v8 = vmul.f32 %v18000_v34, %v11522_v13  ;;  %v9554_v3 = vshrl.u32 %v18032_v27, 16 }
 0x4d2   : > { %v8340_v25 = vpop.f32.mrf.mxu0  ;;  %v7925_v7 = vpop.permute.xlu0 %7924  ;;  %v9552_v41 = vsel %vm12353_vm2, %v9547_v17, %v9551_v63  ;;  %v9938_v1 = vsel %vm12335_vm13, %v11276_v52, %v9937_v31  ;;  %v9939_v26 = vrot.slane %v9937_v31, 4  ;;  %v9559_v16 = vrot.slane %v9557_v48, 5 }
 0x4d3   : > { %v8506_v19 = vmax.f32 %v8474_v14, 0.0  ;;  %v8477_v60 = vadd.f32 %v18014_v4, %v8438_v8  ;;  %v8436_v0 = vmul.f32 %v18000_v34, %v8340_v25  ;;  %v8197_v58 = vsel %vm4846_vm14, %v8165_v12, %v7925_v7  ;;  %v7847_v62 = vpop.permute.xlu1 %7846  ;;  %v18075_v25 = vld [vmem:[#allocation2 + $0x94] sm:$0xf]  ;;  %v9283_v7 = vld [vmem:[#allocation2 + $0x98] sm:$0x1] }
 0x4d4   : > { %v8167_v57 = vsel %vm4813_vm12, %v8135_v55, %v7847_v62  ;;  %11535 = vmatprep.mubr.msk.bf16.mxu0 %vm4899_vm15, %v8197_v58  ;;  %v9778_v61 = vmax.bf16 %v9552_v41, %v17981_v6  ;;  %v18061_v6 = vmax.bf16 %v9938_v1, %v9777_v23  ;;  %v9556_v43 = vrot.slane %v9554_v3, 4 }
 0x4d5   : > { %v8509_v10 = vmax.f32 %v8477_v60, 0.0  ;;  %v8475_v39 = vadd.f32 %v18014_v4, %v8436_v0  ;;  %8582 = vrot.lane.b32.xlu0 %v8506_v19, %s18994_s20  ;;  %v9941_v45 = vsel %vm12335_vm13, %v9939_v26, %v9940_v24  ;;  %v9565_v9 = vrot.slane %v9563_v15, 5 }
 0x4d6   : > { %v5299_v38 = vpop.permute.xlu0 %5298  ;;  %v9573_v59 = vshll.u32 %v9282_v40, 16  ;;  %v18067_v12 = vmax.bf16 %v9941_v45, %v9778_v61  ;;  %v10111_v37 = vmax.bf16 %v10079_v47, %v18061_v6  ;;  %v9569_v33 = vrot.slane %v9567_v42, 4 }
 0x4d7   : > { %v8507_v35 = vmax.f32 %v8475_v39, 0.0  ;;  %5365 = vst.msk [vmem:[%s15239_s24 + $0xf0] sm:$0xff] %vm5334_vm0, %v5299_v38  ;;  %v7927_v46 = vpop.permute.xlu1 %7926  ;;  %v9944_v8 = vrot.slane %v18039_v2, 5  ;;  %v9947_v55 = vrot.slane %v9282_v40, 5  ;;  %v10081_v5 = vmax.bf16 %v18061_v6, %v18005_v29  ;;  %v9805_v29 = vld [vmem:[#allocation2 + $0x90] sm:$0xe] }
 0x4d8   : > { %v8199_v22 = vsel %vm4846_vm14, %v8167_v57, %v7927_v46  ;;  %v9575_v14 = vrot.slane %v9573_v59, 5  ;;  %v10112_v56 = vmax.bf16 %v10080_v30, %v18067_v12  ;;  %v9570_v49 = vor.u32 %v9569_v33, %v9565_v9  ;;  %v9284_v33 = vld [vmem:[#allocation2 + $0xa4] sm:$0x1] }
 0x4d9   : > { %8586 = vrot.lane.b32.xlu0 %v8508_v32, %s18994_s20  ;;  %8584 = vrot.lane.b32.xlu1 %v8507_v35, %s18994_s20  ;;  %v9560_v32 = vor.u32 %v9559_v16, %v9556_v43  ;;  %v10082_v63 = vmax.bf16 %v18067_v12, %v18018_v28  ;;  %v9945_v60 = vsel %vm12335_vm13, %v11277_v53, %v9944_v8  ;;  %v9946_v0 = vrot.slane %v9944_v8, 4  ;;  %v18103_v35 = vld [vmem:[#allocation2 + $0x9c] sm:$0xf]  ;;  %v18117_v16 = vld [vmem:[#allocation2 + $0xa0] sm:$0xf] }
 0x4da   : > { %11536 = vmatmul.mubr.msk.bf16.gmra.mxu0 %vm4899_vm15, %v8199_v22  ;;  %v8559_v13 = vpop.permute.xlu0 %8558  ;;  %v9578_v52 = vshrl.u32 %v18070_v20, 16  ;;  %v11292_v62 = vcombine.low %v10111_v37, %v10112_v56  ;;  %v9571_v50 = vrot.slane %v9570_v49, 4  ;;  %v9581_v11 = vshll.u32 %v18070_v20, 16  ;;  %v9806_v8 = vld [vmem:[#allocation2 + $0x9c] sm:$0xe] }
 0x4db   : > { %8655 = vst.msk [vmem:[%s15239_s24] sm:$0xff] %vm8654_vm1, %v8559_v13  ;;  %v5301_v51 = vpop.permute.xlu1 %5300  ;;  %v9561_v19 = vrot.slane %v9560_v32, 4  ;;  %v9587_v17 = vshll.u32 %v18075_v25, 16  ;;  %v9948_v39 = vsel %vm12335_vm13, %v9946_v0, %v9947_v55  ;;  %v9591_v23 = vshrl.u32 %v18075_v25, 16 }
 0x4dc   : > { %5366 = vst.msk [vmem:[%s15239_s24 + $0xf8] sm:$0xff] %vm5334_vm0, %v5301_v51  ;;  %v9580_v57 = vrot.slane %v9578_v52, 4  ;;  %11557 = vmatprep.mubr.msk.bf16.mxu1 %vm554_vm4, %v11292_v62  ;;  %v9576_v41 = vsel %vm12353_vm2, %v9571_v50, %v9575_v14  ;;  %v9583_v24 = vrot.slane %v9581_v11, 5  ;;  %v9597_v30 = vshll.u32 %v9283_v7, 16 }
 0x4dd   : > { %8588 = vrot.lane.b32.xlu1 %v8509_v10, %s18994_s20  ;;  %v9566_v10 = vsel %vm12353_vm2, %v9561_v19, %v9565_v9  ;;  %v9589_v47 = vrot.slane %v9587_v17, 5  ;;  %v9780_v38 = vmax.bf16 %v9576_v41, %v18039_v2  ;;  %v9593_v61 = vrot.slane %v9591_v23, 4 }
 0x4de   : > { %v8563_v58 = vpop.permute.xlu0 %8562  ;;  %v9779_v31 = vmax.bf16 %v9566_v10, %v18032_v27  ;;  %v11278_v40 = vrot.slane %v9805_v29, 9  ;;  %v9584_v46 = vor.u32 %v9583_v24, %v9580_v57  ;;  %v9951_v1 = vrot.slane %v18075_v25, 5 }
 0x4df   : > { %8657 = vst.msk [vmem:[%s15239_s24 + $0x10] sm:$0xff] %vm8654_vm1, %v8563_v58  ;;  %v8561_v28 = vpop.permute.xlu1 %8560  ;;  %v9954_v26 = vrot.slane %v9283_v7, 5  ;;  %v18109_v15 = vmax.bf16 %v9948_v39, %v9780_v38  ;;  %v9594_v27 = vor.u32 %v9593_v61, %v9589_v47  ;;  %v9599_v36 = vrot.slane %v9597_v30, 5 }
 0x4e0   : > { %8656 = vst.msk [vmem:[%s15239_s24 + $0x8] sm:$0xff] %vm8654_vm1, %v8561_v28  ;;  %v18106_v3 = vmax.bf16 %v9945_v60, %v9779_v31  ;;  %v9602_v22 = vshrl.u32 %v18103_v35, 16  ;;  %v9585_v43 = vrot.slane %v9584_v46, 4  ;;  %v9952_v42 = vsel %vm12335_vm13, %v11278_v40, %v9951_v1 }
 0x4e1   : > { %v9953_v45 = vrot.slane %v9951_v1, 4  ;;  %v10114_v9 = vmax.bf16 %v10082_v63, %v18109_v15  ;;  %v9595_v59 = vrot.slane %v9594_v27, 4  ;;  %v10084_v37 = vmax.bf16 %v18109_v15, %v18067_v12 }
 0x4e2   : > { %v10113_v2 = vmax.bf16 %v10081_v5, %v18106_v3  ;;  %v10083_v13 = vmax.bf16 %v18106_v3, %v18061_v6  ;;  %v9590_v53 = vsel %vm12353_vm2, %v9585_v43, %v9589_v47  ;;  %v9604_v32 = vrot.slane %v9602_v22, 4  ;;  %v9264_v43 = vld [vmem:[#allocation2 + $0xac] sm:$0xf] }
 0x4e3   : > { %v8565_v48 = vpop.permute.xlu1 %8564  ;;  %v9955_v51 = vsel %vm12335_vm13, %v9953_v45, %v9954_v26  ;;  %v9605_v14 = vshll.u32 %v18103_v35, 16  ;;  %v9600_v56 = vsel %vm12353_vm2, %v9595_v59, %v9599_v36  ;;  %v9781_v6 = vmax.bf16 %v9590_v53, %v18070_v20 }
 0x4e4   : > { %8658 = vst.msk [vmem:[%s15239_s24 + $0x18] sm:$0xff] %vm8654_vm1, %v8565_v48  ;;  %v11293_v55 = vcombine.low %v10113_v2, %v10114_v9  ;;  %v9611_v49 = vshll.u32 %v18117_v16, 16  ;;  %v9782_v5 = vmax.bf16 %v9600_v56, %v18075_v25  ;;  %v9615_v19 = vshrl.u32 %v18117_v16, 16  ;;  %v9263_v2 = vld [vmem:[#allocation2 + $0xa8] sm:$0xf] }
 0x4e5   : > { %v9607_v63 = vrot.slane %v9605_v14, 5  ;;  %v9621_v60 = vshll.u32 %v9284_v33, 16  ;;  %v18137_v7 = vmax.bf16 %v9952_v42, %v9781_v6  ;;  %v11279_v58 = vrot.slane %v9806_v8, 9 }
 0x4e6   : > { %11558 = vmatmul.mubr.msk.bf16.gmra.mxu1 %vm554_vm4, %v11293_v55  ;;  %v9613_v52 = vrot.slane %v9611_v49, 5  ;;  %v18139_v50 = vmax.bf16 %v9955_v51, %v9782_v5  ;;  %v9617_v11 = vrot.slane %v9615_v19, 4  ;;  %v9958_v10 = vrot.slane %v18117_v16, 5  ;;  %v9807_v55 = vld [vmem:[#allocation2 + $0xa8] sm:$0xe] }
 0x4e7   : > { %v9608_v20 = vor.u32 %v9607_v63, %v9604_v32  ;;  %v9623_v17 = vrot.slane %v9621_v60, 5  ;;  %v10115_v28 = vmax.bf16 %v10083_v13, %v18137_v7  ;;  %v9961_v31 = vrot.slane %v9284_v33, 5  ;;  %v9285_v13 = vld [vmem:[#allocation2 + $0xb0] sm:$0x1] }
 0x4e8   : > { %v10116_v57 = vmax.bf16 %v10084_v37, %v18139_v50  ;;  %v9618_v41 = vor.u32 %v9617_v11, %v9613_v52  ;;  %v9959_v61 = vsel %vm12335_vm13, %v11279_v58, %v9958_v10  ;;  %v9960_v26 = vrot.slane %v9958_v10, 4 }
 0x4e9   : > { %v11525_v12 = vpop.f32.mrf.mxu0  ;;  %v9609_v23 = vrot.slane %v9608_v20, 4  ;;  %v10085_v9 = vmax.bf16 %v18137_v7, %v18106_v3  ;;  %v10086_v59 = vmax.bf16 %v18139_v50, %v18109_v15  ;;  %v9626_v51 = vshrl.u32 %v9263_v2, 16 }
 0x4ea   : > { %v8441_v0 = vmul.f32 %v18000_v34, %v11525_v12  ;;  %v11294_v40 = vcombine.low %v10115_v28, %v10116_v57  ;;  %v9619_v1 = vrot.slane %v9618_v41, 4  ;;  %v9962_v45 = vsel %vm12335_vm13, %v9960_v26, %v9961_v31 }
 0x4eb   : > { %v8353_v62 = vpop.f32.mrf.mxu0  ;;  %v9614_v46 = vsel %vm12353_vm2, %v9609_v23, %v9613_v52  ;;  %v9629_v32 = vshll.u32 %v9263_v2, 16  ;;  %v9635_v14 = vshll.u32 %v9264_v43, 16  ;;  %v9639_v8 = vshrl.u32 %v9264_v43, 16  ;;  %v9265_v52 = vld [vmem:[#allocation2 + $0xb4] sm:$0xf] }
 0x4ec   : > { %v8480_v25 = vadd.f32 %v18014_v4, %v8441_v0  ;;  %v8439_v29 = vmul.f32 %v18000_v34, %v8353_v62  ;;  %v9783_v22 = vmax.bf16 %v9614_v46, %v18103_v35  ;;  %11561 = vmatprep.mubr.msk.bf16.mxu1 %vm554_vm4, %v11294_v40  ;;  %v9624_v42 = vsel %vm12353_vm2, %v9619_v1, %v9623_v17  ;;  %v9266_v17 = vld [vmem:[#allocation2 + $0xb8] sm:$0xf] }
 0x4ed   : > { %v11526_v39 = vpop.f32.mrf.mxu0  ;;  %v9784_v33 = vmax.bf16 %v9624_v42, %v18117_v16  ;;  %v9645_v6 = vshll.u32 %v9285_v13, 16  ;;  %v9628_v49 = vrot.slane %v9626_v51, 4  ;;  %v9631_v12 = vrot.slane %v9629_v32, 5 }
 0x4ee   : > { %v8512_v24 = vmax.f32 %v8480_v25, 0.0  ;;  %v8478_v47 = vadd.f32 %v18014_v4, %v8439_v29  ;;  %v8442_v38 = vmul.f32 %v18000_v34, %v11526_v39  ;;  %v18167_v53 = vmax.bf16 %v9959_v61, %v9783_v22  ;;  %v9286_v25 = vld [vmem:[#allocation2 + $0xbc] sm:$0x1]  ;;  %v9808_v61 = vld [vmem:[#allocation2 + $0xb4] sm:$0xe] }
 0x4ef   : > { %v8356_v30 = vpop.f32.mrf.mxu0  ;;  %v18169_v3 = vmax.bf16 %v9962_v45, %v9784_v33  ;;  %v9637_v5 = vrot.slane %v9635_v14, 5  ;;  %v9641_v63 = vrot.slane %v9639_v8, 4  ;;  %v9647_v19 = vrot.slane %v9645_v6, 5  ;;  %v9287_v6 = vld [vmem:[#allocation2 + $0xc8] sm:$0x1] }
 0x4f0   : > { %v8510_v48 = vmax.f32 %v8478_v47, 0.0  ;;  %v8481_v27 = vadd.f32 %v18014_v4, %v8442_v38  ;;  %v8440_v36 = vmul.f32 %v18000_v34, %v8356_v30  ;;  %v10117_v15 = vmax.bf16 %v10085_v9, %v18167_v53 }
 0x4f1   : > { %v10118_v16 = vmax.bf16 %v10086_v59, %v18169_v3  ;;  %v11280_v60 = vrot.slane %v9807_v55, 9  ;;  %v9965_v0 = vrot.slane %v9264_v43, 5  ;;  %v9632_v58 = vor.u32 %v9631_v12, %v9628_v49 }
 0x4f2   : > { %v8513_v37 = vmax.f32 %v8481_v27, 0.0  ;;  %v8479_v35 = vadd.f32 %v18014_v4, %v8440_v36  ;;  %8590 = vrot.lane.b32.xlu0 %v8510_v48, %s18994_s20  ;;  %v9642_v62 = vor.u32 %v9641_v63, %v9637_v5  ;;  %v9968_v20 = vrot.slane %v9285_v13, 5  ;;  %v18189_v36 = vld [vmem:[#allocation2 + $0xc0] sm:$0xf] }
 0x4f3   : > { %v10087_v11 = vmax.bf16 %v18167_v53, %v18137_v7  ;;  %v11295_v29 = vcombine.low %v10117_v15, %v10118_v16  ;;  %v9966_v28 = vsel %vm12335_vm13, %v11280_v60, %v9965_v0  ;;  %v9967_v10 = vrot.slane %v9965_v0, 4  ;;  %v9268_v15 = vld [vmem:[#allocation2 + $0xc4] sm:$0xf] }
 0x4f4   : > { %v8511_v56 = vmax.f32 %v8479_v35, 0.0  ;;  %v10088_v39 = vmax.bf16 %v18169_v3, %v18139_v50  ;;  %v9633_v57 = vrot.slane %v9632_v58, 4  ;;  %v9643_v23 = vrot.slane %v9642_v62, 4 }
 0x4f5   : > { %v9650_v41 = vshrl.u32 %v9265_v52, 16  ;;  %v9653_v31 = vshll.u32 %v9265_v52, 16  ;;  %11562 = vmatmul.mubr.msk.bf16.gmra.mxu1 %vm554_vm4, %v11295_v29  ;;  %v9969_v7 = vsel %vm12335_vm13, %v9967_v10, %v9968_v20  ;;  %v9663_v47 = vshrl.u32 %v9266_v17, 16  ;;  %v9809_v29 = vld [vmem:[#allocation2 + $0xc0] sm:$0xe] }
 0x4f6   : > { %8594 = vrot.lane.b32.xlu0 %v8512_v24, %s18994_s20  ;;  %8592 = vrot.lane.b32.xlu1 %v8511_v56, %s18994_s20  ;;  %v9659_v24 = vshll.u32 %v9266_v17, 16  ;;  %v9669_v38 = vshll.u32 %v9286_v25, 16  ;;  %v9638_v30 = vsel %vm12353_vm2, %v9633_v57, %v9637_v5  ;;  %v9648_v50 = vsel %vm12353_vm2, %v9643_v23, %v9647_v19  ;;  %v8799_v23 = vld [vmem:[#allocation2 + $0xd4] sm:$0x1] }
 0x4f7   : > { %v9652_v40 = vrot.slane %v9650_v41, 4  ;;  %v9655_v46 = vrot.slane %v9653_v31, 5  ;;  %v9785_v1 = vmax.bf16 %v9638_v30, %v9263_v2  ;;  %v9786_v26 = vmax.bf16 %v9648_v50, %v9264_v43 }
 0x4f8   : > { %v9661_v48 = vrot.slane %v9659_v24, 5  ;;  %v9665_v27 = vrot.slane %v9663_v47, 4  ;;  %v9671_v42 = vrot.slane %v9669_v38, 5  ;;  %v11281_v45 = vrot.slane %v9808_v61, 9  ;;  %v18223_v47 = vld [vmem:[#allocation2 + $0xd0] sm:$0xf] }
 0x4f9   : > { %v9656_v22 = vor.u32 %v9655_v46, %v9652_v40  ;;  %v9972_v9 = vrot.slane %v9266_v17, 5  ;;  %v18191_v59 = vmax.bf16 %v9966_v28, %v9785_v1  ;;  %v18193_v13 = vmax.bf16 %v9969_v7, %v9786_v26 }
 0x4fa   : > { %8596 = vrot.lane.b32.xlu1 %v8513_v37, %s18994_s20  ;;  %v9666_v37 = vor.u32 %v9665_v27, %v9661_v48  ;;  %v9975_v35 = vrot.slane %v9286_v25, 5  ;;  %v9674_v32 = vshrl.u32 %v18189_v36, 16  ;;  %v9683_v20 = vshll.u32 %v9268_v15, 16 }
 0x4fb   : > { %v9657_v51 = vrot.slane %v9656_v22, 4  ;;  %v9973_v2 = vsel %vm12335_vm13, %v11281_v45, %v9972_v9  ;;  %v9974_v43 = vrot.slane %v9972_v9, 4  ;;  %v10119_v14 = vmax.bf16 %v10087_v11, %v18191_v59 }
 0x4fc   : > { %v10120_v8 = vmax.bf16 %v10088_v39, %v18193_v13  ;;  %v9667_v55 = vrot.slane %v9666_v37, 4  ;;  %v10089_v56 = vmax.bf16 %v18191_v59, %v18167_v53  ;;  %v10090_v5 = vmax.bf16 %v18193_v13, %v18169_v3 }
 0x4fd   : > { %v9662_v49 = vsel %vm12353_vm2, %v9657_v51, %v9661_v48  ;;  %v9976_v12 = vsel %vm12335_vm13, %v9974_v43, %v9975_v35  ;;  %v9676_v63 = vrot.slane %v9674_v32, 4  ;;  %v9677_v53 = vshll.u32 %v18189_v36, 16 }
 0x4fe   : > { %v8567_v33 = vpop.permute.xlu0 %8566  ;;  %v11296_v16 = vcombine.low %v10119_v14, %v10120_v8  ;;  %v9672_v19 = vsel %vm12353_vm2, %v9667_v55, %v9671_v42  ;;  %v9787_v60 = vmax.bf16 %v9662_v49, %v9265_v52  ;;  %v9687_v11 = vshrl.u32 %v9268_v15, 16 }
 0x4ff   : > { %8659 = vst.msk [vmem:[%s15239_s24 + $0x20] sm:$0xff] %vm8654_vm1, %v8567_v33  ;;  %v9788_v62 = vmax.bf16 %v9672_v19, %v9266_v17  ;;  %v9693_v25 = vshll.u32 %v9287_v6, 16  ;;  %v9679_v28 = vrot.slane %v9677_v53, 5  ;;  %v9979_v10 = vrot.slane %v9268_v15, 5  ;;  %v8745_v17 = vld [vmem:[#allocation2 + $0xcc] sm:$0x1] }
 0x500   : > { %11565 = vmatprep.mubr.msk.bf16.mxu1 %vm554_vm4, %v11296_v16  ;;  %v18218_v3 = vmax.bf16 %v9973_v2, %v9787_v60  ;;  %v9685_v39 = vrot.slane %v9683_v20, 5  ;;  %v9689_v57 = vrot.slane %v9687_v11, 4  ;;  %v11282_v24 = vrot.slane %v9809_v29, 9  ;;  %v9810_v19 = vld [vmem:[#allocation2 + $0xcc] sm:$0xe] }
 0x501   : > { %v18220_v52 = vmax.bf16 %v9976_v12, %v9788_v62  ;;  %v9680_v31 = vor.u32 %v9679_v28, %v9676_v63  ;;  %v9695_v7 = vrot.slane %v9693_v25, 5  ;;  %v9981_v50 = vrot.slane %v9979_v10, 4 }
 0x502   : > { %v8571_v0 = vpop.permute.xlu0 %8570  ;;  %v8569_v58 = vpop.permute.xlu1 %8568  ;;  %v10121_v41 = vmax.bf16 %v10089_v56, %v18218_v3  ;;  %v9690_v30 = vor.u32 %v9689_v57, %v9685_v39  ;;  %v9982_v40 = vrot.slane %v9287_v6, 5  ;;  %v8746_v1 = vsel %vm12018_vm5, 4286644096, %v8745_v17 }
 0x503   : > { %8661 = vst.msk [vmem:[%s15239_s24 + $0x30] sm:$0xff] %vm8654_vm1, %v8571_v0  ;;  %8660 = vst.msk [vmem:[%s15239_s24 + $0x28] sm:$0xff] %vm8654_vm1, %v8569_v58  ;;  %v10122_v61 = vmax.bf16 %v10090_v5, %v18220_v52  ;;  %v9681_v46 = vrot.slane %v9680_v31, 4  ;;  %v8800_v26 = vsel %vm12024_vm6, 4286644096, %v8799_v23  ;;  %v9707_v22 = vshll.u32 %v18223_v47, 16 }
 0x504   : > { %v9691_v27 = vrot.slane %v9690_v30, 4  ;;  %8747 = vst [vmem:[#allocation2 + $0xcc] sm:$0x1] %v8746_v1  ;;  %8801 = vst [vmem:[#allocation2 + $0xd4] sm:$0x1] %v8800_v26  ;;  %v9980_v45 = vsel %vm12335_vm13, %v11282_v24, %v9979_v10  ;;  %v10091_v9 = vmax.bf16 %v18218_v3, %v18191_v59  ;;  %v9711_v54 = vshrl.u32 %v18223_v47, 16 }
 0x505   : > { %v11297_v48 = vcombine.low %v10121_v41, %v10122_v61  ;;  %v9686_v42 = vsel %vm12353_vm2, %v9681_v46, %v9685_v39  ;;  %v9983_v35 = vsel %vm12335_vm13, %v9981_v50, %v9982_v40  ;;  %v9709_v33 = vrot.slane %v9707_v22, 5 }
 0x506   : > { %v8573_v38 = vpop.permute.xlu1 %8572  ;;  %v9696_v21 = vsel %vm12353_vm2, %v9691_v27, %v9695_v7  ;;  %v9789_v37 = vmax.bf16 %v9686_v42, %v18189_v36  ;;  %v10092_v2 = vmax.bf16 %v18220_v52, %v18193_v13  ;;  %v9713_v43 = vrot.slane %v9711_v54, 4 }
 0x507   : > { %8662 = vst.msk [vmem:[%s15239_s24 + $0x38] sm:$0xff] %vm8654_vm1, %v8573_v38  ;;  %11566 = vmatmul.mubr.msk.bf16.gmra.mxu1 %vm554_vm4, %v11297_v48  ;;  %v9790_v51 = vmax.bf16 %v9696_v21, %v9268_v15  ;;  %v9986_v59 = vrot.slane %v18223_v47, 5  ;;  %v11283_v62 = vrot.slane %v9810_v19, 9 }
 0x508   : > { %v10059_v32 = vmax.bf16 %v9980_v45, %v9789_v37  ;;  %v9714_v8 = vor.u32 %v9713_v43, %v9709_v33 }
 0x509   : > { %v10060_v14 = vmax.bf16 %v9983_v35, %v9790_v51  ;;  %v9988_v36 = vrot.slane %v9986_v59, 4  ;;  %v9987_v61 = vsel %vm12335_vm13, %v11283_v62, %v9986_v59 }
 0x50a   : > { %v10123_v55 = vmax.bf16 %v10091_v9, %v10059_v32  ;;  %v9715_v12 = vrot.slane %v9714_v8, 4  ;;  %v10093_v30 = vmax.bf16 %v10059_v32, %v18218_v3 }
 0x50b   : > { %v10124_v56 = vmax.bf16 %v10092_v2, %v10060_v14  ;;  %v9269_v6 = vld [vmem:[#allocation2 + $0xcc] sm:$0xf]  ;;  %v9288_v49 = vld [vmem:[#allocation2 + $0xd4] sm:$0x1]  ;;  %v10094_v31 = vmax.bf16 %v10060_v14, %v18220_v52 }
 0x50c   : > { %v9698_v5 = vshrl.u32 %v9269_v6, 16  ;;  %v9701_v63 = vshll.u32 %v9269_v6, 16  ;;  %v9717_v16 = vshll.u32 %v9288_v49, 16  ;;  %v9989_v15 = vrot.slane %v9288_v49, 5 }
 0x50d   : > { %v11298_v60 = vcombine.low %v10123_v55, %v10124_v56 }
 0x50e   : > { %v9700_v13 = vrot.slane %v9698_v5, 4  ;;  %v9703_v0 = vrot.slane %v9701_v63, 5  ;;  %v9719_v58 = vrot.slane %v9717_v16, 5  ;;  %v9990_v28 = vsel %vm12335_vm13, %v9988_v36, %v9989_v15 }
 0x50f   : > { %11569 = vmatprep.mubr.msk.bf16.mxu1 %vm554_vm4, %v11298_v60 }
 0x510   : > { %v9704_v25 = vor.u32 %v9703_v0, %v9700_v13  ;;  %v9720_v29 = vsel %vm12353_vm2, %v9715_v12, %v9719_v58 }
 0x511   : > { %v9792_v39 = vmax.bf16 %v9720_v29, %v18223_v47 }
 0x512   : > { %v11529_v53 = vpop.f32.mrf.mxu0  ;;  %v9705_v17 = vrot.slane %v9704_v25, 4 }
 0x513   : > { %v8445_v20 = vmul.f32 %v18000_v34, %v11529_v53  ;;  %v10062_v41 = vmax.bf16 %v9990_v28, %v9792_v39 }
 0x514   : > { %v8369_v11 = vpop.f32.mrf.mxu0  ;;  %v9710_v38 = vsel %vm12353_vm2, %v9705_v17, %v9709_v33 }
 0x515   : > { %v8443_v10 = vmul.f32 %v18000_v34, %v8369_v11  ;;  %v8484_v7 = vadd.f32 %v18014_v4, %v8445_v20  ;;  %v9791_v46 = vmax.bf16 %v9710_v38, %v9269_v6  ;;  %v10126_v44 = vmax.bf16 %v10094_v31, %v10062_v41 }
 0x516   : > { %v11530_v57 = vpop.f32.mrf.mxu0 }
 0x517   : > { %v8482_v23 = vadd.f32 %v18014_v4, %v8443_v10  ;;  %v8446_v47 = vmul.f32 %v18000_v34, %v11530_v57  ;;  %v10061_v1 = vmax.bf16 %v9987_v61, %v9791_v46  ;;  %v8516_v26 = vmax.f32 %v8484_v7, 0.0 }
 0x518   : > { %v8372_v24 = vpop.f32.mrf.mxu0 }
 0x519   : > { %v8514_v50 = vmax.f32 %v8482_v23, 0.0  ;;  %v8444_v40 = vmul.f32 %v18000_v34, %v8372_v24  ;;  %v8485_v18 = vadd.f32 %v18014_v4, %v8446_v47  ;;  %v10125_v48 = vmax.bf16 %v10093_v30, %v10061_v1 }
 0x51b   : > { %v8483_v52 = vadd.f32 %v18014_v4, %v8444_v40  ;;  %8598 = vrot.lane.b32.xlu0 %v8514_v50, %s18994_s20  ;;  %v11299_v27 = vcombine.low %v10125_v48, %v10126_v44  ;;  %v8517_v22 = vmax.f32 %v8485_v18, 0.0  ;;  %v18331_v50 = vld [vmem:[%s18600_s11] ss:$0 sm:$0xff] }
 0x51c   : > { %v18341_v18 = vld [vmem:[%s18601_s12] ss:$0 sm:$0xff] }
 0x51d   : > { %v8515_v3 = vmax.f32 %v8483_v52, 0.0  ;;  %11570 = vmatmul.mubr.msk.bf16.gmra.mxu1 %vm554_vm4, %v11299_v27  ;;  %vm10658_vm4 = vcmask 195744  }
 0x51f   : > { %8602 = vrot.lane.b32.xlu0 %v8516_v26, %s18994_s20  ;;  %8600 = vrot.lane.b32.xlu1 %v8515_v3, %s18994_s20 }
 0x523   : > { %8604 = vrot.lane.b32.xlu1 %v8517_v22, %s18994_s20 }
 0x528   : > { %v8575_v42 = vpop.permute.xlu0 %8574 }
 0x529   : > { %8663 = vst.msk [vmem:[%s15239_s24 + $0x40] sm:$0xff] %vm8654_vm1, %v8575_v42 }
 0x52c   : > { %v8579_v45 = vpop.permute.xlu0 %8578  ;;  %v8577_v9 = vpop.permute.xlu1 %8576 }
 0x52d   : > { %8665 = vst.msk [vmem:[%s15239_s24 + $0x50] sm:$0xff] %vm8654_vm1, %v8579_v45  ;;  %8664 = vst.msk [vmem:[%s15239_s24 + $0x48] sm:$0xff] %vm8654_vm1, %v8577_v9 }
 0x530   : > { %v8581_v54 = vpop.permute.xlu1 %8580 }
 0x531   : > { %8666 = vst.msk [vmem:[%s15239_s24 + $0x58] sm:$0xff] %vm8654_vm1, %v8581_v54 }
 0x53c   : > { %v11533_v21 = vpop.f32.mrf.mxu0 }
 0x53d   : > { %v8449_v35 = vmul.f32 %v18000_v34, %v11533_v21 }
 0x53e   : > { %v8385_v37 = vpop.f32.mrf.mxu0 }
 0x53f   : > { %v8447_v33 = vmul.f32 %v18000_v34, %v8385_v37  ;;  %v8488_v59 = vadd.f32 %v18014_v4, %v8449_v35 }
 0x540   : > { %v11534_v51 = vpop.f32.mrf.mxu0 }
 0x541   : > { %v8486_v2 = vadd.f32 %v18014_v4, %v8447_v33  ;;  %v8450_v14 = vmul.f32 %v18000_v34, %v11534_v51  ;;  %v8520_v56 = vmax.f32 %v8488_v59, 0.0 }
 0x542   : > { %v8388_v43 = vpop.f32.mrf.mxu0 }
 0x543   : > { %v8518_v32 = vmax.f32 %v8486_v2, 0.0  ;;  %v8448_v8 = vmul.f32 %v18000_v34, %v8388_v43  ;;  %v8489_v6 = vadd.f32 %v18014_v4, %v8450_v14 }
 0x545   : > { %v8487_v55 = vadd.f32 %v18014_v4, %v8448_v8  ;;  %8606 = vrot.lane.b32.xlu0 %v8518_v32, %s18994_s20  ;;  %v8521_v36 = vmax.f32 %v8489_v6, 0.0 }
 0x547   : > { %v8519_v49 = vmax.f32 %v8487_v55, 0.0  ;;  %v8583_v12 = vpop.permute.xlu0 %8582 }
 0x548   : > { %8667 = vst.msk [vmem:[%s15239_s24 + $0x60] sm:$0xff] %vm8654_vm1, %v8583_v12 }
 0x549   : > { %8610 = vrot.lane.b32.xlu0 %v8520_v56, %s18994_s20  ;;  %8608 = vrot.lane.b32.xlu1 %v8519_v49, %s18994_s20 }
 0x54b   : > { %v8587_v5 = vpop.permute.xlu0 %8586  ;;  %v8585_v63 = vpop.permute.xlu1 %8584 }
 0x54c   : > { %8669 = vst.msk [vmem:[%s15239_s24 + $0x70] sm:$0xff] %vm8654_vm1, %v8587_v5  ;;  %8668 = vst.msk [vmem:[%s15239_s24 + $0x68] sm:$0xff] %vm8654_vm1, %v8585_v63 }
 0x54d   : > { %8612 = vrot.lane.b32.xlu1 %v8521_v36, %s18994_s20 }
 0x54f   : > { %v8589_v16 = vpop.permute.xlu1 %8588 }
 0x550   : > { %8670 = vst.msk [vmem:[%s15239_s24 + $0x78] sm:$0xff] %vm8654_vm1, %v8589_v16 }
 0x55b   : > { %v11543_v53 = vpop.f32.mrf.mxu1 }
 0x55c   : > { %v10429_v42 = vmul.f32 %v11543_v53, %v18331_v50 }
 0x55d   : > { %v10293_v0 = vpop.f32.mrf.mxu1 }
 0x55e   : > { %v10427_v52 = vmul.f32 %v18331_v50, %v10293_v0 }
 0x55f   : > { %v11544_v58 = vpop.f32.mrf.mxu1 }
 0x560   : > { %v10466_v45 = vadd.f32 %v18341_v18, %v10427_v52  ;;  %v10430_v33 = vmul.f32 %v11544_v58, %v18331_v50 }
 0x561   : > { %v10296_v62 = vpop.f32.mrf.mxu1 }
 0x562   : > { %v10428_v37 = vmul.f32 %v18331_v50, %v10296_v62  ;;  %v10498_v2 = vmax.f32 %v10466_v45, 0.0 }
 0x564   : > { %v8591_v19 = vpop.permute.xlu0 %8590  ;;  %v10467_v43 = vadd.f32 %v18341_v18, %v10428_v37 }
 0x565   : > { %8671 = vst.msk [vmem:[%s15239_s24 + $0x80] sm:$0xff] %vm8654_vm1, %v8591_v19 }
 0x566   : > { %v10499_v55 = vmax.f32 %v10467_v43, 0.0 }
 0x568   : > { %v8595_v15 = vpop.permute.xlu0 %8594  ;;  %v8593_v60 = vpop.permute.xlu1 %8592 }
 0x569   : > { %8673 = vst.msk [vmem:[%s15239_s24 + $0x90] sm:$0xff] %vm8654_vm1, %v8595_v15  ;;  %8672 = vst.msk [vmem:[%s15239_s24 + $0x88] sm:$0xff] %vm8654_vm1, %v8593_v60 }
 0x56a   : > { %v11547_v20 = vpop.f32.mrf.mxu1 }
 0x56b   : > { %v10433_v14 = vmul.f32 %v11547_v20, %v18331_v50 }
 0x56c   : > { %v8597_v13 = vpop.permute.xlu1 %8596  ;;  %v10309_v11 = vpop.f32.mrf.mxu1 }
 0x56d   : > { %8674 = vst.msk [vmem:[%s15239_s24 + $0x98] sm:$0xff] %vm8654_vm1, %v8597_v13  ;;  %v10431_v59 = vmul.f32 %v18331_v50, %v10309_v11  ;;  %v10472_v36 = vadd.f32 %v18341_v18, %v10433_v14 }
 0x56e   : > { %v18310_v25 = vpop.f32.mrf.mxu1 }
 0x56f   : > { %v10470_v56 = vadd.f32 %v18341_v18, %v10431_v59  ;;  %v10434_v63 = vmul.f32 %v18310_v25, %v18331_v50  ;;  %v10504_v60 = vmax.f32 %v10472_v36, 0.0 }
 0x570   : > { %v10312_v29 = vpop.f32.mrf.mxu1 }
 0x571   : > { %v10432_v6 = vmul.f32 %v18331_v50, %v10312_v29  ;;  %v10502_v5 = vmax.f32 %v10470_v56, 0.0  ;;  %v10473_v13 = vadd.f32 %v18341_v18, %v10434_v63 }
 0x573   : > { %v10471_v16 = vadd.f32 %v18341_v18, %v10432_v6 }
 0x575   : > { %v10503_v0 = vmax.f32 %v10471_v16, 0.0 }
 0x580   : > { %v18312_v28 = vpop.f32.mrf.mxu1 }
 0x581   : > { %v10437_v53 = vmul.f32 %v18312_v28, %v18331_v50  ;;  %v10505_v28 = vmax.f32 %v10473_v13, 0.0 }
 0x582   : > { %v10325_v10 = vpop.f32.mrf.mxu1 }
 0x583   : > { %v10435_v19 = vmul.f32 %v18331_v50, %v10325_v10  ;;  %v10476_v25 = vadd.f32 %v18341_v18, %v10437_v53 }
 0x584   : > { %v18316_v57 = vpop.f32.mrf.mxu1 }
 0x585   : > { %v10474_v58 = vadd.f32 %v18341_v18, %v10435_v19  ;;  %v10438_v29 = vmul.f32 %v18316_v57, %v18331_v50  ;;  %v10508_v57 = vmax.f32 %v10476_v25, 0.0 }
 0x586   : > { %v10328_v31 = vpop.f32.mrf.mxu1 }
 0x587   : > { %v10436_v62 = vmul.f32 %v18331_v50, %v10328_v31  ;;  %v10506_v10 = vmax.f32 %v10474_v58, 0.0 }
 0x58d   : > { %v8599_v39 = vpop.permute.xlu0 %8598 }
 0x58e   : > { %8675 = vst.msk [vmem:[%s15239_s24 + $0xa0] sm:$0xff] %vm8654_vm1, %v8599_v39  ;;  %v10475_v39 = vadd.f32 %v18341_v18, %v10436_v62 }
 0x58f   : > { %v18324_v24 = vpop.f32.mrf.mxu1 }
 0x591   : > { %v8603_v17 = vpop.permute.xlu0 %8602  ;;  %v8601_v23 = vpop.permute.xlu1 %8600 }
 0x592   : > { %8677 = vst.msk [vmem:[%s15239_s24 + $0xb0] sm:$0xff] %vm8654_vm1, %v8603_v17  ;;  %8676 = vst.msk [vmem:[%s15239_s24 + $0xa8] sm:$0xff] %vm8654_vm1, %v8601_v23  ;;  %v18333_v40 = vpop.f32.mrf.mxu1 }
 0x593   : > { %v10439_v17 = vmul.f32 %v18331_v50, %v18333_v40 }
 0x594   : > { %v18345_v27 = vpop.f32.mrf.mxu1 }
 0x595   : > { %v8605_v41 = vpop.permute.xlu1 %8604 }
 0x596   : > { %8678 = vst.msk [vmem:[%s15239_s24 + $0xb8] sm:$0xff] %vm8654_vm1, %v8605_v41  ;;  %v10344_v35 = vpop.f32.mrf.mxu1 }
 0x59a   : > { %v11537_v7 = vpop.f32.mrf.mxu0 }
 0x59b   : > { %v8453_v61 = vmul.f32 %v18000_v34, %v11537_v7  ;;  %v10477_v7 = vadd.f32 %v18341_v18, %v10438_v29 }
 0x59c   : > { %v8401_v38 = vpop.f32.mrf.mxu0 }
 0x59d   : > { %v8451_v30 = vmul.f32 %v18000_v34, %v8401_v38  ;;  %v8492_v44 = vadd.f32 %v18014_v4, %v8453_v61  ;;  %v10507_v38 = vmax.f32 %v10475_v39, 0.0  ;;  %v10441_v61 = vmul.f32 %v18324_v24, %v18331_v50 }
 0x59e   : > { %v11538_v47 = vpop.f32.mrf.mxu0  ;;  %v10509_v52 = vmax.f32 %v10477_v7, 0.0 }
 0x59f   : > { %v8490_v46 = vadd.f32 %v18014_v4, %v8451_v30  ;;  %v8454_v3 = vmul.f32 %v18000_v34, %v11538_v47  ;;  %v8524_v9 = vmax.f32 %v8492_v44, 0.0  ;;  %v10478_v30 = vadd.f32 %v18341_v18, %v10439_v17 }
 0x5a0   : > { %v8404_v1 = vpop.f32.mrf.mxu0  ;;  %v10440_v47 = vmul.f32 %v18331_v50, %v10344_v35  ;;  %v10480_v44 = vadd.f32 %v18341_v18, %v10441_v61 }
 0x5a1   : > { %v8522_v26 = vmax.f32 %v8490_v46, 0.0  ;;  %v8452_v48 = vmul.f32 %v18000_v34, %v8404_v1  ;;  %v8493_v54 = vadd.f32 %v18014_v4, %v8454_v3  ;;  %v10468_v34 = vadd.f32 %v18341_v18, %v10429_v42 }
 0x5a2   : > { %v10442_v1 = vmul.f32 %v18345_v27, %v18331_v50  ;;  %v10479_v24 = vadd.f32 %v18341_v18, %v10440_v47  ;;  %v10512_v45 = vmax.f32 %v10480_v44, 0.0 }
 0x5a3   : > { %v8491_v22 = vadd.f32 %v18014_v4, %v8452_v48  ;;  %8614 = vrot.lane.b32.xlu0 %v8522_v26, %s18994_s20  ;;  %v8525_v51 = vmax.f32 %v8493_v54, 0.0  ;;  %v10469_v4 = vadd.f32 %v18341_v18, %v10430_v33  ;;  %v10500_v8 = vmax.f32 %v10468_v34, 0.0 }
 0x5a4   : > { %v10510_v26 = vmax.f32 %v10478_v30, 0.0 }
 0x5a5   : > { %v8523_v21 = vmax.f32 %v8491_v22, 0.0  ;;  %v10501_v12 = vmax.f32 %v10469_v4, 0.0  ;;  %v10481_v22 = vadd.f32 %v18341_v18, %v10442_v1 }
 0x5a6   : > { %v18359_v32 = vpop.f32.mrf.mxu1 }
 0x5a7   : > { %8618 = vrot.lane.b32.xlu0 %v8524_v9, %s18994_s20  ;;  %8616 = vrot.lane.b32.xlu1 %v8523_v21, %s18994_s20  ;;  %v10445_v42 = vmul.f32 %v18359_v32, %v18331_v50  ;;  %v10511_v9 = vmax.f32 %v10479_v24, 0.0  ;;  %v10513_v37 = vmax.f32 %v10481_v22, 0.0 }
 0x5a8   : > { %v10357_v49 = vpop.f32.mrf.mxu1 }
 0x5a9   : > { %v10443_v3 = vmul.f32 %v18331_v50, %v10357_v49  ;;  %v10484_v35 = vadd.f32 %v18341_v18, %v10445_v42 }
 0x5aa   : > { %v11560_v15 = vpop.f32.mrf.mxu1 }
 0x5ab   : > { %10562 = vrot.lane.b32.xlu0 %v10498_v2, %s18988_s22  ;;  %8620 = vrot.lane.b32.xlu1 %v8525_v51, %s18994_s20  ;;  %v10482_v27 = vadd.f32 %v18341_v18, %v10443_v3  ;;  %v10446_v33 = vmul.f32 %v11560_v15, %v18331_v50  ;;  %v10516_v59 = vmax.f32 %v10484_v35, 0.0  ;;  %s10705_s20 = sshll.u32 %s15239_s24, 4  ;;  %s18542_s20 = int_to_ptr.vmem [resolvable:$true] %s10705_s20 }
 0x5ac   : > { %v10360_v20 = vpop.f32.mrf.mxu1  ;;  %s11815_s15 = scalar_lea.vmem %s18542_s20, 4096  ;;  %p11822_p0 = scmp.lt.s32.totalorder %s18542_s20, %s11820_s23 }
 0x5ad   : > { %v10444_v54 = vmul.f32 %v18331_v50, %v10360_v20  ;;  %v10514_v34 = vmax.f32 %v10482_v27, 0.0  ;;  %v10485_v4 = vadd.f32 %v18341_v18, %v10446_v33  ;;  %p11816_p11 = scmp.ne.s32.totalorder %s18542_s20, %s11815_s15 }
 0x5af   : > { %10566 = vrot.lane.b32.xlu0 %v10500_v8, %s18988_s22  ;;  %10564 = vrot.lane.b32.xlu1 %v10499_v55, %s18988_s22  ;;  %v10483_v51 = vadd.f32 %v18341_v18, %v10444_v54  ;;  %v10517_v36 = vmax.f32 %v10485_v4, 0.0  ;;  %p11817_p12 = pnand %p11816_p11, %p11999_p5 }
 0x5b1   : > { %v10515_v14 = vmax.f32 %v10483_v51, 0.0  ;;  %p11818_p13 = pneg %p11817_p12 }
 0x5b3   : > { %10570 = vrot.lane.b32.xlu0 %v10502_v5, %s18988_s22  ;;  %10568 = vrot.lane.b32.xlu1 %v10501_v12, %s18988_s22 }
 0x5b5   : > { %v11563_v23 = vpop.f32.mrf.mxu1 }
 0x5b6   : > { %v10449_v32 = vmul.f32 %v11563_v23, %v18331_v50 }
 0x5b7   : > { %v8607_v11 = vpop.permute.xlu0 %8606  ;;  %10574 = vrot.lane.b32.xlu0 %v10504_v60, %s18988_s22  ;;  %10572 = vrot.lane.b32.xlu1 %v10503_v0, %s18988_s22  ;;  %v10373_v46 = vpop.f32.mrf.mxu1 }
 0x5b8   : > { %8679 = vst.msk [vmem:[%s15239_s24 + $0xc0] sm:$0xff] %vm8654_vm1, %v8607_v11  ;;  %v10447_v2 = vmul.f32 %v18331_v50, %v10373_v46  ;;  %v10488_v49 = vadd.f32 %v18341_v18, %v10449_v32 }
 0x5b9   : > { %v11564_v48 = vpop.f32.mrf.mxu1 }
 0x5ba   : > { %v10486_v8 = vadd.f32 %v18341_v18, %v10447_v2  ;;  %v10450_v12 = vmul.f32 %v11564_v48, %v18331_v50  ;;  %v10520_v15 = vmax.f32 %v10488_v49, 0.0 }
 0x5bb   : > { %v8611_v41 = vpop.permute.xlu0 %8610  ;;  %v8609_v31 = vpop.permute.xlu1 %8608  ;;  %10578 = vrot.lane.b32.xlu0 %v10506_v10, %s18988_s22  ;;  %10576 = vrot.lane.b32.xlu1 %v10505_v28, %s18988_s22 }
 0x5bc   : > { %8681 = vst.msk [vmem:[%s15239_s24 + $0xd0] sm:$0xff] %vm8654_vm1, %v8611_v41  ;;  %8680 = vst.msk [vmem:[%s15239_s24 + $0xc8] sm:$0xff] %vm8654_vm1, %v8609_v31  ;;  %v10376_v21 = vpop.f32.mrf.mxu1  ;;  %v10518_v5 = vmax.f32 %v10486_v8, 0.0  ;;  %v10489_v60 = vadd.f32 %v18341_v18, %v10450_v12 }
 0x5bd   : > { %v10448_v55 = vmul.f32 %v18331_v50, %v10376_v21 }
 0x5be   : > { %v10521_v62 = vmax.f32 %v10489_v60, 0.0 }
 0x5bf   : > { %v8613_v40 = vpop.permute.xlu1 %8612  ;;  %10582 = vrot.lane.b32.xlu0 %v10508_v57, %s18988_s22  ;;  %10580 = vrot.lane.b32.xlu1 %v10507_v38, %s18988_s22  ;;  %v10487_v63 = vadd.f32 %v18341_v18, %v10448_v55 }
 0x5c0   : > { %8682 = vst.msk [vmem:[%s15239_s24 + $0xd8] sm:$0xff] %vm8654_vm1, %v8613_v40 }
 0x5c1   : > { %v10519_v53 = vmax.f32 %v10487_v63, 0.0 }
 0x5c3   : > { %10586 = vrot.lane.b32.xlu0 %v10510_v26, %s18988_s22  ;;  %10584 = vrot.lane.b32.xlu1 %v10509_v52, %s18988_s22 }
 0x5c7   : > { %10590 = vrot.lane.b32.xlu0 %v10512_v45, %s18988_s22  ;;  %10588 = vrot.lane.b32.xlu1 %v10511_v9, %s18988_s22  ;;  %v11567_v43 = vpop.f32.mrf.mxu1 }
 0x5c8   : > { %v10453_v13 = vmul.f32 %v11567_v43, %v18331_v50 }
 0x5c9   : > { %v10389_v56 = vpop.f32.mrf.mxu1 }
 0x5ca   : > { %v10451_v16 = vmul.f32 %v18331_v50, %v10389_v56  ;;  %v10492_v20 = vadd.f32 %v18341_v18, %v10453_v13 }
 0x5cb   : > { %10594 = vrot.lane.b32.xlu0 %v10514_v34, %s18988_s22  ;;  %10592 = vrot.lane.b32.xlu1 %v10513_v37, %s18988_s22  ;;  %v11568_v6 = vpop.f32.mrf.mxu1 }
 0x5cc   : > { %v10490_v0 = vadd.f32 %v18341_v18, %v10451_v16  ;;  %v10454_v25 = vmul.f32 %v11568_v6, %v18331_v50  ;;  %v10524_v28 = vmax.f32 %v10492_v20, 0.0 }
 0x5cd   : > { %v10392_v19 = vpop.f32.mrf.mxu1 }
 0x5ce   : > { %v10452_v58 = vmul.f32 %v18331_v50, %v10392_v19  ;;  %v10522_v11 = vmax.f32 %v10490_v0, 0.0  ;;  %v10493_v10 = vadd.f32 %v18341_v18, %v10454_v25 }
 0x5cf   : > { %10598 = vrot.lane.b32.xlu0 %v10516_v59, %s18988_s22  ;;  %10596 = vrot.lane.b32.xlu1 %v10515_v14, %s18988_s22 }
 0x5d0   : > { %v10491_v29 = vadd.f32 %v18341_v18, %v10452_v58  ;;  %v10525_v17 = vmax.f32 %v10493_v10, 0.0 }
 0x5d2   : > { %v10523_v39 = vmax.f32 %v10491_v29, 0.0 }
 0x5d3   : > { %10602 = vrot.lane.b32.xlu0 %v10518_v5, %s18988_s22  ;;  %10600 = vrot.lane.b32.xlu1 %v10517_v36, %s18988_s22 }
 0x5d7   : > { %10606 = vrot.lane.b32.xlu0 %v10520_v15, %s18988_s22  ;;  %10604 = vrot.lane.b32.xlu1 %v10519_v53, %s18988_s22 }
 0x5db   : > { %10610 = vrot.lane.b32.xlu0 %v10522_v11, %s18988_s22  ;;  %10608 = vrot.lane.b32.xlu1 %v10521_v62, %s18988_s22 }
 0x5dd   : > { %v11571_v23 = vpop.f32.mrf.mxu1 }
 0x5de   : > { %v10457_v31 = vmul.f32 %v11571_v23, %v18331_v50 }
 0x5df   : > { %10614 = vrot.lane.b32.xlu0 %v10524_v28, %s18988_s22  ;;  %10612 = vrot.lane.b32.xlu1 %v10523_v39, %s18988_s22  ;;  %v10405_v41 = vpop.f32.mrf.mxu1 }
 0x5e0   : > { %v10455_v57 = vmul.f32 %v18331_v50, %v10405_v41  ;;  %v10496_v30 = vadd.f32 %v18341_v18, %v10457_v31 }
 0x5e1   : > { %v11572_v7 = vpop.f32.mrf.mxu1 }
 0x5e2   : > { %v10494_v38 = vadd.f32 %v18341_v18, %v10455_v57  ;;  %v10458_v40 = vmul.f32 %v11572_v7, %v18331_v50  ;;  %v10528_v1 = vmax.f32 %v10496_v30, 0.0 }
 0x5e3   : > { %10616 = vrot.lane.b32.xlu1 %v10525_v17, %s18988_s22  ;;  %v10408_v61 = vpop.f32.mrf.mxu1 }
 0x5e4   : > { %v10526_v47 = vmax.f32 %v10494_v38, 0.0  ;;  %v10456_v46 = vmul.f32 %v18331_v50, %v10408_v61  ;;  %v10497_v44 = vadd.f32 %v18341_v18, %v10458_v40 }
 0x5e6   : > { %v10495_v52 = vadd.f32 %v18341_v18, %v10456_v46  ;;  %10618 = vrot.lane.b32.xlu0 %v10526_v47, %s18988_s22  ;;  %v10529_v24 = vmax.f32 %v10497_v44, 0.0 }
 0x5e8   : > { %v10527_v26 = vmax.f32 %v10495_v52, 0.0 }
 0x5ea   : > { %10622 = vrot.lane.b32.xlu0 %v10528_v1, %s18988_s22  ;;  %10620 = vrot.lane.b32.xlu1 %v10527_v26, %s18988_s22 }
 0x5ee   : > { %10624 = vrot.lane.b32.xlu1 %v10529_v24, %s18988_s22  ;;  %s11356_s22 = sshll.u32 %s11982_s29, 12  ;;  %s19020_s29 = sand.u32 1, %s11867_s26  }
 0x5ef   : > { %s18540_s16 = scalar_lea.hbm %s18602_s13, %s11356_s22  ;;  %s18548_s2 = scalar_lea.sflag [#allocation6], %s19020_s29 }
 0x5f0   : > { %s11821_s22 = scalar_lea.vmem %s11820_s23, 8192 }
 0x5f1   : > { %p11823_p1 = scmp.lt.s32.totalorder %s11821_s22, %s11815_s15 }
 0x5f3   : > { %p11824_p2 = por %p11823_p1, %p11822_p0 }
 0x5f5   : > { %p11825_p3 = pnand %p11824_p2, %p11818_p13 }
 0x615   : > { %v8615_v50 = vpop.permute.xlu0 %8614 }
 0x616   : > { %8683 = vst.msk [vmem:[%s15239_s24 + $0xe0] sm:$0xff] %vm8654_vm1, %v8615_v50 }
 0x619   : > { %v8619_v3 = vpop.permute.xlu0 %8618  ;;  %v8617_v48 = vpop.permute.xlu1 %8616 }
 0x61a   : > { %8685 = vst.msk [vmem:[%s15239_s24 + $0xf0] sm:$0xff] %vm8654_vm1, %v8619_v3  ;;  %8684 = vst.msk [vmem:[%s15239_s24 + $0xe8] sm:$0xff] %vm8654_vm1, %v8617_v48 }
 0x61d   : > { %v10563_v18 = vpop.permute.xlu0 %10562  ;;  %v8621_v22 = vpop.permute.xlu1 %8620 }
 0x61e   : > { %10659 = vst.msk [vmem:[%s15239_s24] sm:$0xff] %vm10658_vm4, %v10563_v18 }
 0x61f   : > { %8686 = vst.msk [vmem:[%s15239_s24 + $0xf8] sm:$0xff] %vm8654_vm1, %v8621_v22 }
 0x621   : > { %v10567_v42 = vpop.permute.xlu0 %10566  ;;  %v10565_v45 = vpop.permute.xlu1 %10564 }
 0x622   : > { %10661 = vst.msk [vmem:[%s15239_s24 + $0x10] sm:$0xff] %vm10658_vm4, %v10567_v42  ;;  %10660 = vst.msk [vmem:[%s15239_s24 + $0x8] sm:$0xff] %vm10658_vm4, %v10565_v45 }
 0x625   : > { %v10571_v9 = vpop.permute.xlu0 %10570  ;;  %v10569_v27 = vpop.permute.xlu1 %10568 }
 0x626   : > { %10663 = vst.msk [vmem:[%s15239_s24 + $0x20] sm:$0xff] %vm10658_vm4, %v10571_v9  ;;  %10662 = vst.msk [vmem:[%s15239_s24 + $0x18] sm:$0xff] %vm10658_vm4, %v10569_v27 }
 0x629   : > { %v10575_v54 = vpop.permute.xlu0 %10574  ;;  %v10573_v21 = vpop.permute.xlu1 %10572 }
 0x62a   : > { %10665 = vst.msk [vmem:[%s15239_s24 + $0x30] sm:$0xff] %vm10658_vm4, %v10575_v54  ;;  %10664 = vst.msk [vmem:[%s15239_s24 + $0x28] sm:$0xff] %vm10658_vm4, %v10573_v21 }
 0x62d   : > { %v10579_v37 = vpop.permute.xlu0 %10578  ;;  %v10577_v35 = vpop.permute.xlu1 %10576 }
 0x62e   : > { %10667 = vst.msk [vmem:[%s15239_s24 + $0x40] sm:$0xff] %vm10658_vm4, %v10579_v37  ;;  %10666 = vst.msk [vmem:[%s15239_s24 + $0x38] sm:$0xff] %vm10658_vm4, %v10577_v35 }
 0x631   : > { %v10583_v34 = vpop.permute.xlu0 %10582  ;;  %v10581_v33 = vpop.permute.xlu1 %10580 }
 0x632   : > { %10669 = vst.msk [vmem:[%s15239_s24 + $0x50] sm:$0xff] %vm10658_vm4, %v10583_v34  ;;  %10668 = vst.msk [vmem:[%s15239_s24 + $0x48] sm:$0xff] %vm10658_vm4, %v10581_v33 }
 0x635   : > { %v10587_v51 = vpop.permute.xlu0 %10586  ;;  %v10585_v2 = vpop.permute.xlu1 %10584 }
 0x636   : > { %10671 = vst.msk [vmem:[%s15239_s24 + $0x60] sm:$0xff] %vm10658_vm4, %v10587_v51  ;;  %10670 = vst.msk [vmem:[%s15239_s24 + $0x58] sm:$0xff] %vm10658_vm4, %v10585_v2 }
 0x639   : > { %v10591_v43 = vpop.permute.xlu0 %10590  ;;  %v10589_v59 = vpop.permute.xlu1 %10588 }
 0x63a   : > { %10673 = vst.msk [vmem:[%s15239_s24 + $0x70] sm:$0xff] %vm10658_vm4, %v10591_v43  ;;  %10672 = vst.msk [vmem:[%s15239_s24 + $0x68] sm:$0xff] %vm10658_vm4, %v10589_v59 }
 0x63d   : > { %v10595_v32 = vpop.permute.xlu0 %10594  ;;  %v10593_v4 = vpop.permute.xlu1 %10592 }
 0x63e   : > { %10675 = vst.msk [vmem:[%s15239_s24 + $0x80] sm:$0xff] %vm10658_vm4, %v10595_v32  ;;  %10674 = vst.msk [vmem:[%s15239_s24 + $0x78] sm:$0xff] %vm10658_vm4, %v10593_v4 }
 0x641   : > { %v10599_v14 = vpop.permute.xlu0 %10598  ;;  %v10597_v8 = vpop.permute.xlu1 %10596 }
 0x642   : > { %10677 = vst.msk [vmem:[%s15239_s24 + $0x90] sm:$0xff] %vm10658_vm4, %v10599_v14  ;;  %10676 = vst.msk [vmem:[%s15239_s24 + $0x88] sm:$0xff] %vm10658_vm4, %v10597_v8 }
 0x645   : > { %v10603_v55 = vpop.permute.xlu0 %10602  ;;  %v10601_v56 = vpop.permute.xlu1 %10600 }
 0x646   : > { %10679 = vst.msk [vmem:[%s15239_s24 + $0xa0] sm:$0xff] %vm10658_vm4, %v10603_v55  ;;  %10678 = vst.msk [vmem:[%s15239_s24 + $0x98] sm:$0xff] %vm10658_vm4, %v10601_v56 }
 0x649   : > { %v10607_v6 = vpop.permute.xlu0 %10606  ;;  %v10605_v49 = vpop.permute.xlu1 %10604 }
 0x64a   : > { %10681 = vst.msk [vmem:[%s15239_s24 + $0xb0] sm:$0xff] %vm10658_vm4, %v10607_v6  ;;  %10680 = vst.msk [vmem:[%s15239_s24 + $0xa8] sm:$0xff] %vm10658_vm4, %v10605_v49 }
 0x64d   : > { %v10611_v12 = vpop.permute.xlu0 %10610  ;;  %v10609_v36 = vpop.permute.xlu1 %10608 }
 0x64e   : > { %10683 = vst.msk [vmem:[%s15239_s24 + $0xc0] sm:$0xff] %vm10658_vm4, %v10611_v12  ;;  %10682 = vst.msk [vmem:[%s15239_s24 + $0xb8] sm:$0xff] %vm10658_vm4, %v10609_v36 }
 0x651   : > { %v10615_v5 = vpop.permute.xlu0 %10614  ;;  %v10613_v63 = vpop.permute.xlu1 %10612 }
 0x652   : > { %10685 = vst.msk [vmem:[%s15239_s24 + $0xd0] sm:$0xff] %vm10658_vm4, %v10615_v5  ;;  %10684 = vst.msk [vmem:[%s15239_s24 + $0xc8] sm:$0xff] %vm10658_vm4, %v10613_v63 }
 0x655   : > { %v10617_v16 = vpop.permute.xlu1 %10616 }
 0x656   : > { %10686 = vst.msk [vmem:[%s15239_s24 + $0xd8] sm:$0xff] %vm10658_vm4, %v10617_v16 }
 0x658   : > { %v10619_v19 = vpop.permute.xlu0 %10618 }
 0x659   : > { %10687 = vst.msk [vmem:[%s15239_s24 + $0xe0] sm:$0xff] %vm10658_vm4, %v10619_v19 }
 0x65c   : > { %v10623_v15 = vpop.permute.xlu0 %10622  ;;  %v10621_v60 = vpop.permute.xlu1 %10620 }
 0x65d   : > { %10689 = vst.msk [vmem:[%s15239_s24 + $0xf0] sm:$0xff] %vm10658_vm4, %v10623_v15  ;;  %10688 = vst.msk [vmem:[%s15239_s24 + $0xe8] sm:$0xff] %vm10658_vm4, %v10621_v60 }
 0x660   : > { %v10625_v53 = vpop.permute.xlu1 %10624 }
 0x661   : > { %10690 = vst.msk [vmem:[%s15239_s24 + $0xf8] sm:$0xff] %vm10658_vm4, %v10625_v53 }
 0x662   : > { %11828 = shalt.err (!%p11825_p3)
}
 0x663   : > { %s11829_s24 = scalar_lea.hbm %s18540_s16, 4096  ;;  %s11833_s29 = scalar_lea.hbm %s18602_s13, 8192 }
 0x664   : > { %p11830_p4 = scmp.ne.s32.totalorder %s18540_s16, %s11829_s24  ;;  %p11834_p9 = scmp.lt.s32.totalorder %s18540_s16, %s18602_s13 }
 0x665   : > { %p11835_p10 = scmp.lt.s32.totalorder %s11833_s29, %s11829_s24 }
 0x666   : > { %p11831_p7 = pnand %p11830_p4, %p11999_p5 }
 0x667   : > { %p11836_p11 = por %p11835_p10, %p11834_p9 }
 0x668   : > { %p11832_p8 = pneg %p11831_p7 }
 0x66a   : > { %p11837_p12 = pnand %p11836_p11, %p11832_p8 }
 0x66c   : > { %11840 = shalt.err (!%p11837_p12)
}
 0x66d   : > { %s11890_s15 = smov 128  }
 0x66e   : > { %11577 = dma.vmem_to_hbm [thread:$0]  (%p11999_p5), %s18542_s20, 4096, %s18540_s16, %s18548_s2, %s11890_s15, %s11890_s15, %s18995_s0  }
 0x66f PF: > { %p11583_p13 = scmp.ge.s32.totalorder %s11875_s28, 2  ;;  %s10720_s23 = sand.u32 1, %s11863_s25  }
 0x670   : > { %s10721_s3 = scalar_lea.sflag [#allocation6], %s10720_s23 }
 0x671   : > { %p11580_p0 = pnand %p11583_p13, %p12003_p6 }
 0x673   : > { %p11581_p1 = pneg %p11580_p0 }
 0x675   : > { %11858 = dma.done.wait (%p11581_p1), %s10721_s3, 4096  }
 0x676   : > { %11860 = vsyncadd (%p11581_p1), %s10721_s3, 4294963200  ;;  %p23_p2 = scmp.ge.s32.totalorder %s11986_s14, 4   ;;  %s19021_s25 = smov %s11867_s26 }
 0x677   : > { %s19022_s26 = smov %s11871_s27  ;;  %s19023_s27 = smov %s11997_s17 }
 0x678   : > { %s19024_s28 = smov %s11986_s14  ;;  %25 = sbr.rel (!%p23_p2) target bundleno = 8 (0x8), region = 115 }
 0x67d   :  { %10726 = vsyncpa [#allocation6], 1 }
 0x67e   :  { %10728 = vsyncpa [#allocation6 + $0x1], 1 }

</bundles_post_ra>
